<compile_context>
chip_gen: v7x
topology: tpu7x:2x2x1
jax: 0.10.0
libtpu: 0.0.40
codegen_flags: <defaults>
</compile_context>

<pallas_src>
import functools

import jax
import jax.numpy as jnp
from jax.experimental import pallas as pl
from jax.experimental.pallas import tpu as pltpu

_EPS = 1e-5
_VMEM_LIMIT = 48 * 1024 * 1024  # headroom on v7x (64 MiB/TC); fine on v5e/v6e (128 MiB)


# ----------------------------------------------------------------------------
# Kernel 1: tiled per-channel sum / sum-of-squares reduction (BatchNorm stats)
# ----------------------------------------------------------------------------
def _bn_stats_kernel(x_ref, sum_ref, sq_ref):
    @pl.when(pl.program_id(0) == 0)
    def _():
        sum_ref[...] = jnp.zeros_like(sum_ref)
        sq_ref[...] = jnp.zeros_like(sq_ref)

    x = x_ref[...].astype(jnp.float32)
    sum_ref[...] += jnp.sum(x, axis=0, keepdims=True)
    sq_ref[...] += jnp.sum(x * x, axis=0, keepdims=True)


def batchnorm_scale_shift(x_nhwc, gamma, beta, *, tile_rows=256):
    """Train-mode BatchNorm2d batch stats -> per-channel (scale, shift).

    bn(x) = x * scale + shift,  scale = gamma / sqrt(var + eps),
                                shift = beta - mean * scale.
    """
    n, h, w, c = x_nhwc.shape
    m = n * h * w
    x2 = x_nhwc.reshape(m, c).astype(jnp.float32)

    m_pad = ((m + tile_rows - 1) // tile_rows) * tile_rows
    if m_pad != m:
        # Zero rows contribute 0 to both sums; we divide by the true m below.
        x2 = jnp.pad(x2, ((0, m_pad - m), (0, 0)))

    sums, sqs = pl.pallas_call(
        _bn_stats_kernel,
        out_shape=(
            jax.ShapeDtypeStruct((1, c), jnp.float32),
            jax.ShapeDtypeStruct((1, c), jnp.float32),
        ),
        grid=(m_pad // tile_rows,),
        in_specs=[pl.BlockSpec((tile_rows, c), lambda i: (i, 0))],
        out_specs=(
            pl.BlockSpec((1, c), lambda i: (0, 0)),
            pl.BlockSpec((1, c), lambda i: (0, 0)),
        ),
        compiler_params=pltpu.CompilerParams(
            dimension_semantics=("arbitrary",),
            vmem_limit_bytes=_VMEM_LIMIT,
        ),
    )(x2)

    mean = sums / m
    var = jnp.maximum(sqs / m - mean * mean, 0.0)  # biased variance (train mode)
    scale = gamma.reshape(1, c) * jax.lax.rsqrt(var + _EPS)
    shift = beta.reshape(1, c) - mean * scale
    return scale, shift


# ----------------------------------------------------------------------------
# Kernel 2: fused BatchNorm-affine + Conv3x3('same') + bias + ReLU
# ----------------------------------------------------------------------------
def _bn_conv3x3_relu_kernel(x_ref, s_ref, t_ref, w_ref, b_ref, o_ref, xp_ref,
                            *, hh, ww, cin):
    # x_ref : (1, H, W, Cin)  raw activations (one image)
    # s/t   : (1, Cin)        BatchNorm scale / shift (f32)
    # w_ref : (9, Cin, TN)    conv weights, tap-major (dy*3+dx), bf16
    # b_ref : (1, TN)         conv bias (f32)
    # o_ref : (1, H, W, TN)   output block
    # xp_ref: (H+2, W+2, Cin) VMEM scratch: zero-padded, normalized input (bf16)

    # Normalize in f32 (VPU), store the zero-padded bf16 tile for the MXU.
    xp_ref[...] = jnp.zeros_like(xp_ref)
    xn = x_ref[0].astype(jnp.float32) * s_ref[...] + t_ref[...]
    xp_ref[1:hh + 1, 1:ww + 1, :] = xn.astype(xp_ref.dtype)

    # Accumulate the 9 shifted-tap matmuls in f32 (im2col lives only in VMEM).
    tn = w_ref.shape[-1]
    acc = jnp.zeros((hh * ww, tn), jnp.float32)
    for tap in range(9):
        dy, dx = tap // 3, tap % 3
        a = xp_ref[dy:dy + hh, dx:dx + ww, :].reshape(hh * ww, cin)
        acc = acc + jnp.dot(a, w_ref[tap], preferred_element_type=jnp.float32)

    out = jnp.maximum(acc + b_ref[...], 0.0)
    o_ref[...] = out.reshape(1, hh, ww, tn).astype(o_ref.dtype)


def bn_conv3x3_relu(x_nhwc, gamma, beta, w_oihw, bias):
    """BatchNorm2d (batch stats) -> Conv2d(3x3, padding='same') -> ReLU, fused."""
    n, h, w, cin = x_nhwc.shape
    cout = w_oihw.shape[0]
    assert w_oihw.shape[1:] == (cin, 3, 3), w_oihw.shape

    scale, shift = batchnorm_scale_shift(x_nhwc, gamma, beta)

    # Weights as (tap = dy*3+dx, Cin, Cout) in bf16 for the MXU; bias stays f32.
    w_taps = jnp.transpose(w_oihw, (2, 3, 1, 0)).reshape(9, cin, cout).astype(jnp.bfloat16)
    bias2d = bias.reshape(1, cout).astype(jnp.float32)

    tn = 128 if cout % 128 == 0 else cout  # lane-dense Cout tiles when possible
    grid = (n, cout // tn)

    kern = functools.partial(_bn_conv3x3_relu_kernel, hh=h, ww=w, cin=cin)
    flops = 2 * n * h * w * 9 * cin * cout
    bytes_accessed = (x_nhwc.size * 4 + w_taps.size * 2 + bias2d.size * 4
                      + 2 * scale.size * 4 + n * h * w * cout * 4)

    return pl.pallas_call(
        kern,
        out_shape=jax.ShapeDtypeStruct((n, h, w, cout), jnp.float32),
        grid=grid,
        in_specs=[
            pl.BlockSpec((1, h, w, cin), lambda b, j: (b, 0, 0, 0)),
            pl.BlockSpec((1, cin), lambda b, j: (0, 0)),
            pl.BlockSpec((1, cin), lambda b, j: (0, 0)),
            pl.BlockSpec((9, cin, tn), lambda b, j: (0, 0, j)),
            pl.BlockSpec((1, tn), lambda b, j: (0, j)),
        ],
        out_specs=pl.BlockSpec((1, h, w, tn), lambda b, j: (b, 0, 0, j)),
        scratch_shapes=[pltpu.VMEM((h + 2, w + 2, cin), jnp.bfloat16)],
        compiler_params=pltpu.CompilerParams(
            dimension_semantics=("parallel", "parallel"),
            vmem_limit_bytes=_VMEM_LIMIT,
        ),
        cost_estimate=pl.CostEstimate(
            flops=flops, transcendentals=0, bytes_accessed=bytes_accessed),
    )(x_nhwc.astype(jnp.float32), scale, shift, w_taps, bias2d)


# ----------------------------------------------------------------------------
# DoubleConv2d forward (NCHW in / NCHW out, PyTorch convention)
# ----------------------------------------------------------------------------
def double_conv2d_forward(x_nchw, params):
    x = jnp.transpose(x_nchw, (0, 2, 3, 1))  # NCHW -> NHWC
    x = bn_conv3x3_relu(x, params["bn1_g"], params["bn1_b"], params["w1"], params["b1"])
    x = bn_conv3x3_relu(x, params["bn2_g"], params["bn2_b"], params["w2"], params["b2"])
    return jnp.transpose(x, (0, 3, 1, 2))    # NHWC -> NCHW


# ----------------------------------------------------------------------------
# Deterministic parameter init (PyTorch defaults: gamma=1, beta=0, U(-1/sqrt(fan_in)))
# ----------------------------------------------------------------------------
def init_params(key, in_channels=1, out_channels=32, kernel_size=3):
    k1, k2, k3, k4 = jax.random.split(key, 4)

    def conv_wb(kw, kb, cout, cin, k):
        fan_in = cin * k * k
        bound = 1.0 / (fan_in ** 0.5)
        w = jax.random.uniform(kw, (cout, cin, k, k), jnp.float32, -bound, bound)
        b = jax.random.uniform(kb, (cout,), jnp.float32, -bound, bound)
        return w, b

    w1, b1 = conv_wb(k1, k2, out_channels, in_channels, kernel_size)
    w2, b2 = conv_wb(k3, k4, out_channels, out_channels, kernel_size)
    return dict(
        bn1_g=jnp.ones((in_channels,), jnp.float32),
        bn1_b=jnp.zeros((in_channels,), jnp.float32),
        w1=w1, b1=b1,
        bn2_g=jnp.ones((out_channels,), jnp.float32),
        bn2_b=jnp.zeros((out_channels,), jnp.float32),
        w2=w2, b2=b2,
    )


# ----------------------------------------------------------------------------
# Pure-JAX reference (for the correctness self-check)
# ----------------------------------------------------------------------------
def reference_double_conv2d(x_nchw, params):
    def bn(x, g, b):
        mean = jnp.mean(x, axis=(0, 2, 3), keepdims=True)
        var = jnp.mean((x - mean) ** 2, axis=(0, 2, 3), keepdims=True)
        return ((x - mean) * jax.lax.rsqrt(var + _EPS) * g.reshape(1, -1, 1, 1)
                + b.reshape(1, -1, 1, 1))

    def conv(x, w, b):
        y = jax.lax.conv_general_dilated(
            x, w, window_strides=(1, 1), padding="SAME",
            dimension_numbers=("NCHW", "OIHW", "NCHW"))
        return y + b.reshape(1, -1, 1, 1)

    h = jax.nn.relu(conv(bn(x_nchw, params["bn1_g"], params["bn1_b"]),
                         params["w1"], params["b1"]))
    h = jax.nn.relu(conv(bn(h, params["bn2_g"], params["bn2_b"]),
                         params["w2"], params["b2"]))
    return h


if __name__ == "__main__":
    key = jax.random.PRNGKey(0)
    pkey, xkey = jax.random.split(key)

    in_channels, out_channels = 1, 32  # DoubleConv2d defaults
    params = init_params(pkey, in_channels, out_channels)

    x = jax.random.normal(xkey, (2, in_channels, 16, 16), dtype=jnp.float32)  # NCHW

    fwd = jax.jit(double_conv2d_forward)
    out = jax.block_until_ready(fwd(x, params))

    assert out.shape == (2, out_channels, 16, 16), out.shape
    assert bool(jnp.all(jnp.isfinite(out)))

    ref = reference_double_conv2d(x, params)
    max_err = float(jnp.max(jnp.abs(out - ref)))
    assert bool(jnp.allclose(out, ref, atol=2e-2, rtol=2e-2)), f"max abs err = {max_err}"

    print("KERNEL_OK")
</pallas_src>

<mosaic_0001>
module attributes {stable_mosaic.version = 11 : i64} {
  func.func @_bn_stats_kernel(%arg0: i32, %arg1: memref<256x1xf32, #tpu.memory_space<vmem>>, %arg2: memref<1x1xf32, #tpu.memory_space<vmem>>, %arg3: memref<1x1xf32, #tpu.memory_space<vmem>>) attributes {dimension_semantics = [#tpu.dimension_semantics<arbitrary>], iteration_bounds = array<i64: 2>, scalar_prefetch = 0 : i64, scratch_operands = 0 : i64, tpu.core_type = #tpu.core_type<tc>, window_params = [{transform_indices = @transform_0, window_bounds = array<i64: 256, 1>}, {pipeline_mode = #tpu.pipeline_mode<synchronous>, transform_indices = @transform_1, window_bounds = array<i64: 1, 1>}, {pipeline_mode = #tpu.pipeline_mode<synchronous>, transform_indices = @transform_2, window_bounds = array<i64: 1, 1>}]} {
    %c0_i32 = arith.constant 0 : i32
    %0 = arith.cmpi eq, %arg0, %c0_i32 : i32
    %1 = arith.extui %0 : i1 to i32
    %c0_i32_0 = arith.constant 0 : i32
    %2 = arith.cmpi ne, %1, %c0_i32_0 : i32
    scf.if %2 {
      %cst_11 = arith.constant 0.000000e+00 : f32
      %15 = vector.broadcast %cst_11 : f32 to vector<1x1xf32>
      %c0_12 = arith.constant 0 : index
      %c0_13 = arith.constant 0 : index
      %16 = vector.load %arg2[%c0_12, %c0_13] : memref<1x1xf32, #tpu.memory_space<vmem>>, vector<1x1xf32>
      tpu.vector_store %arg2[%c0_12, %c0_13], %15 {strides = array<i32>} : memref<1x1xf32, #tpu.memory_space<vmem>>, vector<1x1xf32>,
      %cst_14 = arith.constant 0.000000e+00 : f32
      %17 = vector.broadcast %cst_14 : f32 to vector<1x1xf32>
      %c0_15 = arith.constant 0 : index
      %c0_16 = arith.constant 0 : index
      %18 = vector.load %arg3[%c0_15, %c0_16] : memref<1x1xf32, #tpu.memory_space<vmem>>, vector<1x1xf32>
      tpu.vector_store %arg3[%c0_15, %c0_16], %17 {strides = array<i32>} : memref<1x1xf32, #tpu.memory_space<vmem>>, vector<1x1xf32>,
    } else {
    }
    %c0 = arith.constant 0 : index
    %c0_1 = arith.constant 0 : index
    %3 = vector.load %arg1[%c0, %c0_1] : memref<256x1xf32, #tpu.memory_space<vmem>>, vector<256x1xf32>
    %c0_2 = arith.constant 0 : index
    %c0_3 = arith.constant 0 : index
    %4 = vector.load %arg2[%c0_2, %c0_3] : memref<1x1xf32, #tpu.memory_space<vmem>>, vector<1x1xf32>
    %cst = arith.constant dense<0.000000e+00> : vector<1xf32>
    %5 = vector.multi_reduction <add>, %3, %cst [0] : vector<256x1xf32> to vector<1xf32>
    %6 = vector.shape_cast %5 : vector<1xf32> to vector<1x1xf32>
    %7 = arith.addf %4, %6 : vector<1x1xf32>
    %c0_4 = arith.constant 0 : index
    %c0_5 = arith.constant 0 : index
    %8 = vector.load %arg2[%c0_4, %c0_5] : memref<1x1xf32, #tpu.memory_space<vmem>>, vector<1x1xf32>
    tpu.vector_store %arg2[%c0_4, %c0_5], %7 {strides = array<i32>} : memref<1x1xf32, #tpu.memory_space<vmem>>, vector<1x1xf32>,
    %c0_6 = arith.constant 0 : index
    %c0_7 = arith.constant 0 : index
    %9 = vector.load %arg3[%c0_6, %c0_7] : memref<1x1xf32, #tpu.memory_space<vmem>>, vector<1x1xf32>
    %10 = arith.mulf %3, %3 : vector<256x1xf32>
    %cst_8 = arith.constant dense<0.000000e+00> : vector<1xf32>
    %11 = vector.multi_reduction <add>, %10, %cst_8 [0] : vector<256x1xf32> to vector<1xf32>
    %12 = vector.shape_cast %11 : vector<1xf32> to vector<1x1xf32>
    %13 = arith.addf %9, %12 : vector<1x1xf32>
    %c0_9 = arith.constant 0 : index
    %c0_10 = arith.constant 0 : index
    %14 = vector.load %arg3[%c0_9, %c0_10] : memref<1x1xf32, #tpu.memory_space<vmem>>, vector<1x1xf32>
    tpu.vector_store %arg3[%c0_9, %c0_10], %13 {strides = array<i32>} : memref<1x1xf32, #tpu.memory_space<vmem>>, vector<1x1xf32>,
    return
  }
  func.func @transform_0(%arg0: i32) -> (i32, i32) {
    %c0_i32 = arith.constant 0 : i32
    %c0_i32_0 = arith.constant 0 : i32
    return %arg0, %c0_i32 : i32, i32
  }
  func.func @transform_1(%arg0: i32) -> (i32, i32) {
    %c0_i32 = arith.constant 0 : i32
    %c0_i32_0 = arith.constant 0 : i32
    %c0_i32_1 = arith.constant 0 : i32
    return %c0_i32, %c0_i32_0 : i32, i32
  }
  func.func @transform_2(%arg0: i32) -> (i32, i32) {
    %c0_i32 = arith.constant 0 : i32
    %c0_i32_0 = arith.constant 0 : i32
    %c0_i32_1 = arith.constant 0 : i32
    return %c0_i32, %c0_i32_0 : i32, i32
  }
}

module attributes {stable_mosaic.version = 11 : i64} {
  func.func @_bn_conv3x3_relu_kernel(%arg0: i32, %arg1: i32, %arg2: memref<1x16x16x1xf32, #tpu.memory_space<vmem>>, %arg3: memref<1x1xf32, #tpu.memory_space<vmem>>, %arg4: memref<1x1xf32, #tpu.memory_space<vmem>>, %arg5: memref<9x1x32xbf16, #tpu.memory_space<vmem>>, %arg6: memref<1x32xf32, #tpu.memory_space<vmem>>, %arg7: memref<1x16x16x32xf32, #tpu.memory_space<vmem>>, %arg8: memref<18x18x1xbf16, #tpu.memory_space<vmem>>) attributes {dimension_semantics = [#tpu.dimension_semantics<parallel>, #tpu.dimension_semantics<parallel>], iteration_bounds = array<i64: 2, 1>, scalar_prefetch = 0 : i64, scratch_operands = 1 : i64, tpu.core_type = #tpu.core_type<tc>, window_params = [{transform_indices = @transform_0, window_bounds = array<i64: 1, 16, 16, 1>}, {pipeline_mode = #tpu.pipeline_mode<synchronous>, transform_indices = @transform_1, window_bounds = array<i64: 1, 1>}, {pipeline_mode = #tpu.pipeline_mode<synchronous>, transform_indices = @transform_2, window_bounds = array<i64: 1, 1>}, {transform_indices = @transform_3, window_bounds = array<i64: 9, 1, 32>}, {transform_indices = @transform_4, window_bounds = array<i64: 1, 32>}, {transform_indices = @transform_5, window_bounds = array<i64: 1, 16, 16, 32>}]} {
    %cst = arith.constant 0.000000e+00 : bf16
    %0 = vector.broadcast %cst : bf16 to vector<18x18x1xbf16>
    %c0 = arith.constant 0 : index
    %c0_0 = arith.constant 0 : index
    %c0_1 = arith.constant 0 : index
    %1 = vector.load %arg8[%c0, %c0_0, %c0_1] : memref<18x18x1xbf16, #tpu.memory_space<vmem>>, vector<18x18x1xbf16>
    tpu.vector_store %arg8[%c0, %c0_0, %c0_1], %0 {strides = array<i32>} : memref<18x18x1xbf16, #tpu.memory_space<vmem>>, vector<18x18x1xbf16>,
    %c0_2 = arith.constant 0 : index
    %c0_3 = arith.constant 0 : index
    %c0_4 = arith.constant 0 : index
    %c0_5 = arith.constant 0 : index
    %2 = vector.load %arg2[%c0_2, %c0_3, %c0_4, %c0_5] : memref<1x16x16x1xf32, #tpu.memory_space<vmem>>, vector<1x16x16x1xf32>
    %3 = vector.shape_cast %2 : vector<1x16x16x1xf32> to vector<16x16x1xf32>
    %c0_6 = arith.constant 0 : index
    %c0_7 = arith.constant 0 : index
    %4 = vector.load %arg3[%c0_6, %c0_7] : memref<1x1xf32, #tpu.memory_space<vmem>>, vector<1x1xf32>
    %5 = vector.shape_cast %4 : vector<1x1xf32> to vector<1x1x1xf32>
    %6 = vector.broadcast %5 : vector<1x1x1xf32> to vector<16x16x1xf32>
    %7 = arith.mulf %3, %6 : vector<16x16x1xf32>
    %c0_8 = arith.constant 0 : index
    %c0_9 = arith.constant 0 : index
    %8 = vector.load %arg4[%c0_8, %c0_9] : memref<1x1xf32, #tpu.memory_space<vmem>>, vector<1x1xf32>
    %9 = vector.shape_cast %8 : vector<1x1xf32> to vector<1x1x1xf32>
    %10 = vector.broadcast %9 : vector<1x1x1xf32> to vector<16x16x1xf32>
    %11 = arith.addf %7, %10 : vector<16x16x1xf32>
    %12 = arith.truncf %11 : vector<16x16x1xf32> to vector<16x16x1xbf16>
    %c1 = arith.constant 1 : index
    %c1_10 = arith.constant 1 : index
    %c0_11 = arith.constant 0 : index
    %13 = vector.load %arg8[%c1, %c1_10, %c0_11] : memref<18x18x1xbf16, #tpu.memory_space<vmem>>, vector<16x16x1xbf16>
    tpu.vector_store %arg8[%c1, %c1_10, %c0_11], %12 {strides = array<i32>} : memref<18x18x1xbf16, #tpu.memory_space<vmem>>, vector<16x16x1xbf16>,
    %cst_12 = arith.constant 0.000000e+00 : f32
    %14 = vector.broadcast %cst_12 : f32 to vector<256x32xf32>
    %c0_13 = arith.constant 0 : index
    %c0_14 = arith.constant 0 : index
    %c0_15 = arith.constant 0 : index
    %15 = vector.load %arg8[%c0_13, %c0_14, %c0_15] : memref<18x18x1xbf16, #tpu.memory_space<vmem>>, vector<16x16x1xbf16>
    %16 = vector.shape_cast %15 : vector<16x16x1xbf16> to vector<256x1xbf16>
    %c0_16 = arith.constant 0 : index
    %c0_17 = arith.constant 0 : index
    %c0_18 = arith.constant 0 : index
    %17 = vector.load %arg5[%c0_16, %c0_17, %c0_18] : memref<9x1x32xbf16, #tpu.memory_space<vmem>>, vector<1x1x32xbf16>
    %18 = vector.shape_cast %17 : vector<1x1x32xbf16> to vector<1x32xbf16>
    %cst_19 = arith.constant dense<0.000000e+00> : vector<256x32xf32>
    %19 = tpu.matmul %16, %18, %cst_19 {dimension_numbers = #tpu.dot_dimension_numbers<[1], [0], [0], [1], [0, 0, 1, 1], [], []>} : vector<256x1xbf16>, vector<1x32xbf16>, vector<256x32xf32> -> vector<256x32xf32>
    %20 = arith.addf %14, %19 : vector<256x32xf32>
    %c0_20 = arith.constant 0 : index
    %c1_21 = arith.constant 1 : index
    %c0_22 = arith.constant 0 : index
    %21 = vector.load %arg8[%c0_20, %c1_21, %c0_22] : memref<18x18x1xbf16, #tpu.memory_space<vmem>>, vector<16x16x1xbf16>
    %22 = vector.shape_cast %21 : vector<16x16x1xbf16> to vector<256x1xbf16>
    %c1_23 = arith.constant 1 : index
    %c0_24 = arith.constant 0 : index
    %c0_25 = arith.constant 0 : index
    %23 = vector.load %arg5[%c1_23, %c0_24, %c0_25] : memref<9x1x32xbf16, #tpu.memory_space<vmem>>, vector<1x1x32xbf16>
    %24 = vector.shape_cast %23 : vector<1x1x32xbf16> to vector<1x32xbf16>
    %cst_26 = arith.constant dense<0.000000e+00> : vector<256x32xf32>
    %25 = tpu.matmul %22, %24, %cst_26 {dimension_numbers = #tpu.dot_dimension_numbers<[1], [0], [0], [1], [0, 0, 1, 1], [], []>} : vector<256x1xbf16>, vector<1x32xbf16>, vector<256x32xf32> -> vector<256x32xf32>
    %26 = arith.addf %20, %25 : vector<256x32xf32>
    %c0_27 = arith.constant 0 : index
    %c2 = arith.constant 2 : index
    %c0_28 = arith.constant 0 : index
    %27 = vector.load %arg8[%c0_27, %c2, %c0_28] : memref<18x18x1xbf16, #tpu.memory_space<vmem>>, vector<16x16x1xbf16>
    %28 = vector.shape_cast %27 : vector<16x16x1xbf16> to vector<256x1xbf16>
    %c2_29 = arith.constant 2 : index
    %c0_30 = arith.constant 0 : index
    %c0_31 = arith.constant 0 : index
    %29 = vector.load %arg5[%c2_29, %c0_30, %c0_31] : memref<9x1x32xbf16, #tpu.memory_space<vmem>>, vector<1x1x32xbf16>
    %30 = vector.shape_cast %29 : vector<1x1x32xbf16> to vector<1x32xbf16>
    %cst_32 = arith.constant dense<0.000000e+00> : vector<256x32xf32>
    %31 = tpu.matmul %28, %30, %cst_32 {dimension_numbers = #tpu.dot_dimension_numbers<[1], [0], [0], [1], [0, 0, 1, 1], [], []>} : vector<256x1xbf16>, vector<1x32xbf16>, vector<256x32xf32> -> vector<256x32xf32>
    %32 = arith.addf %26, %31 : vector<256x32xf32>
    %c1_33 = arith.constant 1 : index
    %c0_34 = arith.constant 0 : index
    %c0_35 = arith.constant 0 : index
    %33 = vector.load %arg8[%c1_33, %c0_34, %c0_35] : memref<18x18x1xbf16, #tpu.memory_space<vmem>>, vector<16x16x1xbf16>
    %34 = vector.shape_cast %33 : vector<16x16x1xbf16> to vector<256x1xbf16>
    %c3 = arith.constant 3 : index
    %c0_36 = arith.constant 0 : index
    %c0_37 = arith.constant 0 : index
    %35 = vector.load %arg5[%c3, %c0_36, %c0_37] : memref<9x1x32xbf16, #tpu.memory_space<vmem>>, vector<1x1x32xbf16>
    %36 = vector.shape_cast %35 : vector<1x1x32xbf16> to vector<1x32xbf16>
    %cst_38 = arith.constant dense<0.000000e+00> : vector<256x32xf32>
    %37 = tpu.matmul %34, %36, %cst_38 {dimension_numbers = #tpu.dot_dimension_numbers<[1], [0], [0], [1], [0, 0, 1, 1], [], []>} : vector<256x1xbf16>, vector<1x32xbf16>, vector<256x32xf32> -> vector<256x32xf32>
    %38 = arith.addf %32, %37 : vector<256x32xf32>
    %c1_39 = arith.constant 1 : index
    %c1_40 = arith.constant 1 : index
    %c0_41 = arith.constant 0 : index
    %39 = vector.load %arg8[%c1_39, %c1_40, %c0_41] : memref<18x18x1xbf16, #tpu.memory_space<vmem>>, vector<16x16x1xbf16>
    %40 = vector.shape_cast %39 : vector<16x16x1xbf16> to vector<256x1xbf16>
    %c4 = arith.constant 4 : index
    %c0_42 = arith.constant 0 : index
    %c0_43 = arith.constant 0 : index
    %41 = vector.load %arg5[%c4, %c0_42, %c0_43] : memref<9x1x32xbf16, #tpu.memory_space<vmem>>, vector<1x1x32xbf16>
    %42 = vector.shape_cast %41 : vector<1x1x32xbf16> to vector<1x32xbf16>
    %cst_44 = arith.constant dense<0.000000e+00> : vector<256x32xf32>
    %43 = tpu.matmul %40, %42, %cst_44 {dimension_numbers = #tpu.dot_dimension_numbers<[1], [0], [0], [1], [0, 0, 1, 1], [], []>} : vector<256x1xbf16>, vector<1x32xbf16>, vector<256x32xf32> -> vector<256x32xf32>
    %44 = arith.addf %38, %43 : vector<256x32xf32>
    %c1_45 = arith.constant 1 : index
    %c2_46 = arith.constant 2 : index
    %c0_47 = arith.constant 0 : index
    %45 = vector.load %arg8[%c1_45, %c2_46, %c0_47] : memref<18x18x1xbf16, #tpu.memory_space<vmem>>, vector<16x16x1xbf16>
    %46 = vector.shape_cast %45 : vector<16x16x1xbf16> to vector<256x1xbf16>
    %c5 = arith.constant 5 : index
    %c0_48 = arith.constant 0 : index
    %c0_49 = arith.constant 0 : index
    %47 = vector.load %arg5[%c5, %c0_48, %c0_49] : memref<9x1x32xbf16, #tpu.memory_space<vmem>>, vector<1x1x32xbf16>
    %48 = vector.shape_cast %47 : vector<1x1x32xbf16> to vector<1x32xbf16>
    %cst_50 = arith.constant dense<0.000000e+00> : vector<256x32xf32>
    %49 = tpu.matmul %46, %48, %cst_50 {dimension_numbers = #tpu.dot_dimension_numbers<[1], [0], [0], [1], [0, 0, 1, 1], [], []>} : vector<256x1xbf16>, vector<1x32xbf16>, vector<256x32xf32> -> vector<256x32xf32>
    %50 = arith.addf %44, %49 : vector<256x32xf32>
    %c2_51 = arith.constant 2 : index
    %c0_52 = arith.constant 0 : index
    %c0_53 = arith.constant 0 : index
    %51 = vector.load %arg8[%c2_51, %c0_52, %c0_53] : memref<18x18x1xbf16, #tpu.memory_space<vmem>>, vector<16x16x1xbf16>
    %52 = vector.shape_cast %51 : vector<16x16x1xbf16> to vector<256x1xbf16>
    %c6 = arith.constant 6 : index
    %c0_54 = arith.constant 0 : index
    %c0_55 = arith.constant 0 : index
    %53 = vector.load %arg5[%c6, %c0_54, %c0_55] : memref<9x1x32xbf16, #tpu.memory_space<vmem>>, vector<1x1x32xbf16>
    %54 = vector.shape_cast %53 : vector<1x1x32xbf16> to vector<1x32xbf16>
    %cst_56 = arith.constant dense<0.000000e+00> : vector<256x32xf32>
    %55 = tpu.matmul %52, %54, %cst_56 {dimension_numbers = #tpu.dot_dimension_numbers<[1], [0], [0], [1], [0, 0, 1, 1], [], []>} : vector<256x1xbf16>, vector<1x32xbf16>, vector<256x32xf32> -> vector<256x32xf32>
    %56 = arith.addf %50, %55 : vector<256x32xf32>
    %c2_57 = arith.constant 2 : index
    %c1_58 = arith.constant 1 : index
    %c0_59 = arith.constant 0 : index
    %57 = vector.load %arg8[%c2_57, %c1_58, %c0_59] : memref<18x18x1xbf16, #tpu.memory_space<vmem>>, vector<16x16x1xbf16>
    %58 = vector.shape_cast %57 : vector<16x16x1xbf16> to vector<256x1xbf16>
    %c7 = arith.constant 7 : index
    %c0_60 = arith.constant 0 : index
    %c0_61 = arith.constant 0 : index
    %59 = vector.load %arg5[%c7, %c0_60, %c0_61] : memref<9x1x32xbf16, #tpu.memory_space<vmem>>, vector<1x1x32xbf16>
    %60 = vector.shape_cast %59 : vector<1x1x32xbf16> to vector<1x32xbf16>
    %cst_62 = arith.constant dense<0.000000e+00> : vector<256x32xf32>
    %61 = tpu.matmul %58, %60, %cst_62 {dimension_numbers = #tpu.dot_dimension_numbers<[1], [0], [0], [1], [0, 0, 1, 1], [], []>} : vector<256x1xbf16>, vector<1x32xbf16>, vector<256x32xf32> -> vector<256x32xf32>
    %62 = arith.addf %56, %61 : vector<256x32xf32>
    %c2_63 = arith.constant 2 : index
    %c2_64 = arith.constant 2 : index
    %c0_65 = arith.constant 0 : index
    %63 = vector.load %arg8[%c2_63, %c2_64, %c0_65] : memref<18x18x1xbf16, #tpu.memory_space<vmem>>, vector<16x16x1xbf16>
    %64 = vector.shape_cast %63 : vector<16x16x1xbf16> to vector<256x1xbf16>
    %c8 = arith.constant 8 : index
    %c0_66 = arith.constant 0 : index
    %c0_67 = arith.constant 0 : index
    %65 = vector.load %arg5[%c8, %c0_66, %c0_67] : memref<9x1x32xbf16, #tpu.memory_space<vmem>>, vector<1x1x32xbf16>
    %66 = vector.shape_cast %65 : vector<1x1x32xbf16> to vector<1x32xbf16>
    %cst_68 = arith.constant dense<0.000000e+00> : vector<256x32xf32>
    %67 = tpu.matmul %64, %66, %cst_68 {dimension_numbers = #tpu.dot_dimension_numbers<[1], [0], [0], [1], [0, 0, 1, 1], [], []>} : vector<256x1xbf16>, vector<1x32xbf16>, vector<256x32xf32> -> vector<256x32xf32>
    %68 = arith.addf %62, %67 : vector<256x32xf32>
    %c0_69 = arith.constant 0 : index
    %c0_70 = arith.constant 0 : index
    %69 = vector.load %arg6[%c0_69, %c0_70] : memref<1x32xf32, #tpu.memory_space<vmem>>, vector<1x32xf32>
    %70 = vector.broadcast %69 : vector<1x32xf32> to vector<256x32xf32>
    %71 = arith.addf %68, %70 : vector<256x32xf32>
    %cst_71 = arith.constant 0.000000e+00 : f32
    %72 = vector.broadcast %cst_71 : f32 to vector<256x32xf32>
    %73 = arith.maximumf %71, %72 : vector<256x32xf32>
    %74 = vector.shape_cast %73 : vector<256x32xf32> to vector<1x16x16x32xf32>
    %c0_72 = arith.constant 0 : index
    %c0_73 = arith.constant 0 : index
    %c0_74 = arith.constant 0 : index
    %c0_75 = arith.constant 0 : index
    %75 = vector.load %arg7[%c0_72, %c0_73, %c0_74, %c0_75] : memref<1x16x16x32xf32, #tpu.memory_space<vmem>>, vector<1x16x16x32xf32>
    tpu.vector_store %arg7[%c0_72, %c0_73, %c0_74, %c0_75], %74 {strides = array<i32>} : memref<1x16x16x32xf32, #tpu.memory_space<vmem>>, vector<1x16x16x32xf32>,
    return
  }
  func.func @transform_0(%arg0: i32, %arg1: i32) -> (i32, i32, i32, i32) {
    %c0_i32 = arith.constant 0 : i32
    %c0_i32_0 = arith.constant 0 : i32
    %c0_i32_1 = arith.constant 0 : i32
    %c0_i32_2 = arith.constant 0 : i32
    return %arg0, %c0_i32, %c0_i32_0, %c0_i32_1 : i32, i32, i32, i32
  }
  func.func @transform_1(%arg0: i32, %arg1: i32) -> (i32, i32) {
    %c0_i32 = arith.constant 0 : i32
    %c0_i32_0 = arith.constant 0 : i32
    %c0_i32_1 = arith.constant 0 : i32
    return %c0_i32, %c0_i32_0 : i32, i32
  }
  func.func @transform_2(%arg0: i32, %arg1: i32) -> (i32, i32) {
    %c0_i32 = arith.constant 0 : i32
    %c0_i32_0 = arith.constant 0 : i32
    %c0_i32_1 = arith.constant 0 : i32
    return %c0_i32, %c0_i32_0 : i32, i32
  }
  func.func @transform_3(%arg0: i32, %arg1: i32) -> (i32, i32, i32) {
    %c0_i32 = arith.constant 0 : i32
    %c0_i32_0 = arith.constant 0 : i32
    %c0_i32_1 = arith.constant 0 : i32
    return %c0_i32, %c0_i32_0, %arg1 : i32, i32, i32
  }
  func.func @transform_4(%arg0: i32, %arg1: i32) -> (i32, i32) {
    %c0_i32 = arith.constant 0 : i32
    %c0_i32_0 = arith.constant 0 : i32
    return %c0_i32, %arg1 : i32, i32
  }
  func.func @transform_5(%arg0: i32, %arg1: i32) -> (i32, i32, i32, i32) {
    %c0_i32 = arith.constant 0 : i32
    %c0_i32_0 = arith.constant 0 : i32
    %c0_i32_1 = arith.constant 0 : i32
    return %arg0, %c0_i32, %c0_i32_0, %arg1 : i32, i32, i32, i32
  }
}

module attributes {stable_mosaic.version = 11 : i64} {
  func.func @_bn_stats_kernel(%arg0: i32, %arg1: memref<256x32xf32, #tpu.memory_space<vmem>>, %arg2: memref<1x32xf32, #tpu.memory_space<vmem>>, %arg3: memref<1x32xf32, #tpu.memory_space<vmem>>) attributes {dimension_semantics = [#tpu.dimension_semantics<arbitrary>], iteration_bounds = array<i64: 2>, scalar_prefetch = 0 : i64, scratch_operands = 0 : i64, tpu.core_type = #tpu.core_type<tc>, window_params = [{transform_indices = @transform_0, window_bounds = array<i64: 256, 32>}, {pipeline_mode = #tpu.pipeline_mode<synchronous>, transform_indices = @transform_1, window_bounds = array<i64: 1, 32>}, {pipeline_mode = #tpu.pipeline_mode<synchronous>, transform_indices = @transform_2, window_bounds = array<i64: 1, 32>}]} {
    %c0_i32 = arith.constant 0 : i32
    %0 = arith.cmpi eq, %arg0, %c0_i32 : i32
    %1 = arith.extui %0 : i1 to i32
    %c0_i32_0 = arith.constant 0 : i32
    %2 = arith.cmpi ne, %1, %c0_i32_0 : i32
    scf.if %2 {
      %cst_11 = arith.constant 0.000000e+00 : f32
      %15 = vector.broadcast %cst_11 : f32 to vector<1x32xf32>
      %c0_12 = arith.constant 0 : index
      %c0_13 = arith.constant 0 : index
      %16 = vector.load %arg2[%c0_12, %c0_13] : memref<1x32xf32, #tpu.memory_space<vmem>>, vector<1x32xf32>
      tpu.vector_store %arg2[%c0_12, %c0_13], %15 {strides = array<i32>} : memref<1x32xf32, #tpu.memory_space<vmem>>, vector<1x32xf32>,
      %cst_14 = arith.constant 0.000000e+00 : f32
      %17 = vector.broadcast %cst_14 : f32 to vector<1x32xf32>
      %c0_15 = arith.constant 0 : index
      %c0_16 = arith.constant 0 : index
      %18 = vector.load %arg3[%c0_15, %c0_16] : memref<1x32xf32, #tpu.memory_space<vmem>>, vector<1x32xf32>
      tpu.vector_store %arg3[%c0_15, %c0_16], %17 {strides = array<i32>} : memref<1x32xf32, #tpu.memory_space<vmem>>, vector<1x32xf32>,
    } else {
    }
    %c0 = arith.constant 0 : index
    %c0_1 = arith.constant 0 : index
    %3 = vector.load %arg1[%c0, %c0_1] : memref<256x32xf32, #tpu.memory_space<vmem>>, vector<256x32xf32>
    %c0_2 = arith.constant 0 : index
    %c0_3 = arith.constant 0 : index
    %4 = vector.load %arg2[%c0_2, %c0_3] : memref<1x32xf32, #tpu.memory_space<vmem>>, vector<1x32xf32>
    %cst = arith.constant dense<0.000000e+00> : vector<32xf32>
    %5 = vector.multi_reduction <add>, %3, %cst [0] : vector<256x32xf32> to vector<32xf32>
    %6 = vector.shape_cast %5 : vector<32xf32> to vector<1x32xf32>
    %7 = arith.addf %4, %6 : vector<1x32xf32>
    %c0_4 = arith.constant 0 : index
    %c0_5 = arith.constant 0 : index
    %8 = vector.load %arg2[%c0_4, %c0_5] : memref<1x32xf32, #tpu.memory_space<vmem>>, vector<1x32xf32>
    tpu.vector_store %arg2[%c0_4, %c0_5], %7 {strides = array<i32>} : memref<1x32xf32, #tpu.memory_space<vmem>>, vector<1x32xf32>,
    %c0_6 = arith.constant 0 : index
    %c0_7 = arith.constant 0 : index
    %9 = vector.load %arg3[%c0_6, %c0_7] : memref<1x32xf32, #tpu.memory_space<vmem>>, vector<1x32xf32>
    %10 = arith.mulf %3, %3 : vector<256x32xf32>
    %cst_8 = arith.constant dense<0.000000e+00> : vector<32xf32>
    %11 = vector.multi_reduction <add>, %10, %cst_8 [0] : vector<256x32xf32> to vector<32xf32>
    %12 = vector.shape_cast %11 : vector<32xf32> to vector<1x32xf32>
    %13 = arith.addf %9, %12 : vector<1x32xf32>
    %c0_9 = arith.constant 0 : index
    %c0_10 = arith.constant 0 : index
    %14 = vector.load %arg3[%c0_9, %c0_10] : memref<1x32xf32, #tpu.memory_space<vmem>>, vector<1x32xf32>
    tpu.vector_store %arg3[%c0_9, %c0_10], %13 {strides = array<i32>} : memref<1x32xf32, #tpu.memory_space<vmem>>, vector<1x32xf32>,
    return
  }
  func.func @transform_0(%arg0: i32) -> (i32, i32) {
    %c0_i32 = arith.constant 0 : i32
    %c0_i32_0 = arith.constant 0 : i32
    return %arg0, %c0_i32 : i32, i32
  }
  func.func @transform_1(%arg0: i32) -> (i32, i32) {
    %c0_i32 = arith.constant 0 : i32
    %c0_i32_0 = arith.constant 0 : i32
    %c0_i32_1 = arith.constant 0 : i32
    return %c0_i32, %c0_i32_0 : i32, i32
  }
  func.func @transform_2(%arg0: i32) -> (i32, i32) {
    %c0_i32 = arith.constant 0 : i32
    %c0_i32_0 = arith.constant 0 : i32
    %c0_i32_1 = arith.constant 0 : i32
    return %c0_i32, %c0_i32_0 : i32, i32
  }
}

module attributes {stable_mosaic.version = 11 : i64} {
  func.func @_bn_conv3x3_relu_kernel(%arg0: i32, %arg1: i32, %arg2: memref<1x16x16x32xf32, #tpu.memory_space<vmem>>, %arg3: memref<1x32xf32, #tpu.memory_space<vmem>>, %arg4: memref<1x32xf32, #tpu.memory_space<vmem>>, %arg5: memref<9x32x32xbf16, #tpu.memory_space<vmem>>, %arg6: memref<1x32xf32, #tpu.memory_space<vmem>>, %arg7: memref<1x16x16x32xf32, #tpu.memory_space<vmem>>, %arg8: memref<18x18x32xbf16, #tpu.memory_space<vmem>>) attributes {dimension_semantics = [#tpu.dimension_semantics<parallel>, #tpu.dimension_semantics<parallel>], iteration_bounds = array<i64: 2, 1>, scalar_prefetch = 0 : i64, scratch_operands = 1 : i64, tpu.core_type = #tpu.core_type<tc>, window_params = [{transform_indices = @transform_0, window_bounds = array<i64: 1, 16, 16, 32>}, {pipeline_mode = #tpu.pipeline_mode<synchronous>, transform_indices = @transform_1, window_bounds = array<i64: 1, 32>}, {pipeline_mode = #tpu.pipeline_mode<synchronous>, transform_indices = @transform_2, window_bounds = array<i64: 1, 32>}, {transform_indices = @transform_3, window_bounds = array<i64: 9, 32, 32>}, {transform_indices = @transform_4, window_bounds = array<i64: 1, 32>}, {transform_indices = @transform_5, window_bounds = array<i64: 1, 16, 16, 32>}]} {
    %cst = arith.constant 0.000000e+00 : bf16
    %0 = vector.broadcast %cst : bf16 to vector<18x18x32xbf16>
    %c0 = arith.constant 0 : index
    %c0_0 = arith.constant 0 : index
    %c0_1 = arith.constant 0 : index
    %1 = vector.load %arg8[%c0, %c0_0, %c0_1] : memref<18x18x32xbf16, #tpu.memory_space<vmem>>, vector<18x18x32xbf16>
    tpu.vector_store %arg8[%c0, %c0_0, %c0_1], %0 {strides = array<i32>} : memref<18x18x32xbf16, #tpu.memory_space<vmem>>, vector<18x18x32xbf16>,
    %c0_2 = arith.constant 0 : index
    %c0_3 = arith.constant 0 : index
    %c0_4 = arith.constant 0 : index
    %c0_5 = arith.constant 0 : index
    %2 = vector.load %arg2[%c0_2, %c0_3, %c0_4, %c0_5] : memref<1x16x16x32xf32, #tpu.memory_space<vmem>>, vector<1x16x16x32xf32>
    %3 = vector.shape_cast %2 : vector<1x16x16x32xf32> to vector<16x16x32xf32>
    %c0_6 = arith.constant 0 : index
    %c0_7 = arith.constant 0 : index
    %4 = vector.load %arg3[%c0_6, %c0_7] : memref<1x32xf32, #tpu.memory_space<vmem>>, vector<1x32xf32>
    %5 = vector.shape_cast %4 : vector<1x32xf32> to vector<1x1x32xf32>
    %6 = vector.broadcast %5 : vector<1x1x32xf32> to vector<16x16x32xf32>
    %7 = arith.mulf %3, %6 : vector<16x16x32xf32>
    %c0_8 = arith.constant 0 : index
    %c0_9 = arith.constant 0 : index
    %8 = vector.load %arg4[%c0_8, %c0_9] : memref<1x32xf32, #tpu.memory_space<vmem>>, vector<1x32xf32>
    %9 = vector.shape_cast %8 : vector<1x32xf32> to vector<1x1x32xf32>
    %10 = vector.broadcast %9 : vector<1x1x32xf32> to vector<16x16x32xf32>
    %11 = arith.addf %7, %10 : vector<16x16x32xf32>
    %12 = arith.truncf %11 : vector<16x16x32xf32> to vector<16x16x32xbf16>
    %c1 = arith.constant 1 : index
    %c1_10 = arith.constant 1 : index
    %c0_11 = arith.constant 0 : index
    %13 = vector.load %arg8[%c1, %c1_10, %c0_11] : memref<18x18x32xbf16, #tpu.memory_space<vmem>>, vector<16x16x32xbf16>
    tpu.vector_store %arg8[%c1, %c1_10, %c0_11], %12 {strides = array<i32>} : memref<18x18x32xbf16, #tpu.memory_space<vmem>>, vector<16x16x32xbf16>,
    %cst_12 = arith.constant 0.000000e+00 : f32
    %14 = vector.broadcast %cst_12 : f32 to vector<256x32xf32>
    %c0_13 = arith.constant 0 : index
    %c0_14 = arith.constant 0 : index
    %c0_15 = arith.constant 0 : index
    %15 = vector.load %arg8[%c0_13, %c0_14, %c0_15] : memref<18x18x32xbf16, #tpu.memory_space<vmem>>, vector<16x16x32xbf16>
    %16 = vector.shape_cast %15 : vector<16x16x32xbf16> to vector<256x32xbf16>
    %c0_16 = arith.constant 0 : index
    %c0_17 = arith.constant 0 : index
    %c0_18 = arith.constant 0 : index
    %17 = vector.load %arg5[%c0_16, %c0_17, %c0_18] : memref<9x32x32xbf16, #tpu.memory_space<vmem>>, vector<1x32x32xbf16>
    %18 = vector.shape_cast %17 : vector<1x32x32xbf16> to vector<32x32xbf16>
    %cst_19 = arith.constant dense<0.000000e+00> : vector<256x32xf32>
    %19 = tpu.matmul %16, %18, %cst_19 {dimension_numbers = #tpu.dot_dimension_numbers<[1], [0], [0], [1], [0, 0, 1, 1], [], []>} : vector<256x32xbf16>, vector<32x32xbf16>, vector<256x32xf32> -> vector<256x32xf32>
    %20 = arith.addf %14, %19 : vector<256x32xf32>
    %c0_20 = arith.constant 0 : index
    %c1_21 = arith.constant 1 : index
    %c0_22 = arith.constant 0 : index
    %21 = vector.load %arg8[%c0_20, %c1_21, %c0_22] : memref<18x18x32xbf16, #tpu.memory_space<vmem>>, vector<16x16x32xbf16>
    %22 = vector.shape_cast %21 : vector<16x16x32xbf16> to vector<256x32xbf16>
    %c1_23 = arith.constant 1 : index
    %c0_24 = arith.constant 0 : index
    %c0_25 = arith.constant 0 : index
    %23 = vector.load %arg5[%c1_23, %c0_24, %c0_25] : memref<9x32x32xbf16, #tpu.memory_space<vmem>>, vector<1x32x32xbf16>
    %24 = vector.shape_cast %23 : vector<1x32x32xbf16> to vector<32x32xbf16>
    %cst_26 = arith.constant dense<0.000000e+00> : vector<256x32xf32>
    %25 = tpu.matmul %22, %24, %cst_26 {dimension_numbers = #tpu.dot_dimension_numbers<[1], [0], [0], [1], [0, 0, 1, 1], [], []>} : vector<256x32xbf16>, vector<32x32xbf16>, vector<256x32xf32> -> vector<256x32xf32>
    %26 = arith.addf %20, %25 : vector<256x32xf32>
    %c0_27 = arith.constant 0 : index
    %c2 = arith.constant 2 : index
    %c0_28 = arith.constant 0 : index
    %27 = vector.load %arg8[%c0_27, %c2, %c0_28] : memref<18x18x32xbf16, #tpu.memory_space<vmem>>, vector<16x16x32xbf16>
    %28 = vector.shape_cast %27 : vector<16x16x32xbf16> to vector<256x32xbf16>
    %c2_29 = arith.constant 2 : index
    %c0_30 = arith.constant 0 : index
    %c0_31 = arith.constant 0 : index
    %29 = vector.load %arg5[%c2_29, %c0_30, %c0_31] : memref<9x32x32xbf16, #tpu.memory_space<vmem>>, vector<1x32x32xbf16>
    %30 = vector.shape_cast %29 : vector<1x32x32xbf16> to vector<32x32xbf16>
    %cst_32 = arith.constant dense<0.000000e+00> : vector<256x32xf32>
    %31 = tpu.matmul %28, %30, %cst_32 {dimension_numbers = #tpu.dot_dimension_numbers<[1], [0], [0], [1], [0, 0, 1, 1], [], []>} : vector<256x32xbf16>, vector<32x32xbf16>, vector<256x32xf32> -> vector<256x32xf32>
    %32 = arith.addf %26, %31 : vector<256x32xf32>
    %c1_33 = arith.constant 1 : index
    %c0_34 = arith.constant 0 : index
    %c0_35 = arith.constant 0 : index
    %33 = vector.load %arg8[%c1_33, %c0_34, %c0_35] : memref<18x18x32xbf16, #tpu.memory_space<vmem>>, vector<16x16x32xbf16>
    %34 = vector.shape_cast %33 : vector<16x16x32xbf16> to vector<256x32xbf16>
    %c3 = arith.constant 3 : index
    %c0_36 = arith.constant 0 : index
    %c0_37 = arith.constant 0 : index
    %35 = vector.load %arg5[%c3, %c0_36, %c0_37] : memref<9x32x32xbf16, #tpu.memory_space<vmem>>, vector<1x32x32xbf16>
    %36 = vector.shape_cast %35 : vector<1x32x32xbf16> to vector<32x32xbf16>
    %cst_38 = arith.constant dense<0.000000e+00> : vector<256x32xf32>
    %37 = tpu.matmul %34, %36, %cst_38 {dimension_numbers = #tpu.dot_dimension_numbers<[1], [0], [0], [1], [0, 0, 1, 1], [], []>} : vector<256x32xbf16>, vector<32x32xbf16>, vector<256x32xf32> -> vector<256x32xf32>
    %38 = arith.addf %32, %37 : vector<256x32xf32>
    %c1_39 = arith.constant 1 : index
    %c1_40 = arith.constant 1 : index
    %c0_41 = arith.constant 0 : index
    %39 = vector.load %arg8[%c1_39, %c1_40, %c0_41] : memref<18x18x32xbf16, #tpu.memory_space<vmem>>, vector<16x16x32xbf16>
    %40 = vector.shape_cast %39 : vector<16x16x32xbf16> to vector<256x32xbf16>
    %c4 = arith.constant 4 : index
    %c0_42 = arith.constant 0 : index
    %c0_43 = arith.constant 0 : index
    %41 = vector.load %arg5[%c4, %c0_42, %c0_43] : memref<9x32x32xbf16, #tpu.memory_space<vmem>>, vector<1x32x32xbf16>
    %42 = vector.shape_cast %41 : vector<1x32x32xbf16> to vector<32x32xbf16>
    %cst_44 = arith.constant dense<0.000000e+00> : vector<256x32xf32>
    %43 = tpu.matmul %40, %42, %cst_44 {dimension_numbers = #tpu.dot_dimension_numbers<[1], [0], [0], [1], [0, 0, 1, 1], [], []>} : vector<256x32xbf16>, vector<32x32xbf16>, vector<256x32xf32> -> vector<256x32xf32>
    %44 = arith.addf %38, %43 : vector<256x32xf32>
    %c1_45 = arith.constant 1 : index
    %c2_46 = arith.constant 2 : index
    %c0_47 = arith.constant 0 : index
    %45 = vector.load %arg8[%c1_45, %c2_46, %c0_47] : memref<18x18x32xbf16, #tpu.memory_space<vmem>>, vector<16x16x32xbf16>
    %46 = vector.shape_cast %45 : vector<16x16x32xbf16> to vector<256x32xbf16>
    %c5 = arith.constant 5 : index
    %c0_48 = arith.constant 0 : index
    %c0_49 = arith.constant 0 : index
    %47 = vector.load %arg5[%c5, %c0_48, %c0_49] : memref<9x32x32xbf16, #tpu.memory_space<vmem>>, vector<1x32x32xbf16>
    %48 = vector.shape_cast %47 : vector<1x32x32xbf16> to vector<32x32xbf16>
    %cst_50 = arith.constant dense<0.000000e+00> : vector<256x32xf32>
    %49 = tpu.matmul %46, %48, %cst_50 {dimension_numbers = #tpu.dot_dimension_numbers<[1], [0], [0], [1], [0, 0, 1, 1], [], []>} : vector<256x32xbf16>, vector<32x32xbf16>, vector<256x32xf32> -> vector<256x32xf32>
    %50 = arith.addf %44, %49 : vector<256x32xf32>
    %c2_51 = arith.constant 2 : index
    %c0_52 = arith.constant 0 : index
    %c0_53 = arith.constant 0 : index
    %51 = vector.load %arg8[%c2_51, %c0_52, %c0_53] : memref<18x18x32xbf16, #tpu.memory_space<vmem>>, vector<16x16x32xbf16>
    %52 = vector.shape_cast %51 : vector<16x16x32xbf16> to vector<256x32xbf16>
    %c6 = arith.constant 6 : index
    %c0_54 = arith.constant 0 : index
    %c0_55 = arith.constant 0 : index
    %53 = vector.load %arg5[%c6, %c0_54, %c0_55] : memref<9x32x32xbf16, #tpu.memory_space<vmem>>, vector<1x32x32xbf16>
    %54 = vector.shape_cast %53 : vector<1x32x32xbf16> to vector<32x32xbf16>
    %cst_56 = arith.constant dense<0.000000e+00> : vector<256x32xf32>
    %55 = tpu.matmul %52, %54, %cst_56 {dimension_numbers = #tpu.dot_dimension_numbers<[1], [0], [0], [1], [0, 0, 1, 1], [], []>} : vector<256x32xbf16>, vector<32x32xbf16>, vector<256x32xf32> -> vector<256x32xf32>
    %56 = arith.addf %50, %55 : vector<256x32xf32>
    %c2_57 = arith.constant 2 : index
    %c1_58 = arith.constant 1 : index
    %c0_59 = arith.constant 0 : index
    %57 = vector.load %arg8[%c2_57, %c1_58, %c0_59] : memref<18x18x32xbf16, #tpu.memory_space<vmem>>, vector<16x16x32xbf16>
    %58 = vector.shape_cast %57 : vector<16x16x32xbf16> to vector<256x32xbf16>
    %c7 = arith.constant 7 : index
    %c0_60 = arith.constant 0 : index
    %c0_61 = arith.constant 0 : index
    %59 = vector.load %arg5[%c7, %c0_60, %c0_61] : memref<9x32x32xbf16, #tpu.memory_space<vmem>>, vector<1x32x32xbf16>
    %60 = vector.shape_cast %59 : vector<1x32x32xbf16> to vector<32x32xbf16>
    %cst_62 = arith.constant dense<0.000000e+00> : vector<256x32xf32>
    %61 = tpu.matmul %58, %60, %cst_62 {dimension_numbers = #tpu.dot_dimension_numbers<[1], [0], [0], [1], [0, 0, 1, 1], [], []>} : vector<256x32xbf16>, vector<32x32xbf16>, vector<256x32xf32> -> vector<256x32xf32>
    %62 = arith.addf %56, %61 : vector<256x32xf32>
    %c2_63 = arith.constant 2 : index
    %c2_64 = arith.constant 2 : index
    %c0_65 = arith.constant 0 : index
    %63 = vector.load %arg8[%c2_63, %c2_64, %c0_65] : memref<18x18x32xbf16, #tpu.memory_space<vmem>>, vector<16x16x32xbf16>
    %64 = vector.shape_cast %63 : vector<16x16x32xbf16> to vector<256x32xbf16>
    %c8 = arith.constant 8 : index
    %c0_66 = arith.constant 0 : index
    %c0_67 = arith.constant 0 : index
    %65 = vector.load %arg5[%c8, %c0_66, %c0_67] : memref<9x32x32xbf16, #tpu.memory_space<vmem>>, vector<1x32x32xbf16>
    %66 = vector.shape_cast %65 : vector<1x32x32xbf16> to vector<32x32xbf16>
    %cst_68 = arith.constant dense<0.000000e+00> : vector<256x32xf32>
    %67 = tpu.matmul %64, %66, %cst_68 {dimension_numbers = #tpu.dot_dimension_numbers<[1], [0], [0], [1], [0, 0, 1, 1], [], []>} : vector<256x32xbf16>, vector<32x32xbf16>, vector<256x32xf32> -> vector<256x32xf32>
    %68 = arith.addf %62, %67 : vector<256x32xf32>
    %c0_69 = arith.constant 0 : index
    %c0_70 = arith.constant 0 : index
    %69 = vector.load %arg6[%c0_69, %c0_70] : memref<1x32xf32, #tpu.memory_space<vmem>>, vector<1x32xf32>
    %70 = vector.broadcast %69 : vector<1x32xf32> to vector<256x32xf32>
    %71 = arith.addf %68, %70 : vector<256x32xf32>
    %cst_71 = arith.constant 0.000000e+00 : f32
    %72 = vector.broadcast %cst_71 : f32 to vector<256x32xf32>
    %73 = arith.maximumf %71, %72 : vector<256x32xf32>
    %74 = vector.shape_cast %73 : vector<256x32xf32> to vector<1x16x16x32xf32>
    %c0_72 = arith.constant 0 : index
    %c0_73 = arith.constant 0 : index
    %c0_74 = arith.constant 0 : index
    %c0_75 = arith.constant 0 : index
    %75 = vector.load %arg7[%c0_72, %c0_73, %c0_74, %c0_75] : memref<1x16x16x32xf32, #tpu.memory_space<vmem>>, vector<1x16x16x32xf32>
    tpu.vector_store %arg7[%c0_72, %c0_73, %c0_74, %c0_75], %74 {strides = array<i32>} : memref<1x16x16x32xf32, #tpu.memory_space<vmem>>, vector<1x16x16x32xf32>,
    return
  }
  func.func @transform_0(%arg0: i32, %arg1: i32) -> (i32, i32, i32, i32) {
    %c0_i32 = arith.constant 0 : i32
    %c0_i32_0 = arith.constant 0 : i32
    %c0_i32_1 = arith.constant 0 : i32
    %c0_i32_2 = arith.constant 0 : i32
    return %arg0, %c0_i32, %c0_i32_0, %c0_i32_1 : i32, i32, i32, i32
  }
  func.func @transform_1(%arg0: i32, %arg1: i32) -> (i32, i32) {
    %c0_i32 = arith.constant 0 : i32
    %c0_i32_0 = arith.constant 0 : i32
    %c0_i32_1 = arith.constant 0 : i32
    return %c0_i32, %c0_i32_0 : i32, i32
  }
  func.func @transform_2(%arg0: i32, %arg1: i32) -> (i32, i32) {
    %c0_i32 = arith.constant 0 : i32
    %c0_i32_0 = arith.constant 0 : i32
    %c0_i32_1 = arith.constant 0 : i32
    return %c0_i32, %c0_i32_0 : i32, i32
  }
  func.func @transform_3(%arg0: i32, %arg1: i32) -> (i32, i32, i32) {
    %c0_i32 = arith.constant 0 : i32
    %c0_i32_0 = arith.constant 0 : i32
    %c0_i32_1 = arith.constant 0 : i32
    return %c0_i32, %c0_i32_0, %arg1 : i32, i32, i32
  }
  func.func @transform_4(%arg0: i32, %arg1: i32) -> (i32, i32) {
    %c0_i32 = arith.constant 0 : i32
    %c0_i32_0 = arith.constant 0 : i32
    return %c0_i32, %arg1 : i32, i32
  }
  func.func @transform_5(%arg0: i32, %arg1: i32) -> (i32, i32, i32, i32) {
    %c0_i32 = arith.constant 0 : i32
    %c0_i32_0 = arith.constant 0 : i32
    %c0_i32_1 = arith.constant 0 : i32
    return %arg0, %c0_i32, %c0_i32_0, %arg1 : i32, i32, i32, i32
  }
}

</mosaic_0001>

<bundles_post_ra>
// kernel: double_conv2d_forward.4
= control target key start
LH: loop header
LB: loop body
LE: loop exit
PB: predicated region body
PF: predicated region fallthrough
CT: control target
= control target key end

     0   :  { %8 = vsyncpa [#allocation3], 0  ;;  %s701_s0 = inlined_call_operand.vmem [shape: f32[512,1], index: 0, kind: input, shape index: {}]   ;;  %s702_s1 = inlined_call_operand.hbm [shape: f32[1,1], index: 1, kind: output, shape index: {0}]   ;;  %s703_s2 = inlined_call_operand.hbm [shape: f32[1,1], index: 2, kind: output, shape index: {1}]  }
   0x1   :  { %9 = vsyncpa [#allocation5], 0  ;;  %s538_s9 = smov 0  }
   0x2 LB: > { %s544_s10 = sadd.s32 4294967295, %s518_s9   ;;  %p419_p0 = scmp.ge.s32.totalorder %s518_s9, 1  ;;  %s518_s9 = sphi %s538_s9, %s15_s9  }
   0x3   : > { %p108_p1 = scmp.lt.s32.totalorder %s518_s9, 3 }
   0x5   : > { %p109_p2 = pnand %p419_p0, %p108_p1 }
   0x6   : > { %s420_s11 = sshll.u32 (!%p109_p2), %s544_s10, 5  ;;  %p422_p4 = scmp.ne.s32.totalorder (!%p109_p2), %s544_s10, 0 }
   0x7   : > { %112 = sbr.rel (%p109_p2) target bundleno = 144 (0x90), region = 24  ;;  %p126_p3 = scmp.lt.s32.totalorder (!%p109_p2), %s420_s11, 63 }
   0xe   : > { %s705_s11 = smov (!%p126_p3, %s420_s11), 63  ;;  %134 = sbr.rel (%p422_p4) target bundleno = 21 (0x15), region = 28 }
   0xf   : > { %s421_s12 = sshll.u32 %s705_s11, 3  ;;  %vm135_vm0 = vcmask (!%p422_p4), 0   ;;  %v520_v0 = vmov (!%p422_p4), 0.0  }
  0x10   : > { %s552_s15 = scalar_lea.vmem %s701_s0, %s421_s12  ;;  %136 = vst.msk [vmem:[#allocation2] sm:$0x1] (!%p422_p4), %vm135_vm0, %v520_v0  ;;  %137 = vst.msk [vmem:[#allocation4] sm:$0x1] (!%p422_p4), %vm135_vm0, %v520_v0 }
  0x15 PF: > { %v138_v1 = vld [vmem:[%s552_s15] sm:$0xff]  ;;  %v139_v2 = vld [vmem:[%s552_s15 + $0x8] sm:$0xff]  ;;  %v140_v3 = vld [vmem:[%s552_s15 + $0x10] sm:$0xff]  ;;  %vm171_vm1 = vcmask 7168   ;;  %s521_s16 = smov [#allocation2]   ;;  %vm242_vm2 = vcmask 0  }
  0x16   : > { %v172_v4 = vsel %vm171_vm1, %v138_v1, 0.0  ;;  %v173_v5 = vsel %vm171_vm1, %v139_v2, 0.0  ;;  %v175_v6 = vsel %vm171_vm1, %v140_v3, 0.0  ;;  %v141_v7 = vld [vmem:[%s552_s15 + $0x18] sm:$0xff]  ;;  %v142_v10 = vld [vmem:[%s552_s15 + $0x20] sm:$0xff]  ;;  %v143_v13 = vld [vmem:[%s552_s15 + $0x28] sm:$0xff]  ;;  %v245_v28 = vmul.f32 %v138_v1, %v138_v1 }
  0x17   : > { %v174_v8 = vadd.f32 %v173_v5, %v172_v4  ;;  %v177_v9 = vsel %vm171_vm1, %v141_v7, 0.0  ;;  %v179_v12 = vsel %vm171_vm1, %v142_v10, 0.0  ;;  %v181_v15 = vsel %vm171_vm1, %v143_v13, 0.0  ;;  %v144_v16 = vld [vmem:[%s552_s15 + $0x30] sm:$0xff]  ;;  %v145_v19 = vld [vmem:[%s552_s15 + $0x38] sm:$0xff]  ;;  %v146_v22 = vld [vmem:[%s552_s15 + $0x40] sm:$0xff] }
  0x18   : > { %v183_v18 = vsel %vm171_vm1, %v144_v16, 0.0  ;;  %v185_v21 = vsel %vm171_vm1, %v145_v19, 0.0  ;;  %v187_v24 = vsel %vm171_vm1, %v146_v22, 0.0  ;;  %v147_v25 = vld [vmem:[%s552_s15 + $0x48] sm:$0xff]  ;;  %v246_v29 = vmul.f32 %v139_v2, %v139_v2  ;;  %v148_v31 = vld [vmem:[%s552_s15 + $0x50] sm:$0xff]  ;;  %v149_v33 = vld [vmem:[%s552_s15 + $0x58] sm:$0xff] }
  0x19   : > { %v176_v11 = vadd.f32 %v175_v6, %v174_v8  ;;  %v189_v27 = vsel %vm171_vm1, %v147_v25, 0.0  ;;  %v247_v30 = vmul.f32 %v140_v3, %v140_v3  ;;  %v191_v34 = vsel %vm171_vm1, %v148_v31, 0.0  ;;  %v150_v42 = vld [vmem:[%s552_s15 + $0x60] sm:$0xff]  ;;  %v151_v48 = vld [vmem:[%s552_s15 + $0x68] sm:$0xff]  ;;  %v152_v54 = vld [vmem:[%s552_s15 + $0x70] sm:$0xff]  ;;  %s355_s17 = sshll.u32 %s521_s16, 4  ;;  %s356_s17 = int_to_ptr.vmem [resolvable:$true] %s355_s17 }
  0x1a   : > { %v248_v35 = vmul.f32 %v141_v7, %v141_v7  ;;  %v193_v37 = vsel %vm171_vm1, %v149_v33, 0.0  ;;  %v249_v38 = vmul.f32 %v142_v10, %v142_v10  ;;  %v277_v39 = vsel %vm171_vm1, %v245_v28, 0.0  ;;  %v153_v60 = vld [vmem:[%s552_s15 + $0x78] sm:$0xff]  ;;  %v154_v2 = vld [vmem:[%s552_s15 + $0x80] sm:$0xff]  ;;  %v155_v8 = vld [vmem:[%s552_s15 + $0x88] sm:$0xff]  ;;  %p437_p5 = scmp.eq.s32.totalorder %s544_s10, 1  ;;  %p459_p9 = scmp.lt.s32.totalorder %s356_s17, %s356_s17 }
  0x1b   : > { %v178_v14 = vadd.f32 %v177_v9, %v176_v11  ;;  %v278_v40 = vsel %vm171_vm1, %v246_v29, 0.0  ;;  %v280_v41 = vsel %vm171_vm1, %v247_v30, 0.0  ;;  %v195_v45 = vsel %vm171_vm1, %v150_v42, 0.0  ;;  %s452_s18 = scalar_lea.vmem %s356_s17, 16  ;;  %s458_s19 = scalar_lea.vmem %s356_s17, 32 }
  0x1c   : > { %v279_v44 = vadd.f32 %v278_v40, %v277_v39  ;;  %v250_v46 = vmul.f32 %v143_v13, %v143_v13  ;;  %v282_v47 = vsel %vm171_vm1, %v248_v35, 0.0  ;;  %v197_v51 = vsel %vm171_vm1, %v151_v48, 0.0  ;;  %p453_p6 = scmp.ne.s32.totalorder %s356_s17, %s452_s18  ;;  %p460_p10 = scmp.lt.s32.totalorder %s458_s19, %s452_s18 }
  0x1d   : > { %v180_v17 = vadd.f32 %v179_v12, %v178_v14  ;;  %v251_v52 = vmul.f32 %v144_v16, %v144_v16  ;;  %v284_v53 = vsel %vm171_vm1, %v249_v38, 0.0  ;;  %v199_v57 = vsel %vm171_vm1, %v152_v54, 0.0  ;;  %v156_v14 = vld [vmem:[%s552_s15 + $0x90] sm:$0xff] }
  0x1e   : > { %v281_v50 = vadd.f32 %v280_v41, %v279_v44  ;;  %v252_v58 = vmul.f32 %v145_v19, %v145_v19  ;;  %v286_v59 = vsel %vm171_vm1, %v250_v46, 0.0  ;;  %v201_v63 = vsel %vm171_vm1, %v153_v60, 0.0  ;;  %v160_v38 = vld [vmem:[%s552_s15 + $0xb0] sm:$0xff]  ;;  %v161_v44 = vld [vmem:[%s552_s15 + $0xb8] sm:$0xff]  ;;  %p454_p7 = pnand %p453_p6, %p437_p5  ;;  %p461_p11 = por %p460_p10, %p459_p9 }
  0x1f   : > { %v182_v20 = vadd.f32 %v181_v15, %v180_v17  ;;  %v253_v0 = vmul.f32 %v146_v22, %v146_v22  ;;  %v288_v1 = vsel %vm171_vm1, %v251_v52, 0.0  ;;  %v203_v5 = vsel %vm171_vm1, %v154_v2, 0.0 }
  0x20   : > { %v283_v56 = vadd.f32 %v282_v47, %v281_v50  ;;  %v254_v6 = vmul.f32 %v147_v25, %v147_v25  ;;  %v290_v7 = vsel %vm171_vm1, %v252_v58, 0.0  ;;  %v205_v11 = vsel %vm171_vm1, %v155_v8, 0.0  ;;  %v162_v50 = vld [vmem:[%s552_s15 + $0xc0] sm:$0xff]  ;;  %p455_p8 = pneg %p454_p7 }
  0x21   : > { %v184_v23 = vadd.f32 %v183_v18, %v182_v20  ;;  %v255_v12 = vmul.f32 %v148_v31, %v148_v31  ;;  %v292_v13 = vsel %vm171_vm1, %v253_v0, 0.0  ;;  %v207_v17 = vsel %vm171_vm1, %v156_v14, 0.0  ;;  %v157_v20 = vld [vmem:[%s552_s15 + $0x98] sm:$0xff] }
  0x22   : > { %v285_v62 = vadd.f32 %v284_v53, %v283_v56  ;;  %v256_v18 = vmul.f32 %v149_v33, %v149_v33  ;;  %v294_v19 = vsel %vm171_vm1, %v254_v6, 0.0  ;;  %v258_v30 = vmul.f32 %v151_v48, %v151_v48  ;;  %v163_v56 = vld [vmem:[%s552_s15 + $0xc8] sm:$0xff]  ;;  %p462_p12 = pnand %p461_p11, %p455_p8 }
  0x23   : > { %v186_v26 = vadd.f32 %v185_v21, %v184_v23  ;;  %v209_v23 = vsel %vm171_vm1, %v157_v20, 0.0  ;;  %v296_v25 = vsel %vm171_vm1, %v255_v12, 0.0  ;;  %v215_v41 = vsel %vm171_vm1, %v160_v38, 0.0 }
  0x24   : > { %v287_v4 = vadd.f32 %v286_v59, %v285_v62  ;;  %v298_v31 = vsel %vm171_vm1, %v256_v18, 0.0  ;;  %v217_v47 = vsel %vm171_vm1, %v161_v44, 0.0  ;;  %v261_v48 = vmul.f32 %v154_v2, %v154_v2  ;;  %v164_v62 = vld [vmem:[%s552_s15 + $0xd0] sm:$0xff] }
  0x25   : > { %v188_v32 = vadd.f32 %v187_v24, %v186_v26  ;;  %v257_v24 = vmul.f32 %v150_v42, %v150_v42  ;;  %v158_v26 = vld [vmem:[%s552_s15 + $0xa0] sm:$0xff]  ;;  %v260_v42 = vmul.f32 %v153_v60, %v153_v60  ;;  %v219_v53 = vsel %vm171_vm1, %v162_v50, 0.0 }
  0x26   : > { %v289_v10 = vadd.f32 %v288_v1, %v287_v4  ;;  %v211_v29 = vsel %vm171_vm1, %v158_v26, 0.0  ;;  %v221_v59 = vsel %vm171_vm1, %v163_v56, 0.0  ;;  %v263_v60 = vmul.f32 %v156_v14, %v156_v14  ;;  %v165_v4 = vld [vmem:[%s552_s15 + $0xd8] sm:$0xff] }
  0x27   : > { %v190_v36 = vadd.f32 %v189_v27, %v188_v32  ;;  %v159_v32 = vld [vmem:[%s552_s15 + $0xa8] sm:$0xff]  ;;  %v223_v1 = vsel %vm171_vm1, %v164_v62, 0.0  ;;  %v264_v2 = vmul.f32 %v157_v20, %v157_v20  ;;  %v267_v20 = vmul.f32 %v160_v38, %v160_v38 }
  0x28   : > { %v291_v16 = vadd.f32 %v290_v7, %v289_v10  ;;  %v213_v35 = vsel %vm171_vm1, %v159_v32, 0.0  ;;  %v225_v7 = vsel %vm171_vm1, %v165_v4, 0.0  ;;  %v166_v10 = vld [vmem:[%s552_s15 + $0xe0] sm:$0xff]  ;;  %v266_v14 = vmul.f32 %v159_v32, %v159_v32 }
  0x29   : > { %v192_v43 = vadd.f32 %v191_v34, %v190_v36  ;;  %v259_v36 = vmul.f32 %v152_v54, %v152_v54  ;;  %v262_v54 = vmul.f32 %v155_v8, %v155_v8  ;;  %v265_v8 = vmul.f32 %v158_v26, %v158_v26 }
  0x2a   : > { %v293_v22 = vadd.f32 %v292_v13, %v291_v16  ;;  %v227_v13 = vsel %vm171_vm1, %v166_v10, 0.0  ;;  %v167_v16 = vld [vmem:[%s552_s15 + $0xe8] sm:$0xff]  ;;  %v268_v26 = vmul.f32 %v161_v44, %v161_v44  ;;  %v269_v32 = vmul.f32 %v162_v50, %v162_v50 }
  0x2b   : > { %v194_v49 = vadd.f32 %v193_v37, %v192_v43  ;;  %v300_v37 = vsel %vm171_vm1, %v257_v24, 0.0  ;;  %v302_v43 = vsel %vm171_vm1, %v258_v30, 0.0  ;;  %v272_v44 = vmul.f32 %v165_v4, %v165_v4 }
  0x2c   : > { %v295_v28 = vadd.f32 %v294_v19, %v293_v22  ;;  %v229_v19 = vsel %vm171_vm1, %v167_v16, 0.0  ;;  %v168_v22 = vld [vmem:[%s552_s15 + $0xf0] sm:$0xff] }
  0x2d   : > { %v196_v55 = vadd.f32 %v195_v45, %v194_v49  ;;  %v304_v49 = vsel %vm171_vm1, %v259_v36, 0.0  ;;  %v270_v36 = vmul.f32 %v163_v56, %v163_v56  ;;  %v275_v56 = vmul.f32 %v168_v22, %v168_v22 }
  0x2e   : > { %v297_v34 = vadd.f32 %v296_v25, %v295_v28  ;;  %v231_v25 = vsel %vm171_vm1, %v168_v22, 0.0  ;;  %v169_v28 = vld [vmem:[%s552_s15 + $0xf8] sm:$0xff] }
  0x2f   : > { %v198_v61 = vadd.f32 %v197_v51, %v196_v55  ;;  %v306_v55 = vsel %vm171_vm1, %v260_v42, 0.0 }
  0x30   : > { %v299_v40 = vadd.f32 %v298_v31, %v297_v34  ;;  %v233_v31 = vsel %vm171_vm1, %v169_v28, 0.0 }
  0x31   : > { %v200_v3 = vadd.f32 %v199_v57, %v198_v61  ;;  %v308_v61 = vsel %vm171_vm1, %v261_v48, 0.0  ;;  %v273_v48 = vmul.f32 %v166_v10, %v166_v10 }
  0x32   : > { %v301_v46 = vadd.f32 %v300_v37, %v299_v40  ;;  %v322_v37 = vsel %vm171_vm1, %v268_v26, 0.0  ;;  %v271_v40 = vmul.f32 %v164_v62, %v164_v62 }
  0x33   : > { %v202_v9 = vadd.f32 %v201_v63, %v200_v3  ;;  %v310_v3 = vsel %vm171_vm1, %v262_v54, 0.0 }
  0x34   : > { %v303_v52 = vadd.f32 %v302_v43, %v301_v46 }
  0x35   : > { %v204_v15 = vadd.f32 %v203_v5, %v202_v9  ;;  %v312_v9 = vsel %vm171_vm1, %v263_v60, 0.0  ;;  %v170_v60 = vld [vmem:[#allocation2] sm:$0x1] }
  0x36   : > { %v305_v58 = vadd.f32 %v304_v49, %v303_v52  ;;  %v328_v49 = vsel %vm171_vm1, %v271_v40, 0.0  ;;  %v274_v52 = vmul.f32 %v167_v16, %v167_v16 }
  0x37   : > { %v206_v21 = vadd.f32 %v205_v11, %v204_v15  ;;  %v314_v15 = vsel %vm171_vm1, %v264_v2, 0.0 }
  0x38   : > { %v307_v0 = vadd.f32 %v306_v55, %v305_v58  ;;  %v334_v62 = vsel %vm171_vm1, %v274_v52, 0.0 }
  0x39   : > { %v208_v27 = vadd.f32 %v207_v17, %v206_v21  ;;  %v316_v21 = vsel %vm171_vm1, %v265_v8, 0.0 }
  0x3a   : > { %v309_v6 = vadd.f32 %v308_v61, %v307_v0  ;;  %v276_v61 = vmul.f32 %v169_v28, %v169_v28 }
  0x3b   : > { %v210_v33 = vadd.f32 %v209_v23, %v208_v27  ;;  %v318_v27 = vsel %vm171_vm1, %v266_v14, 0.0 }
  0x3c   : > { %v311_v12 = vadd.f32 %v310_v3, %v309_v6  ;;  %v338_v4 = vsel %vm171_vm1, %v276_v61, 0.0 }
  0x3d   : > { %v212_v39 = vadd.f32 %v211_v29, %v210_v33  ;;  %v320_v33 = vsel %vm171_vm1, %v267_v20, 0.0 }
  0x3e   : > { %v313_v18 = vadd.f32 %v312_v9, %v311_v12 }
  0x3f   : > { %v214_v45 = vadd.f32 %v213_v35, %v212_v39 }
  0x40   : > { %v315_v24 = vadd.f32 %v314_v15, %v313_v18 }
  0x41   : > { %v216_v51 = vadd.f32 %v215_v41, %v214_v45  ;;  %v324_v41 = vsel %vm171_vm1, %v269_v32, 0.0  ;;  %v326_v45 = vsel %vm171_vm1, %v270_v36, 0.0 }
  0x42   : > { %v317_v30 = vadd.f32 %v316_v21, %v315_v24 }
  0x43   : > { %v218_v57 = vadd.f32 %v217_v47, %v216_v51 }
  0x44   : > { %v319_v35 = vadd.f32 %v318_v27, %v317_v30 }
  0x45   : > { %v220_v63 = vadd.f32 %v219_v53, %v218_v57  ;;  %v330_v53 = vsel %vm171_vm1, %v272_v44, 0.0  ;;  %v332_v57 = vsel %vm171_vm1, %v273_v48, 0.0 }
  0x46   : > { %v321_v39 = vadd.f32 %v320_v33, %v319_v35 }
  0x47   : > { %v222_v5 = vadd.f32 %v221_v59, %v220_v63 }
  0x48   : > { %v323_v43 = vadd.f32 %v322_v37, %v321_v39 }
  0x49   : > { %v224_v11 = vadd.f32 %v223_v1, %v222_v5  ;;  %v336_v1 = vsel %vm171_vm1, %v275_v56, 0.0 }
  0x4a   : > { %v325_v47 = vadd.f32 %v324_v41, %v323_v43 }
  0x4b   : > { %v226_v17 = vadd.f32 %v225_v7, %v224_v11 }
  0x4c   : > { %v327_v51 = vadd.f32 %v326_v45, %v325_v47 }
  0x4d   : > { %v228_v23 = vadd.f32 %v227_v13, %v226_v17 }
  0x4e   : > { %v329_v55 = vadd.f32 %v328_v49, %v327_v51 }
  0x4f   : > { %v230_v29 = vadd.f32 %v229_v19, %v228_v23 }
  0x50   : > { %v331_v59 = vadd.f32 %v330_v53, %v329_v55 }
  0x51   : > { %v232_v34 = vadd.f32 %v231_v25, %v230_v29 }
  0x52   : > { %v333_v0 = vadd.f32 %v332_v57, %v331_v59 }
  0x53   : > { %v234_v38 = vadd.f32 %v233_v31, %v232_v34 }
  0x54   : > { %v335_v3 = vadd.f32 %v334_v62, %v333_v0 }
  0x55   : > { %v235_v42 = vrot.slane %v234_v38, 4 }
  0x56   : > { %v337_v5 = vadd.f32 %v336_v1, %v335_v3 }
  0x57   : > { %v236_v46 = vadd.f32 %v235_v42, %v234_v38 }
  0x59   : > { %v237_v50 = vrot.slane %v236_v46, 2 }
  0x5b   : > { %v238_v54 = vadd.f32 %v237_v50, %v236_v46 }
  0x5d   : > { %v239_v58 = vrot.slane %v238_v54, 1 }
  0x5f   : > { %v240_v63 = vadd.f32 %v239_v58, %v238_v54 }
  0x61   : > { %v241_v2 = vadd.f32 %v240_v63, %v170_v60 }
  0x63   : > { %243 = vst.msk [vmem:[#allocation2] sm:$0x1] %vm242_vm2, %v241_v2 }
  0x64   : > { %465 = shalt.err (!%p462_p12)
}
  0x65   : > { %s466_s22 = scalar_lea.hbm %s702_s1, 16 }
  0x66   : > { %p467_p13 = scmp.ne.s32.totalorder %s702_s1, %s466_s22  ;;  %p472_p2 = scmp.lt.u32.totalorder %s466_s22, %s702_s1 }
  0x68   : > { %p468_p0 = pnand %p467_p13, %p437_p5 }
  0x6a   : > { %p469_p1 = pneg %p468_p0 }
  0x6c   : > { %p474_p3 = pnand %p472_p2, %p469_p1 }
  0x6e   : > { %477 = shalt.err (!%p474_p3)
}
  0x6f   : > { %430 = dma.vmem_to_hbm [thread:$0]  (%p437_p5), %s356_s17, 16, %s702_s1, [#allocation3]   ;;  %v339_v6 = vadd.f32 %v338_v4, %v337_v5  ;;  %v244_v12 = vld [vmem:[#allocation4] sm:$0x1] }
  0x70   : > { %s522_s29 = smov [#allocation4]  }
  0x71   : > { %v340_v7 = vrot.slane %v339_v6, 4  ;;  %s366_s30 = sshll.u32 %s522_s29, 4  ;;  %s367_s30 = int_to_ptr.vmem [resolvable:$true] %s366_s30 }
  0x72   : > { %s478_s3 = scalar_lea.vmem %s367_s30, 16  ;;  %s484_s4 = scalar_lea.vmem %s367_s30, 32 }
  0x73   : > { %v341_v8 = vadd.f32 %v340_v7, %v339_v6  ;;  %p479_p4 = scmp.ne.s32.totalorder %s367_s30, %s478_s3  ;;  %p485_p8 = scmp.lt.s32.totalorder %s367_s30, %s367_s30 }
  0x74   : > { %p486_p9 = scmp.lt.s32.totalorder %s484_s4, %s478_s3 }
  0x75   : > { %v342_v9 = vrot.slane %v341_v8, 2  ;;  %p480_p6 = pnand %p479_p4, %p437_p5 }
  0x76   : > { %p487_p10 = por %p486_p9, %p485_p8 }
  0x77   : > { %v343_v10 = vadd.f32 %v342_v9, %v341_v8  ;;  %p481_p7 = pneg %p480_p6 }
  0x79   : > { %v344_v11 = vrot.slane %v343_v10, 1  ;;  %p488_p11 = pnand %p487_p10, %p481_p7 }
  0x7b   : > { %v345_v13 = vadd.f32 %v344_v11, %v343_v10 }
  0x7d   : > { %v346_v14 = vadd.f32 %v345_v13, %v244_v12 }
  0x7f   : > { %347 = vst.msk [vmem:[#allocation4] sm:$0x1] %vm242_vm2, %v346_v14 }
  0x80   : > { %491 = shalt.err (!%p488_p11)
}
  0x81   : > { %s492_s7 = scalar_lea.hbm %s703_s2, 16 }
  0x82   : > { %p493_p12 = scmp.ne.s32.totalorder %s703_s2, %s492_s7  ;;  %p498_p1 = scmp.lt.u32.totalorder %s492_s7, %s703_s2 }
  0x84   : > { %p494_p13 = pnand %p493_p12, %p437_p5 }
  0x86   : > { %p495_p0 = pneg %p494_p13 }
  0x88   : > { %p500_p2 = pnand %p498_p1, %p495_p0 }
  0x8a   : > { %503 = shalt.err (!%p500_p2)
}
  0x8b   : > { %432 = dma.vmem_to_hbm [thread:$0]  (%p437_p5), %s367_s30, 16, %s703_s2, [#allocation5]  }
  0x8c   : > { %509 = dma.done.wait (%p437_p5), [#allocation3], 16  }
  0x8d   : > { %511 = vsyncadd (%p437_p5), [#allocation3], 4294967280 }
  0x8e   : > { %513 = dma.done.wait (%p437_p5), [#allocation5], 16  }
  0x8f   : > { %515 = vsyncadd (%p437_p5), [#allocation5], 4294967280 }
  0x90 PF: > { %s15_s9 = sadd.s32 1, %s518_s9  }
  0x91   : > { %p12_p3 = scmp.ge.s32.totalorder %s15_s9, 4  }
  0x93   :  { %14 = sbr.rel (!%p12_p3) target bundleno = 2 (0x2), region = 63 }
  0x9a   :  { %383 = vsyncpa [#allocation3], 1 }
  0x9b   :  { %385 = vsyncpa [#allocation3 + $0x1], 1 }
  0x9c   :  { %386 = vsyncpa [#allocation5], 1 }

// kernel: double_conv2d_forward.6
= control target key start
LH: loop header
LB: loop body
LE: loop exit
PB: predicated region body
PF: predicated region fallthrough
CT: control target
= control target key end

     0   :  { %s422_s9 = smov 0   ;;  %s554_s0 = inlined_call_operand.vmem [shape: f32[512,32], index: 0, kind: input, shape index: {}]   ;;  %s555_s1 = inlined_call_operand.vmem [shape: f32[1,32], index: 1, kind: output, shape index: {0}]   ;;  %s556_s2 = inlined_call_operand.vmem [shape: f32[1,32], index: 2, kind: output, shape index: {1}]  }
   0x1 LB: > { %s380_s10 = sadd.s32 4294967295, %s404_s9   ;;  %p383_p0 = scmp.ge.s32.totalorder %s404_s9, 1  ;;  %s404_s9 = sphi %s422_s9, %s13_s9  }
   0x2   : > { %p106_p1 = scmp.lt.s32.totalorder %s404_s9, 3 }
   0x4   : > { %p107_p2 = pnand %p383_p0, %p106_p1 }
   0x5   : > { %s384_s11 = sshll.u32 (!%p107_p2), %s380_s10, 5  ;;  %p386_p4 = scmp.ne.s32.totalorder (!%p107_p2), %s380_s10, 0 }
   0x6   : > { %110 = sbr.rel (%p107_p2) target bundleno = 104 (0x68), region = 24  ;;  %p124_p3 = scmp.lt.s32.totalorder (!%p107_p2), %s384_s11, 63 }
   0xd   : > { %s558_s11 = smov (!%p124_p3, %s384_s11), 63  ;;  %132 = sbr.rel (%p386_p4) target bundleno = 20 (0x14), region = 28 }
   0xe   : > { %s385_s12 = sshll.u32 %s558_s11, 3  ;;  %vm133_vm0 = vcmask (!%p386_p4), 253952   ;;  %v406_v0 = vmov (!%p386_p4), 0.0  }
   0xf   : > { %s433_s15 = scalar_lea.vmem %s554_s0, %s385_s12  ;;  %134 = vst.msk [vmem:[%s555_s1] sm:$0x1] (!%p386_p4), %vm133_vm0, %v406_v0  ;;  %135 = vst.msk [vmem:[%s556_s2] sm:$0x1] (!%p386_p4), %vm133_vm0, %v406_v0 }
  0x14 PF: > { %v136_v1 = vld [vmem:[%s433_s15] sm:$0xff]  ;;  %v137_v2 = vld [vmem:[%s433_s15 + $0x8] sm:$0xff]  ;;  %v138_v3 = vld [vmem:[%s433_s15 + $0x10] sm:$0xff]  ;;  %vm169_vm1 = vcmask 261120   ;;  %vm240_vm2 = vcmask 253952  }
  0x15   : > { %v170_v4 = vsel %vm169_vm1, %v136_v1, 0.0  ;;  %v171_v5 = vsel %vm169_vm1, %v137_v2, 0.0  ;;  %v173_v6 = vsel %vm169_vm1, %v138_v3, 0.0  ;;  %v139_v7 = vld [vmem:[%s433_s15 + $0x18] sm:$0xff]  ;;  %v140_v10 = vld [vmem:[%s433_s15 + $0x20] sm:$0xff]  ;;  %v141_v13 = vld [vmem:[%s433_s15 + $0x28] sm:$0xff]  ;;  %v243_v28 = vmul.f32 %v136_v1, %v136_v1 }
  0x16   : > { %v172_v8 = vadd.f32 %v171_v5, %v170_v4  ;;  %v175_v9 = vsel %vm169_vm1, %v139_v7, 0.0  ;;  %v177_v12 = vsel %vm169_vm1, %v140_v10, 0.0  ;;  %v179_v15 = vsel %vm169_vm1, %v141_v13, 0.0  ;;  %v142_v16 = vld [vmem:[%s433_s15 + $0x30] sm:$0xff]  ;;  %v143_v19 = vld [vmem:[%s433_s15 + $0x38] sm:$0xff]  ;;  %v144_v22 = vld [vmem:[%s433_s15 + $0x40] sm:$0xff] }
  0x17   : > { %v181_v18 = vsel %vm169_vm1, %v142_v16, 0.0  ;;  %v183_v21 = vsel %vm169_vm1, %v143_v19, 0.0  ;;  %v185_v24 = vsel %vm169_vm1, %v144_v22, 0.0  ;;  %v145_v25 = vld [vmem:[%s433_s15 + $0x48] sm:$0xff]  ;;  %v244_v29 = vmul.f32 %v137_v2, %v137_v2  ;;  %v146_v31 = vld [vmem:[%s433_s15 + $0x50] sm:$0xff]  ;;  %v147_v33 = vld [vmem:[%s433_s15 + $0x58] sm:$0xff] }
  0x18   : > { %v174_v11 = vadd.f32 %v173_v6, %v172_v8  ;;  %v187_v27 = vsel %vm169_vm1, %v145_v25, 0.0  ;;  %v245_v30 = vmul.f32 %v138_v3, %v138_v3  ;;  %v189_v34 = vsel %vm169_vm1, %v146_v31, 0.0  ;;  %v148_v42 = vld [vmem:[%s433_s15 + $0x60] sm:$0xff]  ;;  %v149_v48 = vld [vmem:[%s433_s15 + $0x68] sm:$0xff]  ;;  %v150_v54 = vld [vmem:[%s433_s15 + $0x70] sm:$0xff] }
  0x19   : > { %v246_v35 = vmul.f32 %v139_v7, %v139_v7  ;;  %v191_v37 = vsel %vm169_vm1, %v147_v33, 0.0  ;;  %v247_v38 = vmul.f32 %v140_v10, %v140_v10  ;;  %v275_v39 = vsel %vm169_vm1, %v243_v28, 0.0  ;;  %v151_v60 = vld [vmem:[%s433_s15 + $0x78] sm:$0xff]  ;;  %v152_v2 = vld [vmem:[%s433_s15 + $0x80] sm:$0xff]  ;;  %v153_v8 = vld [vmem:[%s433_s15 + $0x88] sm:$0xff] }
  0x1a   : > { %v176_v14 = vadd.f32 %v175_v9, %v174_v11  ;;  %v276_v40 = vsel %vm169_vm1, %v244_v29, 0.0  ;;  %v278_v41 = vsel %vm169_vm1, %v245_v30, 0.0  ;;  %v193_v45 = vsel %vm169_vm1, %v148_v42, 0.0 }
  0x1b   : > { %v277_v44 = vadd.f32 %v276_v40, %v275_v39  ;;  %v248_v46 = vmul.f32 %v141_v13, %v141_v13  ;;  %v280_v47 = vsel %vm169_vm1, %v246_v35, 0.0  ;;  %v195_v51 = vsel %vm169_vm1, %v149_v48, 0.0 }
  0x1c   : > { %v178_v17 = vadd.f32 %v177_v12, %v176_v14  ;;  %v249_v52 = vmul.f32 %v142_v16, %v142_v16  ;;  %v282_v53 = vsel %vm169_vm1, %v247_v38, 0.0  ;;  %v197_v57 = vsel %vm169_vm1, %v150_v54, 0.0  ;;  %v154_v14 = vld [vmem:[%s433_s15 + $0x90] sm:$0xff] }
  0x1d   : > { %v279_v50 = vadd.f32 %v278_v41, %v277_v44  ;;  %v250_v58 = vmul.f32 %v143_v19, %v143_v19  ;;  %v284_v59 = vsel %vm169_vm1, %v248_v46, 0.0  ;;  %v199_v63 = vsel %vm169_vm1, %v151_v60, 0.0  ;;  %v158_v38 = vld [vmem:[%s433_s15 + $0xb0] sm:$0xff]  ;;  %v159_v44 = vld [vmem:[%s433_s15 + $0xb8] sm:$0xff] }
  0x1e   : > { %v180_v20 = vadd.f32 %v179_v15, %v178_v17  ;;  %v251_v0 = vmul.f32 %v144_v22, %v144_v22  ;;  %v286_v1 = vsel %vm169_vm1, %v249_v52, 0.0  ;;  %v201_v5 = vsel %vm169_vm1, %v152_v2, 0.0 }
  0x1f   : > { %v281_v56 = vadd.f32 %v280_v47, %v279_v50  ;;  %v252_v6 = vmul.f32 %v145_v25, %v145_v25  ;;  %v288_v7 = vsel %vm169_vm1, %v250_v58, 0.0  ;;  %v203_v11 = vsel %vm169_vm1, %v153_v8, 0.0  ;;  %v160_v50 = vld [vmem:[%s433_s15 + $0xc0] sm:$0xff] }
  0x20   : > { %v182_v23 = vadd.f32 %v181_v18, %v180_v20  ;;  %v253_v12 = vmul.f32 %v146_v31, %v146_v31  ;;  %v290_v13 = vsel %vm169_vm1, %v251_v0, 0.0  ;;  %v205_v17 = vsel %vm169_vm1, %v154_v14, 0.0  ;;  %v155_v20 = vld [vmem:[%s433_s15 + $0x98] sm:$0xff] }
  0x21   : > { %v283_v62 = vadd.f32 %v282_v53, %v281_v56  ;;  %v254_v18 = vmul.f32 %v147_v33, %v147_v33  ;;  %v292_v19 = vsel %vm169_vm1, %v252_v6, 0.0  ;;  %v256_v30 = vmul.f32 %v149_v48, %v149_v48  ;;  %v161_v56 = vld [vmem:[%s433_s15 + $0xc8] sm:$0xff] }
  0x22   : > { %v184_v26 = vadd.f32 %v183_v21, %v182_v23  ;;  %v207_v23 = vsel %vm169_vm1, %v155_v20, 0.0  ;;  %v294_v25 = vsel %vm169_vm1, %v253_v12, 0.0  ;;  %v213_v41 = vsel %vm169_vm1, %v158_v38, 0.0 }
  0x23   : > { %v285_v4 = vadd.f32 %v284_v59, %v283_v62  ;;  %v296_v31 = vsel %vm169_vm1, %v254_v18, 0.0  ;;  %v215_v47 = vsel %vm169_vm1, %v159_v44, 0.0  ;;  %v259_v48 = vmul.f32 %v152_v2, %v152_v2  ;;  %v162_v62 = vld [vmem:[%s433_s15 + $0xd0] sm:$0xff] }
  0x24   : > { %v186_v32 = vadd.f32 %v185_v24, %v184_v26  ;;  %v255_v24 = vmul.f32 %v148_v42, %v148_v42  ;;  %v156_v26 = vld [vmem:[%s433_s15 + $0xa0] sm:$0xff]  ;;  %v258_v42 = vmul.f32 %v151_v60, %v151_v60  ;;  %v217_v53 = vsel %vm169_vm1, %v160_v50, 0.0 }
  0x25   : > { %v287_v10 = vadd.f32 %v286_v1, %v285_v4  ;;  %v209_v29 = vsel %vm169_vm1, %v156_v26, 0.0  ;;  %v219_v59 = vsel %vm169_vm1, %v161_v56, 0.0  ;;  %v261_v60 = vmul.f32 %v154_v14, %v154_v14  ;;  %v163_v4 = vld [vmem:[%s433_s15 + $0xd8] sm:$0xff] }
  0x26   : > { %v188_v36 = vadd.f32 %v187_v27, %v186_v32  ;;  %v157_v32 = vld [vmem:[%s433_s15 + $0xa8] sm:$0xff]  ;;  %v221_v1 = vsel %vm169_vm1, %v162_v62, 0.0  ;;  %v262_v2 = vmul.f32 %v155_v20, %v155_v20  ;;  %v265_v20 = vmul.f32 %v158_v38, %v158_v38 }
  0x27   : > { %v289_v16 = vadd.f32 %v288_v7, %v287_v10  ;;  %v211_v35 = vsel %vm169_vm1, %v157_v32, 0.0  ;;  %v223_v7 = vsel %vm169_vm1, %v163_v4, 0.0  ;;  %v164_v10 = vld [vmem:[%s433_s15 + $0xe0] sm:$0xff]  ;;  %v264_v14 = vmul.f32 %v157_v32, %v157_v32 }
  0x28   : > { %v190_v43 = vadd.f32 %v189_v34, %v188_v36  ;;  %v257_v36 = vmul.f32 %v150_v54, %v150_v54  ;;  %v260_v54 = vmul.f32 %v153_v8, %v153_v8  ;;  %v263_v8 = vmul.f32 %v156_v26, %v156_v26 }
  0x29   : > { %v291_v22 = vadd.f32 %v290_v13, %v289_v16  ;;  %v225_v13 = vsel %vm169_vm1, %v164_v10, 0.0  ;;  %v165_v16 = vld [vmem:[%s433_s15 + $0xe8] sm:$0xff]  ;;  %v266_v26 = vmul.f32 %v159_v44, %v159_v44  ;;  %v267_v32 = vmul.f32 %v160_v50, %v160_v50 }
  0x2a   : > { %v192_v49 = vadd.f32 %v191_v37, %v190_v43  ;;  %v298_v37 = vsel %vm169_vm1, %v255_v24, 0.0  ;;  %v300_v43 = vsel %vm169_vm1, %v256_v30, 0.0  ;;  %v270_v44 = vmul.f32 %v163_v4, %v163_v4 }
  0x2b   : > { %v293_v28 = vadd.f32 %v292_v19, %v291_v22  ;;  %v227_v19 = vsel %vm169_vm1, %v165_v16, 0.0  ;;  %v166_v22 = vld [vmem:[%s433_s15 + $0xf0] sm:$0xff] }
  0x2c   : > { %v194_v55 = vadd.f32 %v193_v45, %v192_v49  ;;  %v302_v49 = vsel %vm169_vm1, %v257_v36, 0.0  ;;  %v268_v36 = vmul.f32 %v161_v56, %v161_v56  ;;  %v273_v56 = vmul.f32 %v166_v22, %v166_v22 }
  0x2d   : > { %v295_v34 = vadd.f32 %v294_v25, %v293_v28  ;;  %v229_v25 = vsel %vm169_vm1, %v166_v22, 0.0  ;;  %v167_v28 = vld [vmem:[%s433_s15 + $0xf8] sm:$0xff] }
  0x2e   : > { %v196_v61 = vadd.f32 %v195_v51, %v194_v55  ;;  %v304_v55 = vsel %vm169_vm1, %v258_v42, 0.0 }
  0x2f   : > { %v297_v40 = vadd.f32 %v296_v31, %v295_v34  ;;  %v231_v31 = vsel %vm169_vm1, %v167_v28, 0.0 }
  0x30   : > { %v198_v3 = vadd.f32 %v197_v57, %v196_v61  ;;  %v306_v61 = vsel %vm169_vm1, %v259_v48, 0.0  ;;  %v271_v48 = vmul.f32 %v164_v10, %v164_v10 }
  0x31   : > { %v299_v46 = vadd.f32 %v298_v37, %v297_v40  ;;  %v320_v37 = vsel %vm169_vm1, %v266_v26, 0.0  ;;  %v269_v40 = vmul.f32 %v162_v62, %v162_v62 }
  0x32   : > { %v200_v9 = vadd.f32 %v199_v63, %v198_v3  ;;  %v308_v3 = vsel %vm169_vm1, %v260_v54, 0.0 }
  0x33   : > { %v301_v52 = vadd.f32 %v300_v43, %v299_v46 }
  0x34   : > { %v202_v15 = vadd.f32 %v201_v5, %v200_v9  ;;  %v310_v9 = vsel %vm169_vm1, %v261_v60, 0.0  ;;  %v168_v60 = vld [vmem:[%s555_s1] sm:$0x1] }
  0x35   : > { %v303_v58 = vadd.f32 %v302_v49, %v301_v52  ;;  %v326_v49 = vsel %vm169_vm1, %v269_v40, 0.0  ;;  %v272_v52 = vmul.f32 %v165_v16, %v165_v16 }
  0x36   : > { %v204_v21 = vadd.f32 %v203_v11, %v202_v15  ;;  %v312_v15 = vsel %vm169_vm1, %v262_v2, 0.0 }
  0x37   : > { %v305_v0 = vadd.f32 %v304_v55, %v303_v58  ;;  %v332_v62 = vsel %vm169_vm1, %v272_v52, 0.0 }
  0x38   : > { %v206_v27 = vadd.f32 %v205_v17, %v204_v21  ;;  %v314_v21 = vsel %vm169_vm1, %v263_v8, 0.0 }
  0x39   : > { %v307_v6 = vadd.f32 %v306_v61, %v305_v0  ;;  %v274_v61 = vmul.f32 %v167_v28, %v167_v28 }
  0x3a   : > { %v208_v33 = vadd.f32 %v207_v23, %v206_v27  ;;  %v316_v27 = vsel %vm169_vm1, %v264_v14, 0.0 }
  0x3b   : > { %v309_v12 = vadd.f32 %v308_v3, %v307_v6  ;;  %v336_v4 = vsel %vm169_vm1, %v274_v61, 0.0 }
  0x3c   : > { %v210_v39 = vadd.f32 %v209_v29, %v208_v33  ;;  %v318_v33 = vsel %vm169_vm1, %v265_v20, 0.0 }
  0x3d   : > { %v311_v18 = vadd.f32 %v310_v9, %v309_v12  ;;  %v242_v12 = vld [vmem:[%s556_s2] sm:$0x1] }
  0x3e   : > { %v212_v45 = vadd.f32 %v211_v35, %v210_v39 }
  0x3f   : > { %v313_v24 = vadd.f32 %v312_v15, %v311_v18 }
  0x40   : > { %v214_v51 = vadd.f32 %v213_v41, %v212_v45  ;;  %v322_v41 = vsel %vm169_vm1, %v267_v32, 0.0  ;;  %v324_v45 = vsel %vm169_vm1, %v268_v36, 0.0 }
  0x41   : > { %v315_v30 = vadd.f32 %v314_v21, %v313_v24 }
  0x42   : > { %v216_v57 = vadd.f32 %v215_v47, %v214_v51 }
  0x43   : > { %v317_v35 = vadd.f32 %v316_v27, %v315_v30 }
  0x44   : > { %v218_v63 = vadd.f32 %v217_v53, %v216_v57  ;;  %v328_v53 = vsel %vm169_vm1, %v270_v44, 0.0  ;;  %v330_v57 = vsel %vm169_vm1, %v271_v48, 0.0 }
  0x45   : > { %v319_v39 = vadd.f32 %v318_v33, %v317_v35 }
  0x46   : > { %v220_v5 = vadd.f32 %v219_v59, %v218_v63 }
  0x47   : > { %v321_v43 = vadd.f32 %v320_v37, %v319_v39 }
  0x48   : > { %v222_v11 = vadd.f32 %v221_v1, %v220_v5  ;;  %v334_v1 = vsel %vm169_vm1, %v273_v56, 0.0 }
  0x49   : > { %v323_v47 = vadd.f32 %v322_v41, %v321_v43 }
  0x4a   : > { %v224_v17 = vadd.f32 %v223_v7, %v222_v11 }
  0x4b   : > { %v325_v51 = vadd.f32 %v324_v45, %v323_v47 }
  0x4c   : > { %v226_v23 = vadd.f32 %v225_v13, %v224_v17 }
  0x4d   : > { %v327_v55 = vadd.f32 %v326_v49, %v325_v51 }
  0x4e   : > { %v228_v29 = vadd.f32 %v227_v19, %v226_v23 }
  0x4f   : > { %v329_v59 = vadd.f32 %v328_v53, %v327_v55 }
  0x50   : > { %v230_v34 = vadd.f32 %v229_v25, %v228_v29 }
  0x51   : > { %v331_v0 = vadd.f32 %v330_v57, %v329_v59 }
  0x52   : > { %v232_v38 = vadd.f32 %v231_v31, %v230_v34 }
  0x53   : > { %v333_v3 = vadd.f32 %v332_v62, %v331_v0 }
  0x54   : > { %v233_v42 = vrot.slane %v232_v38, 4 }
  0x55   : > { %v335_v5 = vadd.f32 %v334_v1, %v333_v3 }
  0x56   : > { %v234_v46 = vadd.f32 %v233_v42, %v232_v38 }
  0x57   : > { %v337_v6 = vadd.f32 %v336_v4, %v335_v5 }
  0x58   : > { %v235_v50 = vrot.slane %v234_v46, 2 }
  0x59   : > { %v338_v7 = vrot.slane %v337_v6, 4 }
  0x5a   : > { %v236_v54 = vadd.f32 %v235_v50, %v234_v46 }
  0x5b   : > { %v339_v8 = vadd.f32 %v338_v7, %v337_v6 }
  0x5c   : > { %v237_v58 = vrot.slane %v236_v54, 1 }
  0x5d   : > { %v340_v9 = vrot.slane %v339_v8, 2 }
  0x5e   : > { %v238_v63 = vadd.f32 %v237_v58, %v236_v54 }
  0x5f   : > { %v341_v10 = vadd.f32 %v340_v9, %v339_v8 }
  0x60   : > { %v239_v2 = vadd.f32 %v238_v63, %v168_v60 }
  0x61   : > { %v342_v11 = vrot.slane %v341_v10, 1 }
  0x62   : > { %241 = vst.msk [vmem:[%s555_s1] sm:$0x1] %vm240_vm2, %v239_v2 }
  0x63   : > { %v343_v13 = vadd.f32 %v342_v11, %v341_v10 }
  0x65   : > { %v344_v14 = vadd.f32 %v343_v13, %v242_v12 }
  0x67   : > { %345 = vst.msk [vmem:[%s556_s2] sm:$0x1] %vm240_vm2, %v344_v14 }
  0x68 PF: > { %s13_s9 = sadd.s32 1, %s404_s9  }
  0x69   : > { %p10_p5 = scmp.ge.s32.totalorder %s13_s9, 4  }
  0x6b   :  { %12 = sbr.rel (!%p10_p5) target bundleno = 1 (0x1), region = 62 }

// kernel: double_conv2d_forward.5
= control target key start
LH: loop header
LB: loop body
LE: loop exit
PB: predicated region body
PF: predicated region fallthrough
CT: control target
= control target key end

     0   :  { %s7067_s22 = smov 0   ;;  %s7069_s23 = smov 0   ;;  %s8992_s0 = inlined_call_operand.vmem [shape: f32[2,16,16,1], index: 0, kind: input, shape index: {}]   ;;  %s8993_s1 = inlined_call_operand.<no memory space> [shape: f32[1,1], index: 1, kind: input, shape index: {}]   ;;  %s8994_s3 = inlined_call_operand.vmem [shape: bf16[9,1,32], index: 3, kind: input, shape index: {}]   ;;  %s8995_s4 = inlined_call_operand.vmem [shape: f32[1,32], index: 4, kind: input, shape index: {}]   ;;  %s8996_s5 = inlined_call_operand.vmem [shape: f32[2,16,16,32], index: 5, kind: output, shape index: {}]   ;;  %s8997_s2 = inlined_call_operand.<no memory space> [shape: f32[1,1], index: 2, kind: input, shape index: {}]  }
   0x1   :  { %v10_v0 = vstv %s8993_s1  ;;  %v12_v1 = vstv %s8997_s2  ;;  %s7071_s24 = smov 0  }
   0x2   :  { %11 = vst [vmem:[#allocation3] sm:$0x1] %v10_v0  ;;  %13 = vst [vmem:[#allocation4] sm:$0x1] %v12_v1 }
   0x3 LB: > { %s31_s1 = sadd.s32 1, %s7024_s23  ;;  %p5753_p0 = scmp.ge.s32.totalorder %s7028_s24, 1  ;;  %s7028_s24 = sphi %s7071_s24, %s19_s24   ;;  %s7024_s23 = sphi %s7069_s23, %s9084_s23   ;;  %s7020_s22 = sphi %s7067_s22, %s9083_s22  }
   0x4   : > { %p33_p1 = scmp.ge.s32.totalorder %s31_s1, 2  ;;  %p221_p2 = scmp.lt.s32.totalorder %s7028_s24, 3 }
   0x6   : > { %s9086_s1 = smov (%p33_p1, %s31_s1), 0  ;;  %p222_p3 = pnand %p5753_p0, %p221_p2 }
   0x8   : > { %225 = sbr.rel (%p222_p3) target bundleno = 681 (0x2a9), region = 40 }
   0xf   : > { %v5792_v2 = vld [vmem:[%s8994_s3 + $0x1] sm:$0x1]  ;;  %vm1516_vm0 = vcmask 1040384   ;;  %v5939_v3 = vld [vmem:[%s8994_s3 + $0x4] sm:$0x1]  ;;  %v7030_v4 = vmov 0  }
  0x10   : > { %v7093_v5 = vsel %vm1516_vm0, 65535, %v7030_v4  ;;  %vm278_vm1 = vcmask 3072   ;;  %vm281_vm2 = vcmask 0   ;;  %p258_p4 = scmp.lt.s32.totalorder %s7020_s22, 1  ;;  %vm1030_vm3 = vsmask.f32 3328 }
  0x11   : > { %v1520_v6 = vand.u32 %v5792_v2, %v7093_v5  ;;  %v7098_v7 = vand.u32 %v5939_v3, %v7093_v5  ;;  %279 = vst.msk [vmem:[#allocation2] sm:$0xf] %vm278_vm1, %v7030_v4  ;;  %280 = vst.msk [vmem:[#allocation2 + $0x4] sm:$0xf] %vm278_vm1, %v7030_v4  ;;  %v1013_v8 = vld [vmem:[%s8994_s3] sm:$0x1] }
  0x12   : > { %282 = vst.msk [vmem:[#allocation2 + $0x8] sm:$0x1] %vm281_vm2, %v7030_v4  ;;  %285 = vst.msk [vmem:[#allocation2 + $0x14] sm:$0x1] %vm281_vm2, %v7030_v4  ;;  %s9088_s22 = smov (!%p258_p4, %s7020_s22), 1  ;;  %v7168_v10 = vand.u32 %v7093_v5, %v1013_v8  ;;  %vm1467_vm8 = vcmask 7168  }
  0x13   : > { %9014 = vst [vmem:[#allocation5_spill] sm:$0xff] %v7098_v7  ;;  %283 = vst.msk [vmem:[#allocation2 + $0xc] sm:$0xf] %vm278_vm1, %v7030_v4  ;;  %6326 = vmatprep.subr.bf16.mxu1 %v1520_v6  ;;  %6462 = vmatprep.subr.bf16.mxu0 %v7098_v7  ;;  %s6139_s30 = sshll.u32 %s9088_s22, 8  ;;  %v7165_v9 = vld [vmem:[#allocation3] ss:$0 sm:$0xff] }
  0x14   : > { %284 = vst.msk [vmem:[#allocation2 + $0x10] sm:$0xf] %vm278_vm1, %v7030_v4  ;;  %286 = vst.msk [vmem:[#allocation2 + $0x18] sm:$0xf] %vm278_vm1, %v7030_v4  ;;  %6327 = vmatpush3.bf16.msra.mxu1 %v1520_v6  ;;  %6463 = vmatpush3.bf16.msra.mxu0 %v7098_v7  ;;  %v5988_v11 = vld [vmem:[%s8994_s3 + $0x5] sm:$0x1]  ;;  %s7178_s10 = scalar_lea.vmem %s8992_s0, %s6139_s30  ;;  %s8882_s27 = scalar_lea.vmem %s8996_s5, %s6139_s30 }
  0x15   : > { %287 = vst.msk [vmem:[#allocation2 + $0x1c] sm:$0xf] %vm278_vm1, %v7030_v4  ;;  %289 = vst.msk [vmem:[#allocation2 + $0x24] sm:$0xf] %vm278_vm1, %v7030_v4  ;;  %vm1031_vm4 = vsmask.f32 7440  ;;  %v7183_v13 = vand.u32 %v5988_v11, %v7093_v5  ;;  %6360 = vmatprep.subr.bf16.mxu1 %v7168_v10 }
  0x16   : > { %288 = vst.msk [vmem:[#allocation2 + $0x20] sm:$0x1] %vm281_vm2, %v7030_v4  ;;  %291 = vst.msk [vmem:[#allocation2 + $0x2c] sm:$0x1] %vm281_vm2, %v7030_v4  ;;  %v7180_v12 = vld [vmem:[#allocation4] ss:$0 sm:$0xff] }
  0x17   : > { %290 = vst.msk [vmem:[#allocation2 + $0x28] sm:$0xf] %vm278_vm1, %v7030_v4  ;;  %292 = vst.msk [vmem:[#allocation2 + $0x30] sm:$0xf] %vm278_vm1, %v7030_v4  ;;  %vm540_vm5 = vsmask.f32 256  ;;  %6496 = vmatprep.subr.bf16.mxu0 %v7183_v13 }
  0x18   : > { %293 = vst.msk [vmem:[#allocation2 + $0x34] sm:$0xf] %vm278_vm1, %v7030_v4  ;;  %295 = vst.msk [vmem:[#allocation2 + $0x3c] sm:$0xf] %vm278_vm1, %v7030_v4  ;;  %v334_v14 = vld [vmem:[%s7178_s10] sm:$0xff]  ;;  %v335_v15 = vld [vmem:[%s7178_s10 + $0x8] sm:$0xff] }
  0x19   : > { %294 = vst.msk [vmem:[#allocation2 + $0x38] sm:$0x1] %vm281_vm2, %v7030_v4  ;;  %297 = vst.msk [vmem:[#allocation2 + $0x44] sm:$0x1] %vm281_vm2, %v7030_v4  ;;  %vm541_vm6 = vsmask.f32 4368  ;;  %v373_v17 = vmul.f32 %v7165_v9, %v334_v14  ;;  %v374_v18 = vmul.f32 %v7165_v9, %v335_v15 }
  0x1a   : > { %296 = vst.msk [vmem:[#allocation2 + $0x40] sm:$0xf] %vm278_vm1, %v7030_v4  ;;  %298 = vst.msk [vmem:[#allocation2 + $0x48] sm:$0xf] %vm278_vm1, %v7030_v4  ;;  %v336_v16 = vld [vmem:[%s7178_s10 + $0x10] sm:$0xff]  ;;  %v337_v19 = vld [vmem:[%s7178_s10 + $0x18] sm:$0xff] }
  0x1b   : > { %299 = vst.msk [vmem:[#allocation2 + $0x4c] sm:$0xf] %vm278_vm1, %v7030_v4  ;;  %301 = vst.msk [vmem:[#allocation2 + $0x54] sm:$0xf] %vm278_vm1, %v7030_v4  ;;  %vm865_vm7 = vsmask.f32 7938  ;;  %v375_v25 = vmul.f32 %v7165_v9, %v336_v16  ;;  %v376_v26 = vmul.f32 %v7165_v9, %v337_v19  ;;  %v412_v33 = vadd.f32 %v7180_v12, %v373_v17 }
  0x1c   : > { %300 = vst.msk [vmem:[#allocation2 + $0x50] sm:$0x1] %vm281_vm2, %v7030_v4  ;;  %303 = vst.msk [vmem:[#allocation2 + $0x5c] sm:$0x1] %vm281_vm2, %v7030_v4  ;;  %v338_v20 = vld [vmem:[%s7178_s10 + $0x20] sm:$0xff]  ;;  %v339_v21 = vld [vmem:[%s7178_s10 + $0x28] sm:$0xff]  ;;  %v413_v34 = vadd.f32 %v7180_v12, %v374_v18 }
  0x1d   : > { %302 = vst.msk [vmem:[#allocation2 + $0x58] sm:$0xf] %vm278_vm1, %v7030_v4  ;;  %304 = vst.msk [vmem:[#allocation2 + $0x60] sm:$0xf] %vm278_vm1, %v7030_v4  ;;  %v981_v22 = vld [vmem:[#allocation2] sm:$0xf]  ;;  %v377_v27 = vmul.f32 %v7165_v9, %v338_v20  ;;  %v378_v35 = vmul.f32 %v7165_v9, %v339_v21  ;;  %v6141_v41 = vpack.c.bf16 %v412_v33, %v412_v33 }
  0x1e   : > { %305 = vst.msk [vmem:[#allocation2 + $0x64] sm:$0xf] %vm278_vm1, %v7030_v4  ;;  %307 = vst.msk [vmem:[#allocation2 + $0x6c] sm:$0xf] %vm278_vm1, %v7030_v4  ;;  %v982_v23 = vld [vmem:[#allocation2 + $0x4] sm:$0xf]  ;;  %v6142_v42 = vpack.c.bf16 %v413_v34, %v413_v34  ;;  %v414_v43 = vadd.f32 %v7180_v12, %v375_v25  ;;  %v415_v46 = vadd.f32 %v7180_v12, %v376_v26 }
  0x1f   : > { %306 = vst.msk [vmem:[#allocation2 + $0x68] sm:$0x1] %vm281_vm2, %v7030_v4  ;;  %309 = vst.msk [vmem:[#allocation2 + $0x74] sm:$0x1] %vm281_vm2, %v7030_v4  ;;  %v1014_v24 = vld [vmem:[#allocation2 + $0x8] sm:$0x1]  ;;  %v416_v47 = vadd.f32 %v7180_v12, %v377_v27  ;;  %v417_v60 = vadd.f32 %v7180_v12, %v378_v35 }
  0x20   : > { %308 = vst.msk [vmem:[#allocation2 + $0x70] sm:$0xf] %vm278_vm1, %v7030_v4  ;;  %310 = vst.msk [vmem:[#allocation2 + $0x78] sm:$0xf] %vm278_vm1, %v7030_v4  ;;  %v1034_v28 = vshrl.u32 %v981_v22, 16  ;;  %v1037_v29 = vshll.u32 %v981_v22, 16  ;;  %v6143_v55 = vpack.c.bf16 %v414_v43, %v414_v43  ;;  %v6144_v56 = vpack.c.bf16 %v415_v46, %v415_v46 }
  0x21   : > { %311 = vst.msk [vmem:[#allocation2 + $0x7c] sm:$0xf] %vm278_vm1, %v7030_v4  ;;  %313 = vst.msk [vmem:[#allocation2 + $0x84] sm:$0xf] %vm278_vm1, %v7030_v4  ;;  %v1043_v30 = vshll.u32 %v982_v23, 16  ;;  %v1047_v31 = vshrl.u32 %v982_v23, 16  ;;  %v6145_v61 = vpack.c.bf16 %v416_v47, %v416_v47  ;;  %v6146_v23 = vpack.c.bf16 %v417_v60, %v417_v60 }
  0x22   : > { %312 = vst.msk [vmem:[#allocation2 + $0x80] sm:$0x1] %vm281_vm2, %v7030_v4  ;;  %315 = vst.msk [vmem:[#allocation2 + $0x8c] sm:$0x1] %vm281_vm2, %v7030_v4  ;;  %v1053_v32 = vshll.u32 %v1014_v24, 16  ;;  %v1036_v36 = vrot.slane %v1034_v28, 4 }
  0x23   : > { %314 = vst.msk [vmem:[#allocation2 + $0x88] sm:$0xf] %vm278_vm1, %v7030_v4  ;;  %316 = vst.msk [vmem:[#allocation2 + $0x90] sm:$0xf] %vm278_vm1, %v7030_v4  ;;  %v1039_v37 = vrot.slane %v1037_v29, 5  ;;  %v1045_v38 = vrot.slane %v1043_v30, 5 }
  0x24   : > { %317 = vst.msk [vmem:[#allocation2 + $0x94] sm:$0xf] %vm278_vm1, %v7030_v4  ;;  %319 = vst.msk [vmem:[#allocation2 + $0x9c] sm:$0xf] %vm278_vm1, %v7030_v4  ;;  %v1049_v39 = vrot.slane %v1047_v31, 4  ;;  %v1055_v40 = vrot.slane %v1053_v32, 5 }
  0x25   : > { %318 = vst.msk [vmem:[#allocation2 + $0x98] sm:$0x1] %vm281_vm2, %v7030_v4  ;;  %321 = vst.msk [vmem:[#allocation2 + $0xa4] sm:$0x1] %vm281_vm2, %v7030_v4  ;;  %v1040_v44 = vor.u32 %v1039_v37, %v1036_v36  ;;  %v544_v49 = vshrl.u32 %v6141_v41, 16  ;;  %v547_v50 = vshll.u32 %v6141_v41, 16 }
  0x26   : > { %320 = vst.msk [vmem:[#allocation2 + $0xa0] sm:$0xf] %vm278_vm1, %v7030_v4  ;;  %322 = vst.msk [vmem:[#allocation2 + $0xa8] sm:$0xf] %vm278_vm1, %v7030_v4  ;;  %v1050_v45 = vor.u32 %v1049_v39, %v1045_v38  ;;  %v552_v51 = vshrl.u32 %v6142_v42, 16  ;;  %v555_v52 = vshll.u32 %v6142_v42, 16 }
  0x27   : > { %323 = vst.msk [vmem:[#allocation2 + $0xac] sm:$0xf] %vm278_vm1, %v7030_v4  ;;  %325 = vst.msk [vmem:[#allocation2 + $0xb4] sm:$0xf] %vm278_vm1, %v7030_v4  ;;  %v1041_v53 = vrot.slane %v1040_v44, 4  ;;  %v546_v58 = vrot.slane %v544_v49, 7 }
  0x28   : > { %324 = vst.msk [vmem:[#allocation2 + $0xb0] sm:$0x1] %vm281_vm2, %v7030_v4  ;;  %327 = vst.msk [vmem:[#allocation2 + $0xbc] sm:$0x1] %vm281_vm2, %v7030_v4  ;;  %v1051_v54 = vrot.slane %v1050_v45, 4  ;;  %v554_v59 = vrot.slane %v552_v51, 7 }
  0x29   : > { %326 = vst.msk [vmem:[#allocation2 + $0xb8] sm:$0xf] %vm278_vm1, %v7030_v4  ;;  %328 = vst.msk [vmem:[#allocation2 + $0xc0] sm:$0xf] %vm278_vm1, %v7030_v4  ;;  %v867_v1 = vld [vmem:[#allocation2 + $0xc] sm:$0xf]  ;;  %v549_v6 = vor.u32 %v547_v50, %v546_v58 }
  0x2a   : > { %329 = vst.msk [vmem:[#allocation2 + $0xc4] sm:$0xf] %vm278_vm1, %v7030_v4  ;;  %331 = vst.msk [vmem:[#allocation2 + $0xcc] sm:$0xf] %vm278_vm1, %v7030_v4  ;;  %v561_v2 = vshrl.u32 %v6143_v55, 16  ;;  %v564_v3 = vshll.u32 %v6143_v55, 16  ;;  %v557_v11 = vor.u32 %v555_v52, %v554_v59 }
  0x2b   : > { %330 = vst.msk [vmem:[#allocation2 + $0xc8] sm:$0x1] %vm281_vm2, %v7030_v4  ;;  %333 = vst.msk [vmem:[#allocation2 + $0xd4] sm:$0x1] %vm281_vm2, %v7030_v4  ;;  %v550_v8 = vrot.slane %v546_v58, 4  ;;  %v559_v16 = vrot.slane %v554_v59, 4 }
  0x2c   : > { %332 = vst.msk [vmem:[#allocation2 + $0xd0] sm:$0xf] %vm278_vm1, %v7030_v4  ;;  %vm7206_vm9 = vmor %vm1030_vm3, %vm1031_vm4  ;;  %v873_v15 = vld [vmem:[#allocation2 + $0x14] sm:$0x1]  ;;  %v563_v17 = vrot.slane %v561_v2, 7  ;;  %v569_v18 = vshrl.u32 %v6144_v56, 16 }
  0x2d   : > { %vm7212_vm10 = vmor %vm540_vm5, %vm541_vm6  ;;  %v1046_v62 = vsel %vm7206_vm9, %v1041_v53, %v1045_v38  ;;  %v1056_v63 = vsel %vm7206_vm9, %v1051_v54, %v1055_v40  ;;  %v572_v19 = vshll.u32 %v6144_v56, 16  ;;  %v876_v22 = vld [vmem:[#allocation2 + $0x18] sm:$0xf]  ;;  %v578_v24 = vshrl.u32 %v6145_v61, 16  ;;  %v340_v25 = vld [vmem:[%s7178_s10 + $0x30] sm:$0xff] }
  0x2e   : > { %vm7223_vm11 = vmand %vm278_vm1, %vm865_vm7  ;;  %v5793_v4 = vcombine.low %v1046_v62, %v1056_v63  ;;  %v558_v20 = vsel %vm7212_vm10, %v550_v8, %v557_v11  ;;  %v566_v27 = vor.u32 %v564_v3, %v563_v17  ;;  %v567_v28 = vrot.slane %v563_v17, 4  ;;  %v880_v30 = vld [vmem:[#allocation2 + $0x20] sm:$0x1]  ;;  %v341_v31 = vld [vmem:[%s7178_s10 + $0x38] sm:$0xff] }
  0x2f   : > { %vm7229_vm12 = vmand %vm281_vm2, %vm540_vm5  ;;  %v868_v21 = vsel %vm7223_vm11, %v549_v6, %v867_v1  ;;  %870 = vst.msk [vmem:[#allocation2 + $0x10] sm:$0xf] %vm278_vm1, %v558_v20  ;;  %v571_v29 = vrot.slane %v569_v18, 7  ;;  %v580_v32 = vrot.slane %v578_v24, 7  ;;  %v581_v33 = vshll.u32 %v6145_v61, 16  ;;  %v342_v36 = vld [vmem:[%s7178_s10 + $0x40] sm:$0xff] }
  0x30   : > { %6328 = vmatprep.mubr.msk.bf16.mxu1 %vm1467_vm8, %v5793_v4  ;;  %869 = vst [vmem:[#allocation2 + $0xc] sm:$0xf] %v868_v21  ;;  %v874_v26 = vsel %vm7229_vm12, %v559_v16, %v873_v15  ;;  %v586_v34 = vshrl.u32 %v6146_v23, 16  ;;  %v589_v35 = vshll.u32 %v6146_v23, 16  ;;  %v877_v39 = vsel %vm7223_vm11, %v566_v27, %v876_v22  ;;  %v883_v40 = vld [vmem:[#allocation2 + $0x24] sm:$0xf] }
  0x31   : > { %875 = vst [vmem:[#allocation2 + $0x14] sm:$0x1] %v874_v26  ;;  %v574_v37 = vor.u32 %v572_v19, %v571_v29  ;;  %v576_v38 = vrot.slane %v571_v29, 4  ;;  %v379_v41 = vmul.f32 %v7165_v9, %v340_v25  ;;  %878 = vst [vmem:[#allocation2 + $0x18] sm:$0xf] %v877_v39  ;;  %v583_v42 = vor.u32 %v581_v33, %v580_v32  ;;  %v343_v46 = vld [vmem:[%s7178_s10 + $0x48] sm:$0xff] }
  0x32   : > { %v584_v43 = vrot.slane %v580_v32, 4  ;;  %v588_v44 = vrot.slane %v586_v34, 7  ;;  %v380_v45 = vmul.f32 %v7165_v9, %v341_v31  ;;  %v887_v50 = vld [vmem:[#allocation2 + $0x2c] sm:$0x1]  ;;  %v381_v52 = vmul.f32 %v7165_v9, %v342_v36  ;;  %v344_v53 = vld [vmem:[%s7178_s10 + $0x50] sm:$0xff]  ;;  %v345_v61 = vld [vmem:[%s7178_s10 + $0x58] sm:$0xff] }
  0x33   : > { %v575_v47 = vsel %vm7212_vm10, %v567_v28, %v574_v37  ;;  %v881_v49 = vsel %vm7229_vm12, %v576_v38, %v880_v30  ;;  %v418_v51 = vadd.f32 %v7180_v12, %v379_v41  ;;  %v884_v56 = vsel %vm7223_vm11, %v583_v42, %v883_v40 }
  0x34   : > { %879 = vst.msk [vmem:[#allocation2 + $0x1c] sm:$0xf] %vm278_vm1, %v575_v47  ;;  %882 = vst [vmem:[#allocation2 + $0x20] sm:$0x1] %v881_v49  ;;  %v591_v54 = vor.u32 %v589_v35, %v588_v44  ;;  %v593_v55 = vrot.slane %v588_v44, 4  ;;  %v419_v58 = vadd.f32 %v7180_v12, %v380_v45  ;;  %v7263_v60 = vmul.f32 %v7165_v9, %v343_v46 }
  0x35   : > { %885 = vst [vmem:[#allocation2 + $0x24] sm:$0xf] %v884_v56  ;;  %v7260_v59 = vpack.c.bf16 %v418_v51, %v418_v51  ;;  %v7271_v4 = vadd.f32 %v7180_v12, %v381_v52  ;;  %v7274_v6 = vmul.f32 %v7165_v9, %v344_v53  ;;  %v7282_v22 = vmul.f32 %v7165_v9, %v345_v61 }
  0x36   : > { %v984_v63 = vld [vmem:[#allocation2 + $0x10] sm:$0xf]  ;;  %v592_v2 = vsel %vm7212_vm10, %v584_v43, %v591_v54  ;;  %v888_v3 = vsel %vm7229_vm12, %v593_v55, %v887_v50  ;;  %v7279_v21 = vpack.c.bf16 %v419_v58, %v419_v58  ;;  %vm2023_vm13 = vcmask 1042432  }
  0x37   : > { %v983_v62 = vld [vmem:[#allocation2 + $0xc] sm:$0xf]  ;;  %v1067_v16 = vshll.u32 %v984_v63, 16  ;;  %v1071_v17 = vshrl.u32 %v984_v63, 16  ;;  %886 = vst.msk [vmem:[#allocation2 + $0x28] sm:$0xf] %vm278_vm1, %v592_v2 }
  0x38   : > { %v2790_v1 = vld [vmem:[#allocation2 + $0xc] sm:$0xf]  ;;  %v1015_v8 = vld [vmem:[#allocation2 + $0x14] sm:$0x1]  ;;  %v1058_v11 = vshrl.u32 %v983_v62, 16  ;;  %v1061_v15 = vshll.u32 %v983_v62, 16 }
  0x39   : > { %889 = vst [vmem:[#allocation2 + $0x2c] sm:$0x1] %v888_v3  ;;  %v1077_v18 = vshll.u32 %v1015_v8, 16  ;;  %v7277_v19 = vld [vmem:[#allocation2 + $0x10] sm:$0xf]  ;;  %v2839_v20 = vshrl.u32 %v2790_v1, 16 }
  0x3a   : > { %v1060_v23 = vrot.slane %v1058_v11, 4  ;;  %v1063_v24 = vrot.slane %v1061_v15, 5  ;;  %v1069_v25 = vrot.slane %v1067_v16, 5  ;;  %v1073_v26 = vrot.slane %v1071_v17, 4  ;;  %v7284_v27 = vld [vmem:[#allocation2 + $0x14] sm:$0x1] }
  0x3b   : > { %v1079_v28 = vrot.slane %v1077_v18, 5  ;;  %v2841_v29 = vrot.slane %v2839_v20, 4  ;;  %v2842_v30 = vshll.u32 %v2790_v1, 16  ;;  %v2848_v31 = vshll.u32 %v7277_v19, 16  ;;  %v2793_v36 = vld [vmem:[#allocation2 + $0x18] sm:$0xf] }
  0x3c   : > { %v1064_v32 = vor.u32 %v1063_v24, %v1060_v23  ;;  %v1074_v33 = vor.u32 %v1073_v26, %v1069_v25  ;;  %v2852_v34 = vshrl.u32 %v7277_v19, 16  ;;  %v2858_v35 = vshll.u32 %v7284_v27, 16  ;;  %v7289_v37 = vld [vmem:[#allocation2 + $0x1c] sm:$0xf]  ;;  %v7293_v47 = vld [vmem:[#allocation2 + $0x20] sm:$0x1] }
  0x3d   : > { %v2844_v38 = vrot.slane %v2842_v30, 5  ;;  %v2850_v39 = vrot.slane %v2848_v31, 5  ;;  %v3582_v40 = vrot.slane %v7277_v19, 5  ;;  %v3585_v41 = vrot.slane %v7284_v27, 5  ;;  %v985_v63 = vld [vmem:[#allocation2 + $0x18] sm:$0xf] }
  0x3e   : > { %v1065_v42 = vrot.slane %v1064_v32, 4  ;;  %v1075_v43 = vrot.slane %v1074_v33, 4  ;;  %v2854_v44 = vrot.slane %v2852_v34, 4  ;;  %v2860_v45 = vrot.slane %v2858_v35, 5  ;;  %v986_v18 = vld [vmem:[#allocation2 + $0x1c] sm:$0xf] }
  0x3f   : > { %v2845_v46 = vor.u32 %v2844_v38, %v2841_v29  ;;  %v2863_v49 = vshrl.u32 %v2793_v36, 16  ;;  %v2866_v50 = vshll.u32 %v2793_v36, 16  ;;  %v2872_v51 = vshll.u32 %v7289_v37, 16  ;;  %v988_v38 = vld [vmem:[#allocation2 + $0x28] sm:$0xf] }
  0x40   : > { %v1070_v52 = vsel %vm7206_vm9, %v1065_v42, %v1069_v25  ;;  %v1080_v53 = vsel %vm7206_vm9, %v1075_v43, %v1079_v28  ;;  %v2855_v54 = vor.u32 %v2854_v44, %v2850_v39  ;;  %v2876_v55 = vshrl.u32 %v7289_v37, 16  ;;  %v1016_v25 = vld [vmem:[#allocation2 + $0x20] sm:$0x1]  ;;  %v987_v28 = vld [vmem:[#allocation2 + $0x24] sm:$0xf] }
  0x41   : > { %v5794_v56 = vcombine.low %v1070_v52, %v1080_v53  ;;  %v2846_v58 = vrot.slane %v2845_v46, 4  ;;  %v2865_v61 = vrot.slane %v2863_v49, 4  ;;  %v2868_v62 = vrot.slane %v2866_v50, 5  ;;  %v1017_v43 = vld [vmem:[#allocation2 + $0x2c] sm:$0x1] }
  0x42   : > { %v2856_v1 = vrot.slane %v2855_v54, 4  ;;  %v2874_v2 = vrot.slane %v2872_v51, 5  ;;  %v2878_v3 = vrot.slane %v2876_v55, 4  ;;  %v2882_v8 = vshll.u32 %v7293_v47, 16  ;;  %v2796_v51 = vld [vmem:[#allocation2 + $0x24] sm:$0xf] }
  0x43   : > { %6329 = vmatmul.mubr.msk.bf16.vlgmr.msra.gmra.mrb[0].mxu1 %vm1467_vm8, %v5794_v56  ;;  %v2851_v11 = vsel %vm7206_vm9, %v2846_v58, %v2850_v39  ;;  %v2869_v15 = vor.u32 %v2868_v62, %v2865_v61  ;;  %v3589_v16 = vrot.slane %v7289_v37, 5  ;;  %v3592_v17 = vrot.slane %v7293_v47, 5  ;;  %v7319_v56 = vld [vmem:[#allocation2 + $0x28] sm:$0xf] }
  0x44   : > { %v2861_v20 = vsel %vm7206_vm9, %v2856_v1, %v2860_v45  ;;  %6361 = vmatpush3.bf16.msra.mxu1 %v7168_v10  ;;  %v2879_v23 = vor.u32 %v2878_v3, %v2874_v2  ;;  %v2884_v24 = vrot.slane %v2882_v8, 5  ;;  %v1082_v26 = vshrl.u32 %v985_v63, 16  ;;  %v7321_v1 = vld [vmem:[#allocation2 + $0x2c] sm:$0x1] }
  0x45   : > { %v5940_v29 = vcombine.low %v2851_v11, %v2861_v20  ;;  %v2870_v30 = vrot.slane %v2869_v15, 4  ;;  %v7312_v31 = vrot.slane %v3589_v16, 4  ;;  %v1085_v32 = vshll.u32 %v985_v63, 16 }
  0x46   : > { %v2880_v33 = vrot.slane %v2879_v23, 4  ;;  %v1084_v34 = vrot.slane %v1082_v26, 4  ;;  %v1091_v35 = vshll.u32 %v986_v18, 16  ;;  %v1095_v36 = vshrl.u32 %v986_v18, 16 }
  0x47   : > { %6464 = vmatprep.mubr.msk.bf16.mxu0 %vm1467_vm8, %v5940_v29  ;;  %v2875_v10 = vsel %vm7206_vm9, %v2870_v30, %v2874_v2  ;;  %v1087_v39 = vrot.slane %v1085_v32, 5  ;;  %v1101_v42 = vshll.u32 %v1016_v25, 16  ;;  %v1106_v44 = vshrl.u32 %v987_v28, 16 }
  0x48   : > { %v2885_v45 = vsel %vm7206_vm9, %v2880_v33, %v2884_v24  ;;  %v1093_v46 = vrot.slane %v1091_v35, 5  ;;  %v1097_v49 = vrot.slane %v1095_v36, 4  ;;  %v1109_v50 = vshll.u32 %v987_v28, 16 }
  0x49   : > { %v5941_v52 = vcombine.low %v2875_v10, %v2885_v45  ;;  %v1088_v53 = vor.u32 %v1087_v39, %v1084_v34  ;;  %v1103_v54 = vrot.slane %v1101_v42, 5  ;;  %v1108_v55 = vrot.slane %v1106_v44, 4 }
  0x4a   : > { %v1098_v58 = vor.u32 %v1097_v49, %v1093_v46  ;;  %v1111_v61 = vrot.slane %v1109_v50, 5  ;;  %v1115_v62 = vshll.u32 %v988_v38, 16  ;;  %v1119_v63 = vshrl.u32 %v988_v38, 16 }
  0x4b   : > { %6465 = vmatmul.mubr.msk.bf16.vlgmr.msra.gmra.mrb[0].mxu0 %vm1467_vm8, %v5941_v52  ;;  %v1089_v2 = vrot.slane %v1088_v53, 4  ;;  %v1125_v3 = vshll.u32 %v1017_v43, 16  ;;  %v2887_v8 = vshrl.u32 %v2796_v51, 16  ;;  %v2890_v11 = vshll.u32 %v2796_v51, 16 }
  0x4c   : > { %6497 = vmatpush3.bf16.msra.mxu0 %v7183_v13  ;;  %v1099_v15 = vrot.slane %v1098_v58, 4  ;;  %v1112_v18 = vor.u32 %v1111_v61, %v1108_v55  ;;  %v1117_v20 = vrot.slane %v1115_v62, 5  ;;  %v1121_v23 = vrot.slane %v1119_v63, 4  ;;  %v890_v58 = vld [vmem:[#allocation2 + $0x30] sm:$0xf] }
  0x4d   : > { %v1094_v24 = vsel %vm7206_vm9, %v1089_v2, %v1093_v46  ;;  %v1127_v25 = vrot.slane %v1125_v3, 5  ;;  %v2889_v26 = vrot.slane %v2887_v8, 4  ;;  %v2892_v28 = vrot.slane %v2890_v11, 5  ;;  %v894_v3 = vld [vmem:[#allocation2 + $0x38] sm:$0x1] }
  0x4e   : > { %v1104_v29 = vsel %vm7206_vm9, %v1099_v15, %v1103_v54  ;;  %v1113_v30 = vrot.slane %v1112_v18, 4  ;;  %v1122_v32 = vor.u32 %v1121_v23, %v1117_v20  ;;  %v2896_v33 = vshll.u32 %v7319_v56, 16 }
  0x4f   : > { %v5795_v34 = vcombine.low %v1094_v24, %v1104_v29  ;;  %v2893_v35 = vor.u32 %v2892_v28, %v2889_v26  ;;  %v2900_v13 = vshrl.u32 %v7319_v56, 16  ;;  %v2906_v36 = vshll.u32 %v7321_v1, 16  ;;  %v347_v29 = vld [vmem:[%s7178_s10 + $0x68] sm:$0xff] }
  0x50   : > { %v1118_v38 = vsel %vm7206_vm9, %v1113_v30, %v1117_v20  ;;  %v1123_v10 = vrot.slane %v1122_v32, 4  ;;  %v2898_v39 = vrot.slane %v2896_v33, 5  ;;  %v595_v42 = vshrl.u32 %v7260_v59, 16  ;;  %v348_v30 = vld [vmem:[%s7178_s10 + $0x70] sm:$0xff] }
  0x51   : > { %6332 = vmatprep.mubr.msk.bf16.mxu1 %vm1467_vm8, %v5795_v34  ;;  %v2894_v43 = vrot.slane %v2893_v35, 4  ;;  %v2902_v44 = vrot.slane %v2900_v13, 4  ;;  %v2908_v45 = vrot.slane %v2906_v36, 5  ;;  %v598_v46 = vshll.u32 %v7260_v59, 16  ;;  %v897_v35 = vld [vmem:[#allocation2 + $0x3c] sm:$0xf] }
  0x52   : > { %v1128_v49 = vsel %vm7206_vm9, %v1123_v10, %v1127_v25  ;;  %v597_v50 = vrot.slane %v595_v42, 7  ;;  %v603_v51 = vshrl.u32 %v7279_v21, 16  ;;  %v606_v52 = vshll.u32 %v7279_v21, 16  ;;  %v901_v42 = vld [vmem:[#allocation2 + $0x44] sm:$0x1] }
  0x53   : > { %v5796_v53 = vcombine.low %v1118_v38, %v1128_v49  ;;  %v2899_v54 = vsel %vm7206_vm9, %v2894_v43, %v2898_v39  ;;  %v2903_v55 = vor.u32 %v2902_v44, %v2898_v39  ;;  %v421_v61 = vadd.f32 %v7180_v12, %v7263_v60 }
  0x54   : > { %v600_v62 = vor.u32 %v598_v46, %v597_v50  ;;  %v601_v59 = vrot.slane %v597_v50, 4  ;;  %v605_v63 = vrot.slane %v603_v51, 7  ;;  %v6149_v2 = vpack.c.bf16 %v7271_v4, %v7271_v4  ;;  %v346_v4 = vld [vmem:[%s7178_s10 + $0x60] sm:$0xff]  ;;  %v349_v51 = vld [vmem:[%s7178_s10 + $0x78] sm:$0xff] }
  0x55   : > { %6333 = vmatmul.mubr.msk.bf16.gmra.mrb[4].mxu1 %vm1467_vm8, %v5796_v53  ;;  %v2904_v21 = vrot.slane %v2903_v55, 4  ;;  %v6150_v8 = vpack.c.bf16 %v421_v61, %v421_v61  ;;  %v422_v11 = vadd.f32 %v7180_v12, %v7274_v6  ;;  %v423_v15 = vadd.f32 %v7180_v12, %v7282_v22 }
  0x56   : > { %v608_v60 = vor.u32 %v606_v52, %v605_v63  ;;  %v610_v18 = vrot.slane %v605_v63, 4  ;;  %v891_v20 = vsel %vm7223_vm11, %v600_v62, %v890_v58  ;;  %v612_v23 = vshrl.u32 %v6149_v2, 16 }
  0x57   : > { %v2909_v24 = vsel %vm7206_vm9, %v2904_v21, %v2908_v45  ;;  %892 = vst [vmem:[#allocation2 + $0x30] sm:$0xf] %v891_v20  ;;  %v615_v25 = vshll.u32 %v6149_v2, 16  ;;  %v620_v26 = vshrl.u32 %v6150_v8, 16  ;;  %v623_v28 = vshll.u32 %v6150_v8, 16 }
  0x58   : > { %v5942_v6 = vcombine.low %v2899_v54, %v2909_v24  ;;  %v609_v22 = vsel %vm7212_vm10, %v601_v59, %v608_v60  ;;  %v895_v32 = vsel %vm7229_vm12, %v610_v18, %v894_v3  ;;  %v614_v33 = vrot.slane %v612_v23, 7 }
  0x59   : > { %893 = vst.msk [vmem:[#allocation2 + $0x34] sm:$0xf] %vm278_vm1, %v609_v22  ;;  %896 = vst [vmem:[#allocation2 + $0x38] sm:$0x1] %v895_v32  ;;  %v622_v34 = vrot.slane %v620_v26, 7  ;;  %v6151_v13 = vpack.c.bf16 %v422_v11, %v422_v11  ;;  %v6152_v36 = vpack.c.bf16 %v423_v15, %v423_v15  ;;  %v385_v38 = vmul.f32 %v7165_v9, %v346_v4 }
  0x5a   : > { %6468 = vmatprep.mubr.msk.bf16.mxu0 %vm1467_vm8, %v5942_v6  ;;  %v617_v10 = vor.u32 %v615_v25, %v614_v33  ;;  %v618_v39 = vrot.slane %v614_v33, 4  ;;  %v386_v43 = vmul.f32 %v7165_v9, %v347_v29  ;;  %v387_v44 = vmul.f32 %v7165_v9, %v348_v30 }
  0x5b   : > { %v625_v45 = vor.u32 %v623_v28, %v622_v34  ;;  %v627_v46 = vrot.slane %v622_v34, 4  ;;  %v629_v49 = vshrl.u32 %v6151_v13, 16  ;;  %v632_v50 = vshll.u32 %v6151_v13, 16  ;;  %v904_v28 = vld [vmem:[#allocation2 + $0x48] sm:$0xf] }
  0x5c   : > { %v898_v52 = vsel %vm7223_vm11, %v617_v10, %v897_v35  ;;  %v637_v53 = vshrl.u32 %v6152_v36, 16  ;;  %v640_v54 = vshll.u32 %v6152_v36, 16  ;;  %v424_v55 = vadd.f32 %v7180_v12, %v385_v38 }
  0x5d   : > { %v626_v58 = vsel %vm7212_vm10, %v618_v39, %v625_v45  ;;  %899 = vst [vmem:[#allocation2 + $0x3c] sm:$0xf] %v898_v52  ;;  %v902_v61 = vsel %vm7229_vm12, %v627_v46, %v901_v42  ;;  %v7376_v62 = vrot.slane %v629_v49, 7  ;;  %v425_v59 = vadd.f32 %v7180_v12, %v386_v43 }
  0x5e   : > { %v2799_v63 = vld [vmem:[#allocation2 + $0x30] sm:$0xf]  ;;  %900 = vst.msk [vmem:[#allocation2 + $0x40] sm:$0xf] %vm278_vm1, %v626_v58  ;;  %903 = vst [vmem:[#allocation2 + $0x44] sm:$0x1] %v902_v61  ;;  %v7382_v3 = vpack.c.bf16 %v424_v55, %v424_v55  ;;  %v388_v8 = vmul.f32 %v7165_v9, %v349_v51  ;;  %v7386_v11 = vadd.f32 %v7180_v12, %v387_v44 }
  0x5f   : > { %v989_v2 = vld [vmem:[#allocation2 + $0x30] sm:$0xf]  ;;  %v7380_v21 = vrot.slane %v637_v53, 7  ;;  %v2911_v15 = vshrl.u32 %v2799_v63, 16  ;;  %v2914_v60 = vshll.u32 %v2799_v63, 16  ;;  %v634_v25 = vor.u32 %v632_v50, %v7376_v62 }
  0x60   : > { %v1130_v18 = vshrl.u32 %v989_v2, 16  ;;  %v1133_v20 = vshll.u32 %v989_v2, 16  ;;  %v7388_v23 = vld [vmem:[#allocation2 + $0x34] sm:$0xf]  ;;  %v7390_v4 = vld [vmem:[#allocation2 + $0x38] sm:$0x1]  ;;  %v7396_v29 = vpack.c.bf16 %v425_v59, %v425_v59  ;;  %v7399_v30 = vadd.f32 %v7180_v12, %v388_v8 }
  0x61   : > { %v990_v24 = vld [vmem:[#allocation2 + $0x34] sm:$0xf]  ;;  %v7394_v26 = vor.u32 %v640_v54, %v7380_v21  ;;  %v2913_v6 = vrot.slane %v2911_v15, 4  ;;  %v2916_v22 = vrot.slane %v2914_v60, 5  ;;  %v2920_v32 = vshll.u32 %v7388_v23, 16 }
  0x62   : > { %v2924_v33 = vshrl.u32 %v7388_v23, 16  ;;  %v1018_v34 = vld [vmem:[#allocation2 + $0x38] sm:$0x1]  ;;  %v2930_v35 = vshll.u32 %v7390_v4, 16  ;;  %v1132_v13 = vrot.slane %v1130_v18, 4  ;;  %v1135_v36 = vrot.slane %v1133_v20, 5 }
  0x63   : > { %v1139_v38 = vshll.u32 %v990_v24, 16  ;;  %v2917_v10 = vor.u32 %v2916_v22, %v2913_v6  ;;  %v2922_v39 = vrot.slane %v2920_v32, 5  ;;  %v1143_v43 = vshrl.u32 %v990_v24, 16 }
  0x64   : > { %v2926_v42 = vrot.slane %v2924_v33, 4  ;;  %v2932_v44 = vrot.slane %v2930_v35, 5  ;;  %v1136_v45 = vor.u32 %v1135_v36, %v1132_v13  ;;  %v1149_v46 = vshll.u32 %v1018_v34, 16  ;;  %v991_v49 = vld [vmem:[#allocation2 + $0x3c] sm:$0xf] }
  0x65   : > { %v1141_v12 = vrot.slane %v1139_v38, 5  ;;  %v2918_v50 = vrot.slane %v2917_v10, 4  ;;  %v1145_v52 = vrot.slane %v1143_v43, 4  ;;  %v992_v53 = vld [vmem:[#allocation2 + $0x40] sm:$0xf]  ;;  %v905_v54 = vsel %vm7223_vm11, %v634_v25, %v904_v28 }
  0x66   : > { %v2927_v51 = vor.u32 %v2926_v42, %v2922_v39  ;;  %v1137_v55 = vrot.slane %v1136_v45, 4  ;;  %v1151_v58 = vrot.slane %v1149_v46, 5  ;;  %v1019_v61 = vld [vmem:[#allocation2 + $0x44] sm:$0x1]  ;;  %v1154_v59 = vshrl.u32 %v991_v49, 16 }
  0x67   : > { %v1157_v63 = vshll.u32 %v991_v49, 16  ;;  %906 = vst [vmem:[#allocation2 + $0x48] sm:$0xf] %v905_v54  ;;  %v2923_v2 = vsel %vm7206_vm9, %v2918_v50, %v2922_v39  ;;  %v1146_v15 = vor.u32 %v1145_v52, %v1141_v12  ;;  %v1163_v60 = vshll.u32 %v992_v53, 16  ;;  %v2802_v18 = vld [vmem:[#allocation2 + $0x3c] sm:$0xf] }
  0x68   : > { %v2928_v8 = vrot.slane %v2927_v51, 4  ;;  %v7408_v20 = vld [vmem:[#allocation2 + $0x40] sm:$0xf]  ;;  %v1142_v24 = vsel %vm7206_vm9, %v1137_v55, %v1141_v12  ;;  %v1156_v6 = vrot.slane %v1154_v59, 4  ;;  %v1167_v28 = vshrl.u32 %v992_v53, 16 }
  0x69   : > { %v1159_v25 = vrot.slane %v1157_v63, 5  ;;  %v7412_v22 = vld [vmem:[#allocation2 + $0x44] sm:$0x1]  ;;  %v1147_v33 = vrot.slane %v1146_v15, 4  ;;  %v1165_v34 = vrot.slane %v1163_v60, 5  ;;  %v1173_v35 = vshll.u32 %v1019_v61, 16 }
  0x6a   : > { %v2933_v32 = vsel %vm7206_vm9, %v2928_v8, %v2932_v44  ;;  %v1169_v38 = vrot.slane %v1167_v28, 4  ;;  %v2935_v10 = vshrl.u32 %v2802_v18, 16  ;;  %v2938_v43 = vshll.u32 %v2802_v18, 16  ;;  %v908_v12 = vld [vmem:[#allocation2 + $0x50] sm:$0x1] }
  0x6b   : > { %v5943_v13 = vcombine.low %v2923_v2, %v2933_v32  ;;  %v1160_v36 = vor.u32 %v1159_v25, %v1156_v6  ;;  %v1152_v39 = vsel %vm7206_vm9, %v1147_v33, %v1151_v58  ;;  %v1175_v42 = vrot.slane %v1173_v35, 5 }
  0x6c   : > { %v2944_v45 = vshll.u32 %v7408_v20, 16  ;;  %v5797_v46 = vcombine.low %v1142_v24, %v1152_v39  ;;  %v1170_v44 = vor.u32 %v1169_v38, %v1165_v34  ;;  %v2937_v50 = vrot.slane %v2935_v10, 4 }
  0x6d   : > { %6469 = vmatmul.mubr.msk.bf16.gmra.mrb[4].mxu0 %vm1467_vm8, %v5943_v13  ;;  %v1161_v49 = vrot.slane %v1160_v36, 4  ;;  %v2940_v51 = vrot.slane %v2938_v43, 5  ;;  %v2948_v53 = vshrl.u32 %v7408_v20, 16  ;;  %v2954_v54 = vshll.u32 %v7412_v22, 16 }
  0x6e   : > { %v2946_v52 = vrot.slane %v2944_v45, 5  ;;  %v2805_v55 = vld [vmem:[#allocation2 + $0x48] sm:$0xf]  ;;  %6336 = vmatprep.mubr.msk.bf16.mxu1 %vm1467_vm8, %v5797_v46  ;;  %v1171_v61 = vrot.slane %v1170_v44, 4  ;;  %v635_v59 = vrot.slane %v7376_v62, 4  ;;  %v644_v63 = vrot.slane %v7380_v21, 4 }
  0x6f   : > { %v1166_v58 = vsel %vm7206_vm9, %v1161_v49, %v1165_v34  ;;  %v2941_v2 = vor.u32 %v2940_v51, %v2937_v50  ;;  %v2950_v8 = vrot.slane %v2948_v53, 4  ;;  %v2956_v15 = vrot.slane %v2954_v54, 5  ;;  %v993_v18 = vld [vmem:[#allocation2 + $0x48] sm:$0xf]  ;;  %v911_v46 = vld [vmem:[#allocation2 + $0x54] sm:$0xf] }
  0x70   : > { %v2959_v60 = vshrl.u32 %v2805_v55, 16  ;;  %v1176_v24 = vsel %vm7206_vm9, %v1171_v61, %v1175_v42  ;;  %v643_v6 = vsel %vm7212_vm10, %v635_v59, %v7394_v26  ;;  %v909_v25 = vsel %vm7229_vm12, %v644_v63, %v908_v12  ;;  %v351_v53 = vld [vmem:[%s7178_s10 + $0x88] sm:$0xff] }
  0x71   : > { %v2962_v28 = vshll.u32 %v2805_v55, 16  ;;  %v5798_v32 = vcombine.low %v1166_v58, %v1176_v24  ;;  %v2942_v62 = vrot.slane %v2941_v2, 4  ;;  %v2951_v33 = vor.u32 %v2950_v8, %v2946_v52  ;;  %907 = vst.msk [vmem:[#allocation2 + $0x4c] sm:$0xf] %vm278_vm1, %v643_v6  ;;  %910 = vst [vmem:[#allocation2 + $0x50] sm:$0x1] %v909_v25 }
  0x72   : > { %v2961_v21 = vrot.slane %v2959_v60, 4  ;;  %v1178_v35 = vshrl.u32 %v993_v18, 16  ;;  %v1181_v13 = vshll.u32 %v993_v18, 16  ;;  %v646_v36 = vshrl.u32 %v7382_v3, 16  ;;  %v915_v8 = vld [vmem:[#allocation2 + $0x5c] sm:$0x1] }
  0x73   : > { %v2964_v34 = vrot.slane %v2962_v28, 5  ;;  %6337 = vmatmul.mubr.msk.bf16.gmra.mrb[8].mxu1 %vm1467_vm8, %v5798_v32  ;;  %v2947_v26 = vsel %vm7206_vm9, %v2942_v62, %v2946_v52  ;;  %v2952_v38 = vrot.slane %v2951_v33, 4  ;;  %v649_v10 = vshll.u32 %v7382_v3, 16  ;;  %v350_v52 = vld [vmem:[%s7178_s10 + $0x80] sm:$0xff] }
  0x74   : > { %v654_v39 = vshrl.u32 %v7396_v29, 16  ;;  %v1180_v43 = vrot.slane %v1178_v35, 4  ;;  %v1183_v45 = vrot.slane %v1181_v13, 5  ;;  %v648_v12 = vrot.slane %v646_v36, 7  ;;  %v6021_v3 = vld [vmem:[%s8994_s3 + $0x6] sm:$0x1] }
  0x75   : > { %v2965_v42 = vor.u32 %v2964_v34, %v2961_v21  ;;  %v2957_v49 = vsel %vm7206_vm9, %v2952_v38, %v2956_v15  ;;  %v657_v50 = vshll.u32 %v7396_v29, 16  ;;  %v6155_v51 = vpack.c.bf16 %v7386_v11, %v7386_v11 }
  0x76   : > { %v656_v44 = vrot.slane %v654_v39, 7  ;;  %v5944_v54 = vcombine.low %v2947_v26, %v2957_v49  ;;  %v1184_v58 = vor.u32 %v1183_v45, %v1180_v43  ;;  %v651_v61 = vor.u32 %v649_v10, %v648_v12 }
  0x77   : > { %v7451_v55 = vrot.slane %v2965_v42, 4  ;;  %v652_v59 = vrot.slane %v648_v12, 4  ;;  %v6156_v29 = vpack.c.bf16 %v7399_v30, %v7399_v30  ;;  %v389_v24 = vmul.f32 %v7165_v9, %v350_v52 }
  0x78   : > { %v659_v63 = vor.u32 %v657_v50, %v656_v44  ;;  %v661_v2 = vrot.slane %v656_v44, 4  ;;  %6472 = vmatprep.mubr.msk.bf16.mxu0 %vm1467_vm8, %v5944_v54  ;;  %v7456_v11 = vld [vmem:[#allocation2 + $0x4c] sm:$0xf]  ;;  %v7458_v15 = vld [vmem:[#allocation2 + $0x50] sm:$0x1]  ;;  %v912_v18 = vsel %vm7223_vm11, %v651_v61, %v911_v46  ;;  %v390_v6 = vmul.f32 %v7165_v9, %v351_v53 }
  0x79   : > { %v994_v60 = vld [vmem:[#allocation2 + $0x4c] sm:$0xf]  ;;  %v7465_v25 = vand.u32 %v6021_v3, %v7093_v5  ;;  %v2968_v28 = vshll.u32 %v7456_v11, 16  ;;  %v2972_v30 = vshrl.u32 %v7456_v11, 16  ;;  %v2978_v32 = vshll.u32 %v7458_v15, 16  ;;  %v352_v44 = vld [vmem:[%s7178_s10 + $0x90] sm:$0xff] }
  0x7a   : > { %v1020_v62 = vld [vmem:[#allocation2 + $0x50] sm:$0x1]  ;;  %v1185_v33 = vrot.slane %v1184_v58, 4  ;;  %913 = vst [vmem:[#allocation2 + $0x54] sm:$0xf] %v912_v18  ;;  %v1187_v21 = vshll.u32 %v994_v60, 16  ;;  %v660_v13 = vsel %vm7212_vm10, %v652_v59, %v659_v63  ;;  %v916_v38 = vsel %vm7229_vm12, %v661_v2, %v915_v8 }
  0x7b   : > { %v1191_v34 = vshrl.u32 %v994_v60, 16  ;;  %v1197_v35 = vshll.u32 %v1020_v62, 16  ;;  %6530 = vmatprep.subr.bf16.mxu0 %v7465_v25  ;;  %v2970_v9 = vrot.slane %v2968_v28, 5  ;;  %v2974_v36 = vrot.slane %v2972_v30, 4  ;;  %914 = vst.msk [vmem:[#allocation2 + $0x58] sm:$0xf] %vm278_vm1, %v660_v13 }
  0x7c   : > { %v2980_v26 = vrot.slane %v2978_v32, 5  ;;  %v1189_v10 = vrot.slane %v1187_v21, 5  ;;  %917 = vst [vmem:[#allocation2 + $0x5c] sm:$0x1] %v916_v38  ;;  %v663_v43 = vshrl.u32 %v6155_v51, 16  ;;  %v666_v46 = vshll.u32 %v6155_v51, 16 }
  0x7d   : > { %v1193_v39 = vrot.slane %v1191_v34, 4  ;;  %v1199_v42 = vrot.slane %v1197_v35, 5  ;;  %v2971_v45 = vsel %vm7206_vm9, %v7451_v55, %v2970_v9  ;;  %v2975_v12 = vor.u32 %v2974_v36, %v2970_v9  ;;  %v7482_v61 = vld [vmem:[#allocation4] ss:$0 sm:$0xff]  ;;  %v7486_v18 = vld [vmem:[#allocation3] ss:$0 sm:$0xff] }
  0x7e   : > { %v671_v49 = vshrl.u32 %v6156_v29, 16  ;;  %v1190_v50 = vsel %vm7206_vm9, %v1185_v33, %v1189_v10  ;;  %v665_v53 = vrot.slane %v663_v43, 7  ;;  %v674_v3 = vshll.u32 %v6156_v29, 16  ;;  %v7897_v57 = vld [vmem:[#allocation2 + $0x4c] sm:$0xf] }
  0x7f   : > { %v1194_v52 = vor.u32 %v1193_v39, %v1189_v10  ;;  %v2976_v54 = vrot.slane %v2975_v12, 4  ;;  %v428_v59 = vadd.f32 %v7482_v61, %v389_v24  ;;  %v429_v63 = vadd.f32 %v7482_v61, %v390_v6 }
  0x80   : > { %v673_v58 = vrot.slane %v671_v49, 7  ;;  %v668_v51 = vor.u32 %v666_v46, %v665_v53  ;;  %v669_v60 = vrot.slane %v665_v53, 4  ;;  %v7489_v28 = vmul.f32 %v7486_v18, %v352_v44  ;;  %v918_v46 = vld [vmem:[#allocation2 + $0x60] sm:$0xf] }
  0x81   : > { %v1195_v2 = vrot.slane %v1194_v52, 4  ;;  %v995_v55 = vld [vmem:[#allocation2 + $0x54] sm:$0xf]  ;;  %v2981_v29 = vsel %vm7206_vm9, %v2976_v54, %v2980_v26  ;;  %v922_v52 = vld [vmem:[#allocation2 + $0x68] sm:$0x1]  ;;  %vm2024_vm14 = vcmask 1046532  }
  0x82   : > { %v2808_v8 = vld [vmem:[#allocation2 + $0x54] sm:$0xf]  ;;  %v1202_v30 = vshrl.u32 %v995_v55, 16  ;;  %v1205_v32 = vshll.u32 %v995_v55, 16  ;;  %v5945_v33 = vcombine.low %v2971_v45, %v2981_v29  ;;  %v996_v6 = vld [vmem:[#allocation2 + $0x58] sm:$0xf]  ;;  %v676_v35 = vor.u32 %v674_v3, %v673_v58  ;;  %vm7521_vm15 = vmor %vm2023_vm13, %vm2024_vm14 }
  0x83   : > { %v2983_v62 = vshrl.u32 %v2808_v8, 16  ;;  %v1200_v24 = vsel %vm7206_vm9, %v1195_v2, %v1199_v42  ;;  %v7495_v21 = vld [vmem:[#allocation2 + $0x58] sm:$0xf]  ;;  %v2986_v34 = vshll.u32 %v2808_v8, 16  ;;  %v1021_v9 = vld [vmem:[#allocation2 + $0x5c] sm:$0x1] }
  0x84   : > { %v5799_v13 = vcombine.low %v1190_v50, %v1200_v24  ;;  %v1204_v36 = vrot.slane %v1202_v30, 4  ;;  %v1207_v38 = vrot.slane %v1205_v32, 5  ;;  %v1211_v10 = vshll.u32 %v996_v6, 16  ;;  %6473 = vmatmul.mubr.msk.bf16.gmra.mrb[8].mxu0 %vm1467_vm8, %v5945_v33  ;;  %v7498_v43 = vld [vmem:[#allocation2 + $0x5c] sm:$0x1] }
  0x85   : > { %v1215_v26 = vshrl.u32 %v996_v6, 16  ;;  %v1221_v39 = vshll.u32 %v1021_v9, 16  ;;  %v2985_v45 = vrot.slane %v2983_v62, 4  ;;  %v2988_v12 = vrot.slane %v2986_v34, 5 }
  0x86   : > { %6340 = vmatprep.mubr.msk.bf16.mxu1 %vm1467_vm8, %v5799_v13  ;;  %v1208_v42 = vor.u32 %v1207_v38, %v1204_v36  ;;  %v1213_v49 = vrot.slane %v1211_v10, 5  ;;  %v2992_v44 = vshll.u32 %v7495_v21, 16  ;;  %v2996_v50 = vshrl.u32 %v7495_v21, 16 }
  0x87   : > { %v1217_v53 = vrot.slane %v1215_v26, 4  ;;  %v1223_v3 = vrot.slane %v1221_v39, 5  ;;  %v2989_v54 = vor.u32 %v2988_v12, %v2985_v45  ;;  %v3002_v2 = vshll.u32 %v7498_v43, 16  ;;  %v7515_v45 = vld [vmem:[#allocation2 + $0x18] sm:$0xe] }
  0x88   : > { %v1209_v55 = vrot.slane %v1208_v42, 4  ;;  %v2994_v8 = vrot.slane %v2992_v44, 5  ;;  %v2998_v29 = vrot.slane %v2996_v50, 4  ;;  %v677_v30 = vsel %vm7212_vm10, %v669_v60, %v676_v35 }
  0x89   : > { %v1218_v32 = vor.u32 %v1217_v53, %v1213_v49  ;;  %v2990_v62 = vrot.slane %v2989_v54, 4  ;;  %v3004_v33 = vrot.slane %v3002_v2, 5  ;;  %v678_v24 = vrot.slane %v673_v58, 4  ;;  %921 = vst.msk [vmem:[#allocation2 + $0x64] sm:$0xf] %vm278_vm1, %v677_v30 }
  0x8a   : > { %v1214_v6 = vsel %vm7206_vm9, %v1209_v55, %v1213_v49  ;;  %v2999_v34 = vor.u32 %v2998_v29, %v2994_v8  ;;  %v919_v13 = vsel %vm7223_vm11, %v668_v51, %v918_v46  ;;  %v6157_v9 = vpack.c.bf16 %v428_v59, %v428_v59  ;;  %v3516_v58 = vld [vmem:[#allocation2 + $0xc] sm:$0xe] }
  0x8b   : > { %v1219_v36 = vrot.slane %v1218_v32, 4  ;;  %v2995_v38 = vsel %vm7206_vm9, %v2990_v62, %v2994_v8  ;;  %920 = vst [vmem:[#allocation2 + $0x60] sm:$0xf] %v919_v13  ;;  %v923_v60 = vsel %vm7229_vm12, %v678_v24, %v922_v52  ;;  %v6158_v35 = vpack.c.bf16 %v429_v63, %v429_v63  ;;  %v925_v53 = vld [vmem:[#allocation2 + $0x6c] sm:$0xf] }
  0x8c   : > { %v3000_v10 = vrot.slane %v2999_v34, 4  ;;  %924 = vst [vmem:[#allocation2 + $0x68] sm:$0x1] %v923_v60  ;;  %v680_v26 = vshrl.u32 %v6157_v9, 16  ;;  %v683_v39 = vshll.u32 %v6157_v9, 16  ;;  %v5972_v44 = vrot.slane %v3516_v58, 9 }
  0x8d   : > { %v1224_v59 = vsel %vm7206_vm9, %v1219_v36, %v1223_v3  ;;  %v688_v51 = vshrl.u32 %v6158_v35, 16  ;;  %v691_v12 = vshll.u32 %v6158_v35, 16  ;;  %v3584_v54 = vrot.slane %v3582_v40, 4 }
  0x8e   : > { %v5800_v46 = vcombine.low %v1214_v6, %v1224_v59  ;;  %v3005_v42 = vsel %vm7206_vm9, %v3000_v10, %v3004_v33  ;;  %v682_v49 = vrot.slane %v680_v26, 7  ;;  %v5973_v3 = vrot.slane %v7515_v45, 9 }
  0x8f   : > { %v5946_v50 = vcombine.low %v2995_v38, %v3005_v42  ;;  %v690_v52 = vrot.slane %v688_v51, 7  ;;  %v7535_v30 = vsel %vm7521_vm15, %v5972_v44, %v3582_v40  ;;  %v7542_v32 = vsel %vm7521_vm15, %v7312_v31, %v3592_v17 }
  0x90   : > { %6341 = vmatmul.mubr.msk.bf16.gmra.mrb[12].mxu1 %vm1467_vm8, %v5800_v46  ;;  %v7529_v2 = vld [vmem:[#allocation2 + $0x64] sm:$0xf]  ;;  %v685_v8 = vor.u32 %v683_v39, %v682_v49  ;;  %v686_v29 = vrot.slane %v682_v49, 4  ;;  %v7553_v17 = vsel %vm7521_vm15, %v3584_v54, %v3585_v41  ;;  %v929_v41 = vld [vmem:[#allocation2 + $0x74] sm:$0x1]  ;;  %v353_v54 = vld [vmem:[%s7178_s10 + $0x98] sm:$0xff] }
  0x91   : > { %v998_v55 = vld [vmem:[#allocation2 + $0x64] sm:$0xf]  ;;  %6476 = vmatprep.mubr.msk.bf16.mxu0 %vm1467_vm8, %v5946_v50  ;;  %v3016_v62 = vshll.u32 %v7529_v2, 16  ;;  %v3020_v33 = vshrl.u32 %v7529_v2, 16  ;;  %v693_v13 = vor.u32 %v691_v12, %v690_v52  ;;  %v695_v40 = vrot.slane %v690_v52, 4 }
  0x92   : > { %v1235_v24 = vshll.u32 %v998_v55, 16  ;;  %v1239_v6 = vshrl.u32 %v998_v55, 16  ;;  %v2811_v19 = vld [vmem:[#allocation2 + $0x60] sm:$0xf]  ;;  %v926_v47 = vsel %vm7223_vm11, %v685_v8, %v925_v53  ;;  %vm5612_vm0 = vcmask 261120  }
  0x93   : > { %v997_v34 = vld [vmem:[#allocation2 + $0x60] sm:$0xf]  ;;  %v7555_v31 = vld [vmem:[#allocation2 + $0x68] sm:$0x1]  ;;  %v3007_v9 = vshrl.u32 %v2811_v19, 16  ;;  %v3010_v36 = vshll.u32 %v2811_v19, 16  ;;  %v694_v53 = vsel %vm7212_vm10, %v686_v29, %v693_v13  ;;  %v7572_v29 = vsel %vm7521_vm15, %v5973_v3, %v3589_v16 }
  0x94   : > { %v3018_v38 = vrot.slane %v3016_v62, 5  ;;  %v3022_v60 = vrot.slane %v3020_v33, 4  ;;  %927 = vst [vmem:[#allocation2 + $0x6c] sm:$0xf] %v926_v47  ;;  %v3026_v35 = vshll.u32 %v7555_v31, 16  ;;  %v1226_v10 = vshrl.u32 %v997_v34, 16 }
  0x95   : > { %v1022_v58 = vld [vmem:[#allocation2 + $0x68] sm:$0x1]  ;;  %v1229_v26 = vshll.u32 %v997_v34, 16  ;;  %v1237_v39 = vrot.slane %v1235_v24, 5  ;;  %v3009_v45 = vrot.slane %v3007_v9, 4  ;;  %v3012_v27 = vrot.slane %v3010_v36, 5 }
  0x96   : > { %v3023_v59 = vor.u32 %v3022_v60, %v3018_v38  ;;  %v1241_v51 = vrot.slane %v1239_v6, 4  ;;  %v3028_v12 = vrot.slane %v3026_v35, 5  ;;  %v1228_v46 = vrot.slane %v1226_v10, 4  ;;  %928 = vst.msk [vmem:[#allocation2 + $0x70] sm:$0xf] %vm278_vm1, %v694_v53  ;;  %v355_v9 = vld [vmem:[%s7178_s10 + $0xa8] sm:$0xff] }
  0x97   : > { %v1231_v42 = vrot.slane %v1229_v26, 5  ;;  %v1245_v49 = vshll.u32 %v1022_v58, 16  ;;  %v3013_v44 = vor.u32 %v3012_v27, %v3009_v45  ;;  %v930_v62 = vsel %vm7229_vm12, %v695_v40, %v929_v41  ;;  %v3518_v10 = vld [vmem:[#allocation2 + $0x24] sm:$0xe] }
  0x98   : > { %v3024_v50 = vrot.slane %v3023_v59, 4  ;;  %v1242_v52 = vor.u32 %v1241_v51, %v1237_v39  ;;  %v5989_v33 = vcombine.low %v7535_v30, %v7553_v17  ;;  %931 = vst [vmem:[#allocation2 + $0x74] sm:$0x1] %v930_v62  ;;  %v5990_v40 = vcombine.low %v7572_v29, %v7542_v32  ;;  %v354_v17 = vld [vmem:[%s7178_s10 + $0xa0] sm:$0xff] }
  0x99   : > { %v1232_v55 = vor.u32 %v1231_v42, %v1228_v46  ;;  %v1247_v8 = vrot.slane %v1245_v49, 5  ;;  %v3014_v24 = vrot.slane %v3013_v44, 4  ;;  %v392_v47 = vmul.f32 %v7486_v18, %v353_v54 }
  0x9a   : > { %v3029_v6 = vsel %vm7206_vm9, %v3024_v50, %v3028_v12  ;;  %v1243_v19 = vrot.slane %v1242_v52, 4  ;;  %v430_v30 = vadd.f32 %v7482_v61, %v7489_v28  ;;  %v393_v27 = vmul.f32 %v7486_v18, %v354_v17 }
  0x9b   : > { %v1233_v34 = vrot.slane %v1232_v55, 4  ;;  %v999_v13 = vld [vmem:[#allocation2 + $0x6c] sm:$0xf]  ;;  %v3019_v36 = vsel %vm7206_vm9, %v3014_v24, %v3018_v38  ;;  %v431_v32 = vadd.f32 %v7482_v61, %v392_v47  ;;  %v394_v41 = vmul.f32 %v7486_v18, %v355_v9  ;;  %v932_v24 = vld [vmem:[#allocation2 + $0x78] sm:$0xf] }
  0x9c   : > { %v1248_v37 = vsel %vm7206_vm9, %v1243_v19, %v1247_v8  ;;  %v1250_v16 = vshrl.u32 %v999_v13, 16  ;;  %v1253_v3 = vshll.u32 %v999_v13, 16  ;;  %v5947_v60 = vcombine.low %v3019_v36, %v3029_v6 }
  0x9d   : > { %v1238_v35 = vsel %vm7206_vm9, %v1233_v34, %v1237_v39  ;;  %v6159_v58 = vpack.c.bf16 %v430_v30, %v430_v30  ;;  %v6160_v38 = vpack.c.bf16 %v431_v32, %v431_v32  ;;  %v1000_v12 = vld [vmem:[#allocation2 + $0x70] sm:$0xf]  ;;  %v432_v46 = vadd.f32 %v7482_v61, %v393_v27 }
  0x9e   : > { %v5801_v26 = vcombine.low %v1238_v35, %v1248_v37  ;;  %v1252_v28 = vrot.slane %v1250_v16, 4  ;;  %v1255_v45 = vrot.slane %v1253_v3, 5  ;;  %6477 = vmatmul.mubr.msk.bf16.gmra.mrb[12].mxu0 %vm1467_vm8, %v5947_v60  ;;  %v5974_v42 = vrot.slane %v3518_v10, 9  ;;  %v936_v37 = vld [vmem:[#allocation2 + $0x80] sm:$0x1] }
  0x9f   : > { %v697_v59 = vshrl.u32 %v6159_v58, 16  ;;  %v700_v51 = vshll.u32 %v6159_v58, 16  ;;  %6498 = vmatprep.mubr.msk.bf16.mxu0 %vm1467_vm8, %v5989_v33  ;;  %v3596_v49 = vrot.slane %v7319_v56, 5  ;;  %v1023_v44 = vld [vmem:[#allocation2 + $0x74] sm:$0x1]  ;;  %v1259_v50 = vshll.u32 %v1000_v12, 16 }
  0xa0   : > { %6344 = vmatprep.mubr.msk.bf16.mxu1 %vm1467_vm8, %v5801_v26  ;;  %v1256_v39 = vor.u32 %v1255_v45, %v1252_v28  ;;  %v1263_v52 = vshrl.u32 %v1000_v12, 16  ;;  %v705_v54 = vshrl.u32 %v6160_v38, 16  ;;  %v1269_v8 = vshll.u32 %v1023_v44, 16  ;;  %v3519_v58 = vld [vmem:[#allocation2 + $0x30] sm:$0xe] }
  0xa1   : > { %v699_v53 = vrot.slane %v697_v59, 7  ;;  %v708_v62 = vshll.u32 %v6160_v38, 16  ;;  %v433_v6 = vadd.f32 %v7482_v61, %v394_v41  ;;  %v1261_v19 = vrot.slane %v1259_v50, 5  ;;  %v939_v12 = vld [vmem:[#allocation2 + $0x84] sm:$0xf] }
  0xa2   : > { %v1257_v55 = vrot.slane %v1256_v39, 4  ;;  %v1265_v29 = vrot.slane %v1263_v52, 4  ;;  %v1271_v13 = vrot.slane %v1269_v8, 5  ;;  %v707_v47 = vrot.slane %v705_v54, 7  ;;  %v943_v50 = vld [vmem:[#allocation2 + $0x8c] sm:$0x1] }
  0xa3   : > { %v702_v34 = vor.u32 %v700_v51, %v699_v53  ;;  %v703_v33 = vrot.slane %v699_v53, 4  ;;  %v6161_v30 = vpack.c.bf16 %v432_v46, %v432_v46  ;;  %v6162_v17 = vpack.c.bf16 %v433_v6, %v433_v6  ;;  %v356_v46 = vld [vmem:[%s7178_s10 + $0xb0] sm:$0xff]  ;;  %v357_v52 = vld [vmem:[%s7178_s10 + $0xb8] sm:$0xff]  ;;  %v358_v53 = vld [vmem:[%s7178_s10 + $0xc0] sm:$0xff] }
  0xa4   : > { %v1262_v56 = vsel %vm7206_vm9, %v1257_v55, %v1261_v19  ;;  %v1266_v9 = vor.u32 %v1265_v29, %v1261_v19  ;;  %v3597_v16 = vsel %vm7521_vm15, %v5974_v42, %v3596_v49  ;;  %v710_v3 = vor.u32 %v708_v62, %v707_v47  ;;  %v359_v29 = vld [vmem:[%s7178_s10 + $0xc8] sm:$0xff] }
  0xa5   : > { %v933_v36 = vsel %vm7223_vm11, %v702_v34, %v932_v24  ;;  %v712_v60 = vrot.slane %v707_v47, 4  ;;  %v714_v35 = vshrl.u32 %v6161_v30, 16  ;;  %v717_v32 = vshll.u32 %v6161_v30, 16 }
  0xa6   : > { %934 = vst [vmem:[#allocation2 + $0x78] sm:$0xf] %v933_v36  ;;  %v1267_v10 = vrot.slane %v1266_v9, 4  ;;  %6499 = vmatmul.mubr.msk.bf16.vlgmr.msra.gmra.mrb[0].mxu0 %vm1467_vm8, %v5990_v40  ;;  %v722_v26 = vshrl.u32 %v6162_v17, 16  ;;  %v725_v28 = vshll.u32 %v6162_v17, 16  ;;  %v3598_v45 = vrot.slane %v3596_v49, 4 }
  0xa7   : > { %6531 = vmatpush3.bf16.msra.mxu0 %v7465_v25  ;;  %v711_v27 = vsel %vm7212_vm10, %v703_v33, %v710_v3  ;;  %v937_v38 = vsel %vm7229_vm12, %v712_v60, %v936_v37  ;;  %v716_v59 = vrot.slane %v714_v35, 7  ;;  %v3599_v51 = vrot.slane %v7321_v1, 5  ;;  %v360_v17 = vld [vmem:[%s7178_s10 + $0xd0] sm:$0xff] }
  0xa8   : > { %v1272_v40 = vsel %vm7206_vm9, %v1267_v10, %v1271_v13  ;;  %935 = vst.msk [vmem:[#allocation2 + $0x7c] sm:$0xf] %vm278_vm1, %v711_v27  ;;  %938 = vst [vmem:[#allocation2 + $0x80] sm:$0x1] %v937_v38  ;;  %v724_v41 = vrot.slane %v722_v26, 7  ;;  %v5975_v25 = vrot.slane %v3519_v58, 9  ;;  %v395_v19 = vmul.f32 %v7486_v18, %v356_v46 }
  0xa9   : > { %v3603_v39 = vrot.slane %v7388_v23, 5  ;;  %v5802_v42 = vcombine.low %v1262_v56, %v1272_v40  ;;  %v719_v49 = vor.u32 %v717_v32, %v716_v59  ;;  %v720_v44 = vrot.slane %v716_v59, 4 }
  0xaa   : > { %v3600_v1 = vsel %vm7521_vm15, %v3598_v45, %v3599_v51  ;;  %v727_v54 = vor.u32 %v725_v28, %v724_v41  ;;  %v729_v55 = vrot.slane %v724_v41, 4  ;;  %v3606_v6 = vrot.slane %v7390_v4, 5 }
  0xab   : > { %v5991_v8 = vcombine.low %v3597_v16, %v3600_v1  ;;  %v3604_v62 = vsel %vm7521_vm15, %v5975_v25, %v3603_v39  ;;  %6345 = vmatmul.mubr.msk.bf16.gmra.mrb[16].mxu1 %vm1467_vm8, %v5802_v42  ;;  %v940_v23 = vsel %vm7223_vm11, %v719_v49, %v939_v12  ;;  %v3605_v24 = vrot.slane %v3603_v39, 4 }
  0xac   : > { %v728_v33 = vsel %vm7212_vm10, %v720_v44, %v727_v54  ;;  %941 = vst [vmem:[#allocation2 + $0x84] sm:$0xf] %v940_v23  ;;  %v944_v13 = vsel %vm7229_vm12, %v729_v55, %v943_v50  ;;  %v396_v47 = vmul.f32 %v7486_v18, %v357_v52  ;;  %v397_v30 = vmul.f32 %v7486_v18, %v358_v53 }
  0xad   : > { %v7626_v34 = vld [vmem:[#allocation2 + $0x78] sm:$0xf]  ;;  %6502 = vmatprep.mubr.msk.bf16.mxu0 %vm1467_vm8, %v5991_v8  ;;  %942 = vst.msk [vmem:[#allocation2 + $0x88] sm:$0xf] %vm278_vm1, %v728_v33  ;;  %945 = vst [vmem:[#allocation2 + $0x8c] sm:$0x1] %v944_v13  ;;  %v3607_v9 = vsel %vm7521_vm15, %v3605_v24, %v3606_v6  ;;  %v434_v36 = vadd.f32 %v7482_v61, %v395_v19  ;;  %v398_v3 = vmul.f32 %v7486_v18, %v359_v29 }
  0xae   : > { %v1274_v4 = vshrl.u32 %v7626_v34, 16  ;;  %v1277_v56 = vshll.u32 %v7626_v34, 16  ;;  %v5992_v37 = vcombine.low %v3604_v62, %v3607_v9  ;;  %v435_v16 = vadd.f32 %v7482_v61, %v396_v47  ;;  %v946_v33 = vld [vmem:[#allocation2 + $0x90] sm:$0xf] }
  0xaf   : > { %v436_v60 = vadd.f32 %v7482_v61, %v397_v30  ;;  %v7645_v35 = vld [vmem:[#allocation2 + $0x7c] sm:$0xf]  ;;  %v1024_v32 = vld [vmem:[#allocation2 + $0x80] sm:$0x1]  ;;  %v6163_v26 = vpack.c.bf16 %v434_v36, %v434_v36  ;;  %v7648_v28 = vmul.f32 %v7486_v18, %v360_v17  ;;  %v437_v12 = vadd.f32 %v7482_v61, %v398_v3 }
  0xb0   : > { %v1276_v58 = vrot.slane %v1274_v4, 4  ;;  %v1279_v10 = vrot.slane %v1277_v56, 5  ;;  %v1283_v45 = vshll.u32 %v7645_v35, 16  ;;  %v1287_v27 = vshrl.u32 %v7645_v35, 16  ;;  %6503 = vmatmul.mubr.msk.bf16.gmra.mrb[4].mxu0 %vm1467_vm8, %v5992_v37 }
  0xb1   : > { %v1293_v38 = vshll.u32 %v1024_v32, 16  ;;  %v6164_v59 = vpack.c.bf16 %v435_v16, %v435_v16  ;;  %v731_v40 = vshrl.u32 %v6163_v26, 16  ;;  %v734_v41 = vshll.u32 %v6163_v26, 16  ;;  %v3520_v32 = vld [vmem:[#allocation2 + $0x3c] sm:$0xe] }
  0xb2   : > { %v1280_v51 = vor.u32 %v1279_v10, %v1276_v58  ;;  %v1285_v25 = vrot.slane %v1283_v45, 5  ;;  %v1289_v39 = vrot.slane %v1287_v27, 4  ;;  %v6165_v52 = vpack.c.bf16 %v436_v60, %v436_v60  ;;  %v950_v26 = vld [vmem:[#allocation2 + $0x98] sm:$0x1] }
  0xb3   : > { %v1295_v46 = vrot.slane %v1293_v38, 5  ;;  %v739_v42 = vshrl.u32 %v6164_v59, 16  ;;  %v7654_v44 = vld [vmem:[#allocation2 + $0x84] sm:$0xf]  ;;  %v733_v50 = vrot.slane %v731_v40, 7  ;;  %v742_v1 = vshll.u32 %v6164_v59, 16 }
  0xb4   : > { %v1281_v49 = vrot.slane %v1280_v51, 4  ;;  %v1290_v53 = vor.u32 %v1289_v39, %v1285_v25  ;;  %v7656_v54 = vld [vmem:[#allocation2 + $0x88] sm:$0xf]  ;;  %v1025_v55 = vld [vmem:[#allocation2 + $0x8c] sm:$0x1]  ;;  %v1298_v8 = vshrl.u32 %v7654_v44, 16  ;;  %v6166_v23 = vpack.c.bf16 %v437_v12, %v437_v12 }
  0xb5   : > { %v1301_v62 = vshll.u32 %v7654_v44, 16  ;;  %v1307_v6 = vshll.u32 %v7656_v54, 16  ;;  %v1311_v19 = vshrl.u32 %v7656_v54, 16  ;;  %v1317_v29 = vshll.u32 %v1025_v55, 16 }
  0xb6   : > { %v1286_v24 = vsel %vm7206_vm9, %v1281_v49, %v1285_v25  ;;  %v1291_v13 = vrot.slane %v1290_v53, 4  ;;  %v1300_v47 = vrot.slane %v1298_v8, 4  ;;  %v736_v17 = vor.u32 %v734_v41, %v733_v50  ;;  %v953_v41 = vld [vmem:[#allocation2 + $0x9c] sm:$0xf]  ;;  %v3521_v53 = vld [vmem:[#allocation2 + $0x48] sm:$0xe] }
  0xb7   : > { %v1303_v30 = vrot.slane %v1301_v62, 5  ;;  %v1309_v4 = vrot.slane %v1307_v6, 5  ;;  %v1313_v56 = vrot.slane %v1311_v19, 4  ;;  %v1319_v9 = vrot.slane %v1317_v29, 5 }
  0xb8   : > { %v737_v36 = vrot.slane %v733_v50, 4  ;;  %v1296_v37 = vsel %vm7206_vm9, %v1291_v13, %v1295_v46  ;;  %v741_v3 = vrot.slane %v739_v42, 7  ;;  %v947_v60 = vsel %vm7223_vm11, %v736_v17, %v946_v33  ;;  %v957_v46 = vld [vmem:[#allocation2 + $0xa4] sm:$0x1]  ;;  %v361_v33 = vld [vmem:[%s7178_s10 + $0xd8] sm:$0xff] }
  0xb9   : > { %v1304_v16 = vor.u32 %v1303_v30, %v1300_v47  ;;  %v5803_v58 = vcombine.low %v1286_v24, %v1296_v37  ;;  %v1314_v10 = vor.u32 %v1313_v56, %v1309_v4  ;;  %948 = vst [vmem:[#allocation2 + $0x90] sm:$0xf] %v947_v60  ;;  %v748_v45 = vshrl.u32 %v6165_v52, 16  ;;  %v363_v56 = vld [vmem:[%s7178_s10 + $0xe8] sm:$0xff] }
  0xba   : > { %v751_v27 = vshll.u32 %v6165_v52, 16  ;;  %v744_v59 = vor.u32 %v742_v1, %v741_v3  ;;  %v746_v51 = vrot.slane %v741_v3, 4  ;;  %v756_v40 = vshrl.u32 %v6166_v23, 16 }
  0xbb   : > { %v1305_v38 = vrot.slane %v1304_v16, 4  ;;  %6348 = vmatprep.mubr.msk.bf16.mxu1 %vm1467_vm8, %v5803_v58  ;;  %v1315_v12 = vrot.slane %v1314_v10, 4  ;;  %v750_v25 = vrot.slane %v748_v45, 7  ;;  %v759_v39 = vshll.u32 %v6166_v23, 16  ;;  %v7696_v16 = vld [vmem:[#allocation2 + $0x54] sm:$0xe] }
  0xbc   : > { %v5976_v42 = vrot.slane %v3520_v32, 9  ;;  %v745_v50 = vsel %vm7212_vm10, %v737_v36, %v744_v59  ;;  %v951_v1 = vsel %vm7229_vm12, %v746_v51, %v950_v26  ;;  %v758_v52 = vrot.slane %v756_v40, 7 }
  0xbd   : > { %v1310_v49 = vsel %vm7206_vm9, %v1305_v38, %v1309_v4  ;;  %v1320_v55 = vsel %vm7206_vm9, %v1315_v12, %v1319_v9  ;;  %949 = vst.msk [vmem:[#allocation2 + $0x94] sm:$0xf] %vm278_vm1, %v745_v50  ;;  %952 = vst [vmem:[#allocation2 + $0x98] sm:$0x1] %v951_v1  ;;  %v753_v8 = vor.u32 %v751_v27, %v750_v25  ;;  %v754_v62 = vrot.slane %v750_v25, 4  ;;  %v362_v4 = vld [vmem:[%s7178_s10 + $0xe0] sm:$0xff] }
  0xbe   : > { %v3610_v23 = vrot.slane %v7408_v20, 5  ;;  %v5804_v24 = vcombine.low %v1310_v49, %v1320_v55  ;;  %v761_v6 = vor.u32 %v759_v39, %v758_v52  ;;  %v763_v19 = vrot.slane %v758_v52, 4 }
  0xbf   : > { %v3613_v29 = vrot.slane %v7412_v22, 5  ;;  %v954_v13 = vsel %vm7223_vm11, %v753_v8, %v953_v41  ;;  %v5977_v17 = vrot.slane %v3521_v53, 9  ;;  %v3617_v36 = vrot.slane %v7456_v11, 5 }
  0xc0   : > { %v3611_v47 = vsel %vm7521_vm15, %v5976_v42, %v3610_v23  ;;  %v3612_v30 = vrot.slane %v3610_v23, 4  ;;  %6349 = vmatmul.mubr.msk.bf16.gmra.mrb[20].mxu1 %vm1467_vm8, %v5804_v24  ;;  %v7688_v9 = vld [vmem:[#allocation2 + $0x90] sm:$0xf]  ;;  %v762_v20 = vsel %vm7212_vm10, %v754_v62, %v761_v6  ;;  %955 = vst [vmem:[#allocation2 + $0x9c] sm:$0xf] %v954_v13  ;;  %v958_v22 = vsel %vm7229_vm12, %v763_v19, %v957_v46 }
  0xc1   : > { %v3620_v37 = vrot.slane %v7458_v15, 5  ;;  %v1322_v3 = vshrl.u32 %v7688_v9, 16  ;;  %v1325_v60 = vshll.u32 %v7688_v9, 16  ;;  %956 = vst.msk [vmem:[#allocation2 + $0xa0] sm:$0xf] %vm278_vm1, %v762_v20  ;;  %v400_v58 = vmul.f32 %v7486_v18, %v361_v33 }
  0xc2   : > { %959 = vst [vmem:[#allocation2 + $0xa4] sm:$0x1] %v958_v22  ;;  %v3614_v32 = vsel %vm7521_vm15, %v3612_v30, %v3613_v29  ;;  %v3618_v11 = vsel %vm7521_vm15, %v5977_v17, %v3617_v36  ;;  %v3619_v26 = vrot.slane %v3617_v36, 4  ;;  %v438_v15 = vadd.f32 %v7482_v61, %v7648_v28 }
  0xc3   : > { %v5993_v10 = vcombine.low %v3611_v47, %v3614_v32  ;;  %v1324_v45 = vrot.slane %v1322_v3, 4  ;;  %v1327_v27 = vrot.slane %v1325_v60, 5  ;;  %v439_v38 = vadd.f32 %v7482_v61, %v400_v58 }
  0xc4   : > { %v401_v59 = vmul.f32 %v7486_v18, %v362_v4  ;;  %v7710_v51 = vld [vmem:[#allocation2 + $0x94] sm:$0xf]  ;;  %v1026_v40 = vld [vmem:[#allocation2 + $0x98] sm:$0x1]  ;;  %v3621_v41 = vsel %vm7521_vm15, %v3619_v26, %v3620_v37  ;;  %v6167_v12 = vpack.c.bf16 %v438_v15, %v438_v15  ;;  %v402_v25 = vmul.f32 %v7486_v18, %v363_v56  ;;  %v960_v37 = vld [vmem:[#allocation2 + $0xa8] sm:$0xf] }
  0xc5   : > { %6506 = vmatprep.mubr.msk.bf16.mxu0 %vm1467_vm8, %v5993_v10  ;;  %v5978_v39 = vrot.slane %v7696_v16, 9  ;;  %v1328_v28 = vor.u32 %v1327_v27, %v1324_v45  ;;  %v1331_v46 = vshll.u32 %v7710_v51, 16  ;;  %v1335_v42 = vshrl.u32 %v7710_v51, 16 }
  0xc6   : > { %v1341_v49 = vshll.u32 %v1026_v40, 16  ;;  %v5994_v50 = vcombine.low %v3618_v11, %v3621_v41  ;;  %v6168_v1 = vpack.c.bf16 %v439_v38, %v439_v38  ;;  %v765_v52 = vshrl.u32 %v6167_v12, 16 }
  0xc7   : > { %v768_v53 = vshll.u32 %v6167_v12, 16  ;;  %v1329_v55 = vrot.slane %v1328_v28, 4  ;;  %v1333_v8 = vrot.slane %v1331_v46, 5  ;;  %v1337_v62 = vrot.slane %v1335_v42, 4  ;;  %v7719_v24 = vld [vmem:[#allocation2 + $0x9c] sm:$0xf] }
  0xc8   : > { %v1343_v23 = vrot.slane %v1341_v49, 5  ;;  %v7721_v6 = vld [vmem:[#allocation2 + $0xa0] sm:$0xf]  ;;  %v1346_v19 = vshrl.u32 %v7719_v24, 16  ;;  %v1349_v29 = vshll.u32 %v7719_v24, 16  ;;  %6507 = vmatmul.mubr.msk.bf16.gmra.mrb[8].mxu0 %vm1467_vm8, %v5994_v50  ;;  %v440_v33 = vadd.f32 %v7482_v61, %v401_v59 }
  0xc9   : > { %v1027_v18 = vld [vmem:[#allocation2 + $0xa4] sm:$0x1]  ;;  %v441_v13 = vadd.f32 %v7482_v61, %v402_v25  ;;  %v1334_v47 = vsel %vm7206_vm9, %v1329_v55, %v1333_v8  ;;  %v1338_v30 = vor.u32 %v1337_v62, %v1333_v8  ;;  %v1355_v17 = vshll.u32 %v7721_v6, 16  ;;  %v964_v12 = vld [vmem:[#allocation2 + $0xb0] sm:$0x1] }
  0xca   : > { %v1359_v4 = vshrl.u32 %v7721_v6, 16  ;;  %v1348_v56 = vrot.slane %v1346_v19, 4  ;;  %v1351_v20 = vrot.slane %v1349_v29, 5  ;;  %v1365_v22 = vshll.u32 %v1027_v18, 16  ;;  %v3523_v55 = vld [vmem:[#allocation2 + $0x60] sm:$0xe] }
  0xcb   : > { %v767_v36 = vrot.slane %v765_v52, 7  ;;  %v1339_v3 = vrot.slane %v1338_v30, 4  ;;  %v1357_v60 = vrot.slane %v1355_v17, 5  ;;  %v773_v58 = vshrl.u32 %v6168_v1, 16 }
  0xcc   : > { %v1361_v32 = vrot.slane %v1359_v4, 4  ;;  %v1352_v10 = vor.u32 %v1351_v20, %v1348_v56  ;;  %v1367_v11 = vrot.slane %v1365_v22, 5  ;;  %v776_v38 = vshll.u32 %v6168_v1, 16  ;;  %v971_v22 = vld [vmem:[#allocation2 + $0xbc] sm:$0x1] }
  0xcd   : > { %v770_v61 = vor.u32 %v768_v53, %v767_v36  ;;  %v771_v26 = vrot.slane %v767_v36, 4  ;;  %v1344_v15 = vsel %vm7206_vm9, %v1339_v3, %v1343_v23  ;;  %v775_v27 = vrot.slane %v773_v58, 7 }
  0xce   : > { %v1362_v45 = vor.u32 %v1361_v32, %v1357_v60  ;;  %v5805_v59 = vcombine.low %v1334_v47, %v1344_v15  ;;  %v1353_v40 = vrot.slane %v1352_v10, 4  ;;  %v6169_v25 = vpack.c.bf16 %v440_v33, %v440_v33  ;;  %v967_v47 = vld [vmem:[#allocation2 + $0xb4] sm:$0xf] }
  0xcf   : > { %v961_v41 = vsel %vm7223_vm11, %v770_v61, %v960_v37  ;;  %v778_v46 = vor.u32 %v776_v38, %v775_v27  ;;  %v780_v42 = vrot.slane %v775_v27, 4  ;;  %v6170_v49 = vpack.c.bf16 %v441_v13, %v441_v13 }
  0xd0   : > { %v1363_v28 = vrot.slane %v1362_v45, 4  ;;  %962 = vst [vmem:[#allocation2 + $0xa8] sm:$0xf] %v961_v41  ;;  %6352 = vmatprep.mubr.msk.bf16.mxu1 %vm1467_vm8, %v5805_v59  ;;  %v1358_v50 = vsel %vm7206_vm9, %v1353_v40, %v1357_v60  ;;  %v782_v52 = vshrl.u32 %v6169_v25, 16  ;;  %v785_v53 = vshll.u32 %v6169_v25, 16 }
  0xd1   : > { %v3624_v1 = vrot.slane %v7495_v21, 5  ;;  %v779_v62 = vsel %vm7212_vm10, %v771_v26, %v778_v46  ;;  %v965_v23 = vsel %vm7229_vm12, %v780_v42, %v964_v12  ;;  %v790_v18 = vshrl.u32 %v6170_v49, 16  ;;  %v5873_v60 = vld [vmem:[%s8994_s3 + $0x2] sm:$0x1]  ;;  %v2815_v45 = vld [vmem:[#allocation2 + $0x70] sm:$0xf] }
  0xd2   : > { %v1368_v8 = vsel %vm7206_vm9, %v1363_v28, %v1367_v11  ;;  %963 = vst.msk [vmem:[#allocation2 + $0xac] sm:$0xf] %vm278_vm1, %v779_v62  ;;  %966 = vst [vmem:[#allocation2 + $0xb0] sm:$0x1] %v965_v23  ;;  %v784_v29 = vrot.slane %v782_v52, 7  ;;  %v793_v33 = vshll.u32 %v6170_v49, 16  ;;  %v7777_v38 = vand.u32 %v5873_v60, %v7093_v5 }
  0xd3   : > { %v5806_v19 = vcombine.low %v1358_v50, %v1368_v8  ;;  %v3625_v21 = vsel %vm7521_vm15, %v5978_v39, %v3624_v1  ;;  %v792_v13 = vrot.slane %v790_v18, 7  ;;  %v3626_v30 = vrot.slane %v3624_v1, 4  ;;  %v2816_v59 = vld [vmem:[#allocation2 + $0x74] sm:$0x1]  ;;  %v3525_v8 = vld [vmem:[#allocation2 + $0x78] sm:$0xe] }
  0xd4   : > { %v3627_v17 = vrot.slane %v7498_v43, 5  ;;  %v5979_v4 = vrot.slane %v3523_v55, 9  ;;  %v787_v56 = vor.u32 %v785_v53, %v784_v29  ;;  %v788_v20 = vrot.slane %v784_v29, 4  ;;  %v3524_v43 = vld [vmem:[#allocation2 + $0x6c] sm:$0xe]  ;;  %6394 = vmatprep.subr.bf16.mxu1 %v7777_v38 }
  0xd5   : > { %6353 = vmatmul.mubr.msk.bf16.gmra.mrb[24].mxu1 %vm1467_vm8, %v5806_v19  ;;  %v3631_v36 = vrot.slane %v7529_v2, 5  ;;  %v3634_v37 = vrot.slane %v7555_v31, 5  ;;  %v795_v3 = vor.u32 %v793_v33, %v792_v13  ;;  %v797_v16 = vrot.slane %v792_v13, 4  ;;  %v7788_v55 = vld [vmem:[#allocation2 + $0x7c] sm:$0xf] }
  0xd6   : > { %v3628_v39 = vsel %vm7521_vm15, %v3626_v30, %v3627_v17  ;;  %v968_v58 = vsel %vm7223_vm11, %v787_v56, %v967_v47  ;;  %v5980_v40 = vrot.slane %v3524_v43, 9  ;;  %v3638_v52 = vrot.slane %v2815_v45, 5  ;;  %v7808_v60 = vld [vmem:[#allocation2 + $0x80] sm:$0x1] }
  0xd7   : > { %v7760_v32 = vld [vmem:[#allocation2 + $0xa8] sm:$0xf]  ;;  %v5995_v10 = vcombine.low %v3625_v21, %v3628_v39  ;;  %v3632_v2 = vsel %vm7521_vm15, %v5979_v4, %v3631_v36  ;;  %v3633_v31 = vrot.slane %v3631_v36, 4  ;;  %v796_v26 = vsel %vm7212_vm10, %v788_v20, %v795_v3  ;;  %969 = vst [vmem:[#allocation2 + $0xb4] sm:$0xf] %v968_v58 }
  0xd8   : > { %v1370_v11 = vshrl.u32 %v7760_v32, 16  ;;  %v1373_v61 = vshll.u32 %v7760_v32, 16  ;;  %v972_v15 = vsel %vm7229_vm12, %v797_v16, %v971_v22  ;;  %970 = vst.msk [vmem:[#allocation2 + $0xb8] sm:$0xf] %vm278_vm1, %v796_v26  ;;  %v3641_v1 = vrot.slane %v2816_v59, 5 }
  0xd9   : > { %973 = vst [vmem:[#allocation2 + $0xbc] sm:$0x1] %v972_v15  ;;  %6510 = vmatprep.mubr.msk.bf16.mxu0 %vm1467_vm8, %v5995_v10  ;;  %v3635_v27 = vsel %vm7521_vm15, %v3633_v31, %v3634_v37  ;;  %v7779_v41 = vld [vmem:[#allocation2 + $0xac] sm:$0xf]  ;;  %v7781_v12 = vld [vmem:[#allocation2 + $0xb0] sm:$0x1]  ;;  %v3639_v13 = vsel %vm7521_vm15, %v5980_v40, %v3638_v52 }
  0xda   : > { %v1372_v25 = vrot.slane %v1370_v11, 4  ;;  %v1375_v28 = vrot.slane %v1373_v61, 5  ;;  %v5996_v46 = vcombine.low %v3632_v2, %v3635_v27  ;;  %v1379_v42 = vshll.u32 %v7779_v41, 16  ;;  %v2821_v2 = vld [vmem:[#allocation2 + $0x88] sm:$0xf] }
  0xdb   : > { %v1383_v49 = vshrl.u32 %v7779_v41, 16  ;;  %v1389_v50 = vshll.u32 %v7781_v12, 16  ;;  %v3640_v29 = vrot.slane %v3638_v52, 4  ;;  %v5981_v47 = vrot.slane %v3525_v8, 9  ;;  %v2822_v31 = vld [vmem:[#allocation2 + $0x8c] sm:$0x1] }
  0xdc   : > { %v1376_v53 = vor.u32 %v1375_v28, %v1372_v25  ;;  %6511 = vmatmul.mubr.msk.bf16.gmra.mrb[12].mxu0 %vm1467_vm8, %v5996_v46  ;;  %v1381_v62 = vrot.slane %v1379_v42, 5  ;;  %v3645_v30 = vrot.slane %v7788_v55, 5  ;;  %v3526_v15 = vld [vmem:[#allocation2 + $0x84] sm:$0xe]  ;;  %v3527_v40 = vld [vmem:[#allocation2 + $0x90] sm:$0xe] }
  0xdd   : > { %v1385_v23 = vrot.slane %v1383_v49, 4  ;;  %v1391_v19 = vrot.slane %v1389_v50, 5  ;;  %v3642_v36 = vsel %vm7521_vm15, %v3640_v29, %v3641_v1  ;;  %v3648_v42 = vrot.slane %v7808_v60, 5  ;;  %v2824_v49 = vld [vmem:[#allocation2 + $0x94] sm:$0xf] }
  0xde   : > { %v1377_v18 = vrot.slane %v1376_v53, 4  ;;  %v7790_v21 = vld [vmem:[#allocation2 + $0xb4] sm:$0xf]  ;;  %v5997_v10 = vcombine.low %v3639_v13, %v3642_v36  ;;  %v3646_v28 = vsel %vm7521_vm15, %v5981_v47, %v3645_v30  ;;  %v3647_v46 = vrot.slane %v3645_v30, 4  ;;  %v2825_v1 = vld [vmem:[#allocation2 + $0x98] sm:$0x1] }
  0xdf   : > { %v1386_v33 = vor.u32 %v1385_v23, %v1381_v62  ;;  %v7797_v4 = vld [vmem:[#allocation2 + $0xb8] sm:$0xf]  ;;  %v1394_v20 = vshrl.u32 %v7790_v21, 16  ;;  %v1397_v22 = vshll.u32 %v7790_v21, 16  ;;  %v5982_v52 = vrot.slane %v3526_v15, 9 }
  0xe0   : > { %v1382_v17 = vsel %vm7206_vm9, %v1377_v18, %v1381_v62  ;;  %v7799_v56 = vld [vmem:[#allocation2 + $0xbc] sm:$0x1]  ;;  %v1403_v3 = vshll.u32 %v7797_v4, 16  ;;  %v1407_v16 = vshrl.u32 %v7797_v4, 16  ;;  %6514 = vmatprep.mubr.msk.bf16.mxu0 %vm1467_vm8, %v5997_v10  ;;  %v3652_v53 = vrot.slane %v2821_v2, 5 }
  0xe1   : > { %v1387_v37 = vrot.slane %v1386_v33, 4  ;;  %v1413_v39 = vshll.u32 %v7799_v56, 16  ;;  %v1396_v43 = vrot.slane %v1394_v20, 4  ;;  %v1399_v58 = vrot.slane %v1397_v22, 5  ;;  %v2827_v30 = vld [vmem:[#allocation2 + $0xa0] sm:$0xf] }
  0xe2   : > { %v1405_v61 = vrot.slane %v1403_v3, 5  ;;  %v1409_v26 = vrot.slane %v1407_v16, 4  ;;  %v3649_v62 = vsel %vm7521_vm15, %v3647_v46, %v3648_v42  ;;  %v3655_v23 = vrot.slane %v2822_v31, 5  ;;  %v6949_v20 = vld [vmem:[#allocation2] sm:$0xf] }
  0xe3   : > { %v1392_v11 = vsel %vm7206_vm9, %v1387_v37, %v1391_v19  ;;  %v1400_v27 = vor.u32 %v1399_v58, %v1396_v43  ;;  %v1415_v59 = vrot.slane %v1413_v39, 5  ;;  %v5983_v18 = vrot.slane %v3527_v40, 9  ;;  %v3528_v19 = vld [vmem:[#allocation2 + $0x9c] sm:$0xe]  ;;  %v7825_v22 = vld [vmem:[#allocation2 + $0x4] sm:$0xf] }
  0xe4   : > { %v5807_v45 = vcombine.low %v1382_v17, %v1392_v11  ;;  %v1410_v25 = vor.u32 %v1409_v26, %v1405_v61  ;;  %v5998_v33 = vcombine.low %v3646_v28, %v3649_v62  ;;  %v3653_v13 = vsel %vm7521_vm15, %v5982_v52, %v3652_v53  ;;  %v2828_v16 = vld [vmem:[#allocation2 + $0xa4] sm:$0x1]  ;;  %v2830_v39 = vld [vmem:[#allocation2 + $0xac] sm:$0xf]  ;;  %v3529_v2 = vld [vmem:[#allocation2 + $0xa8] sm:$0xe] }
  0xe5   : > { %v1401_v50 = vrot.slane %v1400_v27, 4  ;;  %v3654_v47 = vrot.slane %v3652_v53, 4  ;;  %v5825_v36 = vcombine.low %v6949_v20, %v7825_v22  ;;  %v3659_v37 = vrot.slane %v2824_v49, 5  ;;  %v2831_v15 = vld [vmem:[#allocation2 + $0xb0] sm:$0x1]  ;;  %v365_v52 = vld [vmem:[%s7178_s10 + $0xf8] sm:$0xff] }
  0xe6   : > { %6356 = vmatprep.mubr.msk.bf16.mxu1 %vm1467_vm8, %v5807_v45  ;;  %v1411_v8 = vrot.slane %v1410_v25, 4  ;;  %v3662_v3 = vrot.slane %v2825_v1, 5  ;;  %6515 = vmatmul.mubr.msk.bf16.gmra.mrb[16].mxu0 %vm1467_vm8, %v5998_v33  ;;  %v5984_v10 = vrot.slane %v3528_v19, 9  ;;  %v3666_v26 = vrot.slane %v2827_v30, 5  ;;  %v3530_v40 = vld [vmem:[#allocation2 + $0xb4] sm:$0xe] }
  0xe7   : > { %v1406_v29 = vsel %vm7206_vm9, %v1401_v50, %v1405_v61  ;;  %v3656_v58 = vsel %vm7521_vm15, %v3654_v47, %v3655_v23  ;;  %v3660_v11 = vsel %vm7521_vm15, %v5983_v18, %v3659_v37  ;;  %v3661_v61 = vrot.slane %v3659_v37, 4  ;;  %v2834_v49 = vld [vmem:[#allocation2 + $0xbc] sm:$0x1]  ;;  %v364_v50 = vld [vmem:[%s7178_s10 + $0xf0] sm:$0xff]  ;;  %v6951_v62 = vld [vmem:[#allocation2 + $0xc] sm:$0xf] }
  0xe8   : > { %v1416_v17 = vsel %vm7206_vm9, %v1411_v8, %v1415_v59  ;;  %v5999_v31 = vcombine.low %v3653_v13, %v3656_v58  ;;  %v3669_v45 = vrot.slane %v2828_v16, 5  ;;  %v3673_v27 = vrot.slane %v2830_v39, 5  ;;  %v2833_v59 = vld [vmem:[#allocation2 + $0xb8] sm:$0xf]  ;;  %v7842_v23 = vld [vmem:[#allocation2 + $0x10] sm:$0xf] }
  0xe9   : > { %v5808_v43 = vcombine.low %v1406_v29, %v1416_v17  ;;  %v3663_v25 = vsel %vm7521_vm15, %v3661_v61, %v3662_v3  ;;  %v3667_v28 = vsel %vm7521_vm15, %v5984_v10, %v3666_v26  ;;  %v3668_v46 = vrot.slane %v3666_v26, 4  ;;  %v6054_v13 = vld [vmem:[%s8994_s3 + $0x7] sm:$0x1]  ;;  %v6953_v17 = vld [vmem:[#allocation3] ss:$0 sm:$0xff] }
  0xea   : > { %6518 = vmatprep.mubr.msk.bf16.mxu0 %vm1467_vm8, %v5999_v31  ;;  %v5985_v42 = vrot.slane %v3529_v2, 9  ;;  %v6000_v53 = vcombine.low %v3660_v11, %v3663_v25  ;;  %v3675_v1 = vrot.slane %v3673_v27, 4  ;;  %v3676_v8 = vrot.slane %v2831_v15, 5  ;;  %v6954_v37 = vld [vmem:[#allocation2 + $0x18] sm:$0xf] }
  0xeb   : > { %6357 = vmatmul.mubr.msk.bf16.gmra.mrb[28].mxu1 %vm1467_vm8, %v5808_v43  ;;  %v5826_v18 = vcombine.low %v6951_v62, %v7842_v23  ;;  %v3670_v19 = vsel %vm7521_vm15, %v3668_v46, %v3669_v45  ;;  %v5986_v29 = vrot.slane %v3530_v40, 9  ;;  %v3680_v33 = vrot.slane %v2833_v59, 5  ;;  %v7850_v3 = vld [vmem:[#allocation2 + $0x1c] sm:$0xf]  ;;  %v6956_v10 = vld [vmem:[#allocation4] ss:$0 sm:$0xff] }
  0xec   : > { %6362 = vmatprep.mubr.msk.bf16.mxu1 %vm1467_vm8, %v5825_v36  ;;  %v6001_v47 = vcombine.low %v3667_v28, %v3670_v19  ;;  %v3683_v30 = vrot.slane %v2834_v49, 5  ;;  %v403_v20 = vmul.f32 %v6953_v17, %v364_v50  ;;  %v404_v36 = vmul.f32 %v6953_v17, %v365_v52  ;;  %v5906_v59 = vld [vmem:[%s8994_s3 + $0x3] sm:$0x1]  ;;  %v6957_v49 = vld [vmem:[#allocation2 + $0x24] sm:$0xf] }
  0xed   : > { %v5827_v16 = vcombine.low %v6954_v37, %v7850_v3  ;;  %v3674_v39 = vsel %vm7521_vm15, %v5985_v42, %v3673_v27  ;;  %v3682_v43 = vrot.slane %v3680_v33, 4  ;;  %v3677_v58 = vsel %vm7521_vm15, %v3675_v1, %v3676_v8  ;;  %v7873_v50 = vld [vmem:[#allocation2 + $0x28] sm:$0xf]  ;;  %v6959_v8 = vld [vmem:[#allocation2 + $0x30] sm:$0xf] }
  0xee   : > { %6519 = vmatmul.mubr.msk.bf16.gmra.mrb[20].mxu0 %vm1467_vm8, %v6000_v53  ;;  %v442_v2 = vadd.f32 %v6956_v10, %v403_v20  ;;  %v443_v31 = vadd.f32 %v6956_v10, %v404_v36  ;;  %v7859_v11 = vand.u32 %v6054_v13, %v7093_v5  ;;  %v3681_v61 = vsel %vm7521_vm15, %v5986_v29, %v3680_v33  ;;  %v7879_v62 = vld [vmem:[#allocation2 + $0x34] sm:$0xf]  ;;  %v974_v19 = vld [vmem:[#allocation2 + $0xc0] sm:$0xf]  ;;  %v978_v29 = vld [vmem:[#allocation2 + $0xc8] sm:$0x1] }
  0xef   : > { %6522 = vmatprep.mubr.msk.bf16.mxu0 %vm1467_vm8, %v6001_v47  ;;  %v3684_v26 = vsel %vm7521_vm15, %v3682_v43, %v3683_v30  ;;  %v6002_v27 = vcombine.low %v3674_v39, %v3677_v58  ;;  %v5828_v52 = vcombine.low %v6957_v49, %v7873_v50  ;;  %v6961_v37 = vld [vmem:[#allocation2 + $0x3c] sm:$0xf]  ;;  %v6963_v43 = vld [vmem:[#allocation2 + $0x48] sm:$0xf]  ;;  %v3064_v58 = vshll.u32 %v7788_v55, 16 }
  0xf0   : > { %v6171_v15 = vpack.c.bf16 %v442_v2, %v442_v2  ;;  %v6172_v45 = vpack.c.bf16 %v443_v31, %v443_v31  ;;  %6564 = vmatprep.subr.bf16.mxu0 %v7859_v11  ;;  %v6003_v42 = vcombine.low %v3681_v61, %v3684_v26  ;;  %v5831_v0 = vcombine.low %v6963_v43, %v7897_v57  ;;  %v6968_v49 = vld [vmem:[#allocation2 + $0x60] sm:$0xf] }
  0xf1   : > { %v3068_v14 = vshrl.u32 %v7788_v55, 16 }
  0xf2   : > { %v799_v40 = vshrl.u32 %v6171_v15, 16  ;;  %v802_v25 = vshll.u32 %v6171_v15, 16  ;;  %v807_v28 = vshrl.u32 %v6172_v45, 16  ;;  %v810_v46 = vshll.u32 %v6172_v45, 16 }
  0xf3   : > { %6363 = vmatmul.mubr.msk.bf16.vlgmr.msra.gmra.mrb[0].mxu1 %vm1467_vm8, %v5826_v18  ;;  %v5829_v18 = vcombine.low %v6959_v8, %v7879_v62  ;;  %v7904_v45 = vrot.slane %v3064_v58, 5  ;;  %v1977_v58 = vld [vmem:[#allocation2 + $0x18] sm:$0xe] }
  0xf4   : > { %6395 = vmatpush3.bf16.msra.mxu1 %v7777_v38  ;;  %6366 = vmatprep.mubr.msk.bf16.mxu1 %vm1467_vm8, %v5827_v16  ;;  %v801_v53 = vrot.slane %v799_v40, 7  ;;  %v809_v1 = vrot.slane %v807_v28, 7  ;;  %v7877_v38 = vand.u32 %v5906_v59, %v7093_v5  ;;  %v7894_v16 = vld [vmem:[#allocation2 + $0x40] sm:$0xf]  ;;  %v7908_v28 = vld [vmem:[#allocation2 + $0x58] sm:$0xf] }
  0xf5   : > { %v5830_v39 = vcombine.low %v6961_v37, %v7894_v16  ;;  %9025 = vst [vmem:[#allocation6_spill] sm:$0xff] %v7904_v45 }
  0xf6   : > { %6523 = vmatmul.mubr.msk.bf16.gmra.mrb[24].mxu0 %vm1467_vm8, %v6002_v27  ;;  %v804_v33 = vor.u32 %v802_v25, %v801_v53  ;;  %v805_v13 = vrot.slane %v801_v53, 4  ;;  %v812_v47 = vor.u32 %v810_v46, %v809_v1  ;;  %v814_v30 = vrot.slane %v809_v1, 4  ;;  %6428 = vmatprep.subr.bf16.mxu1 %v7877_v38  ;;  %v6965_v25 = vld [vmem:[#allocation2 + $0x54] sm:$0xf]  ;;  %v6915_v53 = vld [vmem:[#allocation2 + $0x18] sm:$0xff]  }
  0xf7   : > { %6526 = vmatprep.mubr.msk.bf16.mxu0 %vm1467_vm8, %v6003_v42  ;;  %v3070_v27 = vrot.slane %v3068_v14, 4  ;;  %v5832_v55 = vcombine.low %v6965_v25, %v7908_v28  ;;  %v7913_v42 = vld [vmem:[#allocation2 + $0x64] sm:$0xf] }
  0xf8   : > { %v813_v17 = vsel %vm7212_vm10, %v805_v13, %v812_v47  ;;  %v975_v20 = vsel %vm7223_vm11, %v804_v33, %v974_v19  ;;  %v979_v36 = vsel %vm7229_vm12, %v814_v30, %v978_v29  ;;  %v1975_v19 = vld [vmem:[#allocation2] sm:$0xe]  ;;  %v2028_v29 = vrot.slane %v7825_v22, 5  ;;  %v6969_v33 = vld [vmem:[#allocation2 + $0x8] sm:$0x1] }
  0xf9   : > { %976 = vst [vmem:[#allocation2 + $0xc0] sm:$0xf] %v975_v20  ;;  %977 = vst.msk [vmem:[#allocation2 + $0xc4] sm:$0xf] %vm278_vm1, %v813_v17  ;;  %v3071_v8 = vor.u32 %v3070_v27, %v7904_v45  ;;  %v2031_v13 = vrot.slane %v6969_v33, 5  ;;  %v3074_v17 = vshll.u32 %v7808_v60, 16  ;;  %v5836_v22 = vcombine.low %v7654_v44, %v7656_v54 }
  0xfa   : > { %980 = vst [vmem:[#allocation2 + $0xc8] sm:$0x1] %v979_v36  ;;  %v6970_v47 = vld [vmem:[#allocation2 + $0x14] sm:$0x1]  ;;  %v1976_v20 = vld [vmem:[#allocation2 + $0xc] sm:$0xe] }
  0xfb   : > { %6367 = vmatmul.mubr.msk.bf16.gmra.mrb[4].mxu1 %vm1467_vm8, %v5828_v52  ;;  %v5833_v52 = vcombine.low %v6968_v49, %v7913_v42  ;;  %v2038_v30 = vrot.slane %v6970_v47, 5  ;;  %v2042_v36 = vrot.slane %v7850_v3, 5  ;;  %v7925_v37 = vrot.slane %v3071_v8, 4  ;;  %v6103_v60 = vld [vmem:[%s8994_s3 + $0x8] sm:$0x1] }
  0xfc   : > { %6370 = vmatprep.mubr.msk.bf16.mxu1 %vm1467_vm8, %v5829_v18  ;;  %v2035_v18 = vrot.slane %v7842_v23, 5  ;;  %v7927_v23 = vld [vmem:[#allocation2 + $0x70] sm:$0xf]  ;;  %v6916_v14 = vld [vmem:[#allocation2 + $0x24] sm:$0xff]   ;;  %v5837_v3 = vcombine.low %v7688_v9, %v7710_v51  ;;  %v7944_v49 = vand.u32 %v6103_v60, %v7093_v5  ;;  %v6975_v47 = vld [vmem:[#allocation2 + $0x38] sm:$0x1] }
  0xfd   : > { %9026 = vst [vmem:[#allocation7_spill] sm:$0xff] %v7925_v37  ;;  %v1979_v27 = vld [vmem:[#allocation2 + $0x30] sm:$0xe]  ;;  %v2044_v25 = vrot.slane %v2042_v36, 4  ;;  %v2070_v60 = vrot.slane %v7897_v57, 5  ;;  %v2077_v54 = vrot.slane %v7908_v28, 5 }
  0xfe   : > { %v1984_v51 = vld [vmem:[#allocation2 + $0x6c] sm:$0xe]  ;;  %v4350_v28 = vld [vmem:[#allocation2 + $0x2c] sm:$0x1] }
 0x100   : > { %v2836_v10 = vld [vmem:[#allocation2 + $0xc4] sm:$0xf]  ;;  %v3531_v31 = vld [vmem:[#allocation2 + $0xc0] sm:$0xe] }
 0x101   : > { %v2837_v2 = vld [vmem:[#allocation2 + $0xc8] sm:$0x1]  ;;  %v5987_v61 = vrot.slane %v3531_v31, 9  ;;  %v3687_v26 = vrot.slane %v2836_v10, 5  ;;  %v5857_v10 = vrot.slane %v1975_v19, 9  ;;  %v2049_v31 = vrot.slane %v7873_v50, 5 }
 0x102   : > { %v3690_v15 = vrot.slane %v2837_v2, 5  ;;  %v1978_v2 = vld [vmem:[#allocation2 + $0x24] sm:$0xe]  ;;  %v5861_v19 = vrot.slane %v1979_v27, 9  ;;  %v4346_v27 = vld [vmem:[#allocation2 + $0x1c] sm:$0xf] }
 0x103   : > { %6371 = vmatmul.mubr.msk.bf16.gmra.mrb[8].mxu1 %vm1467_vm8, %v5830_v39  ;;  %v3688_v59 = vsel %vm7521_vm15, %v5987_v61, %v3687_v26  ;;  %v3689_v40 = vrot.slane %v3687_v26, 4  ;;  %v6971_v39 = vld [vmem:[#allocation2 + $0x6c] sm:$0xf]  ;;  %v2056_v61 = vrot.slane %v7879_v62, 5  ;;  %v5858_v26 = vrot.slane %v1976_v20, 9 }
 0x104   : > { %6374 = vmatprep.mubr.msk.bf16.mxu1 %vm1467_vm8, %v5831_v0  ;;  %v5834_v43 = vcombine.low %v6971_v39, %v7927_v23  ;;  %v5835_v0 = vcombine.low %v7626_v34, %v7645_v35  ;;  %v5838_v34 = vcombine.low %v7719_v24, %v7721_v6  ;;  %v2030_v35 = vrot.slane %v2028_v29, 4  ;;  %v6974_v62 = vld [vmem:[#allocation2 + $0x2c] sm:$0x1]  ;;  %v1980_v39 = vld [vmem:[#allocation2 + $0x3c] sm:$0xe] }
 0x105   : > { %v3691_v46 = vsel %vm7521_vm15, %v3689_v40, %v3690_v15  ;;  %v2037_v15 = vrot.slane %v2035_v18, 4  ;;  %v5859_v40 = vrot.slane %v1977_v58, 9  ;;  %v2051_v8 = vrot.slane %v2049_v31, 4  ;;  %v1981_v58 = vld [vmem:[#allocation2 + $0x48] sm:$0xe] }
 0x106   : > { %v6004_v1 = vcombine.low %v3688_v59, %v3691_v46  ;;  %v6917_v59 = vld [vmem:[#allocation2 + $0x30] sm:$0xff]   ;;  %v2058_v33 = vrot.slane %v2056_v61, 4  ;;  %v2059_v20 = vrot.slane %v6975_v47, 5  ;;  %v7955_v5 = vsel %vm7521_vm15, %v5857_v10, %v2028_v29  ;;  %v6976_v10 = vld [vmem:[#allocation2 + $0x44] sm:$0x1] }
 0x107   : > { %v7975_v29 = vsel %vm7521_vm15, %v5859_v40, %v2042_v36  ;;  %v6977_v40 = vld [vmem:[#allocation2 + $0x50] sm:$0x1]  ;;  %v4403_v47 = vshll.u32 %v4346_v27, 16 }
 0x108   : > { %6527 = vmatmul.mubr.msk.bf16.gmra.mrb[28].mxu0 %vm1467_vm8, %v6004_v1  ;;  %v2063_v1 = vrot.slane %v7894_v16, 5  ;;  %v7959_v16 = vsel %vm7521_vm15, %v2030_v35, %v2031_v13  ;;  %v6919_v35 = vld [vmem:[#allocation2 + $0x48] sm:$0xff]  }
 0x109   : > { %6532 = vmatprep.mubr.msk.bf16.mxu0 %vm1467_vm8, %v6915_v53  ;;  %v2052_v53 = vrot.slane %v6974_v62, 5 }
 0x10b   : > { %6375 = vmatmul.mubr.msk.bf16.gmra.mrb[12].mxu1 %vm1467_vm8, %v5832_v55  ;;  %v6973_v55 = vld [vmem:[#allocation2 + $0x20] sm:$0x1]  ;;  %v7988_v36 = vsel %vm7521_vm15, %v2051_v8, %v2052_v53 }
 0x10c   : > { %6378 = vmatprep.mubr.msk.bf16.mxu1 %vm1467_vm8, %v5833_v52  ;;  %v2045_v46 = vrot.slane %v6973_v55, 5  ;;  %v5860_v52 = vrot.slane %v1978_v2, 9  ;;  %v6918_v2 = vld [vmem:[#allocation2 + $0x3c] sm:$0xff]   ;;  %v1982_v55 = vld [vmem:[#allocation2 + $0x54] sm:$0xe] }
 0x10e   : > { %v7979_v13 = vsel %vm7521_vm15, %v2044_v25, %v2045_v46  ;;  %v7984_v57 = vsel %vm7521_vm15, %v5860_v52, %v2049_v31  ;;  %v5863_v31 = vrot.slane %v1981_v58, 9  ;;  %v2073_v25 = vrot.slane %v6977_v40, 5  ;;  %v4351_v58 = vld [vmem:[#allocation2 + $0x30] sm:$0xf] }
 0x110   : > { %6533 = vmatmul.mubr.msk.bf16.vlgmr.msra.gmra.mrb[0].mxu0 %vm1467_vm8, %v6916_v14  ;;  %v7966_v14 = vrot.slane %v3074_v17, 5  ;;  %v5862_v17 = vrot.slane %v1980_v39, 9  ;;  %v4348_v39 = vld [vmem:[#allocation2 + $0x24] sm:$0xf] }
 0x111   : > { %6565 = vmatpush3.bf16.msra.mxu0 %v7859_v11  ;;  %6536 = vmatprep.mubr.msk.bf16.mxu0 %vm1467_vm8, %v6917_v59  ;;  %v7971_v11 = vsel %vm7521_vm15, %v2037_v15, %v2038_v30  ;;  %v2066_v30 = vrot.slane %v6976_v10, 5  ;;  %v7996_v15 = vsel %vm7521_vm15, %v2058_v33, %v2059_v20  ;;  %v2072_v59 = vrot.slane %v2070_v60, 4 }
 0x112   : > { %9027 = vst [vmem:[#allocation8_spill] sm:$0xff] %v7966_v14  ;;  %6598 = vmatprep.subr.bf16.mxu0 %v7944_v49  ;;  %v4407_v20 = vshrl.u32 %v4346_v27, 16  ;;  %v4421_v9 = vshll.u32 %v4348_v39, 16 }
 0x113   : > { %6379 = vmatmul.mubr.msk.bf16.gmra.mrb[16].mxu1 %vm1467_vm8, %v5834_v43  ;;  %v7963_v43 = vsel %vm7521_vm15, %v5858_v26, %v2035_v18  ;;  %v4345_v18 = vld [vmem:[#allocation2 + $0x18] sm:$0xf]  ;;  %v7992_v26 = vsel %vm7521_vm15, %v5861_v19, %v2056_v61  ;;  %v8008_v19 = vsel %vm7521_vm15, %v5862_v17, %v2063_v1  ;;  %v5864_v17 = vrot.slane %v1982_v55, 9 }
 0x114   : > { %6382 = vmatprep.mubr.msk.bf16.mxu1 %vm1467_vm8, %v5835_v0  ;;  %v2065_v0 = vrot.slane %v2063_v1, 4  ;;  %v4394_v46 = vshrl.u32 %v4345_v18, 16  ;;  %v4397_v52 = vshll.u32 %v4345_v18, 16  ;;  %v8025_v18 = vsel %vm7521_vm15, %v5863_v31, %v2070_v60  ;;  %v8045_v60 = vld [vmem:[#allocation2 + $0x20] sm:$0x1] }
 0x115   : > { %v8034_v44 = vsel %vm7521_vm15, %v2072_v59, %v2073_v25  ;;  %v4418_v31 = vshrl.u32 %v4348_v39, 16  ;;  %v6920_v59 = vld [vmem:[#allocation2 + $0x54] sm:$0xff]   ;;  %v6978_v25 = vld [vmem:[#allocation2 + $0x5c] sm:$0x1]  ;;  %9028 = vst [vmem:[#allocation9_spill] sm:$0xff] %v8045_v60  ;;  %v8049_v39 = vsel %vm7521_vm15, %v5864_v17, %v2077_v54  ;;  %v5866_v61 = vrot.slane %v1984_v51, 9 }
 0x116   : > { %v8012_v33 = vsel %vm7521_vm15, %v2065_v0, %v2066_v30  ;;  %v4349_v0 = vld [vmem:[#allocation2 + $0x28] sm:$0xf]  ;;  %v4396_v10 = vrot.slane %v4394_v46, 4  ;;  %v4399_v30 = vrot.slane %v4397_v52, 5  ;;  %v2080_v55 = vrot.slane %v6978_v25, 5 }
 0x117   : > { %v4427_v27 = vshll.u32 %v4349_v0, 16  ;;  %v4431_v40 = vshrl.u32 %v4349_v0, 16  ;;  %v2091_v52 = vrot.slane %v7927_v23, 5  ;;  %v4420_v53 = vrot.slane %v4418_v31, 4 }
 0x118   : > { %6537 = vmatmul.mubr.msk.bf16.gmra.mrb[4].mxu0 %vm1467_vm8, %v6918_v2  ;;  %v2084_v2 = vrot.slane %v7913_v42, 5  ;;  %v6921_v42 = vld [vmem:[#allocation2 + $0x60] sm:$0xff]   ;;  %v4400_v0 = vor.u32 %v4399_v30, %v4396_v10  ;;  %v4423_v25 = vrot.slane %v4421_v9, 5  ;;  %v4413_v23 = vshll.u32 %v8045_v60, 16 }
 0x119   : > { %6540 = vmatprep.mubr.msk.bf16.mxu0 %vm1467_vm8, %v6919_v35  ;;  %v4409_v35 = vrot.slane %v4407_v20, 4  ;;  %v6979_v20 = vld [vmem:[#allocation2 + $0x68] sm:$0x1]  ;;  %v8053_v62 = vrot.slane %v4427_v27, 5  ;;  %v4433_v50 = vrot.slane %v4431_v40, 4  ;;  %v2093_v17 = vrot.slane %v2091_v52, 4 }
 0x11a   : > { %v2087_v1 = vrot.slane %v6979_v20, 5  ;;  %v2086_v8 = vrot.slane %v2084_v2, 4  ;;  %v4442_v30 = vshrl.u32 %v4351_v58, 16  ;;  %v4445_v31 = vshll.u32 %v4351_v58, 16  ;;  %v6981_v40 = vld [vmem:[#allocation2 + $0x7c] sm:$0xf] }
 0x11b   : > { %6383 = vmatmul.mubr.msk.bf16.gmra.mrb[20].mxu1 %vm1467_vm8, %v5836_v22  ;;  %v1983_v22 = vld [vmem:[#allocation2 + $0x60] sm:$0xe]  ;;  %v9029_v9 = vcombine.low %v7760_v32, %v7779_v41  ;;  %v4401_v6 = vrot.slane %v4400_v0, 4  ;;  %v8079_v32 = vsel %vm7521_vm15, %v5866_v61, %v2091_v52  ;;  %v4424_v27 = vor.u32 %v4423_v25, %v4420_v53  ;;  %v6922_v0 = vld [vmem:[#allocation2 + $0x6c] sm:$0xff]   ;;  %v6923_v53 = vld [vmem:[#allocation2 + $0x78] sm:$0xff]  }
 0x11c   : > { %6386 = vmatprep.mubr.msk.bf16.mxu1 %vm1467_vm8, %v5837_v3  ;;  %v8040_v3 = vrot.slane %v4403_v47, 5  ;;  %v5865_v46 = vrot.slane %v1983_v22, 9  ;;  %v2079_v47 = vrot.slane %v2077_v54, 4  ;;  %v6980_v54 = vld [vmem:[#allocation2 + $0x74] sm:$0x1]  ;;  %v8075_v58 = vsel %vm7521_vm15, %v2086_v8, %v2087_v1 }
 0x11d   : > { %v2094_v10 = vrot.slane %v6980_v54, 5  ;;  %v4444_v61 = vrot.slane %v4442_v30, 4  ;;  %v4447_v52 = vrot.slane %v4445_v31, 5  ;;  %v4354_v54 = vld [vmem:[#allocation2 + $0x3c] sm:$0xf] }
 0x11e   : > { %v4410_v22 = vor.u32 %v4409_v35, %v8040_v3  ;;  %v8067_v51 = vsel %vm7521_vm15, %v2079_v47, %v2080_v55  ;;  %v8071_v24 = vsel %vm7521_vm15, %v5865_v46, %v2084_v2  ;;  %v1985_v35 = vld [vmem:[#allocation2 + $0x78] sm:$0xe]  ;;  %v8081_v55 = vld [vmem:[#allocation2 + $0x34] sm:$0xf]  ;;  %v4415_v47 = vrot.slane %v4413_v23, 5 }
 0x11f   : > { %9030 = vst [vmem:[#allocation10_spill] sm:$0xff] %v8081_v55  ;;  %v4434_v2 = vor.u32 %v4433_v50, %v8053_v62  ;;  %v1986_v46 = vld [vmem:[#allocation2 + $0x84] sm:$0xe]  ;;  %v8086_v8 = vsel %vm7521_vm15, %v2093_v17, %v2094_v10  ;;  %v5867_v1 = vrot.slane %v1985_v35, 9  ;;  %v4406_v25 = vsel %vm7206_vm9, %v4401_v6, %v8040_v3  ;;  %v6984_v35 = vld [vmem:[#allocation2 + $0x8c] sm:$0x1] }
 0x120   : > { %6541 = vmatmul.mubr.msk.bf16.gmra.mrb[8].mxu0 %vm1467_vm8, %v6920_v59  ;;  %v2098_v59 = vrot.slane %v6981_v40, 5  ;;  %v4451_v23 = vshll.u32 %v8081_v55, 16  ;;  %v4455_v50 = vshrl.u32 %v8081_v55, 16  ;;  %v5868_v17 = vrot.slane %v1986_v46, 9 }
 0x121   : > { %6544 = vmatprep.mubr.msk.bf16.mxu0 %vm1467_vm8, %v6921_v42  ;;  %v4411_v42 = vrot.slane %v4410_v22, 4  ;;  %v4435_v30 = vrot.slane %v4434_v2, 4  ;;  %v2108_v45 = vrot.slane %v6984_v35, 5  ;;  %v9031_v3 = vcombine.low %v7790_v21, %v7797_v4 }
 0x122   : > { %v2100_v40 = vrot.slane %v2098_v59, 4  ;;  %v9033_v2 = vcombine.low %v7955_v5, %v7959_v16  ;;  %v8113_v46 = vrot.slane %v4451_v23, 5  ;;  %v4469_v35 = vshll.u32 %v4354_v54, 16 }
 0x123   : > { %6387 = vmatmul.mubr.msk.bf16.gmra.mrb[24].mxu1 %vm1467_vm8, %v5838_v34  ;;  %v4437_v34 = vshll.u32 %v4350_v28, 16  ;;  %v6982_v28 = vld [vmem:[#allocation2 + $0x88] sm:$0xf]  ;;  %v4416_v10 = vsel %vm7206_vm9, %v4411_v42, %v4415_v47  ;;  %v4448_v42 = vor.u32 %v4447_v52, %v4444_v61  ;;  %v4466_v47 = vshrl.u32 %v4354_v54, 16 }
 0x124   : > { %6390 = vmatprep.mubr.msk.bf16.mxu1 %vm1467_vm8, %v9029_v9  ;;  %v2105_v20 = vrot.slane %v6982_v28, 5  ;;  %v4425_v9 = vrot.slane %v4424_v27, 4  ;;  %v6983_v28 = vld [vmem:[#allocation2 + $0x80] sm:$0x1]  ;;  %v8104_v27 = vld [vmem:[#allocation2 + $0x38] sm:$0x1]  ;;  %v8124_v5 = vsel %vm7521_vm15, %v5867_v1, %v2098_v59 }
 0x125   : > { %v4439_v22 = vrot.slane %v4437_v34, 5  ;;  %v2101_v60 = vrot.slane %v6983_v28, 5  ;;  %9032 = vst [vmem:[#allocation11_spill] sm:$0xff] %v8104_v27  ;;  %v8115_v28 = vld [vmem:[#allocation2 + $0x40] sm:$0xf]  ;;  %v4461_v59 = vshll.u32 %v8104_v27, 16 }
 0x126   : > { %v2107_v31 = vrot.slane %v2105_v20, 4  ;;  %9034 = vst [vmem:[#allocation12_spill] sm:$0xff] %v8115_v28  ;;  %v4430_v61 = vsel %vm7206_vm9, %v4425_v9, %v8053_v62  ;;  %v4357_v52 = vld [vmem:[#allocation2 + $0x48] sm:$0xf]  ;;  %v8141_v1 = vld [vmem:[#allocation2 + $0x4c] sm:$0xf] }
 0x127   : > { %v8128_v16 = vsel %vm7521_vm15, %v2100_v40, %v2101_v60  ;;  %v4440_v23 = vsel %vm7206_vm9, %v4435_v30, %v4439_v22  ;;  %v8145_v60 = vld [vmem:[#allocation2 + $0x44] sm:$0x1]  ;;  %v4468_v54 = vrot.slane %v4466_v47, 4  ;;  %v4475_v9 = vshll.u32 %v8115_v28, 16  ;;  %v6925_v30 = vld [vmem:[#allocation2 + $0x90] sm:$0xff]  }
 0x128   : > { %6545 = vmatmul.mubr.msk.bf16.gmra.mrb[12].mxu0 %vm1467_vm8, %v6922_v0  ;;  %v4457_v0 = vrot.slane %v4455_v50, 4  ;;  %v8138_v62 = vsel %vm7521_vm15, %v2107_v31, %v2108_v45  ;;  %v8143_v50 = vrot.slane %v4448_v42, 4  ;;  %9035 = vst [vmem:[#allocation13_spill] sm:$0xff] %v8145_v60  ;;  %v4479_v22 = vshrl.u32 %v8115_v28, 16  ;;  %v4360_v28 = vld [vmem:[#allocation2 + $0x54] sm:$0xf] }
 0x129   : > { %6548 = vmatprep.mubr.msk.bf16.mxu0 %vm1467_vm8, %v6923_v53  ;;  %v6924_v53 = vld [vmem:[#allocation2 + $0x84] sm:$0xff]   ;;  %v4471_v40 = vrot.slane %v4469_v35, 5  ;;  %v4493_v45 = vshll.u32 %v4357_v52, 16  ;;  %v8150_v31 = vcombine.low %v4430_v61, %v4440_v23  ;;  %v4503_v47 = vshrl.u32 %v8141_v1, 16  ;;  %v6985_v35 = vld [vmem:[#allocation2 + $0x94] sm:$0xf] }
 0x12a   : > { %v4463_v34 = vrot.slane %v4461_v59, 5  ;;  %v2112_v6 = vrot.slane %v6985_v35, 5  ;;  %v9036_v61 = vcombine.low %v7963_v43, %v7971_v11  ;;  %v8168_v23 = vrot.slane %v4475_v9, 5  ;;  %v8170_v42 = vld [vmem:[#allocation2 + $0x58] sm:$0xf] }
 0x12b   : > { %6391 = vmatmul.mubr.msk.bf16.gmra.mrb[28].mxu1 %vm1467_vm8, %v9031_v3  ;;  %v8117_v3 = vcombine.low %v4406_v25, %v4416_v10  ;;  %v8134_v25 = vsel %vm7521_vm15, %v5868_v17, %v2105_v20  ;;  %v4458_v20 = vor.u32 %v4457_v0, %v8113_v46  ;;  %v1987_v17 = vld [vmem:[#allocation2 + $0x90] sm:$0xe]  ;;  %v4490_v10 = vshrl.u32 %v4357_v52, 16 }
 0x12c   : > { %6396 = vmatprep.mubr.msk.bf16.mxu1 %vm1467_vm8, %v9033_v2  ;;  %v4499_v2 = vshll.u32 %v8141_v1, 16  ;;  %v4485_v0 = vshll.u32 %v8145_v60, 16  ;;  %v4454_v52 = vsel %vm7206_vm9, %v8143_v50, %v8113_v46  ;;  %v4481_v59 = vrot.slane %v4479_v22, 4  ;;  %v8178_v46 = vld [vmem:[#allocation2 + $0x50] sm:$0x1] }
 0x12d   : > { %v5869_v21 = vrot.slane %v1987_v17, 9  ;;  %v9037_v43 = vcombine.low %v7975_v29, %v7979_v13  ;;  %v4459_v11 = vrot.slane %v4458_v20, 4  ;;  %v4492_v35 = vrot.slane %v4490_v10, 4  ;;  %v6986_v60 = vld [vmem:[#allocation2 + $0x98] sm:$0x1]  ;;  %v6926_v20 = vld [vmem:[#allocation2 + $0x9c] sm:$0xff]  }
 0x12e   : > { %v8180_v50 = vrot.slane %v4499_v2, 5  ;;  %v4505_v9 = vrot.slane %v4503_v47, 4  ;;  %v4514_v22 = vshrl.u32 %v4360_v28, 16  ;;  %v4517_v17 = vshll.u32 %v4360_v28, 16  ;;  %v6987_v28 = vld [vmem:[#allocation2 + $0xa0] sm:$0xf] }
 0x12f   : > { %v2115_v29 = vrot.slane %v6986_v60, 5  ;;  %v4523_v13 = vshll.u32 %v8170_v42, 16  ;;  %v8186_v10 = vrot.slane %v4485_v0, 5  ;;  %v2119_v2 = vrot.slane %v6987_v28, 5  ;;  %v6927_v47 = vld [vmem:[#allocation2 + $0xa8] sm:$0xff]  }
 0x130   : > { %6549 = vmatmul.mubr.msk.bf16.gmra.mrb[16].mxu0 %vm1467_vm8, %v6924_v53  ;;  %v4472_v53 = vor.u32 %v4471_v40, %v4468_v54  ;;  %v4527_v54 = vshrl.u32 %v8170_v42, 16  ;;  %v4482_v40 = vor.u32 %v4481_v59, %v8168_v23  ;;  %v4464_v60 = vsel %vm7206_vm9, %v4459_v11, %v4463_v34 }
 0x131   : > { %6552 = vmatprep.mubr.msk.bf16.mxu0 %vm1467_vm8, %v6925_v30  ;;  %v1988_v30 = vld [vmem:[#allocation2 + $0x9c] sm:$0xe]  ;;  %v4509_v55 = vshll.u32 %v8178_v46, 16  ;;  %v4506_v0 = vor.u32 %v4505_v9, %v8180_v50  ;;  %v4516_v59 = vrot.slane %v4514_v22, 4  ;;  %v4519_v37 = vrot.slane %v4517_v17, 5 }
 0x132   : > { %v5870_v14 = vrot.slane %v1988_v30, 9  ;;  %v8205_v34 = vrot.slane %v4523_v13, 5  ;;  %v4529_v11 = vrot.slane %v4527_v54, 4  ;;  %v2121_v9 = vrot.slane %v2119_v2, 4  ;;  %v4363_v13 = vld [vmem:[#allocation2 + $0x60] sm:$0xf] }
 0x133   : > { %6397 = vmatmul.mubr.msk.bf16.vlgmr.msra.gmra.mrb[0].mxu1 %vm1467_vm8, %v9036_v61  ;;  %v4495_v61 = vrot.slane %v4493_v45, 5  ;;  %v8190_v45 = vsel %vm7521_vm15, %v5869_v21, %v2112_v6  ;;  %v2126_v21 = vrot.slane %v7779_v41, 5  ;;  %v6988_v41 = vld [vmem:[#allocation2 + $0xa4] sm:$0x1]  ;;  %v9039_v17 = vcombine.low %v7992_v26, %v7996_v15  ;;  %v8321_v15 = vld [vmem:[#allocation2 + $0x74] sm:$0x1] }
 0x134   : > { %6429 = vmatpush3.bf16.msra.mxu1 %v7877_v38  ;;  %6400 = vmatprep.mubr.msk.bf16.mxu1 %vm1467_vm8, %v9037_v43  ;;  %v2114_v38 = vrot.slane %v2112_v6, 4  ;;  %v8194_v43 = vrot.slane %v4472_v53, 4  ;;  %v1989_v6 = vld [vmem:[#allocation2 + $0xa8] sm:$0xe]  ;;  %v9038_v53 = vcombine.low %v7984_v57, %v7988_v36  ;;  %v2122_v22 = vrot.slane %v6988_v41, 5  ;;  %9050 = vst [vmem:[#allocation22_spill] sm:$0xff] %v8321_v15 }
 0x135   : > { %6632 = vmatprep.subr.bf16.mxu1 %v7098_v7  ;;  %v4496_v27 = vor.u32 %v4495_v61, %v4492_v35  ;;  %v8197_v7 = vld [vmem:[#allocation2 + $0x5c] sm:$0x1]  ;;  %v8212_v35 = vcombine.low %v4454_v52, %v4464_v60  ;;  %v4483_v61 = vrot.slane %v4482_v40, 4  ;;  %v5871_v36 = vrot.slane %v1989_v6, 9  ;;  %v8236_v60 = vld [vmem:[#allocation2 + $0x64] sm:$0xf] }
 0x136   : > { %v8203_v28 = vsel %vm7521_vm15, %v2114_v38, %v2115_v29  ;;  %v4511_v29 = vrot.slane %v4509_v55, 5  ;;  %v4533_v57 = vshll.u32 %v8197_v7, 16  ;;  %v4507_v54 = vrot.slane %v4506_v0, 4  ;;  %v1990_v55 = vld [vmem:[#allocation2 + $0xb4] sm:$0xe]  ;;  %v6929_v0 = vld [vmem:[#allocation2 + $0xc0] sm:$0xff]  }
 0x137   : > { %v4497_v38 = vrot.slane %v4496_v27, 4  ;;  %v4520_v52 = vor.u32 %v4519_v37, %v4516_v59  ;;  %v2129_v40 = vrot.slane %v7781_v12, 5  ;;  %v4478_v26 = vsel %vm7206_vm9, %v8194_v43, %v8168_v23 }
 0x138   : > { %6553 = vmatmul.mubr.msk.bf16.gmra.mrb[20].mxu0 %vm1467_vm8, %v6926_v20  ;;  %v2128_v20 = vrot.slane %v2126_v21, 4  ;;  %v4530_v27 = vor.u32 %v4529_v11, %v8205_v34  ;;  %v2133_v30 = vrot.slane %v7797_v4, 5  ;;  %v4488_v37 = vsel %vm7206_vm9, %v4483_v61, %v8186_v10 }
 0x139   : > { %6556 = vmatprep.mubr.msk.bf16.mxu0 %vm1467_vm8, %v6927_v47  ;;  %v6928_v47 = vld [vmem:[#allocation2 + $0xb4] sm:$0xff]   ;;  %v8234_v12 = vsel %vm7521_vm15, %v5870_v14, %v2119_v2  ;;  %v4538_v23 = vshrl.u32 %v4363_v13, 16  ;;  %v4541_v43 = vshll.u32 %v4363_v13, 16  ;;  %v8240_v59 = vsel %vm7521_vm15, %v2121_v9, %v2122_v22  ;;  %v8251_v14 = vld [vmem:[#allocation2 + $0x68] sm:$0x1] }
 0x13a   : > { %9040 = vst [vmem:[#allocation14_spill] sm:$0xff] %v8240_v59  ;;  %v4502_v4 = vsel %vm7206_vm9, %v4497_v38, %v8180_v50  ;;  %v8245_v6 = vrot.slane %v4533_v57, 5  ;;  %v8249_v10 = vsel %vm7521_vm15, %v5871_v36, %v2126_v21  ;;  %9042 = vst [vmem:[#allocation16_spill] sm:$0xff] %v8251_v14  ;;  %v4512_v2 = vsel %vm7206_vm9, %v4507_v54, %v4511_v29  ;;  %v4366_v9 = vld [vmem:[#allocation2 + $0x6c] sm:$0xf] }
 0x13b   : > { %6401 = vmatmul.mubr.msk.bf16.gmra.mrb[4].mxu1 %vm1467_vm8, %v9038_v53  ;;  %9041 = vst [vmem:[#allocation15_spill] sm:$0xff] %v8249_v10  ;;  %v8255_v11 = vrot.slane %v4520_v52, 4  ;;  %v8259_v53 = vsel %vm7521_vm15, %v2128_v20, %v2129_v40  ;;  %v5872_v61 = vrot.slane %v1990_v55, 9  ;;  %v8261_v50 = vrot.slane %v4530_v27, 4  ;;  %v8276_v13 = vld [vmem:[#allocation2 + $0x70] sm:$0xf] }
 0x13c   : > { %6404 = vmatprep.mubr.msk.bf16.mxu1 %vm1467_vm8, %v9039_v17  ;;  %9043 = vst [vmem:[#allocation17_spill] sm:$0xff] %v8259_v53  ;;  %v2135_v41 = vrot.slane %v2133_v30, 4  ;;  %v2136_v22 = vrot.slane %v7799_v56, 5  ;;  %v4547_v21 = vshll.u32 %v8236_v60, 16  ;;  %v9044_v17 = vcombine.low %v8008_v19, %v8012_v33  ;;  %9045 = vst [vmem:[#allocation18_spill] sm:$0xff] %v8276_v13 }
 0x13d   : > { %v8270_v38 = vrot.slane %v4538_v23, 4  ;;  %v8272_v29 = vrot.slane %v4541_v43, 5  ;;  %v4551_v57 = vshrl.u32 %v8236_v60, 16  ;;  %v4557_v36 = vshll.u32 %v8251_v14, 16  ;;  %v8299_v27 = vld [vmem:[#allocation2 + $0x7c] sm:$0xf] }
 0x13e   : > { %v9046_v56 = vcombine.low %v8025_v18, %v8034_v44  ;;  %v8283_v19 = vcombine.low %v4478_v26, %v4488_v37  ;;  %v4562_v54 = vshrl.u32 %v4366_v9, 16  ;;  %v4565_v52 = vshll.u32 %v4366_v9, 16  ;;  %v4369_v26 = vld [vmem:[#allocation2 + $0x78] sm:$0xf]  ;;  %9047 = vst [vmem:[#allocation19_spill] sm:$0xff] %v8299_v27 }
 0x13f   : > { %v8287_v20 = vcombine.low %v4502_v4, %v4512_v2  ;;  %v8297_v44 = vsel %vm7521_vm15, %v5872_v61, %v2133_v30  ;;  %v4571_v37 = vshll.u32 %v8276_v13, 16  ;;  %v4575_v23 = vshrl.u32 %v8276_v13, 16  ;;  %v4372_v43 = vld [vmem:[#allocation2 + $0x84] sm:$0xf]  ;;  %v6930_v30 = vld [vmem:[#allocation2 + $0xcc] sm:$0xff]  }
 0x140   : > { %6557 = vmatmul.mubr.msk.bf16.gmra.mrb[24].mxu0 %vm1467_vm8, %v6928_v47  ;;  %v8307_v47 = vsel %vm7521_vm15, %v2135_v41, %v2136_v22  ;;  %v4544_v4 = vor.u32 %v8272_v29, %v8270_v38  ;;  %v8315_v2 = vrot.slane %v4547_v21, 5  ;;  %v4553_v61 = vrot.slane %v4551_v57, 4  ;;  %v8319_v33 = vld [vmem:[#allocation2 + $0x94] sm:$0xf]  ;;  %v8351_v10 = vld [vmem:[#allocation2 + $0x8c] sm:$0x1] }
 0x141   : > { %6560 = vmatprep.mubr.msk.bf16.mxu0 %vm1467_vm8, %v6929_v0  ;;  %v8311_v0 = vld [vmem:[#allocation2 + $0x88] sm:$0xf]  ;;  %v8317_v9 = vrot.slane %v4557_v36, 5  ;;  %v4567_v41 = vrot.slane %v4565_v52, 5  ;;  %v4586_v22 = vshrl.u32 %v4369_v26, 16  ;;  %v4589_v18 = vshll.u32 %v4369_v26, 16 }
 0x142   : > { %9048 = vst [vmem:[#allocation20_spill] sm:$0xff] %v8311_v0  ;;  %9049 = vst [vmem:[#allocation21_spill] sm:$0xff] %v8319_v33  ;;  %v4595_v40 = vshll.u32 %v8299_v27, 16  ;;  %v4599_v55 = vshrl.u32 %v8299_v27, 16  ;;  %v4610_v13 = vshrl.u32 %v4372_v43, 16  ;;  %v4613_v38 = vshll.u32 %v4372_v43, 16 }
 0x143   : > { %6405 = vmatmul.mubr.msk.bf16.gmra.mrb[8].mxu1 %vm1467_vm8, %v9044_v17  ;;  %v4375_v17 = vld [vmem:[#allocation2 + $0x90] sm:$0xf]  ;;  %v8325_v21 = vrot.slane %v4571_v37, 5  ;;  %v4577_v29 = vrot.slane %v4575_v23, 4  ;;  %v4619_v57 = vshll.u32 %v8311_v0, 16  ;;  %v4623_v36 = vshrl.u32 %v8311_v0, 16 }
 0x144   : > { %6408 = vmatprep.mubr.msk.bf16.mxu1 %vm1467_vm8, %v9046_v56  ;;  %v4564_v56 = vrot.slane %v4562_v54, 4  ;;  %v9051_v54 = vcombine.low %v8049_v39, %v8067_v51  ;;  %v4634_v52 = vshrl.u32 %v4375_v17, 16  ;;  %v4637_v26 = vshll.u32 %v4375_v17, 16  ;;  %v8363_v59 = vld [vmem:[#allocation2 + $0xa0] sm:$0xf] }
 0x145   : > { %v4643_v27 = vshll.u32 %v8319_v33, 16  ;;  %v4647_v43 = vshrl.u32 %v8319_v33, 16  ;;  %v9052_v37 = vcombine.low %v8071_v24, %v8075_v58  ;;  %v4554_v39 = vor.u32 %v4553_v61, %v8315_v2  ;;  %v4378_v33 = vld [vmem:[#allocation2 + $0x9c] sm:$0xf]  ;;  %v8347_v58 = vld [vmem:[#allocation2 + $0x80] sm:$0x1] }
 0x146   : > { %v4581_v51 = vshll.u32 %v8321_v15, 16  ;;  %v4588_v23 = vrot.slane %v4586_v22, 4  ;;  %v4601_v17 = vrot.slane %v4599_v55, 4  ;;  %v4612_v0 = vrot.slane %v4610_v13, 4  ;;  %v8359_v55 = vld [vmem:[#allocation2 + $0x98] sm:$0x1] }
 0x147   : > { %v4615_v14 = vrot.slane %v4613_v38, 5  ;;  %v4568_v53 = vor.u32 %v4567_v41, %v4564_v56  ;;  %v4578_v24 = vor.u32 %v4577_v29, %v8325_v21  ;;  %v4636_v61 = vrot.slane %v4634_v52, 4 }
 0x148   : > { %6561 = vmatmul.mubr.msk.bf16.gmra.mrb[28].mxu0 %vm1467_vm8, %v6930_v30  ;;  %v4591_v30 = vrot.slane %v4589_v18, 5  ;;  %v4639_v15 = vrot.slane %v4637_v26, 5  ;;  %v8353_v22 = vrot.slane %v4643_v27, 5  ;;  %v8355_v18 = vrot.slane %v4544_v4, 4 }
 0x149   : > { %6566 = vmatprep.mubr.msk.bf16.mxu0 %vm1467_vm8, %v8117_v3  ;;  %v4625_v3 = vrot.slane %v4623_v36, 4  ;;  %v8357_v13 = vrot.slane %v4554_v39, 4  ;;  %v4658_v56 = vshrl.u32 %v4378_v33, 16  ;;  %v4661_v41 = vshll.u32 %v4378_v33, 16 }
 0x14a   : > { %v4592_v38 = vor.u32 %v4591_v30, %v4588_v23  ;;  %v4616_v36 = vor.u32 %v4615_v14, %v4612_v0  ;;  %v4569_v52 = vrot.slane %v4568_v53, 4  ;;  %v4583_v27 = vrot.slane %v4581_v51, 5 }
 0x14b   : > { %6409 = vmatmul.mubr.msk.bf16.gmra.mrb[12].mxu1 %vm1467_vm8, %v9051_v54  ;;  %v8344_v54 = vrot.slane %v4595_v40, 5  ;;  %v4649_v40 = vrot.slane %v4647_v43, 4  ;;  %v4629_v4 = vshll.u32 %v8351_v10, 16  ;;  %v9053_v43 = vcombine.low %v8079_v32, %v8086_v8 }
 0x14c   : > { %6412 = vmatprep.mubr.msk.bf16.mxu1 %vm1467_vm8, %v9052_v37  ;;  %v8349_v37 = vrot.slane %v4619_v57, 5  ;;  %v4605_v57 = vshll.u32 %v8347_v58, 16  ;;  %v4579_v33 = vrot.slane %v4578_v24, 4  ;;  %v4640_v39 = vor.u32 %v4639_v15, %v4636_v61  ;;  %v4381_v61 = vld [vmem:[#allocation2 + $0xa8] sm:$0xf] }
 0x14d   : > { %v4602_v29 = vor.u32 %v4601_v17, %v8344_v54  ;;  %v4650_v14 = vor.u32 %v4649_v40, %v8353_v22  ;;  %v4653_v0 = vshll.u32 %v8359_v55, 16  ;;  %v9054_v53 = vcombine.low %v8124_v5, %v8128_v16 }
 0x14e   : > { %v4626_v26 = vor.u32 %v4625_v3, %v8349_v37  ;;  %v4660_v51 = vrot.slane %v4658_v56, 4  ;;  %v4663_v32 = vrot.slane %v4661_v41, 5  ;;  %v4667_v8 = vshll.u32 %v8363_v59, 16  ;;  %v8392_v3 = vld [vmem:[#allocation2 + $0xa4] sm:$0x1] }
 0x14f   : > { %v4671_v23 = vshrl.u32 %v8363_v59, 16  ;;  %v4603_v15 = vrot.slane %v4602_v29, 4  ;;  %v4607_v30 = vrot.slane %v4605_v57, 5  ;;  %v4617_v17 = vrot.slane %v4616_v36, 4 }
 0x150   : > { %6567 = vmatmul.mubr.msk.bf16.vlgmr.msra.gmra.mrb[0].mxu0 %vm1467_vm8, %v8150_v31  ;;  %v4593_v31 = vrot.slane %v4592_v38, 4  ;;  %v4560_v5 = vsel %vm7206_vm9, %v8357_v13, %v8317_v9  ;;  %v4627_v16 = vrot.slane %v4626_v26, 4  ;;  %v4631_v24 = vrot.slane %v4629_v4, 5  ;;  %v8397_v38 = vld [vmem:[#allocation2 + $0xac] sm:$0xf] }
 0x151   : > { %6599 = vmatpush3.bf16.msra.mxu0 %v7944_v49  ;;  %6570 = vmatprep.mubr.msk.bf16.mxu0 %vm1467_vm8, %v8212_v35  ;;  %v4550_v49 = vsel %vm7206_vm9, %v8355_v18, %v8315_v2  ;;  %v4574_v35 = vsel %vm7206_vm9, %v4569_v52, %v8325_v21  ;;  %v4641_v40 = vrot.slane %v4640_v39, 4  ;;  %v4651_v56 = vrot.slane %v4650_v14, 4  ;;  %v5075_v14 = vld [vmem:[#allocation2 + $0x48] sm:$0xe] }
 0x152   : > { %v4655_v41 = vrot.slane %v4653_v0, 5  ;;  %v4584_v2 = vsel %vm7206_vm9, %v4579_v33, %v4583_v27  ;;  %v4664_v18 = vor.u32 %v4663_v32, %v4660_v51  ;;  %v8401_v29 = vrot.slane %v4667_v8, 5 }
 0x153   : > { %6413 = vmatmul.mubr.msk.bf16.gmra.mrb[16].mxu1 %vm1467_vm8, %v9053_v43  ;;  %v4673_v9 = vrot.slane %v4671_v23, 4  ;;  %v4598_v13 = vsel %vm7206_vm9, %v4593_v31, %v8344_v54  ;;  %v4608_v57 = vsel %vm7206_vm9, %v4603_v15, %v4607_v30  ;;  %v4622_v21 = vsel %vm7206_vm9, %v4617_v17, %v8349_v37  ;;  %v5076_v31 = vld [vmem:[#allocation2 + $0x54] sm:$0xe] }
 0x154   : > { %6416 = vmatprep.mubr.msk.bf16.mxu1 %vm1467_vm8, %v9054_v53  ;;  %v4677_v36 = vshll.u32 %v8392_v3, 16  ;;  %v4632_v52 = vsel %vm7206_vm9, %v4627_v16, %v4631_v24  ;;  %v4682_v27 = vshrl.u32 %v4381_v61, 16  ;;  %v4685_v26 = vshll.u32 %v4381_v61, 16 }
 0x155   : > { %v4691_v4 = vshll.u32 %v8397_v38, 16  ;;  %v9055_v43 = vcombine.low %v8134_v25, %v8138_v62  ;;  %v9056_v54 = vsel %vm7206_vm9, %v8261_v50, %v8245_v6  ;;  %v9057_v37 = vsel %vm7206_vm9, %v8255_v11, %v8205_v34 }
 0x156   : > { %v6060_v33 = vcombine.low %v9057_v37, %v9056_v54  ;;  %v4646_v25 = vsel %vm7206_vm9, %v4641_v40, %v8353_v22  ;;  %v4656_v62 = vsel %vm7206_vm9, %v4651_v56, %v4655_v41  ;;  %v9058_v39 = vcombine.low %v8190_v45, %v8203_v28  ;;  %v8448_v22 = vld [vmem:[#allocation2 + $0xb0] sm:$0x1]  ;;  %v9064_v37 = vld [vmem:[#allocation16_spill] sm:$0xff] }
 0x157   : > { %v5889_v34 = vcombine.low %v8297_v44, %v8307_v47  ;;  %v6061_v6 = vcombine.low %v4550_v49, %v4560_v5  ;;  %v8445_v11 = vrot.slane %v4664_v18, 4  ;;  %v4674_v50 = vor.u32 %v4673_v9, %v8401_v29  ;;  %v5077_v5 = vld [vmem:[#allocation2 + $0x60] sm:$0xe] }
 0x158   : > { %6571 = vmatmul.mubr.msk.bf16.gmra.mrb[4].mxu0 %vm1467_vm8, %v8283_v19  ;;  %v4695_v19 = vshrl.u32 %v8397_v38, 16  ;;  %v8450_v0 = vcombine.low %v4574_v35, %v4584_v2  ;;  %v8452_v53 = vcombine.low %v4598_v13, %v4608_v57  ;;  %v8454_v45 = vcombine.low %v4622_v21, %v4632_v52  ;;  %v5078_v57 = vld [vmem:[#allocation2 + $0x6c] sm:$0xe]  ;;  %v9059_v21 = vld [vmem:[#allocation14_spill] sm:$0xff] }
 0x159   : > { %6574 = vmatprep.mubr.msk.bf16.mxu0 %vm1467_vm8, %v8287_v20  ;;  %v8456_v28 = vrot.slane %v4677_v36, 5  ;;  %v4384_v20 = vld [vmem:[#allocation2 + $0xb4] sm:$0xf]  ;;  %v8458_v51 = vcombine.low %v4646_v25, %v4656_v62  ;;  %v4684_v32 = vrot.slane %v4682_v27, 4  ;;  %v4687_v8 = vrot.slane %v4685_v26, 5  ;;  %v9061_v27 = vld [vmem:[#allocation15_spill] sm:$0xff] }
 0x15a   : > { %v8460_v23 = vrot.slane %v4691_v4, 5  ;;  %v4697_v15 = vrot.slane %v4695_v19, 4  ;;  %v4701_v30 = vshll.u32 %v8448_v22, 16  ;;  %v6091_v17 = vrot.slane %v5075_v14, 9  ;;  %v9065_v19 = vld [vmem:[#allocation18_spill] sm:$0xff] }
 0x15b   : > { %6417 = vmatmul.mubr.msk.bf16.gmra.mrb[20].mxu1 %vm1467_vm8, %v9055_v43  ;;  %v5165_v49 = vrot.slane %v8141_v1, 5  ;;  %v4670_v16 = vsel %vm7206_vm9, %v8445_v11, %v8401_v29  ;;  %v8468_v24 = vrot.slane %v4674_v50, 4  ;;  %v4706_v61 = vshrl.u32 %v4384_v20, 16 }
 0x15c   : > { %6420 = vmatprep.mubr.msk.bf16.mxu1 %vm1467_vm8, %v9058_v39  ;;  %v5168_v35 = vrot.slane %v8178_v46, 5  ;;  %v6092_v41 = vrot.slane %v5076_v31, 9  ;;  %v5172_v2 = vrot.slane %v8170_v42, 5  ;;  %v4709_v1 = vshll.u32 %v4384_v20, 16  ;;  %v2817_v31 = vld [vmem:[#allocation2 + $0x78] sm:$0xf] }
 0x15d   : > { %v8473_v40 = vsel %vm7521_vm15, %v6091_v17, %v5165_v49  ;;  %v5167_v56 = vrot.slane %v5165_v49, 4  ;;  %v5175_v18 = vrot.slane %v8197_v7, 5  ;;  %v6093_v9 = vrot.slane %v5077_v5, 9  ;;  %v4387_v49 = vld [vmem:[#allocation2 + $0xc0] sm:$0xf] }
 0x15e   : > { %v5179_v13 = vrot.slane %v8236_v60, 5  ;;  %v9060_v36 = vcombine.low %v8234_v12, %v9059_v21  ;;  %v4688_v46 = vor.u32 %v4687_v8, %v4684_v32  ;;  %v8489_v42 = vsel %vm7521_vm15, %v6092_v41, %v5172_v2  ;;  %v9062_v60 = vld [vmem:[#allocation17_spill] sm:$0xff] }
 0x15f   : > { %v8485_v52 = vsel %vm7521_vm15, %v5167_v56, %v5168_v35  ;;  %v5174_v7 = vrot.slane %v5172_v2, 4  ;;  %v9063_v26 = vcombine.low %v9061_v27, %v9062_v60  ;;  %v8496_v12 = vld [vmem:[#allocation2 + $0xb8] sm:$0xf]  ;;  %v6094_v62 = vrot.slane %v5078_v57, 9  ;;  %v8538_v57 = vld [vmem:[#allocation2 + $0xc4] sm:$0xf] }
 0x160   : > { %6575 = vmatmul.mubr.msk.bf16.gmra.mrb[8].mxu0 %vm1467_vm8, %v6060_v33  ;;  %v6108_v4 = vcombine.low %v8473_v40, %v8485_v52  ;;  %v8502_v43 = vsel %vm7521_vm15, %v6093_v9, %v5179_v13  ;;  %v5181_v54 = vrot.slane %v5179_v13, 4  ;;  %v5182_v33 = vrot.slane %v9064_v37, 5  ;;  %v5079_v9 = vld [vmem:[#allocation2 + $0x78] sm:$0xe] }
 0x161   : > { %6578 = vmatprep.mubr.msk.bf16.mxu0 %vm1467_vm8, %v6061_v6  ;;  %v8507_v25 = vsel %vm7521_vm15, %v5174_v7, %v5175_v18  ;;  %v5186_v39 = vrot.slane %v9065_v19, 5  ;;  %v9066_v6 = vld [vmem:[#allocation22_spill] sm:$0xff]  ;;  %v4698_v14 = vor.u32 %v4697_v15, %v8460_v23  ;;  %v8512_v20 = vrot.slane %v4701_v30, 5  ;;  %v6931_v30 = vld [vmem:[#allocation2 + $0xc] sm:$0xff]  }
 0x162   : > { %v5189_v50 = vrot.slane %v9066_v6, 5  ;;  %v6109_v32 = vcombine.low %v8489_v42, %v8507_v25  ;;  %v8518_v8 = vsel %vm7521_vm15, %v5181_v54, %v5182_v33  ;;  %v4715_v17 = vshll.u32 %v8496_v12, 16  ;;  %v9067_v37 = vld [vmem:[#allocation8_spill] sm:$0xff]  ;;  %v9068_v33 = vld [vmem:[#allocation7_spill] sm:$0xff]  ;;  %v6946_v25 = vld [vmem:[#allocation2 + $0xc0] sm:$0xff]  }
 0x163   : > { %6421 = vmatmul.mubr.msk.bf16.gmra.mrb[24].mxu1 %vm1467_vm8, %v9060_v36  ;;  %v8525_v35 = vsel %vm7521_vm15, %v6094_v62, %v5186_v39  ;;  %v5188_v15 = vrot.slane %v5186_v39, 4  ;;  %v4680_v56 = vsel %vm7206_vm9, %v8468_v24, %v8456_v28  ;;  %v8531_v41 = vrot.slane %v4706_v61, 4  ;;  %v9073_v28 = vld [vmem:[#allocation21_spill] sm:$0xff] }
 0x164   : > { %6424 = vmatprep.mubr.msk.bf16.mxu1 %vm1467_vm8, %v9063_v26  ;;  %v8533_v2 = vrot.slane %v4709_v1, 5  ;;  %v4719_v18 = vshrl.u32 %v8496_v12, 16  ;;  %v8536_v13 = vrot.slane %v4688_v46, 4  ;;  %v3055_v36 = vshrl.u32 %v2817_v31, 16  ;;  %v5080_v26 = vld [vmem:[#allocation2 + $0x84] sm:$0xe] }
 0x165   : > { %v8542_v21 = vsel %vm7521_vm15, %v5188_v15, %v5189_v50  ;;  %v3058_v7 = vshll.u32 %v2817_v31, 16  ;;  %v8544_v27 = vrot.slane %v4698_v14, 4  ;;  %v4730_v60 = vshrl.u32 %v4387_v49, 16  ;;  %v9070_v14 = vld [vmem:[#allocation20_spill] sm:$0xff] }
 0x166   : > { %v4733_v61 = vshll.u32 %v4387_v49, 16  ;;  %v3057_v46 = vrot.slane %v3055_v36, 4  ;;  %v3077_v62 = vsel %vm7206_vm9, %v9068_v33, %v9067_v37  ;;  %v6095_v19 = vrot.slane %v5079_v9, 9  ;;  %v6932_v15 = vld [vmem:[#allocation2 + $0x18] sm:$0xff]   ;;  %v8581_v37 = vld [vmem:[#allocation2 + $0xc8] sm:$0x1] }
 0x167   : > { %v3060_v54 = vrot.slane %v3058_v7, 5  ;;  %v4739_v44 = vshll.u32 %v8538_v57, 16  ;;  %v4743_v47 = vshrl.u32 %v8538_v57, 16  ;;  %v6096_v50 = vrot.slane %v5080_v26, 9  ;;  %v8573_v7 = vld [vmem:[#allocation2 + $0xbc] sm:$0x1] }
 0x168   : > { %6579 = vmatmul.mubr.msk.bf16.gmra.mrb[12].mxu0 %vm1467_vm8, %v8450_v0  ;;  %v5196_v0 = vrot.slane %v8347_v58, 5  ;;  %v5200_v31 = vrot.slane %v9070_v14, 5  ;;  %v5203_v49 = vrot.slane %v8351_v10, 5  ;;  %v8567_v9 = vrot.slane %v4715_v17, 5  ;;  %v6933_v17 = vld [vmem:[#allocation2 + $0x24] sm:$0xff]  }
 0x169   : > { %6582 = vmatprep.mubr.msk.bf16.mxu0 %vm1467_vm8, %v8452_v53  ;;  %v3061_v6 = vor.u32 %v3060_v54, %v3057_v46  ;;  %v4712_v58 = vor.u32 %v8533_v2, %v8531_v41  ;;  %v4390_v46 = vld [vmem:[#allocation2 + $0xcc] sm:$0xf]  ;;  %v4735_v33 = vrot.slane %v4733_v61, 5  ;;  %v8589_v41 = vld [vmem:[#allocation2 + $0xd0] sm:$0xf]  ;;  %v9071_v2 = vld [vmem:[#allocation6_spill] sm:$0xff]  ;;  %v4694_v14 = vsel %vm7206_vm9, %v8536_v13, %v8460_v23 }
 0x16a   : > { %v8579_v54 = vsel %vm7521_vm15, %v6096_v50, %v5200_v31  ;;  %v5202_v10 = vrot.slane %v5200_v31, 4  ;;  %v4704_v31 = vsel %vm7206_vm9, %v8544_v27, %v8512_v20  ;;  %v6066_v23 = vcombine.low %v4670_v16, %v4680_v56  ;;  %v8636_v1 = vld [vmem:[#allocation2 + $0xd4] sm:$0x1] }
 0x16b   : > { %6425 = vmatmul.mubr.msk.bf16.gmra.mrb[28].mxu1 %vm1467_vm8, %v5889_v34  ;;  %v9069_v34 = vld [vmem:[#allocation19_spill] sm:$0xff]  ;;  %v3062_v26 = vrot.slane %v3061_v6, 4  ;;  %v6067_v27 = vcombine.low %v4694_v14, %v4704_v31  ;;  %v5207_v24 = vrot.slane %v9073_v28, 5  ;;  %v5210_v16 = vrot.slane %v8359_v55, 5 }
 0x16c   : > { %6430 = vmatprep.mubr.msk.bf16.mxu1 %vm1467_vm8, %v6931_v30  ;;  %v5193_v39 = vrot.slane %v9069_v34, 5  ;;  %v4721_v30 = vrot.slane %v4719_v18, 4  ;;  %v4732_v18 = vrot.slane %v4730_v60, 4  ;;  %v8598_v60 = vsel %vm7521_vm15, %v5202_v10, %v5203_v49  ;;  %v5083_v28 = vld [vmem:[#allocation2 + $0xa8] sm:$0xe] }
 0x16d   : > { %v3067_v6 = vsel %vm7206_vm9, %v3062_v26, %v9071_v2  ;;  %v4754_v49 = vshrl.u32 %v4390_v46, 16  ;;  %v5081_v26 = vld [vmem:[#allocation2 + $0x90] sm:$0xe]  ;;  %v5082_v2 = vld [vmem:[#allocation2 + $0x9c] sm:$0xe]  ;;  %v4773_v31 = vshll.u32 %v8636_v1, 16 }
 0x16e   : > { %v8571_v53 = vsel %vm7521_vm15, %v6095_v19, %v5193_v39  ;;  %v5195_v36 = vrot.slane %v5193_v39, 4  ;;  %v8583_v19 = vrot.slane %v4739_v44, 5  ;;  %v4745_v39 = vrot.slane %v4743_v47, 4 }
 0x16f   : > { %v4722_v61 = vor.u32 %v4721_v30, %v8567_v9  ;;  %v4725_v44 = vshll.u32 %v8573_v7, 16  ;;  %v9072_v30 = vld [vmem:[#allocation5_spill] sm:$0xff]  ;;  %v4736_v20 = vor.u32 %v4735_v33, %v4732_v18  ;;  %v4756_v47 = vrot.slane %v4754_v49, 4 }
 0x170   : > { %v8587_v34 = vsel %vm7521_vm15, %v5195_v36, %v5196_v0  ;;  %v8602_v0 = vcombine.low %v3067_v6, %v3077_v62  ;;  %6583 = vmatmul.mubr.msk.bf16.gmra.mrb[16].mxu0 %vm1467_vm8, %v8454_v45  ;;  %v4749_v62 = vshll.u32 %v8581_v37, 16  ;;  %v4763_v45 = vshll.u32 %v8589_v41, 16  ;;  %v6935_v6 = vld [vmem:[#allocation2 + $0x3c] sm:$0xff]  }
 0x171   : > { %v4767_v36 = vshrl.u32 %v8589_v41, 16  ;;  %6586 = vmatprep.mubr.msk.bf16.mxu0 %vm1467_vm8, %v8458_v51  ;;  %v4746_v13 = vor.u32 %v4745_v39, %v8583_v19  ;;  %v4723_v10 = vrot.slane %v4722_v61, 4  ;;  %v6934_v51 = vld [vmem:[#allocation2 + $0x30] sm:$0xff]   ;;  %v6097_v50 = vrot.slane %v5081_v26, 9  ;;  %v6989_v49 = vld [vmem:[#allocation2 + $0x1c] sm:$0xf] }
 0x172   : > { %v8638_v29 = vrot.slane %v4763_v45, 5  ;;  %v4737_v56 = vrot.slane %v4736_v20, 4  ;;  %v5209_v18 = vrot.slane %v5207_v24, 4  ;;  %v6098_v33 = vrot.slane %v5082_v2, 9  ;;  %v6936_v20 = vld [vmem:[#allocation2 + $0x48] sm:$0xff]  }
 0x173   : > { %6431 = vmatmul.mubr.msk.bf16.vlgmr.msra.gmra.mrb[0].mxu1 %vm1467_vm8, %v6932_v15  ;;  %v4757_v15 = vshll.u32 %v4390_v46, 16  ;;  %v4713_v46 = vrot.slane %v4712_v58, 4  ;;  %v4769_v11 = vrot.slane %v4767_v36, 4  ;;  %v4747_v58 = vrot.slane %v4746_v13, 4 }
 0x174   : > { %6633 = vmatpush3.bf16.msra.mxu1 %v9072_v30  ;;  %6434 = vmatprep.mubr.msk.bf16.mxu1 %vm1467_vm8, %v6933_v17  ;;  %v4727_v17 = vrot.slane %v4725_v44, 5  ;;  %v4751_v30 = vrot.slane %v4749_v62, 5  ;;  %v8643_v39 = vsel %vm7521_vm15, %v6097_v50, %v5207_v24  ;;  %v5214_v61 = vrot.slane %v8363_v59, 5  ;;  %v5071_v62 = vld [vmem:[#allocation2 + $0x18] sm:$0xe] }
 0x175   : > { %v4759_v5 = vrot.slane %v4757_v15, 5  ;;  %v5217_v44 = vrot.slane %v8392_v3, 5  ;;  %v4718_v55 = vsel %vm7206_vm9, %v4713_v46, %v8567_v9  ;;  %v8657_v50 = vsel %vm7521_vm15, %v5209_v18, %v5210_v16  ;;  %v9074_v46 = vld [vmem:[#allocation9_spill] sm:$0xff]  ;;  %v5072_v24 = vld [vmem:[#allocation2 + $0x24] sm:$0xe] }
 0x176   : > { %v4728_v14 = vsel %vm7206_vm9, %v4723_v10, %v4727_v17  ;;  %v4770_v3 = vor.u32 %v4769_v11, %v8638_v29  ;;  %v5137_v15 = vrot.slane %v6989_v49, 5  ;;  %v5216_v9 = vrot.slane %v5214_v61, 4  ;;  %v6937_v17 = vld [vmem:[#allocation2 + $0x54] sm:$0xff]   ;;  %v6990_v16 = vld [vmem:[#allocation2 + $0x28] sm:$0xf] }
 0x177   : > { %v4760_v59 = vor.u32 %v4759_v5, %v4756_v47  ;;  %v4742_v45 = vsel %vm7206_vm9, %v4737_v56, %v8583_v19  ;;  %v4752_v36 = vsel %vm7206_vm9, %v4747_v58, %v4751_v30  ;;  %v6114_v26 = vcombine.low %v8643_v39, %v8657_v50  ;;  %v5073_v49 = vld [vmem:[#allocation2 + $0x30] sm:$0xe] }
 0x178   : > { %6587 = vmatmul.mubr.msk.bf16.gmra.mrb[20].mxu0 %vm1467_vm8, %v6066_v23  ;;  %v8671_v23 = vsel %vm7521_vm15, %v6098_v33, %v5214_v61  ;;  %v6068_v5 = vcombine.low %v4718_v55, %v4728_v14  ;;  %v8675_v47 = vsel %vm7521_vm15, %v5216_v9, %v5217_v44  ;;  %v4775_v13 = vrot.slane %v4773_v31, 5  ;;  %v5084_v33 = vld [vmem:[#allocation2 + $0xb4] sm:$0xe]  ;;  %v9075_v31 = vld [vmem:[#allocation10_spill] sm:$0xff] }
 0x179   : > { %6590 = vmatprep.mubr.msk.bf16.mxu0 %vm1467_vm8, %v6067_v27  ;;  %v6087_v27 = vrot.slane %v5071_v62, 9  ;;  %v5140_v19 = vrot.slane %v9074_v46, 5  ;;  %v6115_v10 = vcombine.low %v8671_v23, %v8675_v47  ;;  %v6069_v2 = vcombine.low %v4742_v45, %v4752_v36  ;;  %v6938_v45 = vld [vmem:[#allocation2 + $0x60] sm:$0xff]  }
 0x17a   : > { %v5139_v30 = vrot.slane %v5137_v15, 4  ;;  %v5144_v56 = vrot.slane %v6990_v16, 5  ;;  %v6099_v58 = vrot.slane %v5083_v28, 9  ;;  %v5221_v18 = vrot.slane %v8397_v38, 5  ;;  %v5074_v16 = vld [vmem:[#allocation2 + $0x3c] sm:$0xe] }
 0x17b   : > { %6435 = vmatmul.mubr.msk.bf16.gmra.mrb[4].mxu1 %vm1467_vm8, %v6934_v51  ;;  %v4761_v51 = vrot.slane %v4760_v59, 4  ;;  %v5138_v11 = vsel %vm7521_vm15, %v6087_v27, %v5137_v15  ;;  %v5224_v14 = vrot.slane %v8448_v22, 5  ;;  %v5151_v59 = vrot.slane %v9075_v31, 5  ;;  %v6939_v27 = vld [vmem:[#allocation2 + $0x6c] sm:$0xff]  }
 0x17c   : > { %6438 = vmatprep.mubr.msk.bf16.mxu1 %vm1467_vm8, %v6935_v6  ;;  %v4771_v6 = vrot.slane %v4770_v3, 4  ;;  %v5141_v55 = vsel %vm7521_vm15, %v5139_v30, %v5140_v19  ;;  %v8698_v38 = vsel %vm7521_vm15, %v6099_v58, %v5221_v18  ;;  %v5223_v3 = vrot.slane %v5221_v18, 4  ;;  %v9077_v58 = vld [vmem:[#allocation12_spill] sm:$0xff] }
 0x17d   : > { %v4766_v61 = vsel %vm7206_vm9, %v4761_v51, %v8638_v29  ;;  %v6088_v62 = vrot.slane %v5072_v24, 9  ;;  %v6100_v15 = vrot.slane %v5084_v33, 9  ;;  %v5228_v29 = vrot.slane %v8496_v12, 5  ;;  %v9076_v51 = vld [vmem:[#allocation11_spill] sm:$0xff] }
 0x17e   : > { %v4776_v44 = vsel %vm7206_vm9, %v4771_v6, %v4775_v13  ;;  %v5231_v9 = vrot.slane %v8573_v7, 5  ;;  %v8704_v22 = vsel %vm7521_vm15, %v5223_v3, %v5224_v14  ;;  %v5146_v46 = vrot.slane %v5144_v56, 4  ;;  %v6940_v14 = vld [vmem:[#allocation2 + $0x78] sm:$0xff]  }
 0x17f   : > { %v6070_v36 = vcombine.low %v4766_v61, %v4776_v44  ;;  %v6116_v19 = vcombine.low %v8698_v38, %v8704_v22  ;;  %v5230_v12 = vrot.slane %v5228_v29, 4  ;;  %v6089_v7 = vrot.slane %v5073_v49, 9  ;;  %v2814_v44 = vld [vmem:[#allocation2 + $0x6c] sm:$0xf]  ;;  %v9078_v49 = vld [vmem:[#allocation13_spill] sm:$0xff] }
 0x180   : > { %6591 = vmatmul.mubr.msk.bf16.gmra.mrb[24].mxu0 %vm1467_vm8, %v6068_v5  ;;  %v6104_v5 = vcombine.low %v5138_v11, %v5141_v55  ;;  %v5154_v6 = vrot.slane %v9076_v51, 5  ;;  %v5145_v24 = vsel %vm7521_vm15, %v6088_v62, %v5144_v56  ;;  %v5158_v18 = vrot.slane %v9077_v58, 5  ;;  %v5086_v55 = vld [vmem:[#allocation2 + $0xcc] sm:$0xe]  ;;  %v6941_v56 = vld [vmem:[#allocation2 + $0x84] sm:$0xff]  }
 0x181   : > { %6594 = vmatprep.mubr.msk.bf16.mxu0 %vm1467_vm8, %v6069_v2  ;;  %v5153_v2 = vrot.slane %v5151_v59, 4  ;;  %v8715_v30 = vsel %vm7521_vm15, %v5230_v12, %v5231_v9  ;;  %v5152_v33 = vsel %vm7521_vm15, %v6089_v7, %v5151_v59  ;;  %v6090_v3 = vrot.slane %v5074_v16, 9  ;;  %v6942_v16 = vld [vmem:[#allocation2 + $0x90] sm:$0xff]  }
 0x182   : > { %v3031_v9 = vshrl.u32 %v2814_v44, 16  ;;  %v5242_v59 = vrot.slane %v8589_v41, 5  ;;  %v5245_v12 = vrot.slane %v8636_v1, 5 }
 0x183   : > { %6439 = vmatmul.mubr.msk.bf16.gmra.mrb[8].mxu1 %vm1467_vm8, %v6936_v20  ;;  %v6991_v20 = vld [vmem:[#allocation2 + $0x2c] sm:$0x1]  ;;  %v5155_v61 = vsel %vm7521_vm15, %v5153_v2, %v5154_v6  ;;  %v5159_v7 = vsel %vm7521_vm15, %v6090_v3, %v5158_v18 }
 0x184   : > { %6442 = vmatprep.mubr.msk.bf16.mxu1 %vm1467_vm8, %v6937_v17  ;;  %v5147_v13 = vrot.slane %v6991_v20, 5  ;;  %v8710_v17 = vsel %vm7521_vm15, %v6100_v15, %v5228_v29  ;;  %v5161_v15 = vrot.slane %v9078_v49, 5  ;;  %v6106_v62 = vcombine.low %v5152_v33, %v5155_v61  ;;  %v6943_v33 = vld [vmem:[#allocation2 + $0x9c] sm:$0xff]   ;;  %v6994_v49 = vld [vmem:[#allocation2 + $0x88] sm:$0xf] }
 0x185   : > { %v6117_v28 = vcombine.low %v8710_v17, %v8715_v30  ;;  %v5160_v29 = vrot.slane %v5158_v18, 4  ;;  %v3033_v2 = vrot.slane %v3031_v9, 4  ;;  %v6993_v18 = vld [vmem:[#allocation2 + $0x74] sm:$0x1] }
 0x186   : > { %v5148_v11 = vsel %vm7521_vm15, %v5146_v46, %v5147_v13  ;;  %v5244_v46 = vrot.slane %v5242_v59, 4 }
 0x187   : > { %v6105_v31 = vcombine.low %v5145_v24, %v5148_v11  ;;  %v5162_v41 = vsel %vm7521_vm15, %v5160_v29, %v5161_v15  ;;  %v3088_v15 = vshll.u32 %v6994_v49, 16 }
 0x188   : > { %6595 = vmatmul.mubr.msk.bf16.gmra.mrb[28].mxu0 %vm1467_vm8, %v6070_v36  ;;  %v3034_v36 = vshll.u32 %v2814_v44, 16  ;;  %v8749_v11 = vsel %vm7521_vm15, %v5244_v46, %v5245_v12  ;;  %v6107_v58 = vcombine.low %v5159_v7, %v5162_v41  ;;  %v2826_v12 = vld [vmem:[#allocation2 + $0x9c] sm:$0xf]  ;;  %v6995_v41 = vld [vmem:[#allocation2 + $0x94] sm:$0xf] }
 0x189   : > { %6600 = vmatprep.mubr.msk.bf16.mxu0 %vm1467_vm8, %v6104_v5  ;;  %v6992_v5 = vld [vmem:[#allocation2 + $0x70] sm:$0xf] }
 0x18a   : > { %v3040_v20 = vshll.u32 %v6992_v5, 16  ;;  %v3044_v13 = vshrl.u32 %v6992_v5, 16  ;;  %v3036_v51 = vrot.slane %v3034_v36, 5  ;;  %v6945_v36 = vld [vmem:[#allocation2 + $0xb4] sm:$0xff]   ;;  %v2823_v5 = vld [vmem:[#allocation2 + $0x90] sm:$0xf] }
 0x18b   : > { %6443 = vmatmul.mubr.msk.bf16.gmra.mrb[12].mxu1 %vm1467_vm8, %v6938_v45  ;;  %v6102_v45 = vrot.slane %v5086_v55, 9  ;;  %v3050_v55 = vshll.u32 %v6993_v18, 16  ;;  %v3106_v7 = vshll.u32 %v2823_v5, 16  ;;  %v6997_v18 = vld [vmem:[#allocation2 + $0xa0] sm:$0xf] }
 0x18c   : > { %6446 = vmatprep.mubr.msk.bf16.mxu1 %vm1467_vm8, %v6939_v27  ;;  %v3042_v6 = vrot.slane %v3040_v20, 5  ;;  %v3046_v24 = vrot.slane %v3044_v13, 4  ;;  %v3037_v61 = vor.u32 %v3036_v51, %v3033_v2  ;;  %v3112_v2 = vshll.u32 %v6995_v41, 16 }
 0x18d   : > { %v8738_v27 = vsel %vm7521_vm15, %v6102_v45, %v5242_v59  ;;  %v3052_v9 = vrot.slane %v3050_v55, 5  ;;  %v6944_v45 = vld [vmem:[#allocation2 + $0xa8] sm:$0xff]   ;;  %v8760_v59 = vrot.slane %v3088_v15, 5  ;;  %v3116_v51 = vshrl.u32 %v6995_v41, 16 }
 0x18e   : > { %v6119_v1 = vcombine.low %v8738_v27, %v8749_v11  ;;  %v3047_v44 = vor.u32 %v3046_v24, %v3042_v6  ;;  %v6996_v24 = vld [vmem:[#allocation2 + $0x8c] sm:$0x1]  ;;  %v3136_v55 = vshll.u32 %v6997_v18, 16 }
 0x18f   : > { %v6999_v41 = vld [vmem:[#allocation2 + $0xac] sm:$0xf] }
 0x190   : > { %6601 = vmatmul.mubr.msk.bf16.vlgmr.msra.gmra.mrb[0].mxu0 %vm1467_vm8, %v6105_v31  ;;  %v3048_v29 = vrot.slane %v3047_v44, 4 }
 0x191   : > { %6604 = vmatprep.mubr.msk.bf16.mxu0 %vm1467_vm8, %v6106_v62  ;;  %v3038_v62 = vrot.slane %v3037_v61, 4 }
 0x192   : > { %v3053_v52 = vsel %vm7206_vm9, %v3048_v29, %v3052_v9 }
 0x193   : > { %6447 = vmatmul.mubr.msk.bf16.gmra.mrb[16].mxu1 %vm1467_vm8, %v6940_v14  ;;  %v2820_v14 = vld [vmem:[#allocation2 + $0x84] sm:$0xf]  ;;  %v3043_v40 = vsel %vm7206_vm9, %v3038_v62, %v3042_v6  ;;  %v9079_v6 = vcombine.low %v8502_v43, %v8518_v8  ;;  %v2829_v8 = vld [vmem:[#allocation2 + $0xa8] sm:$0xf] }
 0x194   : > { %6450 = vmatprep.mubr.msk.bf16.mxu1 %vm1467_vm8, %v6941_v56  ;;  %v3079_v31 = vshrl.u32 %v2820_v14, 16  ;;  %v3082_v3 = vshll.u32 %v2820_v14, 16  ;;  %v3092_v56 = vshrl.u32 %v6994_v49, 16  ;;  %v3140_v14 = vshrl.u32 %v6997_v18, 16 }
 0x195   : > { %v5948_v42 = vcombine.low %v3043_v40, %v3053_v52  ;;  %v3118_v49 = vrot.slane %v3116_v51, 4  ;;  %v2832_v40 = vld [vmem:[#allocation2 + $0xb4] sm:$0xf]  ;;  %v9080_v52 = vcombine.low %v8525_v35, %v8542_v21  ;;  %v3164_v51 = vshrl.u32 %v6999_v41, 16 }
 0x196   : > { %v3081_v20 = vrot.slane %v3079_v31, 4  ;;  %v3084_v13 = vrot.slane %v3082_v3, 5  ;;  %v3094_v46 = vrot.slane %v3092_v56, 4  ;;  %v3108_v31 = vrot.slane %v3106_v7, 5  ;;  %v6998_v56 = vld [vmem:[#allocation2 + $0x98] sm:$0x1] }
 0x197   : > { %v8777_v3 = vrot.slane %v3112_v2, 5  ;;  %v3122_v62 = vshll.u32 %v6998_v56, 16  ;;  %v3160_v2 = vshll.u32 %v6999_v41, 16  ;;  %v2835_v56 = vld [vmem:[#allocation2 + $0xc0] sm:$0xf] }
 0x198   : > { %6605 = vmatmul.mubr.msk.bf16.gmra.mrb[4].mxu0 %vm1467_vm8, %v6107_v58  ;;  %v3127_v58 = vshrl.u32 %v2826_v12, 16  ;;  %v3085_v61 = vor.u32 %v3084_v13, %v3081_v20  ;;  %v3095_v44 = vor.u32 %v3094_v46, %v8760_v59  ;;  %v3151_v46 = vshrl.u32 %v2829_v8, 16 }
 0x199   : > { %6608 = vmatprep.mubr.msk.bf16.mxu0 %vm1467_vm8, %v6108_v4  ;;  %v3103_v4 = vshrl.u32 %v2823_v5, 16  ;;  %v3142_v5 = vrot.slane %v3140_v14, 4  ;;  %v3119_v13 = vor.u32 %v3118_v49, %v8777_v3 }
 0x19a   : > { %v3129_v29 = vrot.slane %v3127_v58, 4  ;;  %v3086_v9 = vrot.slane %v3085_v61, 4  ;;  %v7000_v58 = vld [vmem:[#allocation2 + $0xa4] sm:$0x1]  ;;  %v3178_v61 = vshll.u32 %v2832_v40, 16 }
 0x19b   : > { %6451 = vmatmul.mubr.msk.bf16.gmra.mrb[20].mxu1 %vm1467_vm8, %v6942_v16  ;;  %v3098_v16 = vshll.u32 %v6996_v24, 16  ;;  %v9081_v24 = vcombine.low %v8571_v53, %v8587_v34  ;;  %v3120_v53 = vrot.slane %v3119_v13, 4  ;;  %v3153_v34 = vrot.slane %v3151_v46, 4 }
 0x19c   : > { %6454 = vmatprep.mubr.msk.bf16.mxu1 %vm1467_vm8, %v6943_v33  ;;  %v3130_v33 = vshll.u32 %v2826_v12, 16  ;;  %v3154_v12 = vshll.u32 %v2829_v8, 16  ;;  %v9082_v46 = vcombine.low %v8579_v54, %v8598_v60  ;;  %v3202_v60 = vshll.u32 %v2835_v56, 16 }
 0x19d   : > { %v3100_v15 = vrot.slane %v3098_v16, 5  ;;  %v3091_v16 = vsel %vm7206_vm9, %v3086_v9, %v8760_v59  ;;  %v3166_v59 = vrot.slane %v3164_v51, 4  ;;  %v5085_v51 = vld [vmem:[#allocation2 + $0xc0] sm:$0xe] }
 0x19e   : > { %v3132_v43 = vrot.slane %v3130_v33, 5  ;;  %v3146_v33 = vshll.u32 %v7000_v58, 16 }
 0x1a0   : > { %6609 = vmatmul.mubr.msk.bf16.gmra.mrb[8].mxu0 %vm1467_vm8, %v6109_v32  ;;  %v3105_v32 = vrot.slane %v3103_v4, 4  ;;  %v3124_v4 = vrot.slane %v3122_v62, 5  ;;  %v3133_v7 = vor.u32 %v3132_v43, %v3129_v29  ;;  %v3180_v29 = vrot.slane %v3178_v61, 5 }
 0x1a1   : > { %6612 = vmatprep.mubr.msk.bf16.mxu0 %vm1467_vm8, %v9079_v6  ;;  %v3175_v6 = vshrl.u32 %v2832_v40, 16  ;;  %v7003_v40 = vld [vmem:[#allocation2 + $0xbc] sm:$0x1] }
 0x1a2   : > { %v3109_v20 = vor.u32 %v3108_v31, %v3105_v32  ;;  %v8798_v32 = vrot.slane %v3160_v2, 5 }
 0x1a3   : > { %6455 = vmatmul.mubr.msk.bf16.gmra.mrb[24].mxu1 %vm1467_vm8, %v6944_v45  ;;  %v3096_v45 = vrot.slane %v3095_v44, 4  ;;  %v7001_v44 = vld [vmem:[#allocation2 + $0xb8] sm:$0xf]  ;;  %v3177_v62 = vrot.slane %v3175_v6, 4 }
 0x1a4   : > { %6458 = vmatprep.mubr.msk.bf16.mxu1 %vm1467_vm8, %v6945_v36  ;;  %v8779_v36 = vrot.slane %v3136_v55, 5  ;;  %v3184_v18 = vshll.u32 %v7001_v44, 16  ;;  %v3188_v55 = vshrl.u32 %v7001_v44, 16  ;;  %v3110_v14 = vrot.slane %v3109_v20, 4  ;;  %v7002_v20 = vld [vmem:[#allocation2 + $0xb0] sm:$0x1] }
 0x1a5   : > { %v3101_v35 = vsel %vm7206_vm9, %v3096_v45, %v3100_v15  ;;  %v3148_v15 = vrot.slane %v3146_v33, 5  ;;  %v3125_v45 = vsel %vm7206_vm9, %v3120_v53, %v3124_v4  ;;  %v3170_v13 = vshll.u32 %v7002_v20, 16 }
 0x1a6   : > { %v3143_v21 = vor.u32 %v3142_v5, %v8779_v36  ;;  %v5950_v31 = vcombine.low %v3091_v16, %v3101_v35  ;;  %v3186_v43 = vrot.slane %v3184_v18, 5  ;;  %v3190_v8 = vrot.slane %v3188_v55, 4 }
 0x1a7   : > { %v3115_v9 = vsel %vm7206_vm9, %v3110_v14, %v8777_v3  ;;  %v3167_v3 = vor.u32 %v3166_v59, %v8798_v32  ;;  %v3199_v4 = vshrl.u32 %v2835_v56, 16  ;;  %v6101_v44 = vrot.slane %v5085_v51, 9 }
 0x1a8   : > { %6613 = vmatmul.mubr.msk.bf16.gmra.mrb[12].mxu0 %vm1467_vm8, %v9080_v52  ;;  %v3144_v49 = vrot.slane %v3143_v21, 4  ;;  %v3194_v52 = vshll.u32 %v7003_v40, 16  ;;  %v3191_v2 = vor.u32 %v3190_v8, %v3186_v43  ;;  %v5951_v16 = vcombine.low %v3115_v9, %v3125_v45 }
 0x1a9   : > { %6616 = vmatprep.mubr.msk.bf16.mxu0 %vm1467_vm8, %v9081_v24  ;;  %v5235_v24 = vrot.slane %v8538_v57, 5  ;;  %v3172_v21 = vrot.slane %v3170_v13, 5  ;;  %v3168_v33 = vrot.slane %v3167_v3, 4  ;;  %v3201_v50 = vrot.slane %v3199_v4, 4  ;;  %v8874_v3 = vld [vmem:[%s8995_s4] ss:$0 sm:$0xff] }
 0x1aa   : > { %v3149_v54 = vsel %vm7206_vm9, %v3144_v49, %v3148_v15  ;;  %v3196_v39 = vrot.slane %v3194_v52, 5  ;;  %v3192_v55 = vrot.slane %v3191_v2, 4  ;;  %v5238_v53 = vrot.slane %v8581_v37, 5 }
 0x1ab   : > { %6459 = vmatmul.mubr.msk.bf16.gmra.mrb[28].mxu1 %vm1467_vm8, %v6946_v25  ;;  %v3134_v25 = vrot.slane %v3133_v7, 4  ;;  %v5237_v14 = vrot.slane %v5235_v24, 4 }
 0x1ac   : > { %6480 = vmatprep.mubr.msk.bf16.mxu1 %vm1467_vm8, %v5948_v42  ;;  %v3156_v42 = vrot.slane %v3154_v12, 5 }
 0x1ad   : > { %v3139_v12 = vsel %vm7206_vm9, %v3134_v25, %v8779_v36  ;;  %v3181_v36 = vor.u32 %v3180_v29, %v3177_v62  ;;  %v3173_v25 = vsel %vm7206_vm9, %v3168_v33, %v3172_v21  ;;  %v5239_v59 = vsel %vm7521_vm15, %v5237_v14, %v5238_v53 }
 0x1ae   : > { %v3157_v5 = vor.u32 %v3156_v42, %v3153_v34  ;;  %v5952_v58 = vcombine.low %v3139_v12, %v3149_v54  ;;  %v7005_v34 = vld [vmem:[#allocation2 + $0xc8] sm:$0x1] }
 0x1af   : > { %v3182_v18 = vrot.slane %v3181_v36, 4  ;;  %v3218_v42 = vshll.u32 %v7005_v34, 16 }
 0x1b0   : > { %6617 = vmatmul.mubr.msk.bf16.gmra.mrb[16].mxu0 %vm1467_vm8, %v9082_v46  ;;  %v3158_v35 = vrot.slane %v3157_v5, 4 }
 0x1b1   : > { %6620 = vmatprep.mubr.msk.bf16.mxu0 %vm1467_vm8, %v6114_v26  ;;  %v3204_v26 = vrot.slane %v3202_v60, 5  ;;  %v3187_v47 = vsel %vm7206_vm9, %v3182_v18, %v3186_v43  ;;  %v3220_v49 = vrot.slane %v3218_v42, 5 }
 0x1b2   : > { %v3163_v57 = vsel %vm7206_vm9, %v3158_v35, %v8798_v32  ;;  %v5236_v32 = vsel %vm7521_vm15, %v6101_v44, %v5235_v24 }
 0x1b3   : > { %6481 = vmatmul.mubr.msk.bf16.vlgmr.msra.gmra.mrb[16].mxu1 %vm1467_vm8, %v8602_v0  ;;  %v7004_v0 = vld [vmem:[#allocation2 + $0xc4] sm:$0xf]  ;;  %v3205_v37 = vor.u32 %v3204_v26, %v3201_v50 }
 0x1b4   : > { %6484 = vmatprep.mubr.msk.bf16.mxu1 %vm1467_vm8, %v5950_v31  ;;  %v3208_v7 = vshll.u32 %v7004_v0, 16  ;;  %v3212_v41 = vshrl.u32 %v7004_v0, 16  ;;  %v5953_v31 = vcombine.low %v3163_v57, %v3173_v25 }
 0x1b5   : > { %v3206_v38 = vrot.slane %v3205_v37, 4 }
 0x1b6   : > { %v3210_v6 = vrot.slane %v3208_v7, 5  ;;  %v3214_v61 = vrot.slane %v3212_v41, 4 }
 0x1b8   : > { %6621 = vmatmul.mubr.msk.bf16.gmra.mrb[20].mxu0 %vm1467_vm8, %v6115_v10  ;;  %v3215_v23 = vor.u32 %v3214_v61, %v3210_v6  ;;  %v3197_v10 = vsel %vm7206_vm9, %v3192_v55, %v3196_v39  ;;  %v3211_v56 = vsel %vm7206_vm9, %v3206_v38, %v3210_v6 }
 0x1b9   : > { %6624 = vmatprep.mubr.msk.bf16.mxu0 %vm1467_vm8, %v6116_v19  ;;  %v5954_v15 = vcombine.low %v3187_v47, %v3197_v10  ;;  %v6118_v19 = vcombine.low %v5236_v32, %v5239_v59 }
 0x1ba   : > { %v3216_v22 = vrot.slane %v3215_v23, 4 }
 0x1bb   : > { %6485 = vmatmul.mubr.msk.bf16.gmra.mrb[20].mxu1 %vm1467_vm8, %v5951_v16 }
 0x1bc   : > { %6488 = vmatprep.mubr.msk.bf16.mxu1 %vm1467_vm8, %v5952_v58  ;;  %v3221_v63 = vsel %vm7206_vm9, %v3216_v22, %v3220_v49 }
 0x1bd   : > { %v5955_v62 = vcombine.low %v3211_v56, %v3221_v63 }
 0x1c0   : > { %6625 = vmatmul.mubr.msk.bf16.gmra.mrb[24].mxu0 %vm1467_vm8, %v6117_v28 }
 0x1c1   : > { %6628 = vmatprep.mubr.msk.bf16.mxu0 %vm1467_vm8, %v6118_v19 }
 0x1c3   : > { %6489 = vmatmul.mubr.msk.bf16.gmra.mrb[24].mxu1 %vm1467_vm8, %v5953_v31 }
 0x1c4   : > { %6492 = vmatprep.mubr.msk.bf16.mxu1 %vm1467_vm8, %v5954_v15 }
 0x1c8   : > { %6629 = vmatmul.mubr.msk.bf16.gmra.mrb[28].mxu0 %vm1467_vm8, %v6119_v1 }
 0x1cb   : > { %6493 = vmatmul.mubr.msk.bf16.gmra.mrb[28].mxu1 %vm1467_vm8, %v5955_v62 }
 0x246   : > { %v6432_v17 = vpop.f32.mrb[0].mxu1 }
 0x247   : > { %v2631_v30 = vpop.f32.mrb[1].mxu1 }
 0x248   : > { %v6433_v28 = vpop.f32.mrb[2].mxu1 }
 0x249   : > { %v2634_v29 = vpop.f32.mrb[3].mxu1 }
 0x24e   : > { %v6436_v43 = vpop.f32.mrb[4].mxu1 }
 0x24f   : > { %v2647_v8 = vpop.f32.mrb[5].mxu1 }
 0x250   : > { %v6437_v9 = vpop.f32.mrb[6].mxu1 }
 0x251   : > { %v2650_v45 = vpop.f32.mrb[7].mxu1 }
 0x256   : > { %v6440_v48 = vpop.f32.mrb[8].mxu1 }
 0x257   : > { %v2663_v5 = vpop.f32.mrb[9].mxu1 }
 0x258   : > { %v6441_v20 = vpop.f32.mrb[10].mxu1 }
 0x259   : > { %v2666_v13 = vpop.f32.mrb[11].mxu1 }
 0x25e   : > { %v8863_v46 = vpop.f32.mrb[12].mxu1 }
 0x25f   : > { %v8865_v12 = vpop.f32.mrb[13].mxu1 }
 0x260   : > { %v8867_v27 = vpop.f32.mrb[14].mxu1 }
 0x261   : > { %v8869_v11 = vpop.f32.mrb[15].mxu1 }
 0x263   : > { %v6602_v1 = vpop.f32.mrb[0].mxu0 }
 0x264   : > { %v6634_v40 = vadd.f32 %v6602_v1, %v6432_v17  ;;  %v5382_v52 = vpop.f32.mrb[1].mxu0 }
 0x265   : > { %v6635_v4 = vadd.f32 %v5382_v52, %v2631_v30  ;;  %v6603_v54 = vpop.f32.mrb[2].mxu0 }
 0x266   : > { %v5550_v60 = vadd.f32 %v6634_v40, %v8874_v3  ;;  %v6636_v0 = vadd.f32 %v6603_v54, %v6433_v28  ;;  %v5385_v7 = vpop.f32.mrb[3].mxu0 }
 0x267   : > { %v5548_v41 = vadd.f32 %v6635_v4, %v8874_v3  ;;  %v6637_v36 = vadd.f32 %v5385_v7, %v2634_v29 }
 0x268   : > { %v5582_v2 = vmax.f32 %v5550_v60, 0.0  ;;  %v5551_v51 = vadd.f32 %v6636_v0, %v8874_v3 }
 0x269   : > { %v5580_v24 = vmax.f32 %v5548_v41, 0.0  ;;  %v5549_v16 = vadd.f32 %v6637_v36, %v8874_v3 }
 0x26a   : > { %5615 = vst.msk [vmem:[%s8882_s27 + $0x10] sm:$0xff] %vm5612_vm0, %v5582_v2  ;;  %v5583_v35 = vmax.f32 %v5551_v51, 0.0 }
 0x26b   : > { %5613 = vst.msk [vmem:[%s8882_s27] sm:$0xff] %vm5612_vm0, %v5580_v24  ;;  %v5581_v21 = vmax.f32 %v5549_v16, 0.0  ;;  %v6606_v58 = vpop.f32.mrb[4].mxu0 }
 0x26c   : > { %5616 = vst.msk [vmem:[%s8882_s27 + $0x18] sm:$0xff] %vm5612_vm0, %v5583_v35  ;;  %v6638_v33 = vadd.f32 %v6606_v58, %v6436_v43  ;;  %v5398_v39 = vpop.f32.mrb[5].mxu0 }
 0x26d   : > { %5614 = vst.msk [vmem:[%s8882_s27 + $0x8] sm:$0xff] %vm5612_vm0, %v5581_v21  ;;  %v6639_v50 = vadd.f32 %v5398_v39, %v2647_v8  ;;  %v6607_v26 = vpop.f32.mrb[6].mxu0 }
 0x26e   : > { %v5554_v6 = vadd.f32 %v6638_v33, %v8874_v3  ;;  %v6640_v61 = vadd.f32 %v6607_v26, %v6437_v9  ;;  %v5401_v44 = vpop.f32.mrb[7].mxu0 }
 0x26f   : > { %v5552_v18 = vadd.f32 %v6639_v50, %v8874_v3  ;;  %v6641_v55 = vadd.f32 %v5401_v44, %v2650_v45 }
 0x270   : > { %v5586_v14 = vmax.f32 %v5554_v6, 0.0  ;;  %v5555_v53 = vadd.f32 %v6640_v61, %v8874_v3 }
 0x271   : > { %v5584_v57 = vmax.f32 %v5552_v18, 0.0  ;;  %v5553_v34 = vadd.f32 %v6641_v55, %v8874_v3 }
 0x272   : > { %5619 = vst.msk [vmem:[%s8882_s27 + $0x30] sm:$0xff] %vm5612_vm0, %v5586_v14  ;;  %v5587_v42 = vmax.f32 %v5555_v53, 0.0 }
 0x273   : > { %5617 = vst.msk [vmem:[%s8882_s27 + $0x20] sm:$0xff] %vm5612_vm0, %v5584_v57  ;;  %v5585_v25 = vmax.f32 %v5553_v34, 0.0  ;;  %v6610_v37 = vpop.f32.mrb[8].mxu0 }
 0x274   : > { %5620 = vst.msk [vmem:[%s8882_s27 + $0x38] sm:$0xff] %vm5612_vm0, %v5587_v42  ;;  %v6642_v23 = vadd.f32 %v6610_v37, %v6440_v48  ;;  %v5414_v47 = vpop.f32.mrb[9].mxu0 }
 0x275   : > { %5618 = vst.msk [vmem:[%s8882_s27 + $0x28] sm:$0xff] %vm5612_vm0, %v5585_v25  ;;  %v6643_v10 = vadd.f32 %v5414_v47, %v2663_v5  ;;  %v6611_v32 = vpop.f32.mrb[10].mxu0 }
 0x276   : > { %v5558_v59 = vadd.f32 %v6642_v23, %v8874_v3  ;;  %v6644_v31 = vadd.f32 %v6611_v32, %v6441_v20  ;;  %v5417_v49 = vpop.f32.mrb[11].mxu0 }
 0x277   : > { %v5556_v15 = vadd.f32 %v6643_v10, %v8874_v3  ;;  %v6645_v38 = vadd.f32 %v5417_v49, %v2666_v13 }
 0x278   : > { %v5590_v22 = vmax.f32 %v5558_v59, 0.0  ;;  %v5559_v19 = vadd.f32 %v6644_v31, %v8874_v3 }
 0x279   : > { %v5588_v56 = vmax.f32 %v5556_v15, 0.0  ;;  %v5557_v63 = vadd.f32 %v6645_v38, %v8874_v3 }
 0x27a   : > { %5623 = vst.msk [vmem:[%s8882_s27 + $0x50] sm:$0xff] %vm5612_vm0, %v5590_v22  ;;  %v5591_v62 = vmax.f32 %v5559_v19, 0.0 }
 0x27b   : > { %5621 = vst.msk [vmem:[%s8882_s27 + $0x40] sm:$0xff] %vm5612_vm0, %v5588_v56  ;;  %v5589_v17 = vmax.f32 %v5557_v63, 0.0  ;;  %v6614_v30 = vpop.f32.mrb[12].mxu0 }
 0x27c   : > { %5624 = vst.msk [vmem:[%s8882_s27 + $0x58] sm:$0xff] %vm5612_vm0, %v5591_v62  ;;  %v6646_v28 = vadd.f32 %v6614_v30, %v8863_v46  ;;  %v5430_v29 = vpop.f32.mrb[13].mxu0 }
 0x27d   : > { %5622 = vst.msk [vmem:[%s8882_s27 + $0x48] sm:$0xff] %vm5612_vm0, %v5589_v17  ;;  %v6647_v43 = vadd.f32 %v5430_v29, %v8865_v12  ;;  %v6615_v8 = vpop.f32.mrb[14].mxu0 }
 0x27e   : > { %v5562_v9 = vadd.f32 %v6646_v28, %v8874_v3  ;;  %v6648_v45 = vadd.f32 %v6615_v8, %v8867_v27  ;;  %v5433_v48 = vpop.f32.mrb[15].mxu0 }
 0x27f   : > { %v5560_v5 = vadd.f32 %v6647_v43, %v8874_v3  ;;  %v6649_v20 = vadd.f32 %v5433_v48, %v8869_v11 }
 0x280   : > { %v5594_v13 = vmax.f32 %v5562_v9, 0.0  ;;  %v5563_v46 = vadd.f32 %v6648_v45, %v8874_v3 }
 0x281   : > { %v5592_v1 = vmax.f32 %v5560_v5, 0.0  ;;  %v5561_v40 = vadd.f32 %v6649_v20, %v8874_v3 }
 0x282   : > { %5627 = vst.msk [vmem:[%s8882_s27 + $0x70] sm:$0xff] %vm5612_vm0, %v5594_v13  ;;  %v5595_v12 = vmax.f32 %v5563_v46, 0.0 }
 0x283   : > { %5625 = vst.msk [vmem:[%s8882_s27 + $0x60] sm:$0xff] %vm5612_vm0, %v5592_v1  ;;  %v5593_v52 = vmax.f32 %v5561_v40, 0.0  ;;  %v6618_v27 = vpop.f32.mrb[16].mxu0 }
 0x284   : > { %5628 = vst.msk [vmem:[%s8882_s27 + $0x78] sm:$0xff] %vm5612_vm0, %v5595_v12  ;;  %v5446_v11 = vpop.f32.mrb[17].mxu0 }
 0x285   : > { %5626 = vst.msk [vmem:[%s8882_s27 + $0x68] sm:$0xff] %vm5612_vm0, %v5593_v52  ;;  %v6619_v41 = vpop.f32.mrb[18].mxu0 }
 0x286   : > { %v6482_v4 = vpop.f32.mrb[16].mxu1  ;;  %v5449_v24 = vpop.f32.mrb[19].mxu0 }
 0x287   : > { %v3421_v54 = vpop.f32.mrb[17].mxu1  ;;  %v6650_v60 = vadd.f32 %v6618_v27, %v6482_v4 }
 0x288   : > { %v6483_v0 = vpop.f32.mrb[18].mxu1  ;;  %v6651_v7 = vadd.f32 %v5446_v11, %v3421_v54 }
 0x289   : > { %v5566_v36 = vadd.f32 %v6650_v60, %v8874_v3  ;;  %v3424_v2 = vpop.f32.mrb[19].mxu1  ;;  %v6652_v51 = vadd.f32 %v6619_v41, %v6483_v0 }
 0x28a   : > { %v5564_v16 = vadd.f32 %v6651_v7, %v8874_v3  ;;  %v6653_v35 = vadd.f32 %v5449_v24, %v3424_v2 }
 0x28b   : > { %v5598_v21 = vmax.f32 %v5566_v36, 0.0  ;;  %v5567_v58 = vadd.f32 %v6652_v51, %v8874_v3  ;;  %v6622_v61 = vpop.f32.mrb[20].mxu0 }
 0x28c   : > { %v5596_v33 = vmax.f32 %v5564_v16, 0.0  ;;  %v5565_v39 = vadd.f32 %v6653_v35, %v8874_v3  ;;  %v5462_v55 = vpop.f32.mrb[21].mxu0 }
 0x28d   : > { %5631 = vst.msk [vmem:[%s8882_s27 + $0x90] sm:$0xff] %vm5612_vm0, %v5598_v21  ;;  %v5599_v50 = vmax.f32 %v5567_v58, 0.0  ;;  %v6623_v57 = vpop.f32.mrb[22].mxu0 }
 0x28e   : > { %5629 = vst.msk [vmem:[%s8882_s27 + $0x80] sm:$0xff] %vm5612_vm0, %v5596_v33  ;;  %v5597_v26 = vmax.f32 %v5565_v39, 0.0  ;;  %v6486_v6 = vpop.f32.mrb[20].mxu1  ;;  %v5465_v37 = vpop.f32.mrb[23].mxu0 }
 0x28f   : > { %5632 = vst.msk [vmem:[%s8882_s27 + $0x98] sm:$0xff] %vm5612_vm0, %v5599_v50  ;;  %v3437_v44 = vpop.f32.mrb[21].mxu1  ;;  %v6654_v18 = vadd.f32 %v6622_v61, %v6486_v6 }
 0x290   : > { %5630 = vst.msk [vmem:[%s8882_s27 + $0x88] sm:$0xff] %vm5612_vm0, %v5597_v26  ;;  %v6487_v14 = vpop.f32.mrb[22].mxu1  ;;  %v6655_v53 = vadd.f32 %v5462_v55, %v3437_v44 }
 0x291   : > { %v5570_v34 = vadd.f32 %v6654_v18, %v8874_v3  ;;  %v3440_v42 = vpop.f32.mrb[23].mxu1  ;;  %v6656_v25 = vadd.f32 %v6623_v57, %v6487_v14 }
 0x292   : > { %v5568_v23 = vadd.f32 %v6655_v53, %v8874_v3  ;;  %v6657_v47 = vadd.f32 %v5465_v37, %v3440_v42 }
 0x293   : > { %v5602_v10 = vmax.f32 %v5570_v34, 0.0  ;;  %v5571_v32 = vadd.f32 %v6656_v25, %v8874_v3  ;;  %v6626_v22 = vpop.f32.mrb[24].mxu0 }
 0x294   : > { %v5600_v59 = vmax.f32 %v5568_v23, 0.0  ;;  %v5569_v31 = vadd.f32 %v6657_v47, %v8874_v3  ;;  %v5478_v63 = vpop.f32.mrb[25].mxu0 }
 0x295   : > { %5635 = vst.msk [vmem:[%s8882_s27 + $0xb0] sm:$0xff] %vm5612_vm0, %v5602_v10  ;;  %v5603_v49 = vmax.f32 %v5571_v32, 0.0  ;;  %v6627_v30 = vpop.f32.mrb[26].mxu0 }
 0x296   : > { %5633 = vst.msk [vmem:[%s8882_s27 + $0xa0] sm:$0xff] %vm5612_vm0, %v5600_v59  ;;  %v5601_v15 = vmax.f32 %v5569_v31, 0.0  ;;  %v6490_v38 = vpop.f32.mrb[24].mxu1  ;;  %v5481_v8 = vpop.f32.mrb[27].mxu0 }
 0x297   : > { %5636 = vst.msk [vmem:[%s8882_s27 + $0xb8] sm:$0xff] %vm5612_vm0, %v5603_v49  ;;  %v3453_v19 = vpop.f32.mrb[25].mxu1  ;;  %v6658_v56 = vadd.f32 %v6626_v22, %v6490_v38 }
 0x298   : > { %5634 = vst.msk [vmem:[%s8882_s27 + $0xa8] sm:$0xff] %vm5612_vm0, %v5601_v15  ;;  %v6491_v62 = vpop.f32.mrb[26].mxu1  ;;  %v6659_v17 = vadd.f32 %v5478_v63, %v3453_v19 }
 0x299   : > { %v5574_v28 = vadd.f32 %v6658_v56, %v8874_v3  ;;  %v3456_v29 = vpop.f32.mrb[27].mxu1  ;;  %v6660_v43 = vadd.f32 %v6627_v30, %v6491_v62 }
 0x29a   : > { %v5572_v9 = vadd.f32 %v6659_v17, %v8874_v3  ;;  %v6661_v45 = vadd.f32 %v5481_v8, %v3456_v29 }
 0x29b   : > { %v5606_v48 = vmax.f32 %v5574_v28, 0.0  ;;  %v5575_v5 = vadd.f32 %v6660_v43, %v8874_v3  ;;  %v6630_v12 = vpop.f32.mrb[28].mxu0 }
 0x29c   : > { %v5604_v20 = vmax.f32 %v5572_v9, 0.0  ;;  %v5573_v13 = vadd.f32 %v6661_v45, %v8874_v3  ;;  %v5494_v27 = vpop.f32.mrb[29].mxu0 }
 0x29d   : > { %5639 = vst.msk [vmem:[%s8882_s27 + $0xd0] sm:$0xff] %vm5612_vm0, %v5606_v48  ;;  %v5607_v46 = vmax.f32 %v5575_v5, 0.0  ;;  %v6631_v11 = vpop.f32.mrb[30].mxu0 }
 0x29e   : > { %5637 = vst.msk [vmem:[%s8882_s27 + $0xc0] sm:$0xff] %vm5612_vm0, %v5604_v20  ;;  %v5605_v1 = vmax.f32 %v5573_v13, 0.0  ;;  %v6494_v40 = vpop.f32.mrb[28].mxu1  ;;  %v5497_v36 = vpop.f32.mrb[31].mxu0 }
 0x29f   : > { %5640 = vst.msk [vmem:[%s8882_s27 + $0xd8] sm:$0xff] %vm5612_vm0, %v5607_v46  ;;  %v3469_v52 = vpop.f32.mrb[29].mxu1  ;;  %v6662_v4 = vadd.f32 %v6630_v12, %v6494_v40 }
 0x2a0   : > { %5638 = vst.msk [vmem:[%s8882_s27 + $0xc8] sm:$0xff] %vm5612_vm0, %v5605_v1  ;;  %v6495_v54 = vpop.f32.mrb[30].mxu1  ;;  %v6663_v60 = vadd.f32 %v5494_v27, %v3469_v52 }
 0x2a1   : > { %v5578_v0 = vadd.f32 %v6662_v4, %v8874_v3  ;;  %v3472_v7 = vpop.f32.mrb[31].mxu1  ;;  %v6664_v41 = vadd.f32 %v6631_v11, %v6495_v54 }
 0x2a2   : > { %v5576_v2 = vadd.f32 %v6663_v60, %v8874_v3  ;;  %v6665_v51 = vadd.f32 %v5497_v36, %v3472_v7 }
 0x2a3   : > { %v5610_v24 = vmax.f32 %v5578_v0, 0.0  ;;  %v5579_v16 = vadd.f32 %v6664_v41, %v8874_v3 }
 0x2a4   : > { %v5608_v35 = vmax.f32 %v5576_v2, 0.0  ;;  %v5577_v21 = vadd.f32 %v6665_v51, %v8874_v3 }
 0x2a5   : > { %5643 = vst.msk [vmem:[%s8882_s27 + $0xf0] sm:$0xff] %vm5612_vm0, %v5610_v24  ;;  %v5611_v58 = vmax.f32 %v5579_v16, 0.0 }
 0x2a6   : > { %5641 = vst.msk [vmem:[%s8882_s27 + $0xe0] sm:$0xff] %vm5612_vm0, %v5608_v35  ;;  %v5609_v33 = vmax.f32 %v5577_v21, 0.0 }
 0x2a7   : > { %5644 = vst.msk [vmem:[%s8882_s27 + $0xf8] sm:$0xff] %vm5612_vm0, %v5611_v58 }
 0x2a8   : > { %5642 = vst.msk [vmem:[%s8882_s27 + $0xe8] sm:$0xff] %vm5612_vm0, %v5609_v33 }
 0x2a9 PF: > { %s19_s24 = sadd.s32 1, %s7028_s24   ;;  %s9083_s22 = smov %s7024_s23 }
 0x2aa   : > { %p16_p5 = scmp.ge.s32.totalorder %s19_s24, 4   ;;  %s9084_s23 = smov %s9086_s1 }
 0x2ac   :  { %18 = sbr.rel (!%p16_p5) target bundleno = 3 (0x3), region = 86 }

// kernel: double_conv2d_forward.7
= control target key start
LH: loop header
LB: loop body
LE: loop exit
PB: predicated region body
PF: predicated region fallthrough
CT: control target
= control target key end

     0   :  { %10 = vsyncpa [#allocation4], 0  ;;  %s9418_s0 = inlined_call_operand.vmem [shape: f32[2,16,16,32], index: 0, kind: input, shape index: {}]   ;;  %s9419_s1 = inlined_call_operand.vmem [shape: f32[1,32], index: 1, kind: input, shape index: {}]   ;;  %s9420_s2 = inlined_call_operand.vmem [shape: f32[1,32], index: 2, kind: input, shape index: {}]   ;;  %s9421_s3 = inlined_call_operand.vmem [shape: bf16[9,32,32], index: 3, kind: input, shape index: {}]   ;;  %s9422_s4 = inlined_call_operand.vmem [shape: f32[1,32], index: 4, kind: input, shape index: {}]   ;;  %s9423_s5 = inlined_call_operand.hbm [shape: f32[2,16,16,32], index: 5, kind: output, shape index: {}]  }
   0x1   :  { %12 = vsyncpa [#allocation4 + $0x1], 0  ;;  %s7356_s18 = smov 0   ;;  %s7358_s19 = smov 0  }
   0x2   :  { %s7360_s20 = smov 0   ;;  %s7362_s21 = smov 0  }
   0x3   :  { %s7364_s22 = smov 0   ;;  %s7366_s23 = smov 0  }
   0x4 LB: > { %s5854_s24 = sadd.s32 4294967295, %s7320_s23   ;;  %s5855_s25 = sadd.s32 4294967294, %s7320_s23   ;;  %s7320_s23 = sphi %s7366_s23, %s18_s23   ;;  %s7316_s22 = sphi %s7364_s22, %s9505_s22   ;;  %s7312_s21 = sphi %s7362_s21, %s9504_s21   ;;  %s7308_s20 = sphi %s7360_s20, %s9503_s20   ;;  %s7304_s19 = sphi %s7358_s19, %s9502_s19   ;;  %s7300_s18 = sphi %s7356_s18, %s9501_s18  }
   0x5   : > { %s30_s26 = sadd.s32 1, %s7316_s22  ;;  %s159_s27 = sadd.s32 1, %s7308_s20 }
   0x6   : > { %p32_p0 = scmp.ge.s32.totalorder %s30_s26, 2  ;;  %p169_p1 = scmp.ne.s32.totalorder %s7308_s20, %s7304_s19 }
   0x7   : > { %p170_p2 = scmp.eq.s32.totalorder %s5854_s24, 1  ;;  %p175_p3 = scmp.ne.s32.totalorder %s7304_s19, %s7300_s18 }
   0x8   : > { %s9507_s26 = smov (%p32_p0, %s30_s26), 0  ;;  %p176_p5 = scmp.eq.s32.totalorder %s5855_s25, 1 }
   0x9   : > { %p7396_p4 = por %p170_p2, %p169_p1  ;;  %s154_s29 = ssub.s32 %s7316_s22, %s9507_s26 }
   0xa   : > { %p5860_p6 = scmp.ge.s32.totalorder %s7320_s23, 1  ;;  %p157_p7 = scmp.eq.s32.totalorder %s154_s29, 0 }
   0xb   : > { %p7403_p8 = por %p176_p5, %p175_p3  ;;  %p221_p9 = scmp.lt.s32.totalorder %s7320_s23, 3 }
   0xc   : > { %s7409_s6 = scalar_select %p157_p7, %s7308_s20, %s159_s27  }
   0xd   : > { %p222_p10 = pnand %p5860_p6, %p221_p9 }
   0xf   : > { %225 = sbr.rel (%p222_p10) target bundleno = 701 (0x2bd), region = 40 }
  0x16   : > { %v7128_v0 = vld [vmem:[%s9421_s3 + $0x10] sm:$0xff]   ;;  %vm269_vm0 = vcmask 257024   ;;  %v7129_v1 = vld [vmem:[%s9421_s3 + $0x40] sm:$0xff]   ;;  %v7420_v2 = vld [vmem:[%s9421_s3 + $0x18] sm:$0xff]   ;;  %v7322_v3 = vmov 0   ;;  %vm272_vm1 = vcmask 253952  }
  0x17   : > { %6486 = vmatprep.subr.bf16.mxu1 %v7128_v0  ;;  %270 = vst.msk [vmem:[#allocation2] sm:$0xf] %vm269_vm0, %v7322_v3  ;;  %271 = vst.msk [vmem:[#allocation2 + $0x4] sm:$0xf] %vm269_vm0, %v7322_v3  ;;  %6630 = vmatprep.subr.bf16.mxu0 %v7129_v1  ;;  %v7131_v4 = vld [vmem:[%s9421_s3 + $0x48] sm:$0xff]   ;;  %p256_p11 = scmp.lt.s32.totalorder %s7312_s21, 1 }
  0x18   : > { %274 = vst.msk [vmem:[#allocation2 + $0xc] sm:$0xf] %vm269_vm0, %v7322_v3  ;;  %275 = vst.msk [vmem:[#allocation2 + $0x10] sm:$0xf] %vm269_vm0, %v7322_v3  ;;  %6487 = vmatpush3.bf16.msra.mxu1 %v7128_v0  ;;  %6631 = vmatpush3.bf16.msra.mxu0 %v7129_v1  ;;  %v7484_v5 = vld [vmem:[%s9421_s3] sm:$0xff]   ;;  %v7490_v6 = vld [vmem:[%s9421_s3 + $0x50] sm:$0xff]  }
  0x19   : > { %277 = vst.msk [vmem:[#allocation2 + $0x18] sm:$0xf] %vm269_vm0, %v7322_v3  ;;  %278 = vst.msk [vmem:[#allocation2 + $0x1c] sm:$0xf] %vm269_vm0, %v7322_v3  ;;  %6488 = vmatprep.subr.bf16.mxu1 %v7420_v2  ;;  %6632 = vmatprep.subr.bf16.mxu0 %v7131_v4  ;;  %vm1024_vm2 = vsmask.f32 3328 }
  0x1a   : > { %280 = vst.msk [vmem:[#allocation2 + $0x24] sm:$0xf] %vm269_vm0, %v7322_v3  ;;  %281 = vst.msk [vmem:[#allocation2 + $0x28] sm:$0xf] %vm269_vm0, %v7322_v3  ;;  %s257_s17 = scalar_select %p256_p11, %s7312_s21, 1  ;;  %vm1476_vm6 = vcmask 261120  }
  0x1b   : > { %283 = vst.msk [vmem:[#allocation2 + $0x30] sm:$0xf] %vm269_vm0, %v7322_v3  ;;  %284 = vst.msk [vmem:[#allocation2 + $0x34] sm:$0xf] %vm269_vm0, %v7322_v3  ;;  %vm1025_vm3 = vsmask.f32 7440 }
  0x1c   : > { %286 = vst.msk [vmem:[#allocation2 + $0x3c] sm:$0xf] %vm269_vm0, %v7322_v3  ;;  %287 = vst.msk [vmem:[#allocation2 + $0x40] sm:$0xf] %vm269_vm0, %v7322_v3  ;;  %6489 = vmatpush3.bf16.msra.mxu1 %v7420_v2  ;;  %6633 = vmatpush3.bf16.msra.mxu0 %v7131_v4  ;;  %s6290_s27 = sshll.u32 %s257_s17, 8  ;;  %vm2035_vm12 = vcmask 1042432  }
  0x1d   : > { %289 = vst.msk [vmem:[#allocation2 + $0x48] sm:$0xf] %vm269_vm0, %v7322_v3  ;;  %290 = vst.msk [vmem:[#allocation2 + $0x4c] sm:$0xf] %vm269_vm0, %v7322_v3  ;;  %6522 = vmatprep.subr.bf16.mxu1 %v7484_v5  ;;  %s7497_s8 = scalar_lea.vmem %s9418_s0, %s6290_s27  ;;  %v7502_v9 = vld [vmem:[%s9419_s1] ss:$0 sm:$0xff]  ;;  %6666 = vmatprep.subr.bf16.mxu0 %v7490_v6 }
  0x1e   : > { %292 = vst.msk [vmem:[#allocation2 + $0x54] sm:$0xf] %vm269_vm0, %v7322_v3  ;;  %293 = vst.msk [vmem:[#allocation2 + $0x58] sm:$0xf] %vm269_vm0, %v7322_v3  ;;  %v972_v7 = vld [vmem:[#allocation2] sm:$0xf] }
  0x1f   : > { %295 = vst.msk [vmem:[#allocation2 + $0x60] sm:$0xf] %vm269_vm0, %v7322_v3  ;;  %296 = vst.msk [vmem:[#allocation2 + $0x64] sm:$0xf] %vm269_vm0, %v7322_v3  ;;  %v973_v8 = vld [vmem:[#allocation2 + $0x4] sm:$0xf] }
  0x20   : > { %298 = vst.msk [vmem:[#allocation2 + $0x6c] sm:$0xf] %vm269_vm0, %v7322_v3  ;;  %299 = vst.msk [vmem:[#allocation2 + $0x70] sm:$0xf] %vm269_vm0, %v7322_v3  ;;  %v1028_v11 = vshrl.u32 %v972_v7, 16  ;;  %v1031_v12 = vshll.u32 %v972_v7, 16 }
  0x21   : > { %301 = vst.msk [vmem:[#allocation2 + $0x78] sm:$0xf] %vm269_vm0, %v7322_v3  ;;  %302 = vst.msk [vmem:[#allocation2 + $0x7c] sm:$0xf] %vm269_vm0, %v7322_v3  ;;  %v1037_v13 = vshll.u32 %v973_v8, 16  ;;  %v1041_v14 = vshrl.u32 %v973_v8, 16 }
  0x22   : > { %304 = vst.msk [vmem:[#allocation2 + $0x84] sm:$0xf] %vm269_vm0, %v7322_v3  ;;  %305 = vst.msk [vmem:[#allocation2 + $0x88] sm:$0xf] %vm269_vm0, %v7322_v3  ;;  %v7508_v15 = vld [vmem:[%s9420_s2] ss:$0 sm:$0xff] }
  0x23   : > { %307 = vst.msk [vmem:[#allocation2 + $0x90] sm:$0xf] %vm269_vm0, %v7322_v3  ;;  %308 = vst.msk [vmem:[#allocation2 + $0x94] sm:$0xf] %vm269_vm0, %v7322_v3  ;;  %vm531_vm4 = vsmask.f32 256 }
  0x24   : > { %310 = vst.msk [vmem:[#allocation2 + $0x9c] sm:$0xf] %vm269_vm0, %v7322_v3  ;;  %311 = vst.msk [vmem:[#allocation2 + $0xa0] sm:$0xf] %vm269_vm0, %v7322_v3  ;;  %vm532_vm5 = vsmask.f32 4368 }
  0x25   : > { %313 = vst.msk [vmem:[#allocation2 + $0xa8] sm:$0xf] %vm269_vm0, %v7322_v3  ;;  %314 = vst.msk [vmem:[#allocation2 + $0xac] sm:$0xf] %vm269_vm0, %v7322_v3  ;;  %v325_v17 = vld [vmem:[%s7497_s8] sm:$0xff]  ;;  %v326_v18 = vld [vmem:[%s7497_s8 + $0x8] sm:$0xff] }
  0x26   : > { %316 = vst.msk [vmem:[#allocation2 + $0xb4] sm:$0xf] %vm269_vm0, %v7322_v3  ;;  %317 = vst.msk [vmem:[#allocation2 + $0xb8] sm:$0xf] %vm269_vm0, %v7322_v3  ;;  %vm856_vm7 = vsmask.f32 7938  ;;  %v364_v26 = vmul.f32 %v7502_v9, %v325_v17  ;;  %v365_v27 = vmul.f32 %v7502_v9, %v326_v18 }
  0x27   : > { %319 = vst.msk [vmem:[#allocation2 + $0xc0] sm:$0xf] %vm269_vm0, %v7322_v3  ;;  %320 = vst.msk [vmem:[#allocation2 + $0xc4] sm:$0xf] %vm269_vm0, %v7322_v3  ;;  %v1030_v19 = vrot.slane %v1028_v11, 4  ;;  %v1033_v20 = vrot.slane %v1031_v12, 5 }
  0x28   : > { %322 = vst.msk [vmem:[#allocation2 + $0xcc] sm:$0xf] %vm269_vm0, %v7322_v3  ;;  %323 = vst.msk [vmem:[#allocation2 + $0xd0] sm:$0xf] %vm269_vm0, %v7322_v3  ;;  %v1039_v21 = vrot.slane %v1037_v13, 5  ;;  %v1043_v22 = vrot.slane %v1041_v14, 4  ;;  %v403_v36 = vadd.f32 %v7508_v15, %v364_v26  ;;  %v404_v37 = vadd.f32 %v7508_v15, %v365_v27 }
  0x29   : > { %273 = vst.msk [vmem:[#allocation2 + $0x8] sm:$0x1] %vm272_vm1, %v7322_v3  ;;  %276 = vst.msk [vmem:[#allocation2 + $0x14] sm:$0x1] %vm272_vm1, %v7322_v3  ;;  %v327_v23 = vld [vmem:[%s7497_s8 + $0x10] sm:$0xff]  ;;  %v328_v24 = vld [vmem:[%s7497_s8 + $0x18] sm:$0xff]  ;;  %v1034_v30 = vor.u32 %v1033_v20, %v1030_v19 }
  0x2a   : > { %279 = vst.msk [vmem:[#allocation2 + $0x20] sm:$0x1] %vm272_vm1, %v7322_v3  ;;  %282 = vst.msk [vmem:[#allocation2 + $0x2c] sm:$0x1] %vm272_vm1, %v7322_v3  ;;  %v366_v28 = vmul.f32 %v7502_v9, %v327_v23  ;;  %v329_v29 = vld [vmem:[%s7497_s8 + $0x20] sm:$0xff]  ;;  %v1044_v31 = vor.u32 %v1043_v22, %v1039_v21  ;;  %v367_v32 = vmul.f32 %v7502_v9, %v328_v24  ;;  %v330_v33 = vld [vmem:[%s7497_s8 + $0x28] sm:$0xff] }
  0x2b   : > { %285 = vst.msk [vmem:[#allocation2 + $0x38] sm:$0x1] %vm272_vm1, %v7322_v3  ;;  %288 = vst.msk [vmem:[#allocation2 + $0x44] sm:$0x1] %vm272_vm1, %v7322_v3  ;;  %v368_v34 = vmul.f32 %v7502_v9, %v329_v29  ;;  %v369_v39 = vmul.f32 %v7502_v9, %v330_v33  ;;  %v1035_v40 = vrot.slane %v1034_v30, 4  ;;  %v6291_v44 = vpack.c.bf16 %v403_v36, %v403_v36  ;;  %v331_v24 = vld [vmem:[%s7497_s8 + $0x30] sm:$0xff] }
  0x2c   : > { %291 = vst.msk [vmem:[#allocation2 + $0x50] sm:$0x1] %vm272_vm1, %v7322_v3  ;;  %294 = vst.msk [vmem:[#allocation2 + $0x5c] sm:$0x1] %vm272_vm1, %v7322_v3  ;;  %v405_v38 = vadd.f32 %v7508_v15, %v366_v28  ;;  %v1045_v41 = vrot.slane %v1044_v31, 4  ;;  %v406_v42 = vadd.f32 %v7508_v15, %v367_v32  ;;  %v6292_v45 = vpack.c.bf16 %v404_v37, %v404_v37  ;;  %v333_v30 = vld [vmem:[%s7497_s8 + $0x40] sm:$0xff] }
  0x2d   : > { %297 = vst.msk [vmem:[#allocation2 + $0x68] sm:$0x1] %vm272_vm1, %v7322_v3  ;;  %300 = vst.msk [vmem:[#allocation2 + $0x74] sm:$0x1] %vm272_vm1, %v7322_v3  ;;  %v407_v43 = vadd.f32 %v7508_v15, %v368_v34  ;;  %v408_v47 = vadd.f32 %v7508_v15, %v369_v39  ;;  %v535_v53 = vshrl.u32 %v6291_v44, 16  ;;  %v538_v54 = vshll.u32 %v6291_v44, 16 }
  0x2e   : > { %303 = vst.msk [vmem:[#allocation2 + $0x80] sm:$0x1] %vm272_vm1, %v7322_v3  ;;  %306 = vst.msk [vmem:[#allocation2 + $0x8c] sm:$0x1] %vm272_vm1, %v7322_v3  ;;  %v6293_v46 = vpack.c.bf16 %v405_v38, %v405_v38  ;;  %v6294_v50 = vpack.c.bf16 %v406_v42, %v406_v42  ;;  %v543_v55 = vshrl.u32 %v6292_v45, 16  ;;  %v546_v56 = vshll.u32 %v6292_v45, 16 }
  0x2f   : > { %309 = vst.msk [vmem:[#allocation2 + $0x98] sm:$0x1] %vm272_vm1, %v7322_v3  ;;  %312 = vst.msk [vmem:[#allocation2 + $0xa4] sm:$0x1] %vm272_vm1, %v7322_v3  ;;  %v6295_v51 = vpack.c.bf16 %v407_v43, %v407_v43  ;;  %v537_v62 = vrot.slane %v535_v53, 7  ;;  %v6296_v2 = vpack.c.bf16 %v408_v47, %v408_v47  ;;  %v334_v31 = vld [vmem:[%s7497_s8 + $0x48] sm:$0xff]  ;;  %v370_v42 = vmul.f32 %v7502_v9, %v331_v24 }
  0x30   : > { %315 = vst.msk [vmem:[#allocation2 + $0xb0] sm:$0x1] %vm272_vm1, %v7322_v3  ;;  %318 = vst.msk [vmem:[#allocation2 + $0xbc] sm:$0x1] %vm272_vm1, %v7322_v3  ;;  %v1008_v10 = vld [vmem:[#allocation2 + $0x8] sm:$0x1]  ;;  %v372_v45 = vmul.f32 %v7502_v9, %v333_v30 }
  0x31   : > { %321 = vst.msk [vmem:[#allocation2 + $0xc8] sm:$0x1] %vm272_vm1, %v7322_v3  ;;  %324 = vst.msk [vmem:[#allocation2 + $0xd4] sm:$0x1] %vm272_vm1, %v7322_v3  ;;  %v1047_v16 = vshll.u32 %v1008_v10, 16  ;;  %v552_v58 = vshrl.u32 %v6293_v46, 16  ;;  %v540_v12 = vor.u32 %v538_v54, %v537_v62 }
  0x32   : > { %vm7523_vm8 = vmor %vm1024_vm2, %vm1025_vm3  ;;  %v555_v59 = vshll.u32 %v6293_v46, 16  ;;  %v560_v60 = vshrl.u32 %v6294_v50, 16  ;;  %v545_v63 = vrot.slane %v543_v55, 7  ;;  %v858_v0 = vld [vmem:[#allocation2 + $0xc] sm:$0xf]  ;;  %v563_v1 = vshll.u32 %v6294_v50, 16 }
  0x33   : > { %v1049_v25 = vrot.slane %v1047_v16, 5  ;;  %v1040_v48 = vsel %vm7523_vm8, %v1035_v40, %v1039_v21  ;;  %vm7540_vm9 = vmand %vm272_vm1, %vm531_vm4  ;;  %v864_v4 = vld [vmem:[#allocation2 + $0x14] sm:$0x1]  ;;  %v554_v7 = vrot.slane %v552_v58, 7  ;;  %v569_v10 = vshrl.u32 %v6295_v51, 16  ;;  %v336_v38 = vld [vmem:[%s7497_s8 + $0x58] sm:$0xff] }
  0x34   : > { %vm7547_vm10 = vmor %vm531_vm4, %vm532_vm5  ;;  %v562_v8 = vrot.slane %v560_v60, 7  ;;  %v572_v11 = vshll.u32 %v6295_v51, 16  ;;  %v541_v13 = vrot.slane %v537_v62, 4  ;;  %v548_v14 = vor.u32 %v546_v56, %v545_v63  ;;  %v867_v17 = vld [vmem:[#allocation2 + $0x18] sm:$0xf]  ;;  %v335_v32 = vld [vmem:[%s7497_s8 + $0x50] sm:$0xff] }
  0x35   : > { %v1050_v49 = vsel %vm7523_vm8, %v1045_v41, %v1049_v25  ;;  %vm7553_vm11 = vmand %vm269_vm0, %vm856_vm7  ;;  %v550_v16 = vrot.slane %v545_v63, 4  ;;  %v871_v18 = vld [vmem:[#allocation2 + $0x20] sm:$0x1]  ;;  %v557_v19 = vor.u32 %v555_v59, %v554_v7  ;;  %v558_v20 = vrot.slane %v554_v7, 4  ;;  %v874_v23 = vld [vmem:[#allocation2 + $0x24] sm:$0xf] }
  0x36   : > { %v5902_v52 = vcombine.low %v1040_v48, %v1050_v49  ;;  %v565_v21 = vor.u32 %v563_v1, %v562_v8  ;;  %v567_v22 = vrot.slane %v562_v8, 4  ;;  %v332_v25 = vld [vmem:[%s7497_s8 + $0x38] sm:$0xff]  ;;  %v549_v26 = vsel %vm7547_vm10, %v541_v13, %v548_v14  ;;  %v878_v48 = vld [vmem:[#allocation2 + $0x2c] sm:$0x1]  ;;  %s253_s9 = sand.u32 1, %s7304_s19   ;;  %s6323_s14 = sshll.u32 %s7312_s21, 12 }
  0x37   : > { %v859_v27 = vsel %vm7553_vm11, %v540_v12, %v858_v0  ;;  %v865_v28 = vsel %vm7540_vm9, %v550_v16, %v864_v4  ;;  %v571_v29 = vrot.slane %v569_v10, 7  ;;  %861 = vst.msk [vmem:[#allocation2 + $0x10] sm:$0xf] %vm269_vm0, %v549_v26  ;;  %v868_v34 = vsel %vm7553_vm11, %v557_v19, %v867_v17  ;;  %v337_v0 = vld [vmem:[%s7497_s8 + $0x60] sm:$0xff]  ;;  %s5861_s12 = sshll.u32 %s253_s9, 8  ;;  %s9360_s17 = scalar_lea.hbm %s9423_s5, %s6323_s14 }
  0x38   : > { %6490 = vmatprep.mubr.msk.bf16.mxu1 %vm1476_vm6, %v5902_v52  ;;  %860 = vst [vmem:[#allocation2 + $0xc] sm:$0xf] %v859_v27  ;;  %866 = vst [vmem:[#allocation2 + $0x14] sm:$0x1] %v865_v28  ;;  %v566_v33 = vsel %vm7547_vm10, %v558_v20, %v565_v21  ;;  %v872_v36 = vsel %vm7540_vm9, %v567_v22, %v871_v18  ;;  %v577_v37 = vshrl.u32 %v6296_v2, 16  ;;  %v580_v41 = vshll.u32 %v6296_v2, 16 }
  0x39   : > { %869 = vst [vmem:[#allocation2 + $0x18] sm:$0xf] %v868_v34  ;;  %870 = vst.msk [vmem:[#allocation2 + $0x1c] sm:$0xf] %vm269_vm0, %v566_v33  ;;  %v574_v39 = vor.u32 %v572_v11, %v571_v29  ;;  %v575_v40 = vrot.slane %v571_v29, 4  ;;  %v371_v44 = vmul.f32 %v7502_v9, %v332_v25  ;;  %v373_v46 = vmul.f32 %v7502_v9, %v334_v31  ;;  %s9263_s13 = scalar_lea.vmem [#allocation3], %s5861_s12 }
  0x3a   : > { %873 = vst [vmem:[#allocation2 + $0x20] sm:$0x1] %v872_v36  ;;  %v579_v43 = vrot.slane %v577_v37, 7  ;;  %v409_v49 = vadd.f32 %v7508_v15, %v370_v42  ;;  %v374_v50 = vmul.f32 %v7502_v9, %v335_v32  ;;  %v375_v51 = vmul.f32 %v7502_v9, %v336_v38  ;;  %s9372_s21 = scalar_lea.sflag [#allocation4], %s253_s9  ;;  %s7323_s25 = smov [#allocation3]  }
  0x3b   : > { %v875_v47 = vsel %vm7553_vm11, %v574_v39, %v874_v23  ;;  %v410_v54 = vadd.f32 %v7508_v15, %v371_v44  ;;  %v411_v55 = vadd.f32 %v7508_v15, %v372_v45  ;;  %v412_v56 = vadd.f32 %v7508_v15, %v373_v46  ;;  %s7246_s27 = sshll.u32 %s7323_s25, 4  ;;  %s7247_s27 = int_to_ptr.vmem [resolvable:$false] %s7246_s27 }
  0x3c   : > { %v582_v52 = vor.u32 %v580_v41, %v579_v43  ;;  %v584_v53 = vrot.slane %v579_v43, 4  ;;  %876 = vst [vmem:[#allocation2 + $0x24] sm:$0xf] %v875_v47  ;;  %v413_v58 = vadd.f32 %v7508_v15, %v374_v50  ;;  %v414_v59 = vadd.f32 %v7508_v15, %v375_v51  ;;  %s7248_s29 = scalar_lea.vmem %s7247_s27, 8192 }
  0x3d   : > { %v7595_v63 = vpack.c.bf16 %v409_v49, %v409_v49  ;;  %v7599_v7 = vpack.c.bf16 %v410_v54, %v410_v54  ;;  %v7601_v8 = vpack.c.bf16 %v411_v55, %v411_v55  ;;  %v7603_v10 = vpack.c.bf16 %v412_v56, %v412_v56 }
  0x3e   : > { %v583_v60 = vsel %vm7547_vm10, %v575_v40, %v582_v52  ;;  %v879_v62 = vsel %vm7540_vm9, %v584_v53, %v878_v48  ;;  %v975_v2 = vld [vmem:[#allocation2 + $0x10] sm:$0xf]  ;;  %v7605_v11 = vpack.c.bf16 %v413_v58, %v413_v58  ;;  %v7609_v21 = vpack.c.bf16 %v414_v59, %v414_v59 }
  0x3f   : > { %v974_v1 = vld [vmem:[#allocation2 + $0xc] sm:$0xf]  ;;  %v1009_v4 = vld [vmem:[#allocation2 + $0x14] sm:$0x1]  ;;  %877 = vst.msk [vmem:[#allocation2 + $0x28] sm:$0xf] %vm269_vm0, %v583_v60  ;;  %v7612_v22 = vmul.f32 %v7502_v9, %v337_v0 }
  0x40   : > { %880 = vst [vmem:[#allocation2 + $0x2c] sm:$0x1] %v879_v62  ;;  %v1052_v12 = vshrl.u32 %v974_v1, 16  ;;  %v1055_v13 = vshll.u32 %v974_v1, 16  ;;  %v1061_v14 = vshll.u32 %v975_v2, 16  ;;  %v1065_v16 = vshrl.u32 %v975_v2, 16 }
  0x41   : > { %v2826_v17 = vld [vmem:[#allocation2 + $0xc] sm:$0xf]  ;;  %v1071_v18 = vshll.u32 %v1009_v4, 16  ;;  %v7607_v19 = vld [vmem:[#allocation2 + $0x10] sm:$0xf]  ;;  %vm2036_vm13 = vcmask 1046532  }
  0x42   : > { %v2875_v20 = vshrl.u32 %v2826_v17, 16  ;;  %v1054_v23 = vrot.slane %v1052_v12, 4  ;;  %v1057_v24 = vrot.slane %v1055_v13, 5  ;;  %v1063_v25 = vrot.slane %v1061_v14, 5  ;;  %v7614_v27 = vld [vmem:[#allocation2 + $0x14] sm:$0x1]  ;;  %vm7833_vm14 = vmor %vm2035_vm12, %vm2036_vm13 }
  0x43   : > { %v1067_v26 = vrot.slane %v1065_v16, 4  ;;  %v1073_v28 = vrot.slane %v1071_v18, 5  ;;  %v2878_v30 = vshll.u32 %v2826_v17, 16  ;;  %v2884_v31 = vshll.u32 %v7607_v19, 16  ;;  %v2829_v37 = vld [vmem:[#allocation2 + $0x18] sm:$0xf] }
  0x44   : > { %v2877_v29 = vrot.slane %v2875_v20, 4  ;;  %v1058_v32 = vor.u32 %v1057_v24, %v1054_v23  ;;  %v2888_v34 = vshrl.u32 %v7607_v19, 16  ;;  %v2894_v36 = vshll.u32 %v7614_v27, 16  ;;  %v7619_v38 = vld [vmem:[#allocation2 + $0x1c] sm:$0xf]  ;;  %v7135_v0 = vld [vmem:[%s9421_s3 + $0x8] sm:$0xff]  }
  0x45   : > { %v1068_v33 = vor.u32 %v1067_v26, %v1063_v25  ;;  %v2880_v39 = vrot.slane %v2878_v30, 5  ;;  %v2886_v40 = vrot.slane %v2884_v31, 5  ;;  %v3630_v41 = vrot.slane %v7607_v19, 5  ;;  %v7623_v48 = vld [vmem:[#allocation2 + $0x20] sm:$0x1] }
  0x46   : > { %v3633_v42 = vrot.slane %v7614_v27, 5  ;;  %v1059_v43 = vrot.slane %v1058_v32, 4  ;;  %v2890_v45 = vrot.slane %v2888_v34, 4  ;;  %v2896_v46 = vrot.slane %v2894_v36, 5  ;;  %v976_v62 = vld [vmem:[#allocation2 + $0x18] sm:$0xf] }
  0x47   : > { %v1069_v44 = vrot.slane %v1068_v33, 4  ;;  %v2881_v47 = vor.u32 %v2880_v39, %v2877_v29  ;;  %v2899_v49 = vshrl.u32 %v2829_v37, 16  ;;  %v2902_v50 = vshll.u32 %v2829_v37, 16  ;;  %v977_v18 = vld [vmem:[#allocation2 + $0x1c] sm:$0xf] }
  0x48   : > { %v2908_v51 = vshll.u32 %v7619_v38, 16  ;;  %v1064_v52 = vsel %vm7523_vm8, %v1059_v43, %v1063_v25  ;;  %v2891_v54 = vor.u32 %v2890_v45, %v2886_v40  ;;  %v2912_v55 = vshrl.u32 %v7619_v38, 16  ;;  %v1010_v25 = vld [vmem:[#allocation2 + $0x20] sm:$0x1]  ;;  %v979_v39 = vld [vmem:[#allocation2 + $0x28] sm:$0xf] }
  0x49   : > { %v1074_v53 = vsel %vm7523_vm8, %v1069_v44, %v1073_v28  ;;  %v2882_v58 = vrot.slane %v2881_v47, 4  ;;  %v2901_v59 = vrot.slane %v2899_v49, 4  ;;  %v2904_v60 = vrot.slane %v2902_v50, 5  ;;  %v978_v28 = vld [vmem:[#allocation2 + $0x24] sm:$0xf] }
  0x4a   : > { %v5903_v56 = vcombine.low %v1064_v52, %v1074_v53  ;;  %v2892_v1 = vrot.slane %v2891_v54, 4  ;;  %v2910_v2 = vrot.slane %v2908_v51, 5  ;;  %v2914_v4 = vrot.slane %v2912_v55, 4  ;;  %v1011_v44 = vld [vmem:[#allocation2 + $0x2c] sm:$0x1]  ;;  %v7134_v52 = vld [vmem:[%s9421_s3 + $0x58] sm:$0xff]  }
  0x4b   : > { %v2918_v12 = vshll.u32 %v7623_v48, 16  ;;  %v2887_v13 = vsel %vm7523_vm8, %v2882_v58, %v2886_v40  ;;  %v2905_v14 = vor.u32 %v2904_v60, %v2901_v59  ;;  %v3637_v16 = vrot.slane %v7619_v38, 5  ;;  %v2832_v51 = vld [vmem:[#allocation2 + $0x24] sm:$0xf]  ;;  %v7655_v58 = vld [vmem:[#allocation2 + $0x28] sm:$0xf] }
  0x4c   : > { %6491 = vmatmul.mubr.msk.bf16.vlgmr.msra.gmra.mrb[0].mxu1 %vm1476_vm6, %v5903_v56  ;;  %v3640_v17 = vrot.slane %v7623_v48, 5  ;;  %v2897_v20 = vsel %vm7523_vm8, %v2892_v1, %v2896_v46  ;;  %v2915_v23 = vor.u32 %v2914_v4, %v2910_v2  ;;  %v1076_v26 = vshrl.u32 %v976_v62, 16  ;;  %v7874_v48 = vld [vmem:[%s9419_s1] ss:$0 sm:$0xff] }
  0x4d   : > { %6523 = vmatpush3.bf16.msra.mxu1 %v7484_v5  ;;  %v2920_v24 = vrot.slane %v2918_v12, 5  ;;  %v6066_v29 = vcombine.low %v2887_v13, %v2897_v20  ;;  %v2906_v30 = vrot.slane %v2905_v14, 4  ;;  %v7645_v31 = vrot.slane %v3637_v16, 4 }
  0x4e   : > { %v1079_v32 = vshll.u32 %v976_v62, 16  ;;  %6524 = vmatprep.subr.bf16.mxu1 %v7135_v0  ;;  %v2916_v33 = vrot.slane %v2915_v23, 4  ;;  %v1078_v34 = vrot.slane %v1076_v26, 4  ;;  %v1085_v36 = vshll.u32 %v977_v18, 16  ;;  %v7659_v23 = vld [vmem:[#allocation2 + $0x2c] sm:$0x1] }
  0x4f   : > { %v1089_v37 = vshrl.u32 %v977_v18, 16  ;;  %6634 = vmatprep.mubr.msk.bf16.mxu0 %vm1476_vm6, %v6066_v29  ;;  %v2911_v5 = vsel %vm7523_vm8, %v2906_v30, %v2910_v2  ;;  %v1095_v43 = vshll.u32 %v1010_v25, 16  ;;  %v1100_v45 = vshrl.u32 %v978_v28, 16  ;;  %v7666_v29 = vld [vmem:[%s9421_s3 + $0x60] sm:$0xff]  }
  0x50   : > { %v1081_v40 = vrot.slane %v1079_v32, 5  ;;  %v2921_v46 = vsel %vm7523_vm8, %v2916_v33, %v2920_v24  ;;  %v1087_v47 = vrot.slane %v1085_v36, 5  ;;  %v1103_v50 = vshll.u32 %v978_v28, 16 }
  0x51   : > { %v1091_v49 = vrot.slane %v1089_v37, 4  ;;  %6525 = vmatpush3.bf16.msra.mxu1 %v7135_v0  ;;  %v6067_v53 = vcombine.low %v2911_v5, %v2921_v46  ;;  %v1097_v55 = vrot.slane %v1095_v43, 5  ;;  %v1102_v56 = vrot.slane %v1100_v45, 4 }
  0x52   : > { %v1082_v54 = vor.u32 %v1081_v40, %v1078_v34  ;;  %v1105_v60 = vrot.slane %v1103_v50, 5  ;;  %v1109_v62 = vshll.u32 %v979_v39, 16  ;;  %v1113_v1 = vshrl.u32 %v979_v39, 16 }
  0x53   : > { %v1092_v59 = vor.u32 %v1091_v49, %v1087_v47  ;;  %6635 = vmatmul.mubr.msk.bf16.vlgmr.msra.gmra.mrb[0].mxu0 %vm1476_vm6, %v6067_v53  ;;  %v1119_v4 = vshll.u32 %v1011_v44, 16  ;;  %v2923_v12 = vshrl.u32 %v2832_v51, 16  ;;  %v2926_v13 = vshll.u32 %v2832_v51, 16 }
  0x54   : > { %v1083_v2 = vrot.slane %v1082_v54, 4  ;;  %6667 = vmatpush3.bf16.msra.mxu0 %v7490_v6  ;;  %v1106_v0 = vor.u32 %v1105_v60, %v1102_v56  ;;  %v1111_v18 = vrot.slane %v1109_v62, 5  ;;  %v1115_v20 = vrot.slane %v1113_v1, 4  ;;  %v885_v60 = vld [vmem:[#allocation2 + $0x38] sm:$0x1] }
  0x55   : > { %v1093_v14 = vrot.slane %v1092_v59, 4  ;;  %v1121_v25 = vrot.slane %v1119_v4, 5  ;;  %v2925_v26 = vrot.slane %v2923_v12, 4  ;;  %v2928_v28 = vrot.slane %v2926_v13, 5  ;;  %6668 = vmatprep.subr.bf16.mxu0 %v7134_v52  ;;  %v888_v12 = vld [vmem:[#allocation2 + $0x3c] sm:$0xf] }
  0x56   : > { %v1088_v24 = vsel %vm7523_vm8, %v1083_v2, %v1087_v47  ;;  %v1107_v30 = vrot.slane %v1106_v0, 4  ;;  %v1116_v32 = vor.u32 %v1115_v20, %v1111_v18  ;;  %v2932_v33 = vshll.u32 %v7655_v58, 16 }
  0x57   : > { %v1098_v6 = vsel %vm7523_vm8, %v1093_v14, %v1097_v55  ;;  %v2929_v36 = vor.u32 %v2928_v28, %v2925_v26  ;;  %v2936_v37 = vshrl.u32 %v7655_v58, 16  ;;  %v2942_v39 = vshll.u32 %v7659_v23, 16  ;;  %v881_v55 = vld [vmem:[#allocation2 + $0x30] sm:$0xf]  ;;  %v338_v26 = vld [vmem:[%s7497_s8 + $0x68] sm:$0xff] }
  0x58   : > { %v5904_v34 = vcombine.low %v1088_v24, %v1098_v6  ;;  %v1112_v5 = vsel %vm7523_vm8, %v1107_v30, %v1111_v18  ;;  %v1117_v40 = vrot.slane %v1116_v32, 4  ;;  %v2934_v43 = vrot.slane %v2932_v33, 5  ;;  %6669 = vmatpush3.bf16.msra.mxu0 %v7134_v52  ;;  %v339_v33 = vld [vmem:[%s7497_s8 + $0x70] sm:$0xff] }
  0x59   : > { %v586_v44 = vshrl.u32 %v7595_v63, 16  ;;  %v2930_v45 = vrot.slane %v2929_v36, 4  ;;  %v2938_v46 = vrot.slane %v2936_v37, 4  ;;  %v2944_v47 = vrot.slane %v2942_v39, 5  ;;  %6702 = vmatprep.subr.bf16.mxu0 %v7666_v29 }
  0x5a   : > { %6494 = vmatprep.mubr.msk.bf16.mxu1 %vm1476_vm6, %v5904_v34  ;;  %v589_v49 = vshll.u32 %v7595_v63, 16  ;;  %v1122_v50 = vsel %vm7523_vm8, %v1117_v40, %v1121_v25  ;;  %v594_v53 = vshrl.u32 %v7599_v7, 16  ;;  %v597_v54 = vshll.u32 %v7599_v7, 16  ;;  %v892_v25 = vld [vmem:[#allocation2 + $0x44] sm:$0x1]  ;;  %v340_v34 = vld [vmem:[%s7497_s8 + $0x78] sm:$0xff] }
  0x5b   : > { %v588_v51 = vrot.slane %v586_v44, 7  ;;  %v5905_v56 = vcombine.low %v1112_v5, %v1122_v50  ;;  %v2935_v52 = vsel %vm7523_vm8, %v2930_v45, %v2934_v43  ;;  %v2939_v59 = vor.u32 %v2938_v46, %v2934_v43  ;;  %v895_v5 = vld [vmem:[#allocation2 + $0x48] sm:$0xf]  ;;  %v341_v40 = vld [vmem:[%s7497_s8 + $0x80] sm:$0xff] }
  0x5c   : > { %v603_v62 = vshrl.u32 %v7601_v8, 16  ;;  %v596_v2 = vrot.slane %v594_v53, 7  ;;  %v606_v4 = vshll.u32 %v7601_v8, 16  ;;  %v611_v14 = vshrl.u32 %v7603_v10, 16  ;;  %v342_v53 = vld [vmem:[%s7497_s8 + $0x88] sm:$0xff] }
  0x5d   : > { %v591_v63 = vor.u32 %v589_v49, %v588_v51  ;;  %v592_v1 = vrot.slane %v588_v51, 4  ;;  %6495 = vmatmul.mubr.msk.bf16.gmra.mrb[4].mxu1 %vm1476_vm6, %v5905_v56  ;;  %v2940_v7 = vrot.slane %v2939_v59, 4  ;;  %v614_v0 = vshll.u32 %v7603_v10, 16 }
  0x5e   : > { %v605_v13 = vrot.slane %v603_v62, 7  ;;  %v599_v18 = vor.u32 %v597_v54, %v596_v2  ;;  %v601_v20 = vrot.slane %v596_v2, 4  ;;  %v620_v8 = vshrl.u32 %v7605_v11, 16 }
  0x5f   : > { %v882_v24 = vsel %vm7553_vm11, %v591_v63, %v881_v55  ;;  %v2945_v28 = vsel %vm7523_vm8, %v2940_v7, %v2944_v47  ;;  %v613_v32 = vrot.slane %v611_v14, 7  ;;  %v623_v46 = vshll.u32 %v7605_v11, 16  ;;  %v899_v63 = vld [vmem:[#allocation2 + $0x50] sm:$0x1] }
  0x60   : > { %883 = vst [vmem:[#allocation2 + $0x30] sm:$0xf] %v882_v24  ;;  %v608_v6 = vor.u32 %v606_v4, %v605_v13  ;;  %v609_v30 = vrot.slane %v605_v13, 4  ;;  %v6068_v10 = vcombine.low %v2935_v52, %v2945_v28  ;;  %v600_v36 = vsel %vm7547_vm10, %v592_v1, %v599_v18 }
  0x61   : > { %v886_v37 = vsel %vm7540_vm9, %v601_v20, %v885_v60  ;;  %v622_v39 = vrot.slane %v620_v8, 7  ;;  %884 = vst.msk [vmem:[#allocation2 + $0x34] sm:$0xf] %vm269_vm0, %v600_v36  ;;  %v616_v43 = vor.u32 %v614_v0, %v613_v32  ;;  %v618_v44 = vrot.slane %v613_v32, 4 }
  0x62   : > { %887 = vst [vmem:[#allocation2 + $0x38] sm:$0x1] %v886_v37  ;;  %v889_v45 = vsel %vm7553_vm11, %v608_v6, %v888_v12  ;;  %6638 = vmatprep.mubr.msk.bf16.mxu0 %vm1476_vm6, %v6068_v10  ;;  %v628_v49 = vshrl.u32 %v7609_v21, 16  ;;  %v631_v50 = vshll.u32 %v7609_v21, 16  ;;  %v377_v51 = vmul.f32 %v7502_v9, %v338_v26 }
  0x63   : > { %890 = vst [vmem:[#allocation2 + $0x3c] sm:$0xf] %v889_v45  ;;  %v626_v47 = vrot.slane %v622_v39, 4  ;;  %v617_v54 = vsel %vm7547_vm10, %v609_v30, %v616_v43  ;;  %v893_v55 = vsel %vm7540_vm9, %v618_v44, %v892_v25  ;;  %v625_v56 = vor.u32 %v623_v46, %v622_v39 }
  0x64   : > { %v415_v11 = vadd.f32 %v7508_v15, %v7612_v22  ;;  %891 = vst.msk [vmem:[#allocation2 + $0x40] sm:$0xf] %vm269_vm0, %v617_v54  ;;  %894 = vst [vmem:[#allocation2 + $0x44] sm:$0x1] %v893_v55  ;;  %v630_v52 = vrot.slane %v628_v49, 7  ;;  %v416_v59 = vadd.f32 %v7508_v15, %v377_v51  ;;  %v378_v21 = vmul.f32 %v7502_v9, %v339_v33 }
  0x65   : > { %v379_v60 = vmul.f32 %v7502_v9, %v340_v34  ;;  %v896_v62 = vsel %vm7553_vm11, %v625_v56, %v895_v5  ;;  %v7727_v2 = vmul.f32 %v7502_v9, %v341_v40  ;;  %v7730_v22 = vmul.f32 %v7502_v9, %v342_v53 }
  0x66   : > { %v7724_v1 = vpack.c.bf16 %v415_v11, %v415_v11  ;;  %v633_v7 = vor.u32 %v631_v50, %v630_v52  ;;  %v635_v13 = vrot.slane %v630_v52, 4  ;;  %897 = vst [vmem:[#allocation2 + $0x48] sm:$0xf] %v896_v62  ;;  %v7732_v14 = vpack.c.bf16 %v416_v59, %v416_v59 }
  0x67   : > { %v2835_v4 = vld [vmem:[#allocation2 + $0x30] sm:$0xf]  ;;  %v417_v0 = vadd.f32 %v7508_v15, %v378_v21  ;;  %v7744_v30 = vadd.f32 %v7508_v15, %v379_v60 }
  0x68   : > { %v980_v12 = vld [vmem:[#allocation2 + $0x30] sm:$0xf]  ;;  %v2947_v18 = vshrl.u32 %v2835_v4, 16  ;;  %v2950_v20 = vshll.u32 %v2835_v4, 16  ;;  %v7735_v8 = vld [vmem:[#allocation2 + $0x34] sm:$0xf]  ;;  %v634_v9 = vsel %vm7547_vm10, %v626_v47, %v633_v7  ;;  %v900_v6 = vsel %vm7540_vm9, %v635_v13, %v899_v63 }
  0x69   : > { %v1124_v24 = vshrl.u32 %v980_v12, 16  ;;  %v1127_v25 = vshll.u32 %v980_v12, 16  ;;  %v7737_v26 = vld [vmem:[#allocation2 + $0x38] sm:$0x1]  ;;  %v981_v28 = vld [vmem:[#allocation2 + $0x34] sm:$0xf]  ;;  %v7746_v32 = vpack.c.bf16 %v417_v0, %v417_v0 }
  0x6a   : > { %v2949_v33 = vrot.slane %v2947_v18, 4  ;;  %v2952_v34 = vrot.slane %v2950_v20, 5  ;;  %v2956_v10 = vshll.u32 %v7735_v8, 16  ;;  %v2960_v36 = vshrl.u32 %v7735_v8, 16  ;;  %v1012_v37 = vld [vmem:[#allocation2 + $0x38] sm:$0x1] }
  0x6b   : > { %898 = vst.msk [vmem:[#allocation2 + $0x4c] sm:$0xf] %vm269_vm0, %v634_v9  ;;  %901 = vst [vmem:[#allocation2 + $0x50] sm:$0x1] %v900_v6  ;;  %v2966_v39 = vshll.u32 %v7737_v26, 16  ;;  %v1126_v5 = vrot.slane %v1124_v24, 4 }
  0x6c   : > { %v1129_v40 = vrot.slane %v1127_v25, 5  ;;  %v1133_v43 = vshll.u32 %v981_v28, 16  ;;  %v982_v44 = vld [vmem:[#allocation2 + $0x3c] sm:$0xf]  ;;  %v2953_v15 = vor.u32 %v2952_v34, %v2949_v33  ;;  %v2958_v45 = vrot.slane %v2956_v10, 5 }
  0x6d   : > { %v2962_v46 = vrot.slane %v2960_v36, 4  ;;  %v1137_v47 = vshrl.u32 %v981_v28, 16  ;;  %v983_v49 = vld [vmem:[#allocation2 + $0x40] sm:$0xf]  ;;  %v2968_v50 = vrot.slane %v2966_v39, 5  ;;  %v1143_v54 = vshll.u32 %v1012_v37, 16 }
  0x6e   : > { %v1130_v51 = vor.u32 %v1129_v40, %v1126_v5  ;;  %v1135_v53 = vrot.slane %v1133_v43, 5  ;;  %v2954_v55 = vrot.slane %v2953_v15, 4  ;;  %v1013_v52 = vld [vmem:[#allocation2 + $0x44] sm:$0x1]  ;;  %v1148_v59 = vshrl.u32 %v982_v44, 16 }
  0x6f   : > { %v2963_v56 = vor.u32 %v2962_v46, %v2958_v45  ;;  %v1139_v11 = vrot.slane %v1137_v47, 4  ;;  %v1145_v60 = vrot.slane %v1143_v54, 5  ;;  %v1151_v62 = vshll.u32 %v982_v44, 16  ;;  %v2838_v4 = vld [vmem:[#allocation2 + $0x3c] sm:$0xf] }
  0x70   : > { %v1131_v21 = vrot.slane %v1130_v51, 4  ;;  %v1157_v63 = vshll.u32 %v983_v49, 16  ;;  %v2959_v12 = vsel %vm7523_vm8, %v2954_v55, %v2958_v45  ;;  %v1150_v0 = vrot.slane %v1148_v59, 4  ;;  %v7756_v28 = vld [vmem:[#allocation2 + $0x40] sm:$0xf] }
  0x71   : > { %v2964_v7 = vrot.slane %v2963_v56, 4  ;;  %v1140_v13 = vor.u32 %v1139_v11, %v1135_v53  ;;  %v1153_v20 = vrot.slane %v1151_v62, 5  ;;  %v1161_v25 = vshrl.u32 %v983_v49, 16  ;;  %v7760_v39 = vld [vmem:[#allocation2 + $0x44] sm:$0x1] }
  0x72   : > { %v1136_v18 = vsel %vm7523_vm8, %v1131_v21, %v1135_v53  ;;  %v1159_v24 = vrot.slane %v1157_v63, 5  ;;  %v1167_v33 = vshll.u32 %v1013_v52, 16  ;;  %v2971_v34 = vshrl.u32 %v2838_v4, 16  ;;  %v2841_v40 = vld [vmem:[#allocation2 + $0x48] sm:$0xf] }
  0x73   : > { %v2969_v9 = vsel %vm7523_vm8, %v2964_v7, %v2968_v50  ;;  %v1141_v6 = vrot.slane %v1140_v13, 4  ;;  %v1154_v36 = vor.u32 %v1153_v20, %v1150_v0  ;;  %v1163_v37 = vrot.slane %v1161_v25, 4  ;;  %v7766_v51 = vld [vmem:[#allocation2 + $0x4c] sm:$0xf]  ;;  %v7768_v53 = vld [vmem:[#allocation2 + $0x50] sm:$0x1] }
  0x74   : > { %v6069_v10 = vcombine.low %v2959_v12, %v2969_v9  ;;  %v2974_v5 = vshll.u32 %v2838_v4, 16  ;;  %v1169_v44 = vrot.slane %v1167_v33, 5  ;;  %v2973_v15 = vrot.slane %v2971_v34, 4  ;;  %v984_v52 = vld [vmem:[#allocation2 + $0x48] sm:$0xf]  ;;  %v7137_v0 = vld [vmem:[%s9421_s3 + $0x20] sm:$0xff]  }
  0x75   : > { %v1146_v43 = vsel %vm7523_vm8, %v1141_v6, %v1145_v60  ;;  %v2980_v45 = vshll.u32 %v7756_v28, 16  ;;  %v1155_v47 = vrot.slane %v1154_v36, 4  ;;  %v1164_v49 = vor.u32 %v1163_v37, %v1159_v24  ;;  %v985_v63 = vld [vmem:[#allocation2 + $0x4c] sm:$0xf]  ;;  %v1014_v9 = vld [vmem:[#allocation2 + $0x50] sm:$0x1]  ;;  %6558 = vmatprep.subr.bf16.mxu1 %v7137_v0 }
  0x76   : > { %6639 = vmatmul.mubr.msk.bf16.gmra.mrb[4].mxu0 %vm1476_vm6, %v6069_v10  ;;  %v5906_v46 = vcombine.low %v1136_v18, %v1146_v43  ;;  %v2976_v50 = vrot.slane %v2974_v5, 5  ;;  %v2984_v55 = vshrl.u32 %v7756_v28, 16  ;;  %v2990_v56 = vshll.u32 %v7760_v39, 16 }
  0x77   : > { %v2982_v54 = vrot.slane %v2980_v45, 5  ;;  %v2995_v11 = vshrl.u32 %v2841_v40, 16  ;;  %v1160_v59 = vsel %vm7523_vm8, %v1155_v47, %v1159_v24  ;;  %v1165_v21 = vrot.slane %v1164_v49, 4 }
  0x78   : > { %6498 = vmatprep.mubr.msk.bf16.mxu1 %vm1476_vm6, %v5906_v46  ;;  %v2977_v60 = vor.u32 %v2976_v50, %v2973_v15  ;;  %v2998_v62 = vshll.u32 %v2841_v40, 16  ;;  %v2986_v4 = vrot.slane %v2984_v55, 4  ;;  %v2992_v12 = vrot.slane %v2990_v56, 5 }
  0x79   : > { %v2997_v7 = vrot.slane %v2995_v11, 4  ;;  %v3004_v13 = vshll.u32 %v7766_v51, 16  ;;  %v1170_v18 = vsel %vm7523_vm8, %v1165_v21, %v1169_v44  ;;  %v3008_v24 = vshrl.u32 %v7766_v51, 16 }
  0x7a   : > { %v2978_v20 = vrot.slane %v2977_v60, 4  ;;  %v3000_v25 = vrot.slane %v2998_v62, 5  ;;  %v5907_v6 = vcombine.low %v1160_v59, %v1170_v18  ;;  %v2987_v33 = vor.u32 %v2986_v4, %v2982_v54 }
  0x7b   : > { %v3006_v34 = vrot.slane %v3004_v13, 5  ;;  %v3014_v10 = vshll.u32 %v7768_v53, 16  ;;  %v3010_v5 = vrot.slane %v3008_v24, 4  ;;  %v1172_v40 = vshrl.u32 %v984_v52, 16 }
  0x7c   : > { %v2983_v36 = vsel %vm7523_vm8, %v2978_v20, %v2982_v54  ;;  %v3001_v37 = vor.u32 %v3000_v25, %v2997_v7  ;;  %6499 = vmatmul.mubr.msk.bf16.gmra.mrb[8].mxu1 %vm1476_vm6, %v5907_v6  ;;  %v2988_v43 = vrot.slane %v2987_v33, 4  ;;  %v1175_v15 = vshll.u32 %v984_v52, 16 }
  0x7d   : > { %v3016_v44 = vrot.slane %v3014_v10, 5  ;;  %v1181_v45 = vshll.u32 %v985_v63, 16  ;;  %v3011_v47 = vor.u32 %v3010_v5, %v3006_v34  ;;  %v1174_v49 = vrot.slane %v1172_v40, 4  ;;  %v906_v5 = vld [vmem:[#allocation2 + $0x5c] sm:$0x1] }
  0x7e   : > { %v3002_v46 = vrot.slane %v3001_v37, 4  ;;  %v1185_v50 = vshrl.u32 %v985_v63, 16  ;;  %v2993_v55 = vsel %vm7523_vm8, %v2988_v43, %v2992_v12  ;;  %v1177_v56 = vrot.slane %v1175_v15, 5 }
  0x7f   : > { %v1183_v11 = vrot.slane %v1181_v45, 5  ;;  %v1191_v59 = vshll.u32 %v1014_v9, 16  ;;  %v6070_v54 = vcombine.low %v2983_v36, %v2993_v55  ;;  %v3012_v60 = vrot.slane %v3011_v47, 4 }
  0x80   : > { %v3007_v21 = vsel %vm7523_vm8, %v3002_v46, %v3006_v34  ;;  %v1187_v62 = vrot.slane %v1185_v50, 4  ;;  %v1178_v4 = vor.u32 %v1177_v56, %v1174_v49  ;;  %v637_v52 = vshrl.u32 %v7724_v1, 16  ;;  %v902_v34 = vld [vmem:[#allocation2 + $0x54] sm:$0xf]  ;;  %v909_v49 = vld [vmem:[#allocation2 + $0x60] sm:$0xf] }
  0x81   : > { %v1193_v7 = vrot.slane %v1191_v59, 5  ;;  %v640_v13 = vshll.u32 %v7724_v1, 16  ;;  %6642 = vmatprep.mubr.msk.bf16.mxu0 %vm1476_vm6, %v6070_v54  ;;  %v3017_v63 = vsel %vm7523_vm8, %v3012_v60, %v3016_v44  ;;  %v645_v0 = vshrl.u32 %v7732_v14, 16  ;;  %v3564_v50 = vld [vmem:[#allocation2 + $0xc] sm:$0xe] }
  0x82   : > { %v1188_v12 = vor.u32 %v1187_v62, %v1183_v11  ;;  %v648_v18 = vshll.u32 %v7732_v14, 16  ;;  %v6071_v20 = vcombine.low %v3007_v21, %v3017_v63  ;;  %v1179_v25 = vrot.slane %v1178_v4, 4  ;;  %v913_v54 = vld [vmem:[#allocation2 + $0x68] sm:$0x1]  ;;  %v7817_v62 = vld [vmem:[%s9420_s2] ss:$0 sm:$0xff] }
  0x83   : > { %v639_v24 = vrot.slane %v637_v52, 7  ;;  %v6306_v9 = vpack.c.bf16 %v7744_v30, %v7744_v30  ;;  %v647_v33 = vrot.slane %v645_v0, 7  ;;  %v654_v1 = vshrl.u32 %v7746_v32, 16  ;;  %v3565_v52 = vld [vmem:[#allocation2 + $0x18] sm:$0xe] }
  0x84   : > { %v1189_v6 = vrot.slane %v1188_v12, 4  ;;  %v657_v10 = vshll.u32 %v7746_v32, 16  ;;  %6643 = vmatmul.mubr.msk.bf16.gmra.mrb[8].mxu0 %vm1476_vm6, %v6071_v20  ;;  %v1184_v36 = vsel %vm7523_vm8, %v1179_v25, %v1183_v11  ;;  %v419_v4 = vadd.f32 %v7817_v62, %v7727_v2  ;;  %v343_v20 = vld [vmem:[%s7497_s8 + $0x90] sm:$0xff]  ;;  %v344_v25 = vld [vmem:[%s7497_s8 + $0x98] sm:$0xff] }
  0x85   : > { %v642_v37 = vor.u32 %v640_v13, %v639_v24  ;;  %v643_v14 = vrot.slane %v639_v24, 4  ;;  %v662_v40 = vshrl.u32 %v6306_v9, 16  ;;  %v650_v30 = vor.u32 %v648_v18, %v647_v33 }
  0x86   : > { %v1194_v43 = vsel %vm7523_vm8, %v1189_v6, %v1193_v7  ;;  %v652_v44 = vrot.slane %v647_v33, 4  ;;  %v656_v15 = vrot.slane %v654_v1, 7  ;;  %v665_v47 = vshll.u32 %v6306_v9, 16 }
  0x87   : > { %v5908_v45 = vcombine.low %v1184_v36, %v1194_v43  ;;  %v903_v46 = vsel %vm7553_vm11, %v642_v37, %v902_v34  ;;  %v664_v32 = vrot.slane %v662_v40, 7  ;;  %v651_v55 = vsel %vm7547_vm10, %v643_v14, %v650_v30 }
  0x88   : > { %904 = vst [vmem:[#allocation2 + $0x54] sm:$0xf] %v903_v46  ;;  %v907_v56 = vsel %vm7540_vm9, %v652_v44, %v906_v5  ;;  %v659_v11 = vor.u32 %v657_v10, %v656_v15  ;;  %v660_v59 = vrot.slane %v656_v15, 4  ;;  %905 = vst.msk [vmem:[#allocation2 + $0x58] sm:$0xf] %vm269_vm0, %v651_v55  ;;  %v420_v7 = vadd.f32 %v7817_v62, %v7730_v22 }
  0x89   : > { %6502 = vmatprep.mubr.msk.bf16.mxu1 %vm1476_vm6, %v5908_v45  ;;  %908 = vst [vmem:[#allocation2 + $0x5c] sm:$0x1] %v907_v56  ;;  %v667_v21 = vor.u32 %v665_v47, %v664_v32  ;;  %v669_v60 = vrot.slane %v664_v32, 4  ;;  %v6100_v63 = vrot.slane %v3564_v50, 9  ;;  %v7829_v18 = vpack.c.bf16 %v419_v4, %v419_v4 }
  0x8a   : > { %v910_v13 = vsel %vm7553_vm11, %v659_v11, %v909_v49  ;;  %v7831_v2 = vpack.c.bf16 %v420_v7, %v420_v7  ;;  %v3632_v9 = vrot.slane %v3630_v41, 4  ;;  %v6101_v6 = vrot.slane %v3565_v52, 9 }
  0x8b   : > { %v668_v12 = vsel %vm7547_vm10, %v660_v59, %v667_v21  ;;  %911 = vst [vmem:[#allocation2 + $0x60] sm:$0xf] %v910_v13  ;;  %v914_v0 = vsel %vm7540_vm9, %v669_v60, %v913_v54  ;;  %v7844_v24 = vsel %vm7833_vm14, %v6100_v63, %v3630_v41  ;;  %v7853_v33 = vsel %vm7833_vm14, %v7645_v31, %v3640_v17 }
  0x8c   : > { %912 = vst.msk [vmem:[#allocation2 + $0x64] sm:$0xf] %vm269_vm0, %v668_v12  ;;  %915 = vst [vmem:[#allocation2 + $0x68] sm:$0x1] %v914_v0  ;;  %v671_v34 = vshrl.u32 %v7829_v18, 16  ;;  %v674_v1 = vshll.u32 %v7829_v18, 16  ;;  %v7863_v19 = vsel %vm7833_vm14, %v3632_v9, %v3633_v42  ;;  %v7869_v41 = vsel %vm7833_vm14, %v6101_v6, %v3637_v16 }
  0x8d   : > { %v679_v10 = vshrl.u32 %v7831_v2, 16  ;;  %v682_v36 = vshll.u32 %v7831_v2, 16  ;;  %v382_v17 = vmul.f32 %v7874_v48, %v343_v20  ;;  %v383_v31 = vmul.f32 %v7874_v48, %v344_v25 }
  0x8e   : > { %v7878_v14 = vrot.slane %v671_v34, 7  ;;  %v6120_v38 = vcombine.low %v7844_v24, %v7863_v19  ;;  %v6121_v16 = vcombine.low %v7869_v41, %v7853_v33  ;;  %v3651_v41 = vrot.slane %v7735_v8, 5 }
  0x8f   : > { %v986_v27 = vld [vmem:[#allocation2 + $0x54] sm:$0xf]  ;;  %v7880_v42 = vrot.slane %v679_v10, 7  ;;  %v987_v5 = vld [vmem:[#allocation2 + $0x58] sm:$0xf]  ;;  %v7887_v44 = vadd.f32 %v7817_v62, %v382_v17  ;;  %v7890_v15 = vadd.f32 %v7817_v62, %v383_v31 }
  0x90   : > { %v2844_v37 = vld [vmem:[#allocation2 + $0x54] sm:$0xf]  ;;  %v1015_v40 = vld [vmem:[#allocation2 + $0x5c] sm:$0x1]  ;;  %v1196_v43 = vshrl.u32 %v986_v27, 16  ;;  %v1199_v30 = vshll.u32 %v986_v27, 16 }
  0x91   : > { %v1205_v45 = vshll.u32 %v987_v5, 16  ;;  %v1209_v46 = vshrl.u32 %v987_v5, 16  ;;  %v1215_v32 = vshll.u32 %v1015_v40, 16  ;;  %v7892_v47 = vld [vmem:[#allocation2 + $0x58] sm:$0xf]  ;;  %v3019_v49 = vshrl.u32 %v2844_v37, 16 }
  0x92   : > { %v1198_v50 = vrot.slane %v1196_v43, 4  ;;  %v1201_v55 = vrot.slane %v1199_v30, 5  ;;  %v7894_v56 = vld [vmem:[#allocation2 + $0x5c] sm:$0x1]  ;;  %v3022_v11 = vshll.u32 %v2844_v37, 16  ;;  %v3028_v59 = vshll.u32 %v7892_v47, 16 }
  0x93   : > { %v1207_v54 = vrot.slane %v1205_v45, 5  ;;  %v1211_v21 = vrot.slane %v1209_v46, 4  ;;  %v1217_v60 = vrot.slane %v1215_v32, 5  ;;  %v3021_v4 = vrot.slane %v3019_v49, 4  ;;  %v2847_v7 = vld [vmem:[#allocation2 + $0x60] sm:$0xf] }
  0x94   : > { %v1202_v52 = vor.u32 %v1201_v55, %v1198_v50  ;;  %v3024_v13 = vrot.slane %v3022_v11, 5  ;;  %v3030_v63 = vrot.slane %v3028_v59, 5  ;;  %v3032_v12 = vshrl.u32 %v7892_v47, 16  ;;  %v7898_v0 = vld [vmem:[#allocation2 + $0x64] sm:$0xf] }
  0x95   : > { %v1212_v20 = vor.u32 %v1211_v21, %v1207_v54  ;;  %v3038_v25 = vshll.u32 %v7894_v56, 16  ;;  %v3043_v9 = vshrl.u32 %v2847_v7, 16  ;;  %v3046_v6 = vshll.u32 %v2847_v7, 16  ;;  %v7901_v31 = vld [vmem:[#allocation2 + $0x68] sm:$0x1] }
  0x96   : > { %v1203_v34 = vrot.slane %v1202_v52, 4  ;;  %v3025_v10 = vor.u32 %v3024_v13, %v3021_v4  ;;  %v3034_v17 = vrot.slane %v3032_v12, 4  ;;  %v3052_v27 = vshll.u32 %v7898_v0, 16  ;;  %v988_v30 = vld [vmem:[#allocation2 + $0x60] sm:$0xf] }
  0x97   : > { %v1213_v37 = vrot.slane %v1212_v20, 4  ;;  %v3040_v5 = vrot.slane %v3038_v25, 5  ;;  %v3045_v40 = vrot.slane %v3043_v9, 4  ;;  %v3048_v43 = vrot.slane %v3046_v6, 5  ;;  %v989_v21 = vld [vmem:[#allocation2 + $0x64] sm:$0xf] }
  0x98   : > { %v1208_v45 = vsel %vm7523_vm8, %v1203_v34, %v1207_v54  ;;  %v3026_v46 = vrot.slane %v3025_v10, 4  ;;  %v3035_v32 = vor.u32 %v3034_v17, %v3030_v63  ;;  %v3054_v49 = vrot.slane %v3052_v27, 5  ;;  %v1016_v13 = vld [vmem:[#allocation2 + $0x68] sm:$0x1]  ;;  %v916_v6 = vld [vmem:[#allocation2 + $0x6c] sm:$0xf] }
  0x99   : > { %v1218_v50 = vsel %vm7523_vm8, %v1213_v37, %v1217_v60  ;;  %v3049_v55 = vor.u32 %v3048_v43, %v3045_v40  ;;  %v3056_v11 = vshrl.u32 %v7898_v0, 16  ;;  %v3062_v59 = vshll.u32 %v7901_v31, 16 }
  0x9a   : > { %v5909_v4 = vcombine.low %v1208_v45, %v1218_v50  ;;  %v3031_v7 = vsel %vm7523_vm8, %v3026_v46, %v3030_v63  ;;  %v3036_v52 = vrot.slane %v3035_v32, 4  ;;  %v1220_v12 = vshrl.u32 %v988_v30, 16 }
  0x9b   : > { %v3050_v54 = vrot.slane %v3049_v55, 4  ;;  %v3058_v20 = vrot.slane %v3056_v11, 4  ;;  %v3064_v25 = vrot.slane %v3062_v59, 5  ;;  %v1223_v9 = vshll.u32 %v988_v30, 16  ;;  %v920_v55 = vld [vmem:[#allocation2 + $0x74] sm:$0x1] }
  0x9c   : > { %6503 = vmatmul.mubr.msk.bf16.gmra.mrb[12].mxu1 %vm1476_vm6, %v5909_v4  ;;  %v3041_v60 = vsel %vm7523_vm8, %v3036_v52, %v3040_v5  ;;  %v1222_v34 = vrot.slane %v1220_v12, 4  ;;  %v1229_v10 = vshll.u32 %v989_v21, 16  ;;  %v1233_v17 = vshrl.u32 %v989_v21, 16 }
  0x9d   : > { %v6072_v27 = vcombine.low %v3031_v7, %v3041_v60  ;;  %v3055_v63 = vsel %vm7523_vm8, %v3050_v54, %v3054_v49  ;;  %v3059_v37 = vor.u32 %v3058_v20, %v3054_v49  ;;  %v1225_v40 = vrot.slane %v1223_v9, 5  ;;  %v3566_v54 = vld [vmem:[#allocation2 + $0x24] sm:$0xe] }
  0x9e   : > { %v1231_v43 = vrot.slane %v1229_v10, 5  ;;  %v1235_v45 = vrot.slane %v1233_v17, 4  ;;  %v1239_v46 = vshll.u32 %v1016_v13, 16  ;;  %v676_v30 = vor.u32 %v674_v1, %v7878_v14  ;;  %v345_v1 = vld [vmem:[%s7497_s8 + $0xa0] sm:$0xff]  ;;  %v7948_v17 = vld [vmem:[#allocation2 + $0x30] sm:$0xe] }
  0x9f   : > { %6646 = vmatprep.mubr.msk.bf16.mxu0 %vm1476_vm6, %v6072_v27  ;;  %v3060_v5 = vrot.slane %v3059_v37, 4  ;;  %v1226_v32 = vor.u32 %v1225_v40, %v1222_v34  ;;  %v677_v50 = vrot.slane %v7878_v14, 4  ;;  %v684_v49 = vor.u32 %v682_v36, %v7880_v42  ;;  %v346_v36 = vld [vmem:[%s7497_s8 + $0xa8] sm:$0xff] }
  0xa0   : > { %v1236_v11 = vor.u32 %v1235_v45, %v1231_v43  ;;  %v1241_v59 = vrot.slane %v1239_v46, 5  ;;  %v686_v21 = vrot.slane %v7880_v42, 4  ;;  %v917_v18 = vsel %vm7553_vm11, %v676_v30, %v916_v6 }
  0xa1   : > { %v3065_v4 = vsel %vm7523_vm8, %v3060_v5, %v3064_v25  ;;  %v1227_v7 = vrot.slane %v1226_v32, 4  ;;  %v685_v14 = vsel %vm7547_vm10, %v677_v50, %v684_v49  ;;  %918 = vst [vmem:[#allocation2 + $0x6c] sm:$0xf] %v917_v18  ;;  %v6309_v2 = vpack.c.bf16 %v7887_v44, %v7887_v44  ;;  %v927_v50 = vld [vmem:[#allocation2 + $0x80] sm:$0x1] }
  0xa2   : > { %v6073_v52 = vcombine.low %v3055_v63, %v3065_v4  ;;  %v1237_v13 = vrot.slane %v1236_v11, 4  ;;  %919 = vst.msk [vmem:[#allocation2 + $0x70] sm:$0xf] %vm269_vm0, %v685_v14  ;;  %v921_v42 = vsel %vm7540_vm9, %v686_v21, %v920_v55  ;;  %v6310_v12 = vpack.c.bf16 %v7890_v15, %v7890_v15 }
  0xa3   : > { %v1232_v20 = vsel %vm7523_vm8, %v1227_v7, %v1231_v43  ;;  %922 = vst [vmem:[#allocation2 + $0x74] sm:$0x1] %v921_v42  ;;  %v688_v25 = vshrl.u32 %v6309_v2, 16  ;;  %v691_v9 = vshll.u32 %v6309_v2, 16  ;;  %v384_v44 = vmul.f32 %v7874_v48, %v345_v1  ;;  %v923_v43 = vld [vmem:[#allocation2 + $0x78] sm:$0xf] }
  0xa4   : > { %6647 = vmatmul.mubr.msk.bf16.gmra.mrb[12].mxu0 %vm1476_vm6, %v6073_v52  ;;  %v1242_v6 = vsel %vm7523_vm8, %v1237_v13, %v1241_v59  ;;  %v696_v60 = vshrl.u32 %v6310_v12, 16  ;;  %v699_v34 = vshll.u32 %v6310_v12, 16  ;;  %v385_v10 = vmul.f32 %v7874_v48, %v346_v36  ;;  %v7138_v52 = vld [vmem:[%s9421_s3 + $0x68] sm:$0xff]  }
  0xa5   : > { %v5910_v15 = vcombine.low %v1232_v20, %v1242_v6  ;;  %6670 = vmatprep.mubr.msk.bf16.mxu0 %vm1476_vm6, %v6120_v38  ;;  %v690_v27 = vrot.slane %v688_v25, 7  ;;  %v423_v63 = vadd.f32 %v7817_v62, %v384_v44  ;;  %v6102_v37 = vrot.slane %v3566_v54, 9  ;;  %v930_v20 = vld [vmem:[#allocation2 + $0x84] sm:$0xf]  ;;  %v347_v25 = vld [vmem:[%s7497_s8 + $0xb0] sm:$0xff] }
  0xa6   : > { %v698_v40 = vrot.slane %v696_v60, 7  ;;  %v424_v45 = vadd.f32 %v7817_v62, %v385_v10  ;;  %v3644_v46 = vrot.slane %v7655_v58, 5  ;;  %v3647_v30 = vrot.slane %v7659_v23, 5 }
  0xa7   : > { %6506 = vmatprep.mubr.msk.bf16.mxu1 %vm1476_vm6, %v5910_v15  ;;  %v693_v5 = vor.u32 %v691_v9, %v690_v27  ;;  %v694_v32 = vrot.slane %v690_v27, 4  ;;  %v6311_v24 = vpack.c.bf16 %v423_v63, %v423_v63  ;;  %v6103_v19 = vrot.slane %v7948_v17, 9  ;;  %v7141_v27 = vld [vmem:[%s9421_s3 + $0x70] sm:$0xff]  }
  0xa8   : > { %v990_v38 = vld [vmem:[#allocation2 + $0x6c] sm:$0xf]  ;;  %v701_v49 = vor.u32 %v699_v34, %v698_v40  ;;  %v703_v55 = vrot.slane %v698_v40, 4  ;;  %v6312_v11 = vpack.c.bf16 %v424_v45, %v424_v45  ;;  %v7962_v59 = vsel %vm7833_vm14, %v6102_v37, %v3644_v46 }
  0xa9   : > { %v991_v21 = vld [vmem:[#allocation2 + $0x70] sm:$0xf]  ;;  %v1244_v58 = vshrl.u32 %v990_v38, 16  ;;  %v1247_v18 = vshll.u32 %v990_v38, 16  ;;  %v924_v23 = vsel %vm7553_vm11, %v693_v5, %v923_v43  ;;  %v705_v1 = vshrl.u32 %v6311_v24, 16 }
  0xaa   : > { %v1017_v4 = vld [vmem:[#allocation2 + $0x74] sm:$0x1]  ;;  %v1253_v7 = vshll.u32 %v991_v21, 16  ;;  %v1257_v14 = vshrl.u32 %v991_v21, 16  ;;  %v702_v2 = vsel %vm7547_vm10, %v694_v32, %v701_v49  ;;  %925 = vst [vmem:[#allocation2 + $0x78] sm:$0xf] %v924_v23  ;;  %v928_v36 = vsel %vm7540_vm9, %v703_v55, %v927_v50 }
  0xab   : > { %v1246_v13 = vrot.slane %v1244_v58, 4  ;;  %v1249_v42 = vrot.slane %v1247_v18, 5  ;;  %v1263_v12 = vshll.u32 %v1017_v4, 16  ;;  %926 = vst.msk [vmem:[#allocation2 + $0x7c] sm:$0xf] %vm269_vm0, %v702_v2  ;;  %v707_v54 = vrot.slane %v705_v1, 7 }
  0xac   : > { %929 = vst [vmem:[#allocation2 + $0x80] sm:$0x1] %v928_v36  ;;  %v1255_v9 = vrot.slane %v1253_v7, 5  ;;  %v1259_v44 = vrot.slane %v1257_v14, 4  ;;  %6671 = vmatmul.mubr.msk.bf16.vlgmr.msra.gmra.mrb[0].mxu0 %vm1476_vm6, %v6121_v16  ;;  %v708_v6 = vshll.u32 %v6311_v24, 16  ;;  %v713_v60 = vshrl.u32 %v6312_v11, 16 }
  0xad   : > { %v1250_v34 = vor.u32 %v1249_v42, %v1246_v13  ;;  %v1265_v10 = vrot.slane %v1263_v12, 5  ;;  %6703 = vmatpush3.bf16.msra.mxu0 %v7666_v29  ;;  %v711_v17 = vrot.slane %v707_v54, 4  ;;  %v716_v15 = vshll.u32 %v6312_v11, 16  ;;  %v348_v7 = vld [vmem:[%s7497_s8 + $0xb8] sm:$0xff]  ;;  %v349_v13 = vld [vmem:[%s7497_s8 + $0xc0] sm:$0xff]  ;;  %v350_v42 = vld [vmem:[%s7497_s8 + $0xc8] sm:$0xff] }
  0xae   : > { %v1260_v63 = vor.u32 %v1259_v44, %v1255_v9  ;;  %v710_v37 = vor.u32 %v708_v6, %v707_v54  ;;  %v715_v40 = vrot.slane %v713_v60, 7  ;;  %v3646_v43 = vrot.slane %v3644_v46, 4  ;;  %6704 = vmatprep.subr.bf16.mxu0 %v7138_v52  ;;  %v934_v46 = vld [vmem:[#allocation2 + $0x8c] sm:$0x1]  ;;  %v8013_v12 = vld [vmem:[#allocation2 + $0x3c] sm:$0xe] }
  0xaf   : > { %v1251_v33 = vrot.slane %v1250_v34, 4  ;;  %v3654_v16 = vrot.slane %v7737_v26, 5  ;;  %v386_v45 = vmul.f32 %v7874_v48, %v347_v25  ;;  %v3652_v26 = vsel %vm7833_vm14, %v6103_v19, %v3651_v41 }
  0xb0   : > { %v1261_v5 = vrot.slane %v1260_v63, 4  ;;  %v718_v29 = vor.u32 %v716_v15, %v715_v40  ;;  %v720_v32 = vrot.slane %v715_v40, 4  ;;  %v931_v50 = vsel %vm7553_vm11, %v710_v37, %v930_v20 }
  0xb1   : > { %v1256_v24 = vsel %vm7523_vm8, %v1251_v33, %v1255_v9  ;;  %v7990_v38 = vld [vmem:[#allocation2 + $0x78] sm:$0xf]  ;;  %932 = vst [vmem:[#allocation2 + $0x84] sm:$0xf] %v931_v50  ;;  %v3648_v8 = vsel %vm7833_vm14, %v3646_v43, %v3647_v30  ;;  %v3653_v49 = vrot.slane %v3651_v41, 4  ;;  %6705 = vmatpush3.bf16.msra.mxu0 %v7138_v52  ;;  %v387_v60 = vmul.f32 %v7874_v48, %v348_v7 }
  0xb2   : > { %v1266_v55 = vsel %vm7523_vm8, %v1261_v5, %v1265_v10  ;;  %v7998_v11 = vld [vmem:[#allocation2 + $0x7c] sm:$0xf]  ;;  %v1268_v58 = vshrl.u32 %v7990_v38, 16  ;;  %v1271_v18 = vshll.u32 %v7990_v38, 16  ;;  %v719_v30 = vsel %vm7547_vm10, %v711_v17, %v718_v29  ;;  %6738 = vmatprep.subr.bf16.mxu0 %v7141_v27 }
  0xb3   : > { %v1018_v21 = vld [vmem:[#allocation2 + $0x80] sm:$0x1]  ;;  %v5911_v23 = vcombine.low %v1256_v24, %v1266_v55  ;;  %v1277_v19 = vshll.u32 %v7998_v11, 16  ;;  %v1281_v1 = vshrl.u32 %v7998_v11, 16  ;;  %933 = vst.msk [vmem:[#allocation2 + $0x88] sm:$0xf] %vm269_vm0, %v719_v30  ;;  %v935_v36 = vsel %vm7540_vm9, %v720_v32, %v934_v46 }
  0xb4   : > { %v1287_v4 = vshll.u32 %v1018_v21, 16  ;;  %v1270_v14 = vrot.slane %v1268_v58, 4  ;;  %v1273_v2 = vrot.slane %v1271_v18, 5  ;;  %v6122_v52 = vcombine.low %v7962_v59, %v3648_v8  ;;  %936 = vst [vmem:[#allocation2 + $0x8c] sm:$0x1] %v935_v36 }
  0xb5   : > { %6507 = vmatmul.mubr.msk.bf16.gmra.mrb[16].mxu1 %vm1476_vm6, %v5911_v23  ;;  %v1279_v54 = vrot.slane %v1277_v19, 5  ;;  %v1283_v20 = vrot.slane %v1281_v1, 4  ;;  %v3655_v9 = vsel %vm7833_vm14, %v3653_v49, %v3654_v16  ;;  %v425_v59 = vadd.f32 %v7817_v62, %v386_v45 }
  0xb6   : > { %v1289_v25 = vrot.slane %v1287_v4, 5  ;;  %v1274_v44 = vor.u32 %v1273_v2, %v1270_v14  ;;  %6674 = vmatprep.mubr.msk.bf16.mxu0 %vm1476_vm6, %v6122_v52  ;;  %v6123_v6 = vcombine.low %v3652_v26, %v3655_v9  ;;  %v388_v10 = vmul.f32 %v7874_v48, %v349_v13  ;;  %v937_v4 = vld [vmem:[#allocation2 + $0x90] sm:$0xf] }
  0xb7   : > { %v1284_v34 = vor.u32 %v1283_v20, %v1279_v54  ;;  %v389_v17 = vmul.f32 %v7874_v48, %v350_v42  ;;  %v6104_v15 = vrot.slane %v8013_v12, 9  ;;  %v426_v37 = vadd.f32 %v7817_v62, %v387_v60  ;;  %v941_v42 = vld [vmem:[#allocation2 + $0x98] sm:$0x1] }
  0xb8   : > { %v1275_v27 = vrot.slane %v1274_v44, 4  ;;  %v8024_v63 = vld [vmem:[#allocation2 + $0x84] sm:$0xf]  ;;  %6675 = vmatmul.mubr.msk.bf16.gmra.mrb[4].mxu0 %vm1476_vm6, %v6123_v6  ;;  %v6313_v40 = vpack.c.bf16 %v425_v59, %v425_v59  ;;  %v3658_v43 = vrot.slane %v7756_v28, 5  ;;  %v427_v45 = vadd.f32 %v7817_v62, %v388_v10  ;;  %v3569_v10 = vld [vmem:[#allocation2 + $0x48] sm:$0xe] }
  0xb9   : > { %v1285_v33 = vrot.slane %v1284_v34, 4  ;;  %v1292_v41 = vshrl.u32 %v8024_v63, 16  ;;  %v1295_v16 = vshll.u32 %v8024_v63, 16  ;;  %v6314_v32 = vpack.c.bf16 %v426_v37, %v426_v37 }
  0xba   : > { %v1280_v5 = vsel %vm7523_vm8, %v1275_v27, %v1279_v54  ;;  %v8034_v29 = vld [vmem:[#allocation2 + $0x88] sm:$0xf]  ;;  %v722_v50 = vshrl.u32 %v6313_v40, 16  ;;  %v725_v24 = vshll.u32 %v6313_v40, 16  ;;  %v428_v12 = vadd.f32 %v7817_v62, %v389_v17 }
  0xbb   : > { %v1290_v46 = vsel %vm7523_vm8, %v1285_v33, %v1289_v25  ;;  %v1294_v8 = vrot.slane %v1292_v41, 4  ;;  %v1297_v28 = vrot.slane %v1295_v16, 5  ;;  %v1301_v26 = vshll.u32 %v8034_v29, 16  ;;  %v1019_v55 = vld [vmem:[#allocation2 + $0x8c] sm:$0x1] }
  0xbc   : > { %v5912_v49 = vcombine.low %v1280_v5, %v1290_v46  ;;  %v1305_v21 = vshrl.u32 %v8034_v29, 16  ;;  %v724_v58 = vrot.slane %v722_v50, 7  ;;  %v730_v18 = vshrl.u32 %v6314_v32, 16 }
  0xbd   : > { %v1298_v30 = vor.u32 %v1297_v28, %v1294_v8  ;;  %v1303_v23 = vrot.slane %v1301_v26, 5  ;;  %v1311_v19 = vshll.u32 %v1019_v55, 16  ;;  %v733_v1 = vshll.u32 %v6314_v32, 16  ;;  %v944_v32 = vld [vmem:[#allocation2 + $0x9c] sm:$0xf] }
  0xbe   : > { %6510 = vmatprep.mubr.msk.bf16.mxu1 %vm1476_vm6, %v5912_v49  ;;  %v1307_v7 = vrot.slane %v1305_v21, 4  ;;  %v727_v14 = vor.u32 %v725_v24, %v724_v58  ;;  %v728_v2 = vrot.slane %v724_v58, 4  ;;  %v732_v36 = vrot.slane %v730_v18, 7  ;;  %v351_v49 = vld [vmem:[%s7497_s8 + $0xd0] sm:$0xff]  ;;  %v352_v55 = vld [vmem:[%s7497_s8 + $0xd8] sm:$0xff]  ;;  %v353_v21 = vld [vmem:[%s7497_s8 + $0xe0] sm:$0xff] }
  0xbf   : > { %v1299_v52 = vrot.slane %v1298_v30, 4  ;;  %v1313_v13 = vrot.slane %v1311_v19, 5  ;;  %v6315_v54 = vpack.c.bf16 %v427_v45, %v427_v45  ;;  %v6316_v60 = vpack.c.bf16 %v428_v12, %v428_v12  ;;  %v948_v58 = vld [vmem:[#allocation2 + $0xa4] sm:$0x1] }
  0xc0   : > { %v1308_v20 = vor.u32 %v1307_v7, %v1303_v23  ;;  %v735_v25 = vor.u32 %v733_v1, %v732_v36  ;;  %v737_v9 = vrot.slane %v732_v36, 4  ;;  %v938_v44 = vsel %vm7553_vm11, %v727_v14, %v937_v4  ;;  %v354_v4 = vld [vmem:[%s7497_s8 + $0xe8] sm:$0xff] }
  0xc1   : > { %v1304_v6 = vsel %vm7523_vm8, %v1299_v52, %v1303_v23  ;;  %939 = vst [vmem:[#allocation2 + $0x90] sm:$0xf] %v938_v44  ;;  %v739_v59 = vshrl.u32 %v6315_v54, 16  ;;  %v742_v34 = vshll.u32 %v6315_v54, 16  ;;  %v3659_v40 = vsel %vm7833_vm14, %v6104_v15, %v3658_v43 }
  0xc2   : > { %v1309_v27 = vrot.slane %v1308_v20, 4  ;;  %v736_v37 = vsel %vm7547_vm10, %v728_v2, %v735_v25  ;;  %v942_v17 = vsel %vm7540_vm9, %v737_v9, %v941_v42  ;;  %v747_v41 = vshrl.u32 %v6316_v60, 16 }
  0xc3   : > { %940 = vst.msk [vmem:[#allocation2 + $0x94] sm:$0xf] %vm269_vm0, %v736_v37  ;;  %943 = vst [vmem:[#allocation2 + $0x98] sm:$0x1] %v942_v17  ;;  %v741_v33 = vrot.slane %v739_v59, 7  ;;  %v750_v16 = vshll.u32 %v6316_v60, 16  ;;  %v390_v2 = vmul.f32 %v7874_v48, %v351_v49  ;;  %v391_v36 = vmul.f32 %v7874_v48, %v352_v55 }
  0xc4   : > { %v3660_v45 = vrot.slane %v3658_v43, 4  ;;  %v1314_v5 = vsel %vm7523_vm8, %v1309_v27, %v1313_v13  ;;  %v3661_v50 = vrot.slane %v7760_v39, 5  ;;  %v6105_v24 = vrot.slane %v3569_v10, 9 }
  0xc5   : > { %v3665_v46 = vrot.slane %v7766_v51, 5  ;;  %v5913_v15 = vcombine.low %v1304_v6, %v1314_v5  ;;  %v744_v8 = vor.u32 %v742_v34, %v741_v33  ;;  %v745_v28 = vrot.slane %v741_v33, 4 }
  0xc6   : > { %v749_v26 = vrot.slane %v747_v41, 7  ;;  %v3662_v43 = vsel %vm7833_vm14, %v3660_v45, %v3661_v50  ;;  %v3668_v39 = vrot.slane %v7768_v53, 5  ;;  %v392_v53 = vmul.f32 %v7874_v48, %v353_v21 }
  0xc7   : > { %v3666_v18 = vsel %vm7833_vm14, %v6105_v24, %v3665_v46  ;;  %v3667_v30 = vrot.slane %v3665_v46, 4  ;;  %6511 = vmatmul.mubr.msk.bf16.gmra.mrb[20].mxu1 %vm1476_vm6, %v5913_v15  ;;  %v945_v19 = vsel %vm7553_vm11, %v744_v8, %v944_v32  ;;  %v6124_v1 = vcombine.low %v3659_v40, %v3662_v43 }
  0xc8   : > { %v752_v51 = vor.u32 %v750_v16, %v749_v26  ;;  %v754_v23 = vrot.slane %v749_v26, 4  ;;  %v8069_v7 = vld [vmem:[#allocation2 + $0x90] sm:$0xf]  ;;  %946 = vst [vmem:[#allocation2 + $0x9c] sm:$0xf] %v945_v19  ;;  %v429_v9 = vadd.f32 %v7817_v62, %v390_v2  ;;  %v430_v44 = vadd.f32 %v7817_v62, %v391_v36 }
  0xc9   : > { %v3669_v14 = vsel %vm7833_vm14, %v3667_v30, %v3668_v39  ;;  %v1316_v52 = vshrl.u32 %v8069_v7, 16  ;;  %v1319_v13 = vshll.u32 %v8069_v7, 16  ;;  %6678 = vmatprep.mubr.msk.bf16.mxu0 %vm1476_vm6, %v6124_v1  ;;  %v393_v6 = vmul.f32 %v7874_v48, %v354_v4  ;;  %v951_v4 = vld [vmem:[#allocation2 + $0xa8] sm:$0xf] }
  0xca   : > { %v753_v42 = vsel %vm7547_vm10, %v745_v28, %v752_v51  ;;  %v949_v12 = vsel %vm7540_vm9, %v754_v23, %v948_v58  ;;  %v8083_v54 = vld [vmem:[#allocation2 + $0x94] sm:$0xf]  ;;  %v1020_v20 = vld [vmem:[#allocation2 + $0x98] sm:$0x1]  ;;  %v6125_v25 = vcombine.low %v3666_v18, %v3669_v14  ;;  %v6317_v37 = vpack.c.bf16 %v429_v9, %v429_v9 }
  0xcb   : > { %947 = vst.msk [vmem:[#allocation2 + $0xa0] sm:$0xf] %vm269_vm0, %v753_v42  ;;  %950 = vst [vmem:[#allocation2 + $0xa4] sm:$0x1] %v949_v12  ;;  %v1318_v60 = vrot.slane %v1316_v52, 4  ;;  %v1321_v59 = vrot.slane %v1319_v13, 5  ;;  %v6318_v17 = vpack.c.bf16 %v430_v44, %v430_v44  ;;  %v431_v40 = vadd.f32 %v7817_v62, %v392_v53 }
  0xcc   : > { %v1325_v34 = vshll.u32 %v8083_v54, 16  ;;  %v1329_v10 = vshrl.u32 %v8083_v54, 16  ;;  %v1335_v27 = vshll.u32 %v1020_v20, 16  ;;  %6679 = vmatmul.mubr.msk.bf16.gmra.mrb[8].mxu0 %vm1476_vm6, %v6125_v25  ;;  %v432_v45 = vadd.f32 %v7817_v62, %v393_v6  ;;  %v955_v20 = vld [vmem:[#allocation2 + $0xb0] sm:$0x1] }
  0xcd   : > { %v1322_v33 = vor.u32 %v1321_v59, %v1318_v60  ;;  %v756_v48 = vshrl.u32 %v6317_v37, 16  ;;  %v759_v32 = vshll.u32 %v6317_v37, 16  ;;  %v764_v50 = vshrl.u32 %v6318_v17, 16 }
  0xce   : > { %v1327_v41 = vrot.slane %v1325_v34, 5  ;;  %v1331_v16 = vrot.slane %v1329_v10, 4  ;;  %v1337_v5 = vrot.slane %v1335_v27, 5  ;;  %v767_v8 = vshll.u32 %v6318_v17, 16  ;;  %v3570_v27 = vld [vmem:[#allocation2 + $0x54] sm:$0xe] }
  0xcf   : > { %v1323_v24 = vrot.slane %v1322_v33, 4  ;;  %v8094_v15 = vld [vmem:[#allocation2 + $0x9c] sm:$0xf]  ;;  %v6319_v28 = vpack.c.bf16 %v431_v40, %v431_v40  ;;  %v758_v55 = vrot.slane %v756_v48, 7  ;;  %v766_v21 = vrot.slane %v764_v50, 7 }
  0xd0   : > { %v1332_v46 = vor.u32 %v1331_v16, %v1327_v41  ;;  %v1340_v26 = vshrl.u32 %v8094_v15, 16  ;;  %v1343_v49 = vshll.u32 %v8094_v15, 16  ;;  %v6320_v30 = vpack.c.bf16 %v432_v45, %v432_v45  ;;  %v3571_v16 = vld [vmem:[#allocation2 + $0x60] sm:$0xe] }
  0xd1   : > { %v1328_v58 = vsel %vm7523_vm8, %v1323_v24, %v1327_v41  ;;  %v773_v39 = vshrl.u32 %v6319_v28, 16  ;;  %v761_v36 = vor.u32 %v759_v32, %v758_v55  ;;  %v762_v53 = vrot.slane %v758_v55, 4  ;;  %v958_v41 = vld [vmem:[#allocation2 + $0xb4] sm:$0xf] }
  0xd2   : > { %v1333_v62 = vrot.slane %v1332_v46, 4  ;;  %v8100_v43 = vld [vmem:[#allocation2 + $0xa0] sm:$0xf]  ;;  %v1021_v18 = vld [vmem:[#allocation2 + $0xa4] sm:$0x1]  ;;  %v1342_v51 = vrot.slane %v1340_v26, 4  ;;  %v769_v9 = vor.u32 %v767_v8, %v766_v21 }
  0xd3   : > { %v1345_v23 = vrot.slane %v1343_v49, 5  ;;  %v1349_v19 = vshll.u32 %v8100_v43, 16  ;;  %v1353_v1 = vshrl.u32 %v8100_v43, 16  ;;  %v1359_v2 = vshll.u32 %v1021_v18, 16  ;;  %v962_v49 = vld [vmem:[#allocation2 + $0xbc] sm:$0x1] }
  0xd4   : > { %v1338_v14 = vsel %vm7523_vm8, %v1333_v62, %v1337_v5  ;;  %v771_v44 = vrot.slane %v766_v21, 4  ;;  %v952_v6 = vsel %vm7553_vm11, %v761_v36, %v951_v4  ;;  %v775_v34 = vrot.slane %v773_v39, 7 }
  0xd5   : > { %v5914_v52 = vcombine.low %v1328_v58, %v1338_v14  ;;  %v1346_v13 = vor.u32 %v1345_v23, %v1342_v51  ;;  %v1351_v42 = vrot.slane %v1349_v19, 5  ;;  %v1355_v12 = vrot.slane %v1353_v1, 4  ;;  %953 = vst [vmem:[#allocation2 + $0xa8] sm:$0xf] %v952_v6  ;;  %v2851_v19 = vld [vmem:[#allocation2 + $0x70] sm:$0xf] }
  0xd6   : > { %v1361_v25 = vrot.slane %v1359_v2, 5  ;;  %v776_v10 = vshll.u32 %v6319_v28, 16  ;;  %v770_v37 = vsel %vm7547_vm10, %v762_v53, %v769_v9  ;;  %v956_v17 = vsel %vm7540_vm9, %v771_v44, %v955_v20  ;;  %v2852_v53 = vld [vmem:[#allocation2 + $0x74] sm:$0x1] }
  0xd7   : > { %6514 = vmatprep.mubr.msk.bf16.mxu1 %vm1476_vm6, %v5914_v52  ;;  %v1347_v60 = vrot.slane %v1346_v13, 4  ;;  %v1356_v59 = vor.u32 %v1355_v12, %v1351_v42  ;;  %v781_v40 = vshrl.u32 %v6320_v30, 16  ;;  %v784_v33 = vshll.u32 %v6320_v30, 16  ;;  %954 = vst.msk [vmem:[#allocation2 + $0xac] sm:$0xf] %vm269_vm0, %v770_v37 }
  0xd8   : > { %957 = vst [vmem:[#allocation2 + $0xb0] sm:$0x1] %v956_v17  ;;  %v778_v48 = vor.u32 %v776_v10, %v775_v34  ;;  %v779_v32 = vrot.slane %v775_v34, 4  ;;  %v6106_v24 = vrot.slane %v3570_v27, 9  ;;  %v3672_v46 = vrot.slane %v7892_v47, 5 }
  0xd9   : > { %v1352_v45 = vsel %vm7523_vm8, %v1347_v60, %v1351_v42  ;;  %v1357_v5 = vrot.slane %v1356_v59, 4  ;;  %v783_v50 = vrot.slane %v781_v40, 7  ;;  %v3675_v8 = vrot.slane %v7894_v56, 5  ;;  %v3572_v47 = vld [vmem:[#allocation2 + $0x6c] sm:$0xe] }
  0xda   : > { %v959_v26 = vsel %vm7553_vm11, %v778_v48, %v958_v41  ;;  %v6107_v55 = vrot.slane %v3571_v16, 9  ;;  %v3679_v21 = vrot.slane %v7898_v0, 5  ;;  %v3673_v30 = vsel %vm7833_vm14, %v6106_v24, %v3672_v46 }
  0xdb   : > { %v1362_v28 = vsel %vm7523_vm8, %v1357_v5, %v1361_v25  ;;  %v786_v62 = vor.u32 %v784_v33, %v783_v50  ;;  %v788_v18 = vrot.slane %v783_v50, 4  ;;  %960 = vst [vmem:[#allocation2 + $0xb4] sm:$0xf] %v959_v26  ;;  %v3674_v39 = vrot.slane %v3672_v46, 4  ;;  %v3573_v5 = vld [vmem:[#allocation2 + $0x78] sm:$0xe] }
  0xdc   : > { %v5915_v58 = vcombine.low %v1352_v45, %v1362_v28  ;;  %v3680_v56 = vsel %vm7833_vm14, %v6107_v55, %v3679_v21  ;;  %v3681_v51 = vrot.slane %v3679_v21, 4  ;;  %v3682_v23 = vrot.slane %v7901_v31, 5  ;;  %v8129_v1 = vld [vmem:[#allocation2 + $0xa8] sm:$0xf] }
  0xdd   : > { %v787_v0 = vsel %vm7547_vm10, %v779_v32, %v786_v62  ;;  %v963_v4 = vsel %vm7540_vm9, %v788_v18, %v962_v49  ;;  %v1364_v14 = vshrl.u32 %v8129_v1, 16  ;;  %v1367_v2 = vshll.u32 %v8129_v1, 16  ;;  %v8163_v49 = vld [vmem:[#allocation2 + $0x7c] sm:$0xf]  ;;  %v8170_v18 = vld [vmem:[#allocation2 + $0x80] sm:$0x1] }
  0xde   : > { %6515 = vmatmul.mubr.msk.bf16.gmra.mrb[24].mxu1 %vm1476_vm6, %v5915_v58  ;;  %961 = vst.msk [vmem:[#allocation2 + $0xb8] sm:$0xf] %vm269_vm0, %v787_v0  ;;  %964 = vst [vmem:[#allocation2 + $0xbc] sm:$0x1] %v963_v4  ;;  %v3676_v31 = vsel %vm7833_vm14, %v3674_v39, %v3675_v8  ;;  %v3683_v36 = vsel %vm7833_vm14, %v3681_v51, %v3682_v23  ;;  %v8142_v52 = vld [vmem:[#allocation2 + $0xac] sm:$0xf] }
  0xdf   : > { %v8144_v13 = vld [vmem:[#allocation2 + $0xb0] sm:$0x1]  ;;  %v6126_v42 = vcombine.low %v3673_v30, %v3676_v31  ;;  %v6127_v12 = vcombine.low %v3680_v56, %v3683_v36  ;;  %v6108_v20 = vrot.slane %v3572_v47, 9  ;;  %v3686_v25 = vrot.slane %v2851_v19, 5  ;;  %v2857_v39 = vld [vmem:[#allocation2 + $0x88] sm:$0xf] }
  0xe0   : > { %v1366_v9 = vrot.slane %v1364_v14, 4  ;;  %v1369_v44 = vrot.slane %v1367_v2, 5  ;;  %v1373_v6 = vshll.u32 %v8142_v52, 16  ;;  %v1377_v60 = vshrl.u32 %v8142_v52, 16  ;;  %v3574_v56 = vld [vmem:[#allocation2 + $0x84] sm:$0xe] }
  0xe1   : > { %v1383_v59 = vshll.u32 %v8144_v13, 16  ;;  %6682 = vmatprep.mubr.msk.bf16.mxu0 %vm1476_vm6, %v6126_v42  ;;  %v3687_v34 = vsel %vm7833_vm14, %v6108_v20, %v3686_v25  ;;  %v3688_v10 = vrot.slane %v3686_v25, 4  ;;  %v3689_v27 = vrot.slane %v2852_v53, 5  ;;  %v2858_v2 = vld [vmem:[#allocation2 + $0x8c] sm:$0x1] }
  0xe2   : > { %v1370_v37 = vor.u32 %v1369_v44, %v1366_v9  ;;  %v1375_v17 = vrot.slane %v1373_v6, 5  ;;  %v1379_v40 = vrot.slane %v1377_v60, 4  ;;  %v8152_v33 = vld [vmem:[#allocation2 + $0xb4] sm:$0xf]  ;;  %6683 = vmatmul.mubr.msk.bf16.gmra.mrb[12].mxu0 %vm1476_vm6, %v6127_v12  ;;  %v6109_v0 = vrot.slane %v3573_v5, 9 }
  0xe3   : > { %v1388_v41 = vshrl.u32 %v8152_v33, 16  ;;  %v1391_v16 = vshll.u32 %v8152_v33, 16  ;;  %v3690_v45 = vsel %vm7833_vm14, %v3688_v10, %v3689_v27  ;;  %v1385_v50 = vrot.slane %v1383_v59, 5  ;;  %v3575_v12 = vld [vmem:[#allocation2 + $0x90] sm:$0xe] }
  0xe4   : > { %v1371_v48 = vrot.slane %v1370_v37, 4  ;;  %v1380_v32 = vor.u32 %v1379_v40, %v1375_v17  ;;  %v6128_v24 = vcombine.low %v3687_v34, %v3690_v45  ;;  %v3693_v53 = vrot.slane %v8163_v49, 5  ;;  %v2860_v44 = vld [vmem:[#allocation2 + $0x94] sm:$0xf]  ;;  %v2861_v6 = vld [vmem:[#allocation2 + $0x98] sm:$0x1] }
  0xe5   : > { %v8159_v46 = vld [vmem:[#allocation2 + $0xb8] sm:$0xf]  ;;  %v8161_v8 = vld [vmem:[#allocation2 + $0xbc] sm:$0x1]  ;;  %v1390_v28 = vrot.slane %v1388_v41, 4  ;;  %v1393_v26 = vrot.slane %v1391_v16, 5 }
  0xe6   : > { %v1376_v55 = vsel %vm7523_vm8, %v1371_v48, %v1375_v17  ;;  %v1381_v21 = vrot.slane %v1380_v32, 4  ;;  %v1397_v58 = vshll.u32 %v8159_v46, 16  ;;  %v1401_v62 = vshrl.u32 %v8159_v46, 16  ;;  %6686 = vmatprep.mubr.msk.bf16.mxu0 %vm1476_vm6, %v6128_v24  ;;  %v7180_v27 = vld [vmem:[#allocation2] sm:$0xf] }
  0xe7   : > { %v1394_v30 = vor.u32 %v1393_v26, %v1390_v28  ;;  %v1407_v47 = vshll.u32 %v8161_v8, 16  ;;  %v3696_v42 = vrot.slane %v8170_v18, 5  ;;  %v6110_v25 = vrot.slane %v3574_v56, 9  ;;  %v8182_v37 = vld [vmem:[#allocation2 + $0x4] sm:$0xf] }
  0xe8   : > { %v1386_v51 = vsel %vm7523_vm8, %v1381_v21, %v1385_v50  ;;  %v1399_v23 = vrot.slane %v1397_v58, 5  ;;  %v1403_v19 = vrot.slane %v1401_v62, 4  ;;  %v3700_v9 = vrot.slane %v2857_v39, 5  ;;  %v3576_v45 = vld [vmem:[#allocation2 + $0x9c] sm:$0xe] }
  0xe9   : > { %v5916_v4 = vcombine.low %v1376_v55, %v1386_v51  ;;  %v1395_v14 = vrot.slane %v1394_v30, 4  ;;  %v1409_v36 = vrot.slane %v1407_v47, 5  ;;  %v3694_v59 = vsel %vm7833_vm14, %v6109_v0, %v3693_v53  ;;  %v2863_v24 = vld [vmem:[#allocation2 + $0xa0] sm:$0xf]  ;;  %v2864_v28 = vld [vmem:[#allocation2 + $0xa4] sm:$0x1] }
  0xea   : > { %v1404_v31 = vor.u32 %v1403_v19, %v1399_v23  ;;  %v3695_v34 = vrot.slane %v3693_v53, 4  ;;  %v3703_v10 = vrot.slane %v2858_v2, 5  ;;  %v5936_v17 = vcombine.low %v7180_v27, %v8182_v37  ;;  %v2866_v58 = vld [vmem:[#allocation2 + $0xac] sm:$0xf]  ;;  %v2867_v47 = vld [vmem:[#allocation2 + $0xb0] sm:$0x1] }
  0xeb   : > { %6518 = vmatprep.mubr.msk.bf16.mxu1 %vm1476_vm6, %v5916_v4  ;;  %v1400_v20 = vsel %vm7523_vm8, %v1395_v14, %v1399_v23  ;;  %v3701_v40 = vsel %vm7833_vm14, %v6110_v25, %v3700_v9  ;;  %v3702_v41 = vrot.slane %v3700_v9, 4  ;;  %v6111_v16 = vrot.slane %v3575_v12, 9  ;;  %v3577_v39 = vld [vmem:[#allocation2 + $0xa8] sm:$0xe]  ;;  %v2869_v19 = vld [vmem:[#allocation2 + $0xb8] sm:$0xf] }
  0xec   : > { %v1405_v60 = vrot.slane %v1404_v31, 4  ;;  %v3697_v48 = vsel %vm7833_vm14, %v3695_v34, %v3696_v42  ;;  %v3707_v32 = vrot.slane %v2860_v44, 5  ;;  %v3710_v50 = vrot.slane %v2861_v6, 5  ;;  %v355_v2 = vld [vmem:[%s7497_s8 + $0xf0] sm:$0xff]  ;;  %v356_v31 = vld [vmem:[%s7497_s8 + $0xf8] sm:$0xff]  ;;  %s5755_s8 = sshll.u32 %s9263_s13, 4  ;;  %s9362_s8 = int_to_ptr.vmem [resolvable:$true] %s5755_s8 }
  0xed   : > { %v6129_v55 = vcombine.low %v3694_v59, %v3697_v48  ;;  %v3704_v21 = vsel %vm7833_vm14, %v3702_v41, %v3703_v10  ;;  %v6112_v56 = vrot.slane %v3576_v45, 9  ;;  %v3714_v51 = vrot.slane %v2863_v24, 5  ;;  %v8203_v53 = vld [vmem:[#allocation2 + $0x10] sm:$0xf]  ;;  %v7184_v12 = vld [vmem:[#allocation2 + $0x18] sm:$0xf]  ;;  %p7249_p1 = scmp.lt.s32.totalorder %s9362_s8, %s7247_s27 }
  0xee   : > { %v1410_v5 = vsel %vm7523_vm8, %v1405_v60, %v1409_v36  ;;  %v6130_v62 = vcombine.low %v3701_v40, %v3704_v21  ;;  %v3709_v30 = vrot.slane %v3707_v32, 4  ;;  %v3717_v23 = vrot.slane %v2864_v28, 5  ;;  %v7182_v36 = vld [vmem:[#allocation2 + $0xc] sm:$0xf]  ;;  %v2870_v44 = vld [vmem:[#allocation2 + $0xbc] sm:$0x1] }
  0xef   : > { %v5917_v26 = vcombine.low %v1400_v20, %v1410_v5  ;;  %6687 = vmatmul.mubr.msk.bf16.gmra.mrb[16].mxu0 %vm1476_vm6, %v6129_v55  ;;  %v3708_v0 = vsel %vm7833_vm14, %v6111_v16, %v3707_v32  ;;  %v3721_v14 = vrot.slane %v2866_v58, 5  ;;  %v5937_v42 = vcombine.low %v7182_v36, %v8203_v53  ;;  %v8206_v20 = vld [vmem:[#allocation2 + $0x1c] sm:$0xf]  ;;  %v3578_v6 = vld [vmem:[#allocation2 + $0xb4] sm:$0xe]  ;;  %v7139_v55 = vld [vmem:[%s9421_s3 + $0x28] sm:$0xff]  }
  0xf0   : > { %6690 = vmatprep.mubr.msk.bf16.mxu0 %vm1476_vm6, %v6130_v62  ;;  %v3711_v4 = vsel %vm7833_vm14, %v3709_v30, %v3710_v50  ;;  %v5938_v25 = vcombine.low %v7184_v12, %v8206_v20  ;;  %v3716_v9 = vrot.slane %v3714_v51, 4  ;;  %v3715_v60 = vsel %vm7833_vm14, %v6112_v56, %v3714_v51  ;;  %v7186_v40 = vld [vmem:[%s9419_s1] ss:$0 sm:$0xff]  ;;  %v8239_v51 = vld [vmem:[%s9421_s3 + $0x30] sm:$0xff]   ;;  %s7242_s24 = scalar_lea.vmem %s9362_s8, 4096 }
  0xf1   : > { %6519 = vmatmul.mubr.msk.bf16.gmra.mrb[28].mxu1 %vm1476_vm6, %v5917_v26  ;;  %v6113_v59 = vrot.slane %v3577_v39, 9  ;;  %v3724_v34 = vrot.slane %v2867_v47, 5  ;;  %v3728_v10 = vrot.slane %v2869_v19, 5  ;;  %v6131_v27 = vcombine.low %v3708_v0, %v3711_v4  ;;  %v7187_v24 = vld [vmem:[%s9420_s2] ss:$0 sm:$0xff]  ;;  %p7243_p12 = scmp.ne.s32.totalorder %s9362_s8, %s7242_s24  ;;  %p7250_p2 = scmp.lt.s32.totalorder %s7248_s29, %s7242_s24 }
  0xf2   : > { %6526 = vmatprep.mubr.msk.bf16.mxu1 %vm1476_vm6, %v5936_v17  ;;  %v3718_v17 = vsel %vm7833_vm14, %v3716_v9, %v3717_v23  ;;  %v394_v41 = vmul.f32 %v7186_v40, %v355_v2  ;;  %v395_v16 = vmul.f32 %v7186_v40, %v356_v31  ;;  %v3723_v45 = vrot.slane %v3721_v14, 4  ;;  %v7188_v30 = vld [vmem:[%s9421_s3 + $0x20] sm:$0xff]   ;;  %v8242_v2 = vld [vmem:[#allocation2 + $0x28] sm:$0xf]  ;;  %v8245_v9 = vld [vmem:[#allocation2 + $0x34] sm:$0xf] }
  0xf3   : > { %v6114_v5 = vrot.slane %v3578_v6, 9  ;;  %v3730_v48 = vrot.slane %v3728_v10, 4  ;;  %v3731_v32 = vrot.slane %v2870_v44, 5  ;;  %v6132_v50 = vcombine.low %v3715_v60, %v3718_v17  ;;  %v965_v60 = vld [vmem:[#allocation2 + $0xc0] sm:$0xf]  ;;  %p7244_p13 = pnand %p7243_p12, %p7396_p4  ;;  %p7251_p3 = por %p7250_p2, %p7249_p1 }
  0xf4   : > { %v433_v28 = vadd.f32 %v7187_v24, %v394_v41  ;;  %v434_v26 = vadd.f32 %v7187_v24, %v395_v16  ;;  %v3722_v21 = vsel %vm7833_vm14, %v6113_v59, %v3721_v14  ;;  %v3725_v47 = vsel %vm7833_vm14, %v3723_v45, %v3724_v34  ;;  %v7189_v14 = vld [vmem:[#allocation2 + $0x24] sm:$0xf]  ;;  %v969_v59 = vld [vmem:[#allocation2 + $0xc8] sm:$0x1]  ;;  %v7193_v45 = vld [vmem:[#allocation2 + $0x3c] sm:$0xf] }
  0xf5   : > { %v3729_v39 = vsel %vm7833_vm14, %v6114_v5, %v3728_v10  ;;  %v3732_v56 = vsel %vm7833_vm14, %v3730_v48, %v3731_v32  ;;  %v5939_v31 = vcombine.low %v7189_v14, %v8242_v2  ;;  %v6133_v36 = vcombine.low %v3722_v21, %v3725_v47  ;;  %v8260_v5 = vld [vmem:[#allocation2 + $0x40] sm:$0xf]  ;;  %v7195_v48 = vld [vmem:[#allocation2 + $0x48] sm:$0xf]  ;;  %v8263_v32 = vld [vmem:[#allocation2 + $0x4c] sm:$0xf]  ;;  %p7245_p0 = pneg %p7244_p13 }
  0xf6   : > { %v6321_v58 = vpack.c.bf16 %v433_v28, %v433_v28  ;;  %v6322_v62 = vpack.c.bf16 %v434_v26, %v434_v26  ;;  %v6134_v6 = vcombine.low %v3729_v39, %v3732_v56  ;;  %v5941_v61 = vcombine.low %v7193_v45, %v8260_v5  ;;  %v7197_v47 = vld [vmem:[#allocation2 + $0x54] sm:$0xf]  ;;  %v8272_v39 = vld [vmem:[#allocation2 + $0x58] sm:$0xf] }
  0xf7   : > { %6691 = vmatmul.mubr.msk.bf16.gmra.mrb[20].mxu0 %vm1476_vm6, %v6131_v27  ;;  %v5942_v3 = vcombine.low %v7195_v48, %v8263_v32  ;;  %v3100_v21 = vshll.u32 %v8163_v49, 16  ;;  %v5943_v56 = vcombine.low %v7197_v47, %v8272_v39  ;;  %v7140_v14 = vld [vmem:[#allocation2 + $0x18] sm:$0xff]   ;;  %p7252_p5 = pnand %p7251_p3, %p7245_p0 }
  0xf8   : > { %6694 = vmatprep.mubr.msk.bf16.mxu0 %vm1476_vm6, %v6132_v50  ;;  %v790_v23 = vshrl.u32 %v6321_v58, 16  ;;  %v793_v19 = vshll.u32 %v6321_v58, 16  ;;  %v798_v0 = vshrl.u32 %v6322_v62, 16  ;;  %v801_v4 = vshll.u32 %v6322_v62, 16  ;;  %v1989_v45 = vld [vmem:[#allocation2 + $0x18] sm:$0xe] }
  0xf9   : > { %6527 = vmatmul.mubr.msk.bf16.vlgmr.msra.gmra.mrb[0].mxu1 %vm1476_vm6, %v5937_v42  ;;  %v3104_v58 = vshrl.u32 %v8163_v49, 16  ;;  %v8280_v49 = vrot.slane %v3100_v21, 5  ;;  %v7151_v21 = vld [vmem:[%s9421_s3 + $0x78] sm:$0xff]  }
  0xfa   : > { %6559 = vmatpush3.bf16.msra.mxu1 %v7188_v30  ;;  %6530 = vmatprep.mubr.msk.bf16.mxu1 %vm1476_vm6, %v5938_v25  ;;  %v792_v42 = vrot.slane %v790_v23, 7  ;;  %v800_v12 = vrot.slane %v798_v0, 7  ;;  %v7191_v25 = vld [vmem:[#allocation2 + $0x30] sm:$0xf]  ;;  %v8277_v0 = vld [vmem:[#allocation2 + $0x64] sm:$0xf] }
  0xfb   : > { %6560 = vmatprep.subr.bf16.mxu1 %v7139_v55  ;;  %v5940_v44 = vcombine.low %v7191_v25, %v8245_v9  ;;  %9450 = vst [vmem:[#allocation6_spill] sm:$0xff] %v8280_v49  ;;  %v2040_v25 = vrot.slane %v8182_v37, 5  ;;  %v5946_v37 = vcombine.low %v7990_v38, %v7998_v11  ;;  %v1991_v38 = vld [vmem:[#allocation2 + $0x30] sm:$0xe] }
  0xfc   : > { %v795_v34 = vor.u32 %v793_v19, %v792_v42  ;;  %v796_v10 = vrot.slane %v792_v42, 4  ;;  %v803_v27 = vor.u32 %v801_v4, %v800_v12  ;;  %v805_v17 = vrot.slane %v800_v12, 4  ;;  %v7199_v19 = vld [vmem:[#allocation2 + $0x60] sm:$0xf]  ;;  %v7143_v11 = vld [vmem:[#allocation2 + $0x30] sm:$0xff]  }
  0xfd   : > { %v5944_v4 = vcombine.low %v7199_v19, %v8277_v0  ;;  %v3110_v42 = vshll.u32 %v8170_v18, 16  ;;  %v1987_v12 = vld [vmem:[#allocation2] sm:$0xe]  ;;  %v2054_v18 = vrot.slane %v8206_v20, 5  ;;  %v2061_v20 = vrot.slane %v8242_v2, 5 }
  0xfe   : > { %6561 = vmatpush3.bf16.msra.mxu1 %v7139_v55  ;;  %v804_v40 = vsel %vm7547_vm10, %v796_v10, %v803_v27  ;;  %v966_v41 = vsel %vm7553_vm11, %v795_v34, %v965_v60  ;;  %v970_v16 = vsel %vm7540_vm9, %v805_v17, %v969_v59  ;;  %v2047_v60 = vrot.slane %v8203_v53, 5  ;;  %v7202_v59 = vld [vmem:[#allocation2 + $0x14] sm:$0x1]  ;;  %v1988_v10 = vld [vmem:[#allocation2 + $0xc] sm:$0xe] }
  0xff   : > { %6594 = vmatprep.subr.bf16.mxu1 %v8239_v51  ;;  %6695 = vmatmul.mubr.msk.bf16.gmra.mrb[24].mxu0 %vm1476_vm6, %v6133_v36  ;;  %967 = vst [vmem:[#allocation2 + $0xc0] sm:$0xf] %v966_v41  ;;  %968 = vst.msk [vmem:[#allocation2 + $0xc4] sm:$0xf] %vm269_vm0, %v804_v40  ;;  %v3106_v36 = vrot.slane %v3104_v58, 4  ;;  %v2050_v34 = vrot.slane %v7202_v59, 5  ;;  %v5947_v53 = vcombine.low %v8024_v63, %v8034_v29 }
 0x100   : > { %6698 = vmatprep.mubr.msk.bf16.mxu0 %vm1476_vm6, %v6134_v6  ;;  %971 = vst [vmem:[#allocation2 + $0xc8] sm:$0x1] %v970_v16  ;;  %v8291_v17 = vrot.slane %v3110_v42, 5  ;;  %v7203_v40 = vld [vmem:[#allocation2 + $0x6c] sm:$0xf]  ;;  %v5970_v48 = vrot.slane %v1987_v12, 9 }
 0x101   : > { %6531 = vmatmul.mubr.msk.bf16.gmra.mrb[4].mxu1 %vm1476_vm6, %v5939_v31  ;;  %v3107_v27 = vor.u32 %v3106_v36, %v8280_v49  ;;  %v8293_v41 = vld [vmem:[#allocation2 + $0x70] sm:$0xf]  ;;  %v5972_v58 = vrot.slane %v1989_v45, 9  ;;  %v7205_v2 = vld [vmem:[#allocation2 + $0x20] sm:$0x1]  ;;  %v2075_v19 = vrot.slane %v8260_v5, 5 }
 0x102   : > { %6534 = vmatprep.mubr.msk.bf16.mxu1 %vm1476_vm6, %v5940_v44  ;;  %v7201_v44 = vld [vmem:[#allocation2 + $0x8] sm:$0x1]  ;;  %9451 = vst [vmem:[#allocation7_spill] sm:$0xff] %v8291_v17  ;;  %v5945_v16 = vcombine.low %v7203_v40, %v8293_v41  ;;  %v7207_v36 = vld [vmem:[#allocation2 + $0x38] sm:$0x1]  ;;  %v8320_v5 = vsel %vm7833_vm14, %v5970_v48, %v2040_v25  ;;  %v2089_v29 = vrot.slane %v8272_v39, 5 }
 0x103   : > { %v2043_v6 = vrot.slane %v7201_v44, 5  ;;  %v2071_v42 = vrot.slane %v7207_v36, 5  ;;  %v1992_v12 = vld [vmem:[#allocation2 + $0x3c] sm:$0xe]  ;;  %v7208_v44 = vld [vmem:[%s9421_s3 + $0x70] sm:$0xff]   ;;  %v8331_v45 = vrot.slane %v3107_v27, 4 }
 0x104   : > { %v1993_v40 = vld [vmem:[#allocation2 + $0x48] sm:$0xe]  ;;  %v7209_v48 = vld [vmem:[#allocation2 + $0x44] sm:$0x1]  ;;  %v2138_v17 = vrot.slane %v8142_v52, 5 }
 0x105   : > { %9452 = vst [vmem:[#allocation8_spill] sm:$0xff] %v8331_v45 }
 0x106   : > { %v2872_v57 = vld [vmem:[#allocation2 + $0xc4] sm:$0xf]  ;;  %v3579_v24 = vld [vmem:[#allocation2 + $0xc0] sm:$0xe] }
 0x107   : > { %v2873_v50 = vld [vmem:[#allocation2 + $0xc8] sm:$0x1]  ;;  %v6115_v28 = vrot.slane %v3579_v24, 9  ;;  %v3735_v26 = vrot.slane %v2872_v57, 5  ;;  %v2068_v57 = vrot.slane %v8245_v9, 5  ;;  %v5949_v24 = vcombine.low %v8094_v15, %v8100_v43 }
 0x108   : > { %v3738_v55 = vrot.slane %v2873_v50, 5  ;;  %v5948_v50 = vcombine.low %v8069_v7, %v8083_v54  ;;  %v5950_v9 = vcombine.low %v8129_v1, %v8142_v52  ;;  %v1996_v54 = vld [vmem:[#allocation2 + $0x6c] sm:$0xe] }
 0x109   : > { %6535 = vmatmul.mubr.msk.bf16.gmra.mrb[8].mxu1 %vm1476_vm6, %v5941_v61  ;;  %v3736_v62 = vsel %vm7833_vm14, %v6115_v28, %v3735_v26  ;;  %v3737_v30 = vrot.slane %v3735_v26, 4  ;;  %v7142_v61 = vld [vmem:[#allocation2 + $0x24] sm:$0xff]   ;;  %v2042_v28 = vrot.slane %v2040_v25, 4  ;;  %v5971_v26 = vrot.slane %v1988_v10, 9 }
 0x10a   : > { %6538 = vmatprep.mubr.msk.bf16.mxu1 %vm1476_vm6, %v5942_v3  ;;  %v1990_v3 = vld [vmem:[#allocation2 + $0x24] sm:$0xe]  ;;  %v8340_v25 = vsel %vm7833_vm14, %v5972_v58, %v2054_v18 }
 0x10b   : > { %v3739_v23 = vsel %vm7833_vm14, %v3737_v30, %v3738_v55  ;;  %v2049_v55 = vrot.slane %v2047_v60, 4  ;;  %v2057_v30 = vrot.slane %v7205_v2, 5  ;;  %v5973_v47 = vrot.slane %v1990_v3, 9 }
 0x10c   : > { %v6135_v31 = vcombine.low %v3736_v62, %v3739_v23  ;;  %v2056_v62 = vrot.slane %v2054_v18, 4  ;;  %v8324_v59 = vsel %vm7833_vm14, %v2042_v28, %v2043_v6  ;;  %v8328_v10 = vsel %vm7833_vm14, %v5971_v26, %v2047_v60  ;;  %v4417_v60 = vld [vmem:[#allocation2 + $0x18] sm:$0xf]  ;;  %v7144_v18 = vld [vmem:[#allocation2 + $0x3c] sm:$0xff]   ;;  %v7145_v28 = vld [vmem:[#allocation2 + $0x48] sm:$0xff]  }
 0x10d   : > { %v8353_v27 = vsel %vm7833_vm14, %v5973_v47, %v2061_v20  ;;  %v2078_v3 = vrot.slane %v7209_v48, 5  ;;  %v4466_v47 = vshrl.u32 %v4417_v60, 16 }
 0x10e   : > { %6699 = vmatmul.mubr.msk.bf16.gmra.mrb[28].mxu0 %vm1476_vm6, %v6135_v31  ;;  %v2070_v31 = vrot.slane %v2068_v57, 4  ;;  %v8344_v6 = vsel %vm7833_vm14, %v2056_v62, %v2057_v30  ;;  %v7210_v62 = vld [vmem:[#allocation2 + $0x50] sm:$0x1]  ;;  %v1994_v30 = vld [vmem:[#allocation2 + $0x54] sm:$0xe] }
 0x10f   : > { %6706 = vmatprep.mubr.msk.bf16.mxu0 %vm1476_vm6, %v7140_v14  ;;  %v5974_v14 = vrot.slane %v1991_v38, 9  ;;  %v2085_v2 = vrot.slane %v7210_v62, 5  ;;  %v7211_v62 = vld [vmem:[#allocation2 + $0x5c] sm:$0x1] }
 0x111   : > { %6539 = vmatmul.mubr.msk.bf16.gmra.mrb[12].mxu1 %vm1476_vm6, %v5943_v56  ;;  %v7206_v56 = vld [vmem:[#allocation2 + $0x2c] sm:$0x1]  ;;  %v8361_v38 = vsel %vm7833_vm14, %v5974_v14, %v2068_v57  ;;  %v5979_v14 = vrot.slane %v1996_v54, 9 }
 0x112   : > { %6542 = vmatprep.mubr.msk.bf16.mxu1 %vm1476_vm6, %v5944_v4  ;;  %v2064_v23 = vrot.slane %v7206_v56, 5  ;;  %v2063_v4 = vrot.slane %v2061_v20, 4  ;;  %v5976_v20 = vrot.slane %v1993_v40, 9  ;;  %v4469_v56 = vshll.u32 %v4417_v60, 16 }
 0x113   : > { %v5977_v60 = vrot.slane %v1994_v30, 9 }
 0x114   : > { %v8357_v26 = vsel %vm7833_vm14, %v2063_v4, %v2064_v23  ;;  %v4471_v48 = vrot.slane %v4469_v56, 5  ;;  %v4419_v56 = vld [vmem:[#allocation2 + $0x20] sm:$0x1]  ;;  %v4422_v4 = vld [vmem:[#allocation2 + $0x2c] sm:$0x1] }
 0x116   : > { %6707 = vmatmul.mubr.msk.bf16.vlgmr.msra.gmra.mrb[0].mxu0 %vm1476_vm6, %v7142_v61  ;;  %v2077_v61 = vrot.slane %v2075_v19, 4 }
 0x117   : > { %6739 = vmatpush3.bf16.msra.mxu0 %v7208_v44  ;;  %6710 = vmatprep.mubr.msk.bf16.mxu0 %vm1476_vm6, %v7143_v11  ;;  %v8365_v11 = vsel %vm7833_vm14, %v2070_v31, %v2071_v42 }
 0x118   : > { %6740 = vmatprep.subr.bf16.mxu0 %v7151_v21  ;;  %v8382_v31 = vsel %vm7833_vm14, %v2077_v61, %v2078_v3  ;;  %v4468_v61 = vrot.slane %v4466_v47, 4  ;;  %v2096_v3 = vrot.slane %v8277_v0, 5  ;;  %v2103_v47 = vrot.slane %v8293_v41, 5 }
 0x119   : > { %6543 = vmatmul.mubr.msk.bf16.gmra.mrb[16].mxu1 %vm1476_vm6, %v5945_v16  ;;  %v2082_v16 = vrot.slane %v8263_v32, 5  ;;  %v8349_v32 = vld [vmem:[%s9421_s3 + $0x80] sm:$0xff]   ;;  %v8417_v0 = vsel %vm7833_vm14, %v5977_v60, %v2089_v29 }
 0x11a   : > { %6546 = vmatprep.mubr.msk.bf16.mxu1 %vm1476_vm6, %v5946_v37  ;;  %v8336_v37 = vsel %vm7833_vm14, %v2049_v55, %v2050_v34  ;;  %v5975_v34 = vrot.slane %v1992_v12, 9  ;;  %v4418_v55 = vld [vmem:[#allocation2 + $0x1c] sm:$0xf]  ;;  %v4420_v12 = vld [vmem:[#allocation2 + $0x24] sm:$0xf]  ;;  %v2098_v44 = vrot.slane %v2096_v3, 4  ;;  %v8446_v1 = vsel %vm7833_vm14, %v5979_v14, %v2103_v47 }
 0x11b   : > { %6741 = vmatpush3.bf16.msra.mxu0 %v7151_v21  ;;  %v2084_v58 = vrot.slane %v2082_v16, 4  ;;  %v4475_v36 = vshll.u32 %v4418_v55, 16  ;;  %v4479_v42 = vshrl.u32 %v4418_v55, 16  ;;  %v8395_v40 = vsel %vm7833_vm14, %v5976_v20, %v2082_v16  ;;  %v7147_v16 = vld [vmem:[#allocation2 + $0x60] sm:$0xff]  }
 0x11c   : > { %6774 = vmatprep.subr.bf16.mxu0 %v8349_v32  ;;  %v8378_v21 = vsel %vm7833_vm14, %v5975_v34, %v2075_v19  ;;  %v4421_v34 = vld [vmem:[#allocation2 + $0x28] sm:$0xf]  ;;  %v4493_v7 = vshll.u32 %v4420_v12, 16  ;;  %v4472_v19 = vor.u32 %v4471_v48, %v4468_v61  ;;  %v2105_v60 = vrot.slane %v2103_v47, 4 }
 0x11d   : > { %v8404_v63 = vsel %vm7833_vm14, %v2084_v58, %v2085_v2  ;;  %v4499_v20 = vshll.u32 %v4421_v34, 16  ;;  %v4503_v55 = vshrl.u32 %v4421_v34, 16  ;;  %v7146_v58 = vld [vmem:[#allocation2 + $0x54] sm:$0xff]   ;;  %v2092_v2 = vrot.slane %v7211_v62, 5  ;;  %v4423_v34 = vld [vmem:[#allocation2 + $0x30] sm:$0xf] }
 0x11e   : > { %6711 = vmatmul.mubr.msk.bf16.gmra.mrb[4].mxu0 %vm1476_vm6, %v7144_v18  ;;  %v4490_v18 = vshrl.u32 %v4420_v12, 16  ;;  %v7212_v12 = vld [vmem:[#allocation2 + $0x68] sm:$0x1]  ;;  %v4495_v57 = vrot.slane %v4493_v7, 5  ;;  %v4485_v62 = vshll.u32 %v4419_v56, 16  ;;  %v4514_v48 = vshrl.u32 %v4423_v34, 16 }
 0x11f   : > { %6714 = vmatprep.mubr.msk.bf16.mxu0 %vm1476_vm6, %v7145_v28  ;;  %v4481_v28 = vrot.slane %v4479_v42, 4  ;;  %v2099_v42 = vrot.slane %v7212_v12, 5  ;;  %v8420_v41 = vrot.slane %v4499_v20, 5  ;;  %v4505_v23 = vrot.slane %v4503_v55, 4  ;;  %v1997_v7 = vld [vmem:[#allocation2 + $0x78] sm:$0xe] }
 0x120   : > { %v4492_v39 = vrot.slane %v4490_v18, 4  ;;  %v4517_v54 = vshll.u32 %v4423_v34, 16  ;;  %v4473_v43 = vrot.slane %v4472_v19, 4  ;;  %v8448_v55 = vld [vmem:[#allocation2 + $0x34] sm:$0xf]  ;;  %v7148_v56 = vld [vmem:[#allocation2 + $0x6c] sm:$0xff]  }
 0x121   : > { %6547 = vmatmul.mubr.msk.bf16.gmra.mrb[20].mxu1 %vm1476_vm6, %v5947_v53  ;;  %v1995_v53 = vld [vmem:[#allocation2 + $0x60] sm:$0xe]  ;;  %9453 = vst [vmem:[#allocation9_spill] sm:$0xff] %v8448_v55  ;;  %v1998_v19 = vld [vmem:[#allocation2 + $0x84] sm:$0xe]  ;;  %v4516_v14 = vrot.slane %v4514_v48, 4 }
 0x122   : > { %6550 = vmatprep.mubr.msk.bf16.mxu1 %vm1476_vm6, %v5948_v50  ;;  %v8410_v50 = vrot.slane %v4475_v36, 5  ;;  %v5978_v30 = vrot.slane %v1995_v53, 9  ;;  %v2091_v36 = vrot.slane %v2089_v29, 4  ;;  %v7213_v29 = vld [vmem:[#allocation2 + $0x74] sm:$0x1]  ;;  %v4519_v47 = vrot.slane %v4517_v54, 5 }
 0x123   : > { %v2106_v61 = vrot.slane %v7213_v29, 5  ;;  %v4426_v34 = vld [vmem:[#allocation2 + $0x3c] sm:$0xf]  ;;  %v7216_v29 = vld [vmem:[#allocation2 + $0x80] sm:$0x1] }
 0x124   : > { %v4482_v53 = vor.u32 %v4481_v28, %v8410_v50  ;;  %v8434_v18 = vsel %vm7833_vm14, %v2091_v36, %v2092_v2  ;;  %v8438_v15 = vsel %vm7833_vm14, %v5978_v30, %v2096_v3  ;;  %v8442_v28 = vsel %vm7833_vm14, %v2098_v44, %v2099_v42 }
 0x125   : > { %v4487_v2 = vrot.slane %v4485_v62, 5  ;;  %v4506_v3 = vor.u32 %v4505_v23, %v8420_v41  ;;  %v8453_v44 = vsel %vm7833_vm14, %v2105_v60, %v2106_v61  ;;  %v5980_v36 = vrot.slane %v1997_v7, 9  ;;  %v7217_v7 = vld [vmem:[#allocation2 + $0x8c] sm:$0x1] }
 0x126   : > { %6715 = vmatmul.mubr.msk.bf16.gmra.mrb[8].mxu0 %vm1476_vm6, %v7146_v58  ;;  %v4483_v58 = vrot.slane %v4482_v53, 4  ;;  %v4523_v42 = vshll.u32 %v8448_v55, 16  ;;  %v4527_v23 = vshrl.u32 %v8448_v55, 16  ;;  %v5981_v60 = vrot.slane %v1998_v19, 9 }
 0x127   : > { %6718 = vmatprep.mubr.msk.bf16.mxu0 %vm1476_vm6, %v7147_v16  ;;  %v7214_v16 = vld [vmem:[#allocation2 + $0x7c] sm:$0xf]  ;;  %v4507_v48 = vrot.slane %v4506_v3, 4  ;;  %v9456_v3 = vcombine.low %v8320_v5, %v8324_v59 }
 0x128   : > { %v2110_v20 = vrot.slane %v7214_v16, 5  ;;  %v2113_v16 = vrot.slane %v7216_v29, 5  ;;  %v4488_v61 = vsel %vm7523_vm8, %v4483_v58, %v4487_v2  ;;  %v4520_v58 = vor.u32 %v4519_v47, %v4516_v14  ;;  %v8482_v29 = vld [vmem:[#allocation2 + $0x40] sm:$0xf]  ;;  %v4429_v47 = vld [vmem:[#allocation2 + $0x48] sm:$0xf] }
 0x129   : > { %6551 = vmatmul.mubr.msk.bf16.gmra.mrb[24].mxu1 %vm1476_vm6, %v5949_v24  ;;  %v4509_v24 = vshll.u32 %v4422_v4, 16  ;;  %v7215_v4 = vld [vmem:[#allocation2 + $0x88] sm:$0xf]  ;;  %v4538_v2 = vshrl.u32 %v4426_v34, 16  ;;  %v8480_v19 = vrot.slane %v4523_v42, 5  ;;  %9457 = vst [vmem:[#allocation11_spill] sm:$0xff] %v8482_v29 }
 0x12a   : > { %6554 = vmatprep.mubr.msk.bf16.mxu1 %vm1476_vm6, %v5950_v9  ;;  %v4496_v9 = vor.u32 %v4495_v57, %v4492_v39  ;;  %v2117_v30 = vrot.slane %v7215_v4, 5  ;;  %v7150_v57 = vld [vmem:[#allocation2 + $0x78] sm:$0xff]   ;;  %v4478_v39 = vsel %vm7523_vm8, %v4473_v43, %v8410_v50  ;;  %v2112_v62 = vrot.slane %v2110_v20, 4 }
 0x12b   : > { %v4511_v12 = vrot.slane %v4509_v24, 5  ;;  %v2120_v4 = vrot.slane %v7217_v7, 5  ;;  %v9454_v50 = vcombine.low %v8152_v33, %v8159_v46  ;;  %v4541_v7 = vshll.u32 %v4426_v34, 16  ;;  %v8512_v34 = vld [vmem:[#allocation2 + $0x44] sm:$0x1] }
 0x12c   : > { %v4497_v53 = vrot.slane %v4496_v9, 4  ;;  %v2119_v54 = vrot.slane %v2117_v30, 4  ;;  %v8471_v9 = vld [vmem:[#allocation2 + $0x38] sm:$0x1]  ;;  %v8491_v5 = vsel %vm7833_vm14, %v5980_v36, %v2110_v20  ;;  %v8495_v59 = vsel %vm7833_vm14, %v2112_v62, %v2113_v16  ;;  %v8508_v36 = vld [vmem:[#allocation2 + $0x4c] sm:$0xf] }
 0x12d   : > { %9455 = vst [vmem:[#allocation10_spill] sm:$0xff] %v8471_v9  ;;  %v4512_v42 = vsel %vm7523_vm8, %v4507_v48, %v4511_v12  ;;  %v4533_v20 = vshll.u32 %v8471_v9, 16  ;;  %9458 = vst [vmem:[#allocation12_spill] sm:$0xff] %v8512_v34  ;;  %v4547_v62 = vshll.u32 %v8482_v29, 16  ;;  %v4551_v12 = vshrl.u32 %v8482_v29, 16 }
 0x12e   : > { %6719 = vmatmul.mubr.msk.bf16.gmra.mrb[12].mxu0 %vm1476_vm6, %v7148_v56  ;;  %v4529_v56 = vrot.slane %v4527_v23, 4  ;;  %v4502_v14 = vsel %vm7523_vm8, %v4497_v53, %v8420_v41  ;;  %v8505_v41 = vsel %vm7833_vm14, %v2119_v54, %v2120_v4  ;;  %v8510_v23 = vrot.slane %v4520_v58, 4  ;;  %v7153_v54 = vld [vmem:[#allocation2 + $0x90] sm:$0xff]   ;;  %v7159_v4 = vld [vmem:[%s9421_s3 + $0x38] sm:$0xff]  }
 0x12f   : > { %6722 = vmatprep.mubr.msk.bf16.mxu0 %vm1476_vm6, %v7150_v57  ;;  %v7152_v57 = vld [vmem:[#allocation2 + $0x84] sm:$0xff]   ;;  %v4540_v53 = vrot.slane %v4538_v2, 4  ;;  %v4543_v16 = vrot.slane %v4541_v7, 5  ;;  %v4565_v48 = vshll.u32 %v4429_v47, 16  ;;  %v8520_v58 = vcombine.low %v4502_v14, %v4512_v42  ;;  %v7218_v24 = vld [vmem:[#allocation2 + $0x94] sm:$0xf] }
 0x130   : > { %v4575_v33 = vshrl.u32 %v8508_v36, 16  ;;  %v4535_v7 = vrot.slane %v4533_v20, 5  ;;  %v2124_v43 = vrot.slane %v7218_v24, 5  ;;  %v4432_v29 = vld [vmem:[#allocation2 + $0x54] sm:$0xf]  ;;  %v9459_v14 = vcombine.low %v8328_v10, %v8336_v37 }
 0x131   : > { %6555 = vmatmul.mubr.msk.bf16.gmra.mrb[28].mxu1 %vm1476_vm6, %v9454_v50  ;;  %v8484_v50 = vcombine.low %v4478_v39, %v4488_v61  ;;  %v8501_v39 = vsel %vm7833_vm14, %v5981_v60, %v2117_v30  ;;  %v4530_v30 = vor.u32 %v4529_v56, %v8480_v19  ;;  %v1999_v60 = vld [vmem:[#allocation2 + $0x90] sm:$0xe]  ;;  %v4562_v61 = vshrl.u32 %v4429_v47, 16  ;;  %v7219_v9 = vld [vmem:[#allocation2 + $0x98] sm:$0x1] }
 0x132   : > { %6562 = vmatprep.mubr.msk.bf16.mxu1 %vm1476_vm6, %v9456_v3  ;;  %v4571_v3 = vshll.u32 %v8508_v36, 16  ;;  %v4557_v47 = vshll.u32 %v8512_v34, 16  ;;  %v4526_v42 = vsel %vm7523_vm8, %v8510_v23, %v8480_v19  ;;  %v8538_v2 = vrot.slane %v4547_v62, 5  ;;  %v8540_v34 = vld [vmem:[#allocation2 + $0x58] sm:$0xf] }
 0x133   : > { %v4553_v20 = vrot.slane %v4551_v12, 4  ;;  %v5982_v56 = vrot.slane %v1999_v60, 9  ;;  %v9460_v10 = vcombine.low %v8340_v25, %v8344_v6  ;;  %v4531_v37 = vrot.slane %v4530_v30, 4  ;;  %v8548_v19 = vld [vmem:[#allocation2 + $0x50] sm:$0x1] }
 0x134   : > { %v4544_v24 = vor.u32 %v4543_v16, %v4540_v53  ;;  %v8550_v23 = vrot.slane %v4571_v3, 5  ;;  %v4577_v62 = vrot.slane %v4575_v33, 4  ;;  %v4586_v12 = vshrl.u32 %v4432_v29, 16  ;;  %v7154_v53 = vld [vmem:[#allocation2 + $0x9c] sm:$0xff]  }
 0x135   : > { %v4589_v60 = vshll.u32 %v4432_v29, 16  ;;  %v2127_v55 = vrot.slane %v7219_v9, 5  ;;  %v4595_v25 = vshll.u32 %v8540_v34, 16  ;;  %v4599_v6 = vshrl.u32 %v8540_v34, 16  ;;  %v7220_v33 = vld [vmem:[#allocation2 + $0xa0] sm:$0xf] }
 0x136   : > { %6723 = vmatmul.mubr.msk.bf16.gmra.mrb[16].mxu0 %vm1476_vm6, %v7152_v57  ;;  %v4564_v57 = vrot.slane %v4562_v61, 4  ;;  %v4554_v30 = vor.u32 %v4553_v20, %v8538_v2  ;;  %v8555_v16 = vrot.slane %v4557_v47, 5  ;;  %v8559_v61 = vsel %vm7833_vm14, %v5982_v56, %v2124_v43  ;;  %v7155_v29 = vld [vmem:[#allocation2 + $0xa8] sm:$0xff]   ;;  %v8566_v20 = vld [vmem:[#allocation2 + $0x5c] sm:$0x1] }
 0x137   : > { %6726 = vmatprep.mubr.msk.bf16.mxu0 %vm1476_vm6, %v7153_v54  ;;  %v2131_v54 = vrot.slane %v7220_v33, 5  ;;  %v4536_v9 = vsel %vm7523_vm8, %v4531_v37, %v4535_v7  ;;  %v8563_v3 = vrot.slane %v4544_v24, 4  ;;  %v4581_v49 = vshll.u32 %v8548_v19, 16  ;;  %v2001_v56 = vld [vmem:[#allocation2 + $0xa8] sm:$0xe] }
 0x138   : > { %v4578_v47 = vor.u32 %v4577_v62, %v8550_v23  ;;  %v4588_v45 = vrot.slane %v4586_v12, 4  ;;  %v8580_v24 = vrot.slane %v4595_v25, 5  ;;  %v8587_v52 = vcombine.low %v4526_v42, %v4536_v9 }
 0x139   : > { %6563 = vmatmul.mubr.msk.bf16.vlgmr.msra.gmra.mrb[0].mxu1 %vm1476_vm6, %v9459_v14  ;;  %v4567_v14 = vrot.slane %v4565_v48, 5  ;;  %v2000_v48 = vld [vmem:[#allocation2 + $0x9c] sm:$0xe]  ;;  %v4555_v62 = vrot.slane %v4554_v30, 4  ;;  %v2133_v12 = vrot.slane %v2131_v54, 4  ;;  %v4583_v25 = vrot.slane %v4581_v49, 5 }
 0x13a   : > { %6595 = vmatpush3.bf16.msra.mxu1 %v8239_v51  ;;  %6566 = vmatprep.mubr.msk.bf16.mxu1 %vm1476_vm6, %v9460_v10  ;;  %v2126_v51 = vrot.slane %v2124_v43, 4  ;;  %v4591_v43 = vrot.slane %v4589_v60, 5  ;;  %v5983_v37 = vrot.slane %v2000_v48, 9  ;;  %v7222_v60 = vld [vmem:[#allocation2 + $0xa4] sm:$0x1]  ;;  %v2140_v48 = vrot.slane %v2138_v17, 4 }
 0x13b   : > { %6596 = vmatprep.subr.bf16.mxu1 %v7159_v4  ;;  %v4568_v10 = vor.u32 %v4567_v14, %v4564_v57  ;;  %v4601_v57 = vrot.slane %v4599_v6, 4  ;;  %v9462_v14 = vcombine.low %v8353_v27, %v8357_v26  ;;  %v2134_v33 = vrot.slane %v7222_v60, 5  ;;  %v4435_v6 = vld [vmem:[#allocation2 + $0x60] sm:$0xf]  ;;  %v2002_v49 = vld [vmem:[#allocation2 + $0xb4] sm:$0xe] }
 0x13c   : > { %v8578_v7 = vsel %vm7833_vm14, %v2126_v51, %v2127_v55  ;;  %v9463_v55 = vcombine.low %v8361_v38, %v8365_v11  ;;  %v4605_v27 = vshll.u32 %v8566_v20, 16  ;;  %v5984_v26 = vrot.slane %v2001_v56, 9  ;;  %v4438_v60 = vld [vmem:[#allocation2 + $0x6c] sm:$0xf]  ;;  %v8694_v11 = vld [vmem:[#allocation2 + $0x94] sm:$0xf] }
 0x13d   : > { %v4569_v51 = vrot.slane %v4568_v10, 4  ;;  %v4592_v42 = vor.u32 %v4591_v43, %v4588_v45  ;;  %v2141_v30 = vrot.slane %v8144_v13, 5  ;;  %v4550_v38 = vsel %vm7523_vm8, %v8563_v3, %v8538_v2  ;;  %v7156_v10 = vld [vmem:[#allocation2 + $0xb4] sm:$0xff]   ;;  %v7157_v43 = vld [vmem:[#allocation2 + $0xc0] sm:$0xff]   ;;  %9472 = vst [vmem:[#allocation20_spill] sm:$0xff] %v8694_v11 }
 0x13e   : > { %6597 = vmatpush3.bf16.msra.mxu1 %v7159_v4  ;;  %v8573_v4 = vld [vmem:[%s9421_s3 + $0x40] sm:$0xff]   ;;  %6727 = vmatmul.mubr.msk.bf16.gmra.mrb[20].mxu0 %vm1476_vm6, %v7154_v53  ;;  %v4579_v53 = vrot.slane %v4578_v47, 4  ;;  %v2145_v9 = vrot.slane %v8159_v46, 5  ;;  %v4560_v45 = vsel %vm7523_vm8, %v4555_v62, %v8555_v16  ;;  %v8609_v13 = vsel %vm7833_vm14, %v5983_v37, %v2131_v54  ;;  %v8626_v54 = vld [vmem:[#allocation2 + $0x68] sm:$0x1] }
 0x13f   : > { %9461 = vst [vmem:[#allocation13_spill] sm:$0xff] %v8573_v4  ;;  %6810 = vmatprep.subr.bf16.mxu1 %v8573_v4  ;;  %6730 = vmatprep.mubr.msk.bf16.mxu0 %vm1476_vm6, %v7155_v29  ;;  %v4602_v29 = vor.u32 %v4601_v57, %v8580_v24  ;;  %v8611_v47 = vld [vmem:[#allocation2 + $0x64] sm:$0xf]  ;;  %v4610_v2 = vshrl.u32 %v4435_v6, 16  ;;  %v4613_v3 = vshll.u32 %v4435_v6, 16  ;;  %v8615_v56 = vsel %vm7833_vm14, %v2133_v12, %v2134_v33 }
 0x140   : > { %v4574_v46 = vsel %vm7523_vm8, %v4569_v51, %v8550_v23  ;;  %v8620_v57 = vrot.slane %v4605_v27, 5  ;;  %v8624_v16 = vsel %vm7833_vm14, %v5984_v26, %v2138_v17  ;;  %9465 = vst [vmem:[#allocation15_spill] sm:$0xff] %v8626_v54  ;;  %v4584_v37 = vsel %vm7523_vm8, %v4579_v53, %v4583_v25  ;;  %v8651_v53 = vld [vmem:[#allocation2 + $0x70] sm:$0xf] }
 0x141   : > { %6567 = vmatmul.mubr.msk.bf16.gmra.mrb[4].mxu1 %vm1476_vm6, %v9462_v14  ;;  %9464 = vst [vmem:[#allocation14_spill] sm:$0xff] %v8624_v16  ;;  %v8630_v14 = vrot.slane %v4592_v42, 4  ;;  %v8634_v62 = vsel %vm7833_vm14, %v2140_v48, %v2141_v30  ;;  %v5985_v12 = vrot.slane %v2002_v49, 9  ;;  %v8636_v23 = vrot.slane %v4602_v29, 4  ;;  %9468 = vst [vmem:[#allocation17_spill] sm:$0xff] %v8651_v53 }
 0x142   : > { %6570 = vmatprep.mubr.msk.bf16.mxu1 %vm1476_vm6, %v9463_v55  ;;  %9466 = vst [vmem:[#allocation16_spill] sm:$0xff] %v8634_v62  ;;  %v2147_v33 = vrot.slane %v2145_v9, 4  ;;  %v2148_v55 = vrot.slane %v8161_v8, 5  ;;  %v4619_v17 = vshll.u32 %v8611_v47, 16  ;;  %v9467_v51 = vcombine.low %v8378_v21, %v8382_v31  ;;  %v8674_v49 = vld [vmem:[#allocation2 + $0x7c] sm:$0xf] }
 0x143   : > { %v8645_v25 = vrot.slane %v4610_v2, 4  ;;  %v8647_v27 = vrot.slane %v4613_v3, 5  ;;  %v4623_v26 = vshrl.u32 %v8611_v47, 16  ;;  %v4629_v6 = vshll.u32 %v8626_v54, 16  ;;  %9470 = vst [vmem:[#allocation18_spill] sm:$0xff] %v8674_v49 }
 0x144   : > { %v9469_v8 = vcombine.low %v8395_v40, %v8404_v63  ;;  %v8658_v21 = vcombine.low %v4550_v38, %v4560_v45  ;;  %v4634_v42 = vshrl.u32 %v4438_v60, 16  ;;  %v4637_v48 = vshll.u32 %v4438_v60, 16  ;;  %v4441_v38 = vld [vmem:[#allocation2 + $0x78] sm:$0xf]  ;;  %v8696_v29 = vld [vmem:[#allocation2 + $0x74] sm:$0x1] }
 0x145   : > { %v8662_v30 = vcombine.low %v4574_v46, %v4584_v37  ;;  %v8672_v63 = vsel %vm7833_vm14, %v5985_v12, %v2145_v9  ;;  %v8682_v45 = vsel %vm7833_vm14, %v2147_v33, %v2148_v55  ;;  %v4643_v2 = vshll.u32 %v8651_v53, 16  ;;  %v8686_v46 = vld [vmem:[#allocation2 + $0x88] sm:$0xf]  ;;  %v7158_v9 = vld [vmem:[#allocation2 + $0xcc] sm:$0xff]   ;;  %9473 = vst [vmem:[#allocation21_spill] sm:$0xff] %v8696_v29 }
 0x146   : > { %6731 = vmatmul.mubr.msk.bf16.gmra.mrb[24].mxu0 %vm1476_vm6, %v7156_v10  ;;  %v4647_v3 = vshrl.u32 %v8651_v53, 16  ;;  %9471 = vst [vmem:[#allocation19_spill] sm:$0xff] %v8686_v46  ;;  %v4616_v37 = vor.u32 %v8647_v27, %v8645_v25  ;;  %v8690_v12 = vrot.slane %v4619_v17, 5  ;;  %v4625_v60 = vrot.slane %v4623_v26, 4  ;;  %v8726_v16 = vld [vmem:[#allocation2 + $0x8c] sm:$0x1] }
 0x147   : > { %6734 = vmatprep.mubr.msk.bf16.mxu0 %vm1476_vm6, %v7157_v43  ;;  %v4444_v43 = vld [vmem:[#allocation2 + $0x84] sm:$0xf]  ;;  %v4636_v40 = vrot.slane %v4634_v42, 4  ;;  %v4639_v33 = vrot.slane %v4637_v48, 5  ;;  %v4658_v55 = vshrl.u32 %v4441_v38, 16  ;;  %v4661_v31 = vshll.u32 %v4441_v38, 16 }
 0x148   : > { %v4667_v10 = vshll.u32 %v8674_v49, 16  ;;  %v4671_v4 = vshrl.u32 %v8674_v49, 16  ;;  %v4682_v53 = vshrl.u32 %v4444_v43, 16  ;;  %v4685_v25 = vshll.u32 %v4444_v43, 16 }
 0x149   : > { %6571 = vmatmul.mubr.msk.bf16.gmra.mrb[8].mxu1 %vm1476_vm6, %v9467_v51  ;;  %v8692_v51 = vrot.slane %v4629_v6, 5  ;;  %v8700_v17 = vrot.slane %v4643_v2, 5  ;;  %v4649_v27 = vrot.slane %v4647_v3, 4  ;;  %v4691_v26 = vshll.u32 %v8686_v46, 16 }
 0x14a   : > { %6574 = vmatprep.mubr.msk.bf16.mxu1 %vm1476_vm6, %v9469_v8  ;;  %v4447_v8 = vld [vmem:[#allocation2 + $0x90] sm:$0xf]  ;;  %v4695_v6 = vshrl.u32 %v8686_v46, 16  ;;  %v9474_v42 = vcombine.low %v8417_v0, %v8434_v18  ;;  %v4715_v49 = vshll.u32 %v8694_v11, 16  ;;  %v4719_v43 = vshrl.u32 %v8694_v11, 16 }
 0x14b   : > { %v4706_v48 = vshrl.u32 %v4447_v8, 16  ;;  %v4709_v38 = vshll.u32 %v4447_v8, 16  ;;  %v9475_v2 = vcombine.low %v8438_v15, %v8442_v28  ;;  %v4626_v0 = vor.u32 %v4625_v60, %v8690_v12  ;;  %v4450_v11 = vld [vmem:[#allocation2 + $0x9c] sm:$0xf]  ;;  %v8722_v28 = vld [vmem:[#allocation2 + $0x80] sm:$0x1] }
 0x14c   : > { %v4653_v18 = vshll.u32 %v8696_v29, 16  ;;  %v4660_v3 = vrot.slane %v4658_v55, 4  ;;  %v4673_v8 = vrot.slane %v4671_v4, 4  ;;  %v4684_v46 = vrot.slane %v4682_v53, 4  ;;  %v8734_v53 = vld [vmem:[#allocation2 + $0x98] sm:$0x1] }
 0x14d   : > { %v4687_v54 = vrot.slane %v4685_v25, 5  ;;  %v4640_v62 = vor.u32 %v4639_v33, %v4636_v40  ;;  %v4650_v15 = vor.u32 %v4649_v27, %v8700_v17  ;;  %v4708_v60 = vrot.slane %v4706_v48, 4  ;;  %v8741_v48 = vld [vmem:[#allocation2 + $0xa0] sm:$0xf] }
 0x14e   : > { %6735 = vmatmul.mubr.msk.bf16.gmra.mrb[28].mxu0 %vm1476_vm6, %v7158_v9  ;;  %v4663_v9 = vrot.slane %v4661_v31, 5  ;;  %v4711_v29 = vrot.slane %v4709_v38, 5  ;;  %v8728_v55 = vrot.slane %v4715_v49, 5  ;;  %v4721_v31 = vrot.slane %v4719_v43, 4 }
 0x14f   : > { %6742 = vmatprep.mubr.msk.bf16.mxu0 %vm1476_vm6, %v8484_v50  ;;  %v4697_v50 = vrot.slane %v4695_v6, 4  ;;  %v8732_v4 = vrot.slane %v4626_v0, 4  ;;  %v4730_v40 = vshrl.u32 %v4450_v11, 16  ;;  %v4733_v33 = vshll.u32 %v4450_v11, 16  ;;  %v7163_v6 = vld [vmem:[%s9421_s3 + $0x88] sm:$0xff]  }
 0x150   : > { %v4664_v25 = vor.u32 %v4663_v9, %v4660_v3  ;;  %v4688_v49 = vor.u32 %v4687_v54, %v4684_v46  ;;  %v4655_v38 = vrot.slane %v4653_v18, 5  ;;  %v4701_v0 = vshll.u32 %v8726_v16, 16 }
 0x151   : > { %6575 = vmatmul.mubr.msk.bf16.gmra.mrb[12].mxu1 %vm1476_vm6, %v9474_v42  ;;  %v8719_v42 = vrot.slane %v4667_v10, 5  ;;  %v8730_v10 = vrot.slane %v4616_v37, 4  ;;  %v4641_v37 = vrot.slane %v4640_v62, 4  ;;  %v9476_v11 = vcombine.low %v8446_v1, %v8453_v44 }
 0x152   : > { %6578 = vmatprep.mubr.msk.bf16.mxu1 %vm1476_vm6, %v9475_v2  ;;  %v8724_v2 = vrot.slane %v4691_v26, 5  ;;  %v4677_v26 = vshll.u32 %v8722_v28, 16  ;;  %v4651_v3 = vrot.slane %v4650_v15, 4  ;;  %v4712_v9 = vor.u32 %v4711_v29, %v4708_v60 }
 0x153   : > { %v4674_v27 = vor.u32 %v4673_v8, %v8719_v42  ;;  %v4722_v54 = vor.u32 %v4721_v31, %v8728_v55  ;;  %v4725_v46 = vshll.u32 %v8734_v53, 16  ;;  %v9477_v62 = vcombine.low %v8491_v5, %v8495_v59  ;;  %v8770_v31 = vld [vmem:[#allocation2 + $0xa4] sm:$0x1] }
 0x154   : > { %v4698_v43 = vor.u32 %v4697_v50, %v8724_v2  ;;  %v4732_v18 = vrot.slane %v4730_v40, 4  ;;  %v4735_v1 = vrot.slane %v4733_v33, 5  ;;  %v4739_v44 = vshll.u32 %v8741_v48, 16 }
 0x155   : > { %v4743_v8 = vshrl.u32 %v8741_v48, 16  ;;  %v4675_v29 = vrot.slane %v4674_v27, 4  ;;  %v4679_v15 = vrot.slane %v4677_v26, 5  ;;  %v4689_v50 = vrot.slane %v4688_v49, 4  ;;  %v8775_v26 = vld [vmem:[#allocation2 + $0xac] sm:$0xf] }
 0x156   : > { %6743 = vmatmul.mubr.msk.bf16.vlgmr.msra.gmra.mrb[0].mxu0 %vm1476_vm6, %v8520_v58  ;;  %v4665_v58 = vrot.slane %v4664_v25, 4  ;;  %v4632_v5 = vsel %vm7523_vm8, %v8732_v4, %v8692_v51  ;;  %v4699_v59 = vrot.slane %v4698_v43, 4  ;;  %v4703_v60 = vrot.slane %v4701_v0, 5 }
 0x157   : > { %6775 = vmatpush3.bf16.msra.mxu0 %v8349_v32  ;;  %6746 = vmatprep.mubr.msk.bf16.mxu0 %vm1476_vm6, %v8587_v52  ;;  %v4622_v32 = vsel %vm7523_vm8, %v8730_v10, %v8690_v12  ;;  %v4453_v52 = vld [vmem:[#allocation2 + $0xa8] sm:$0xf]  ;;  %v4646_v40 = vsel %vm7523_vm8, %v4641_v37, %v8700_v17  ;;  %v4713_v33 = vrot.slane %v4712_v9, 4  ;;  %v4723_v25 = vrot.slane %v4722_v54, 4 }
 0x158   : > { %6776 = vmatprep.subr.bf16.mxu0 %v7163_v6  ;;  %v4727_v27 = vrot.slane %v4725_v46, 5  ;;  %v4656_v12 = vsel %vm7523_vm8, %v4651_v3, %v4655_v38  ;;  %v4736_v10 = vor.u32 %v4735_v1, %v4732_v18  ;;  %v8779_v51 = vrot.slane %v4739_v44, 5  ;;  %v5159_v46 = vld [vmem:[#allocation2 + $0x48] sm:$0xe] }
 0x159   : > { %6579 = vmatmul.mubr.msk.bf16.gmra.mrb[16].mxu1 %vm1476_vm6, %v9476_v11  ;;  %v4745_v4 = vrot.slane %v4743_v8, 4  ;;  %v4670_v49 = vsel %vm7523_vm8, %v4665_v58, %v8719_v42  ;;  %v4680_v17 = vsel %vm7523_vm8, %v4675_v29, %v4679_v15  ;;  %v4694_v37 = vsel %vm7523_vm8, %v4689_v50, %v8724_v2  ;;  %v5160_v29 = vld [vmem:[#allocation2 + $0x54] sm:$0xe] }
 0x15a   : > { %6582 = vmatprep.mubr.msk.bf16.mxu1 %vm1476_vm6, %v9477_v62  ;;  %v4749_v43 = vshll.u32 %v8770_v31, 16  ;;  %v4754_v38 = vshrl.u32 %v4453_v52, 16  ;;  %v4757_v0 = vshll.u32 %v4453_v52, 16  ;;  %v4763_v11 = vshll.u32 %v8775_v26, 16 }
 0x15b   : > { %6777 = vmatpush3.bf16.msra.mxu0 %v7163_v6  ;;  %v4704_v6 = vsel %vm7523_vm8, %v4699_v59, %v4703_v60  ;;  %v9478_v3 = vcombine.low %v8501_v39, %v8505_v41  ;;  %v9479_v42 = vsel %vm7523_vm8, %v8636_v23, %v8620_v57  ;;  %v9480_v2 = vsel %vm7523_vm8, %v8630_v14, %v8580_v24  ;;  %v5161_v59 = vld [vmem:[#allocation2 + $0x60] sm:$0xe] }
 0x15c   : > { %v6201_v9 = vcombine.low %v9480_v2, %v9479_v42  ;;  %v4718_v39 = vsel %vm7523_vm8, %v4713_v33, %v8728_v55  ;;  %v4728_v41 = vsel %vm7523_vm8, %v4723_v25, %v4727_v27  ;;  %v9481_v54 = vcombine.low %v8559_v61, %v8578_v7  ;;  %v8826_v55 = vld [vmem:[#allocation2 + $0xb0] sm:$0x1]  ;;  %v9486_v42 = vld [vmem:[#allocation15_spill] sm:$0xff] }
 0x15d   : > { %v6005_v24 = vcombine.low %v8672_v63, %v8682_v45  ;;  %v6202_v57 = vcombine.low %v4622_v32, %v4632_v5  ;;  %v8823_v14 = vrot.slane %v4736_v10, 4  ;;  %v4746_v23 = vor.u32 %v4745_v4, %v8779_v51 }
 0x15e   : > { %6747 = vmatmul.mubr.msk.bf16.gmra.mrb[4].mxu0 %vm1476_vm6, %v8658_v21  ;;  %v4767_v21 = vshrl.u32 %v8775_v26, 16  ;;  %v8828_v62 = vcombine.low %v4646_v40, %v4656_v12  ;;  %v8830_v18 = vcombine.low %v4670_v49, %v4680_v17  ;;  %v8832_v61 = vcombine.low %v4694_v37, %v4704_v6  ;;  %v5162_v37 = vld [vmem:[#allocation2 + $0x6c] sm:$0xe] }
 0x15f   : > { %6750 = vmatprep.mubr.msk.bf16.mxu0 %vm1476_vm6, %v8662_v30  ;;  %v8834_v7 = vrot.slane %v4749_v43, 5  ;;  %v4456_v30 = vld [vmem:[#allocation2 + $0xb4] sm:$0xf]  ;;  %v8836_v1 = vcombine.low %v4718_v39, %v4728_v41  ;;  %v4756_v44 = vrot.slane %v4754_v38, 4  ;;  %v4759_v8 = vrot.slane %v4757_v0, 5  ;;  %v9483_v38 = vld [vmem:[#allocation14_spill] sm:$0xff] }
 0x160   : > { %v8838_v58 = vrot.slane %v4763_v11, 5  ;;  %v4769_v15 = vrot.slane %v4767_v21, 4  ;;  %v4773_v50 = vshll.u32 %v8826_v55, 16  ;;  %v6234_v32 = vrot.slane %v5159_v46, 9  ;;  %v9487_v41 = vld [vmem:[#allocation17_spill] sm:$0xff] }
 0x161   : > { %6583 = vmatmul.mubr.msk.bf16.gmra.mrb[20].mxu1 %vm1476_vm6, %v9478_v3  ;;  %v5249_v5 = vrot.slane %v8508_v36, 5  ;;  %v4742_v60 = vsel %vm7523_vm8, %v8823_v14, %v8779_v51  ;;  %v8846_v52 = vrot.slane %v4746_v23, 4  ;;  %v4778_v40 = vshrl.u32 %v4456_v30, 16  ;;  %v9495_v51 = vld [vmem:[#allocation20_spill] sm:$0xff] }
 0x162   : > { %6586 = vmatprep.mubr.msk.bf16.mxu1 %vm1476_vm6, %v9481_v54  ;;  %v5252_v33 = vrot.slane %v8548_v19, 5  ;;  %v6235_v12 = vrot.slane %v5160_v29, 9  ;;  %v5256_v10 = vrot.slane %v8540_v34, 5  ;;  %v4781_v36 = vshll.u32 %v4456_v30, 16  ;;  %v9488_v54 = vld [vmem:[#allocation21_spill] sm:$0xff] }
 0x163   : > { %v8851_v25 = vsel %vm7833_vm14, %v6234_v32, %v5249_v5  ;;  %v5251_v27 = vrot.slane %v5249_v5, 4  ;;  %v5259_v4 = vrot.slane %v8566_v20, 5  ;;  %v6236_v49 = vrot.slane %v5161_v59, 9  ;;  %v4459_v32 = vld [vmem:[#allocation2 + $0xc0] sm:$0xf] }
 0x164   : > { %v5263_v17 = vrot.slane %v8611_v47, 5  ;;  %v9482_v43 = vcombine.low %v8609_v13, %v8615_v56  ;;  %v4760_v19 = vor.u32 %v4759_v8, %v4756_v44  ;;  %v8867_v34 = vsel %vm7833_vm14, %v6235_v12, %v5256_v10  ;;  %v9484_v47 = vld [vmem:[#allocation16_spill] sm:$0xff]  ;;  %v8874_v13 = vld [vmem:[#allocation2 + $0xb8] sm:$0xf] }
 0x165   : > { %v8863_v6 = vsel %vm7833_vm14, %v5251_v27, %v5252_v33  ;;  %v5258_v20 = vrot.slane %v5256_v10, 4  ;;  %v9485_v0 = vcombine.low %v9483_v38, %v9484_v47  ;;  %v5266_v2 = vrot.slane %v9486_v42, 5  ;;  %v2853_v8 = vld [vmem:[#allocation2 + $0x78] sm:$0xf]  ;;  %v9489_v42 = vld [vmem:[#allocation7_spill] sm:$0xff] }
 0x166   : > { %6751 = vmatmul.mubr.msk.bf16.gmra.mrb[8].mxu0 %vm1476_vm6, %v6201_v9  ;;  %v6254_v56 = vcombine.low %v8851_v25, %v8863_v6  ;;  %v8880_v11 = vsel %vm7833_vm14, %v6236_v49, %v5263_v17  ;;  %v5265_v3 = vrot.slane %v5263_v17, 4  ;;  %v6237_v39 = vrot.slane %v5162_v37, 9  ;;  %v8916_v17 = vld [vmem:[#allocation2 + $0xc4] sm:$0xf] }
 0x167   : > { %6754 = vmatprep.mubr.msk.bf16.mxu0 %vm1476_vm6, %v6202_v57  ;;  %v8885_v9 = vsel %vm7833_vm14, %v5258_v20, %v5259_v4  ;;  %v5270_v21 = vrot.slane %v9487_v41, 5  ;;  %v5273_v57 = vrot.slane %v9488_v54, 5  ;;  %v4770_v23 = vor.u32 %v4769_v15, %v8838_v58  ;;  %v5163_v4 = vld [vmem:[#allocation2 + $0x78] sm:$0xe] }
 0x168   : > { %v8890_v46 = vrot.slane %v4773_v50, 5  ;;  %v6255_v30 = vcombine.low %v8867_v34, %v8885_v9  ;;  %v8896_v44 = vsel %vm7833_vm14, %v5265_v3, %v5266_v2  ;;  %v4787_v29 = vshll.u32 %v8874_v13, 16  ;;  %v7161_v50 = vld [vmem:[#allocation2 + $0xc] sm:$0xff]   ;;  %v7177_v9 = vld [vmem:[#allocation2 + $0xc0] sm:$0xff]  }
 0x169   : > { %6587 = vmatmul.mubr.msk.bf16.gmra.mrb[24].mxu1 %vm1476_vm6, %v9482_v43  ;;  %v6256_v5 = vcombine.low %v8880_v11, %v8896_v44  ;;  %v8903_v59 = vsel %vm7833_vm14, %v6237_v39, %v5270_v21  ;;  %v5272_v15 = vrot.slane %v5270_v21, 4  ;;  %v4752_v33 = vsel %vm7523_vm8, %v8846_v52, %v8834_v7  ;;  %v9490_v2 = vld [vmem:[#allocation8_spill] sm:$0xff]  ;;  %v7165_v7 = vld [vmem:[#allocation2 + $0x30] sm:$0xff]   ;;  %v7166_v52 = vld [vmem:[#allocation2 + $0x3c] sm:$0xff]  }
 0x16a   : > { %6590 = vmatprep.mubr.msk.bf16.mxu1 %vm1476_vm6, %v9485_v0  ;;  %v8909_v27 = vrot.slane %v4778_v40, 4  ;;  %v8911_v12 = vrot.slane %v4781_v36, 5  ;;  %v4791_v10 = vshrl.u32 %v8874_v13, 16  ;;  %v8914_v49 = vrot.slane %v4760_v19, 4  ;;  %v5164_v0 = vld [vmem:[#allocation2 + $0x84] sm:$0xe] }
 0x16b   : > { %v8920_v37 = vsel %vm7833_vm14, %v5272_v15, %v5273_v57  ;;  %v3091_v43 = vshrl.u32 %v2853_v8, 16  ;;  %v3094_v20 = vshll.u32 %v2853_v8, 16  ;;  %v8922_v38 = vrot.slane %v4770_v23, 4  ;;  %v9492_v23 = vld [vmem:[#allocation19_spill] sm:$0xff]  ;;  %v7162_v15 = vld [vmem:[#allocation2 + $0x18] sm:$0xff]  }
 0x16c   : > { %v4802_v47 = vshrl.u32 %v4459_v32, 16  ;;  %v4805_v40 = vshll.u32 %v4459_v32, 16  ;;  %v6257_v36 = vcombine.low %v8903_v59, %v8920_v37  ;;  %v3113_v39 = vsel %vm7523_vm8, %v9490_v2, %v9489_v42  ;;  %v8959_v42 = vld [vmem:[#allocation2 + $0xc8] sm:$0x1] }
 0x16d   : > { %v3093_v19 = vrot.slane %v3091_v43, 4  ;;  %v3096_v3 = vrot.slane %v3094_v20, 5  ;;  %v6238_v41 = vrot.slane %v5163_v4, 9  ;;  %v4811_v63 = vshll.u32 %v8916_v17, 16  ;;  %v8951_v20 = vld [vmem:[#allocation2 + $0xbc] sm:$0x1] }
 0x16e   : > { %6755 = vmatmul.mubr.msk.bf16.gmra.mrb[12].mxu0 %vm1476_vm6, %v8828_v62  ;;  %v4815_v45 = vshrl.u32 %v8916_v17, 16  ;;  %v5280_v62 = vrot.slane %v8722_v28, 5  ;;  %v6239_v57 = vrot.slane %v5164_v0, 9  ;;  %v5284_v8 = vrot.slane %v9492_v23, 5  ;;  %v2865_v44 = vld [vmem:[#allocation2 + $0xa8] sm:$0xf] }
 0x16f   : > { %6758 = vmatprep.mubr.msk.bf16.mxu0 %vm1476_vm6, %v8830_v18  ;;  %v3097_v54 = vor.u32 %v3096_v3, %v3093_v19  ;;  %v5287_v32 = vrot.slane %v8726_v16, 5  ;;  %v8945_v4 = vrot.slane %v4787_v29, 5  ;;  %v4784_v28 = vor.u32 %v8911_v12, %v8909_v27  ;;  %v4462_v19 = vld [vmem:[#allocation2 + $0xcc] sm:$0xf]  ;;  %v7164_v29 = vld [vmem:[#allocation2 + $0x24] sm:$0xff]   ;;  %v9493_v12 = vld [vmem:[#allocation6_spill] sm:$0xff] }
 0x170   : > { %v8957_v3 = vsel %vm7833_vm14, %v6239_v57, %v5284_v8  ;;  %v5286_v16 = vrot.slane %v5284_v8, 4  ;;  %v4807_v2 = vrot.slane %v4805_v40, 5  ;;  %v8967_v27 = vld [vmem:[#allocation2 + $0xd0] sm:$0xf]  ;;  %v4766_v23 = vsel %vm7523_vm8, %v8914_v49, %v8838_v58 }
 0x171   : > { %6591 = vmatmul.mubr.msk.bf16.gmra.mrb[28].mxu1 %vm1476_vm6, %v6005_v24  ;;  %v9491_v24 = vld [vmem:[#allocation18_spill] sm:$0xff]  ;;  %v3098_v0 = vrot.slane %v3097_v54, 4  ;;  %v4776_v8 = vsel %vm7523_vm8, %v8922_v38, %v8890_v46  ;;  %v6207_v58 = vcombine.low %v4742_v60, %v4752_v33  ;;  %v7223_v38 = vld [vmem:[%s9421_s3 + $0x48] sm:$0xff]   ;;  %v5291_v14 = vrot.slane %v9495_v51, 5  ;;  %v9017_v60 = vld [vmem:[#allocation2 + $0xd4] sm:$0x1] }
 0x172   : > { %6598 = vmatprep.mubr.msk.bf16.mxu1 %vm1476_vm6, %v7161_v50  ;;  %v5277_v21 = vrot.slane %v9491_v24, 5  ;;  %v4793_v50 = vrot.slane %v4791_v10, 4  ;;  %v4804_v10 = vrot.slane %v4802_v47, 4  ;;  %v8976_v47 = vsel %vm7833_vm14, %v5286_v16, %v5287_v32 }
 0x173   : > { %v3103_v54 = vsel %vm7523_vm8, %v3098_v0, %v9493_v12  ;;  %v4826_v32 = vshrl.u32 %v4462_v19, 16  ;;  %v5165_v0 = vld [vmem:[#allocation2 + $0x90] sm:$0xe]  ;;  %v5166_v12 = vld [vmem:[#allocation2 + $0x9c] sm:$0xe] }
 0x174   : > { %v8949_v18 = vsel %vm7833_vm14, %v6238_v41, %v5277_v21  ;;  %v5279_v43 = vrot.slane %v5277_v21, 4  ;;  %v8961_v41 = vrot.slane %v4811_v63, 5  ;;  %v4817_v21 = vrot.slane %v4815_v45, 4 }
 0x175   : > { %v4794_v40 = vor.u32 %v4793_v50, %v8945_v4  ;;  %v4797_v63 = vshll.u32 %v8951_v20, 16  ;;  %v9494_v50 = vld [vmem:[#allocation13_spill] sm:$0xff]  ;;  %v4808_v46 = vor.u32 %v4807_v2, %v4804_v10  ;;  %v6240_v45 = vrot.slane %v5165_v0, 9  ;;  %v7224_v0 = vld [vmem:[#allocation2 + $0x1c] sm:$0xf] }
 0x176   : > { %v8965_v24 = vsel %vm7833_vm14, %v5279_v43, %v5280_v62  ;;  %v8980_v62 = vcombine.low %v3103_v54, %v3113_v39  ;;  %6759 = vmatmul.mubr.msk.bf16.gmra.mrb[16].mxu0 %vm1476_vm6, %v8832_v61  ;;  %v4821_v39 = vshll.u32 %v8959_v42, 16  ;;  %v4835_v61 = vshll.u32 %v8967_v27, 16 }
 0x177   : > { %v6258_v57 = vcombine.low %v8949_v18, %v8965_v24  ;;  %v4839_v43 = vshrl.u32 %v8967_v27, 16  ;;  %6762 = vmatprep.mubr.msk.bf16.mxu0 %vm1476_vm6, %v8836_v1  ;;  %v4818_v49 = vor.u32 %v4817_v21, %v8961_v41  ;;  %v6208_v1 = vcombine.low %v4766_v23, %v4776_v8 }
 0x178   : > { %v4795_v16 = vrot.slane %v4794_v40, 4  ;;  %v4823_v54 = vrot.slane %v4821_v39, 5  ;;  %v9019_v10 = vrot.slane %v4835_v61, 5  ;;  %v5294_v21 = vrot.slane %v8734_v53, 5 }
 0x179   : > { %6599 = vmatmul.mubr.msk.bf16.vlgmr.msra.gmra.mrb[0].mxu1 %vm1476_vm6, %v7162_v15  ;;  %v4829_v15 = vshll.u32 %v4462_v19, 16  ;;  %v4785_v19 = vrot.slane %v4784_v28, 4  ;;  %v4841_v2 = vrot.slane %v4839_v43, 4  ;;  %v4809_v28 = vrot.slane %v4808_v46, 4  ;;  %v5155_v43 = vld [vmem:[#allocation2 + $0x18] sm:$0xe] }
 0x17a   : > { %6812 = vmatpush3.bf16.msra.mxu1 %v9494_v50  ;;  %6602 = vmatprep.mubr.msk.bf16.mxu1 %vm1476_vm6, %v7164_v29  ;;  %v4799_v29 = vrot.slane %v4797_v63, 5  ;;  %v4828_v50 = vrot.slane %v4826_v32, 4  ;;  %v4819_v40 = vrot.slane %v4818_v49, 4  ;;  %v5293_v63 = vrot.slane %v5291_v14, 4 }
 0x17b   : > { %6811 = vmatprep.subr.bf16.mxu1 %v7223_v38  ;;  %v4831_v33 = vrot.slane %v4829_v15, 5  ;;  %v6241_v23 = vrot.slane %v5166_v12, 9  ;;  %v9024_v8 = vsel %vm7833_vm14, %v6240_v45, %v5291_v14  ;;  %v5298_v39 = vrot.slane %v8741_v48, 5 }
 0x17c   : > { %v5301_v32 = vrot.slane %v8770_v31, 5  ;;  %v4790_v53 = vsel %vm7523_vm8, %v4785_v19, %v8945_v4  ;;  %v4800_v15 = vsel %vm7523_vm8, %v4795_v16, %v4799_v29  ;;  %v4845_v61 = vshll.u32 %v9017_v60, 16  ;;  %v7167_v29 = vld [vmem:[#allocation2 + $0x48] sm:$0xff]  }
 0x17d   : > { %v9038_v45 = vsel %vm7833_vm14, %v5293_v63, %v5294_v21  ;;  %v4832_v48 = vor.u32 %v4831_v33, %v4828_v50  ;;  %v4842_v31 = vor.u32 %v4841_v2, %v9019_v10  ;;  %v5300_v4 = vrot.slane %v5298_v39, 4  ;;  %v7168_v50 = vld [vmem:[#allocation2 + $0x54] sm:$0xff]   ;;  %v5167_v21 = vld [vmem:[#allocation2 + $0xa8] sm:$0xe] }
 0x17e   : > { %6813 = vmatpush3.bf16.msra.mxu1 %v7223_v38  ;;  %6763 = vmatmul.mubr.msk.bf16.gmra.mrb[20].mxu0 %vm1476_vm6, %v6207_v58  ;;  %v5221_v58 = vrot.slane %v7224_v0, 5  ;;  %v4814_v46 = vsel %vm7523_vm8, %v4809_v28, %v8961_v41  ;;  %v4824_v49 = vsel %vm7523_vm8, %v4819_v40, %v4823_v54  ;;  %v6260_v38 = vcombine.low %v9024_v8, %v9038_v45  ;;  %v5156_v28 = vld [vmem:[#allocation2 + $0x24] sm:$0xe]  ;;  %v7226_v63 = vld [vmem:[#allocation2 + $0x28] sm:$0xf] }
 0x17f   : > { %6766 = vmatprep.mubr.msk.bf16.mxu0 %vm1476_vm6, %v6208_v1  ;;  %v9052_v1 = vsel %vm7833_vm14, %v6241_v23, %v5298_v39  ;;  %v6209_v19 = vcombine.low %v4790_v53, %v4800_v15  ;;  %v9056_v16 = vsel %vm7833_vm14, %v5300_v4, %v5301_v32  ;;  %v4847_v12 = vrot.slane %v4845_v61, 5  ;;  %v5168_v53 = vld [vmem:[#allocation2 + $0xb4] sm:$0xe] }
 0x180   : > { %v6261_v54 = vcombine.low %v9052_v1, %v9056_v16  ;;  %v6210_v51 = vcombine.low %v4814_v46, %v4824_v49  ;;  %v4833_v14 = vrot.slane %v4832_v48, 4  ;;  %v4843_v33 = vrot.slane %v4842_v31, 4  ;;  %v5157_v46 = vld [vmem:[#allocation2 + $0x30] sm:$0xe] }
 0x181   : > { %6603 = vmatmul.mubr.msk.bf16.gmra.mrb[4].mxu1 %vm1476_vm6, %v7165_v7  ;;  %v6230_v7 = vrot.slane %v5155_v43, 9  ;;  %v5223_v2 = vrot.slane %v5221_v58, 4  ;;  %v5228_v23 = vrot.slane %v7226_v63, 5  ;;  %v6242_v39 = vrot.slane %v5167_v21, 9  ;;  %v9496_v43 = vld [vmem:[#allocation9_spill] sm:$0xff]  ;;  %v9497_v21 = vld [vmem:[#allocation10_spill] sm:$0xff] }
 0x182   : > { %6606 = vmatprep.mubr.msk.bf16.mxu1 %vm1476_vm6, %v7166_v52  ;;  %v7225_v52 = vld [vmem:[#allocation2 + $0x20] sm:$0x1]  ;;  %v5305_v32 = vrot.slane %v8775_v26, 5  ;;  %v4838_v15 = vsel %vm7523_vm8, %v4833_v14, %v9019_v10  ;;  %v4848_v61 = vsel %vm7523_vm8, %v4843_v33, %v4847_v12  ;;  %v5308_v31 = vrot.slane %v8826_v55, 5 }
 0x183   : > { %v5224_v41 = vrot.slane %v7225_v52, 5  ;;  %v5222_v40 = vsel %vm7833_vm14, %v6230_v7, %v5221_v58  ;;  %v5235_v0 = vrot.slane %v9496_v43, 5  ;;  %v6231_v4 = vrot.slane %v5156_v28, 9  ;;  %v7227_v52 = vld [vmem:[#allocation2 + $0x2c] sm:$0x1] }
 0x184   : > { %v9078_v26 = vsel %vm7833_vm14, %v6242_v39, %v5305_v32  ;;  %v5307_v58 = vrot.slane %v5305_v32, 4  ;;  %v6243_v49 = vrot.slane %v5168_v53, 9  ;;  %v5312_v10 = vrot.slane %v8874_v13, 5  ;;  %v5158_v53 = vld [vmem:[#allocation2 + $0x3c] sm:$0xe] }
 0x185   : > { %v5225_v48 = vsel %vm7833_vm14, %v5223_v2, %v5224_v41  ;;  %v6211_v12 = vcombine.low %v4838_v15, %v4848_v61  ;;  %v5231_v41 = vrot.slane %v7227_v52, 5  ;;  %v5237_v2 = vrot.slane %v5235_v0, 4  ;;  %v9498_v15 = vld [vmem:[#allocation11_spill] sm:$0xff]  ;;  %v2850_v43 = vld [vmem:[#allocation2 + $0x6c] sm:$0xf] }
 0x186   : > { %6767 = vmatmul.mubr.msk.bf16.gmra.mrb[24].mxu0 %vm1476_vm6, %v6209_v19  ;;  %v5315_v19 = vrot.slane %v8951_v20, 5  ;;  %v6250_v7 = vcombine.low %v5222_v40, %v5225_v48  ;;  %v9084_v55 = vsel %vm7833_vm14, %v5307_v58, %v5308_v31  ;;  %v9090_v33 = vsel %vm7833_vm14, %v6243_v49, %v5312_v10  ;;  %v5170_v58 = vld [vmem:[#allocation2 + $0xcc] sm:$0xe] }
 0x187   : > { %6770 = vmatprep.mubr.msk.bf16.mxu0 %vm1476_vm6, %v6210_v51  ;;  %v5230_v51 = vrot.slane %v5228_v23, 4  ;;  %v6262_v14 = vcombine.low %v9078_v26, %v9084_v55  ;;  %v5314_v13 = vrot.slane %v5312_v10, 4  ;;  %v6232_v20 = vrot.slane %v5157_v46, 9  ;;  %v7171_v46 = vld [vmem:[#allocation2 + $0x78] sm:$0xff]  }
 0x188   : > { %v5238_v28 = vrot.slane %v9497_v21, 5  ;;  %v5229_v39 = vsel %vm7833_vm14, %v6231_v4, %v5228_v23  ;;  %v5242_v61 = vrot.slane %v9498_v15, 5  ;;  %v6233_v10 = vrot.slane %v5158_v53, 9  ;;  %v7172_v23 = vld [vmem:[#allocation2 + $0x84] sm:$0xff]  }
 0x189   : > { %6607 = vmatmul.mubr.msk.bf16.gmra.mrb[8].mxu1 %vm1476_vm6, %v7167_v29  ;;  %v7169_v29 = vld [vmem:[#allocation2 + $0x60] sm:$0xff]   ;;  %v9095_v40 = vsel %vm7833_vm14, %v5314_v13, %v5315_v19  ;;  %v5232_v32 = vsel %vm7833_vm14, %v5230_v51, %v5231_v41  ;;  %v5236_v48 = vsel %vm7833_vm14, %v6232_v20, %v5235_v0  ;;  %v9499_v19 = vld [vmem:[#allocation12_spill] sm:$0xff]  ;;  %v6245_v52 = vrot.slane %v5170_v58, 9 }
 0x18a   : > { %6610 = vmatprep.mubr.msk.bf16.mxu1 %vm1476_vm6, %v7168_v50  ;;  %v7170_v50 = vld [vmem:[#allocation2 + $0x6c] sm:$0xff]   ;;  %v6263_v63 = vcombine.low %v9090_v33, %v9095_v40  ;;  %v5239_v31 = vsel %vm7833_vm14, %v5237_v2, %v5238_v28  ;;  %v6251_v49 = vcombine.low %v5229_v39, %v5232_v32  ;;  %v3070_v41 = vshll.u32 %v2850_v43, 16  ;;  %v7174_v58 = vld [vmem:[#allocation2 + $0x9c] sm:$0xff]  }
 0x18b   : > { %v6252_v4 = vcombine.low %v5236_v48, %v5239_v31  ;;  %v5326_v0 = vrot.slane %v8967_v27, 5  ;;  %v5329_v21 = vrot.slane %v9017_v60, 5  ;;  %v5243_v28 = vsel %vm7833_vm14, %v6233_v10, %v5242_v61  ;;  %v7173_v31 = vld [vmem:[#allocation2 + $0x90] sm:$0xff]  }
 0x18c   : > { %v3072_v32 = vrot.slane %v3070_v41, 5 }
 0x18d   : > { %v9118_v20 = vsel %vm7833_vm14, %v6245_v52, %v5326_v0  ;;  %v5328_v2 = vrot.slane %v5326_v0, 4  ;;  %v2859_v0 = vld [vmem:[#allocation2 + $0x90] sm:$0xf] }
 0x18e   : > { %6771 = vmatmul.mubr.msk.bf16.gmra.mrb[28].mxu0 %vm1476_vm6, %v6211_v12  ;;  %v5244_v12 = vrot.slane %v5242_v61, 4  ;;  %v7229_v61 = vld [vmem:[#allocation2 + $0x74] sm:$0x1] }
 0x18f   : > { %6778 = vmatprep.mubr.msk.bf16.mxu0 %vm1476_vm6, %v6250_v7  ;;  %v3067_v7 = vshrl.u32 %v2850_v43, 16  ;;  %v9129_v48 = vsel %vm7833_vm14, %v5328_v2, %v5329_v21  ;;  %v3086_v10 = vshll.u32 %v7229_v61, 16 }
 0x190   : > { %v6265_v60 = vcombine.low %v9118_v20, %v9129_v48 }
 0x191   : > { %6611 = vmatmul.mubr.msk.bf16.gmra.mrb[12].mxu1 %vm1476_vm6, %v7169_v29  ;;  %v5245_v29 = vrot.slane %v9499_v19, 5  ;;  %v3069_v39 = vrot.slane %v3067_v7, 4  ;;  %v2856_v19 = vld [vmem:[#allocation2 + $0x84] sm:$0xf] }
 0x192   : > { %6614 = vmatprep.mubr.msk.bf16.mxu1 %vm1476_vm6, %v7170_v50  ;;  %v7228_v50 = vld [vmem:[#allocation2 + $0x70] sm:$0xf] }
 0x193   : > { %v3076_v51 = vshll.u32 %v7228_v50, 16  ;;  %v3080_v13 = vshrl.u32 %v7228_v50, 16  ;;  %v5246_v27 = vsel %vm7833_vm14, %v5244_v12, %v5245_v29  ;;  %v3115_v29 = vshrl.u32 %v2856_v19, 16 }
 0x194   : > { %v6253_v43 = vcombine.low %v5243_v28, %v5246_v27  ;;  %v3088_v50 = vrot.slane %v3086_v10, 5 }
 0x195   : > { %v3078_v53 = vrot.slane %v3076_v51, 5  ;;  %v3082_v15 = vrot.slane %v3080_v13, 4  ;;  %v7175_v51 = vld [vmem:[#allocation2 + $0xa8] sm:$0xff]   ;;  %v7176_v13 = vld [vmem:[#allocation2 + $0xb4] sm:$0xff]   ;;  %v3117_v2 = vrot.slane %v3115_v29, 4 }
 0x196   : > { %6779 = vmatmul.mubr.msk.bf16.vlgmr.msra.gmra.mrb[0].mxu0 %vm1476_vm6, %v6251_v49 }
 0x197   : > { %6782 = vmatprep.mubr.msk.bf16.mxu0 %vm1476_vm6, %v6252_v4  ;;  %v3083_v49 = vor.u32 %v3082_v15, %v3078_v53  ;;  %v7230_v4 = vld [vmem:[#allocation2 + $0x88] sm:$0xf]  ;;  %v7231_v15 = vld [vmem:[#allocation2 + $0x94] sm:$0xf] }
 0x198   : > { %v3124_v12 = vshll.u32 %v7230_v4, 16  ;;  %v3128_v7 = vshrl.u32 %v7230_v4, 16 }
 0x199   : > { %6615 = vmatmul.mubr.msk.bf16.gmra.mrb[16].mxu1 %vm1476_vm6, %v7171_v46  ;;  %v3073_v46 = vor.u32 %v3072_v32, %v3069_v39  ;;  %v3084_v41 = vrot.slane %v3083_v49, 4  ;;  %v2862_v39 = vld [vmem:[#allocation2 + $0x9c] sm:$0xf]  ;;  %v3142_v32 = vshll.u32 %v2859_v0, 16 }
 0x19a   : > { %6618 = vmatprep.mubr.msk.bf16.mxu1 %vm1476_vm6, %v7172_v23  ;;  %v3118_v23 = vshll.u32 %v2856_v19, 16  ;;  %v9140_v28 = vrot.slane %v3124_v12, 5  ;;  %v3130_v27 = vrot.slane %v3128_v7, 4  ;;  %v3163_v49 = vshrl.u32 %v2862_v39, 16  ;;  %v7233_v19 = vld [vmem:[#allocation2 + $0xa0] sm:$0xf] }
 0x19b   : > { %v3074_v52 = vrot.slane %v3073_v46, 4  ;;  %v3089_v6 = vsel %vm7523_vm8, %v3084_v41, %v3088_v50  ;;  %v3166_v61 = vshll.u32 %v2862_v39, 16  ;;  %v3172_v29 = vshll.u32 %v7233_v19, 16  ;;  %v7234_v41 = vld [vmem:[#allocation2 + $0x98] sm:$0x1] }
 0x19c   : > { %v3120_v21 = vrot.slane %v3118_v23, 5  ;;  %v3131_v10 = vor.u32 %v3130_v27, %v9140_v28  ;;  %v3176_v23 = vshrl.u32 %v7233_v19, 16  ;;  %v3144_v4 = vrot.slane %v3142_v32, 5 }
 0x19d   : > { %v3079_v25 = vsel %vm7523_vm8, %v3074_v52, %v3078_v53  ;;  %v3158_v50 = vshll.u32 %v7234_v41, 16  ;;  %v3168_v11 = vrot.slane %v3166_v61, 5  ;;  %v3187_v39 = vshrl.u32 %v2865_v44, 16 }
 0x19e   : > { %6783 = vmatmul.mubr.msk.bf16.gmra.mrb[4].mxu0 %vm1476_vm6, %v6253_v43  ;;  %v3152_v43 = vshrl.u32 %v7231_v15, 16  ;;  %v3121_v53 = vor.u32 %v3120_v21, %v3117_v2  ;;  %v6074_v34 = vcombine.low %v3079_v25, %v3089_v6  ;;  %v3178_v2 = vrot.slane %v3176_v23, 4  ;;  %v2868_v6 = vld [vmem:[#allocation2 + $0xb4] sm:$0xf] }
 0x19f   : > { %6786 = vmatprep.mubr.msk.bf16.mxu0 %vm1476_vm6, %v6254_v56  ;;  %v3139_v56 = vshrl.u32 %v2859_v0, 16  ;;  %v9159_v0 = vrot.slane %v3172_v29, 5  ;;  %v3190_v25 = vshll.u32 %v2865_v44, 16  ;;  %v3214_v61 = vshll.u32 %v2868_v6, 16 }
 0x1a0   : > { %v3154_v7 = vrot.slane %v3152_v43, 4  ;;  %v3189_v24 = vrot.slane %v3187_v39, 4  ;;  %v7239_v39 = vld [vmem:[#allocation2 + $0xbc] sm:$0x1] }
 0x1a1   : > { %6619 = vmatmul.mubr.msk.bf16.gmra.mrb[20].mxu1 %vm1476_vm6, %v7173_v31  ;;  %v3148_v31 = vshll.u32 %v7231_v15, 16  ;;  %v7235_v15 = vld [vmem:[#allocation2 + $0xac] sm:$0xf]  ;;  %v3179_v37 = vor.u32 %v3178_v2, %v9159_v0  ;;  %v3216_v41 = vrot.slane %v3214_v61, 5 }
 0x1a2   : > { %6622 = vmatprep.mubr.msk.bf16.mxu1 %vm1476_vm6, %v7174_v58  ;;  %v7232_v58 = vld [vmem:[#allocation2 + $0x8c] sm:$0x1]  ;;  %v3200_v43 = vshrl.u32 %v7235_v15, 16 }
 0x1a3   : > { %v3134_v46 = vshll.u32 %v7232_v58, 16  ;;  %v9157_v12 = vrot.slane %v3148_v31, 5  ;;  %v3196_v31 = vshll.u32 %v7235_v15, 16 }
 0x1a5   : > { %v3136_v52 = vrot.slane %v3134_v46, 5  ;;  %v3155_v27 = vor.u32 %v3154_v7, %v9157_v12  ;;  %v2871_v7 = vld [vmem:[#allocation2 + $0xc0] sm:$0xf] }
 0x1a6   : > { %6787 = vmatmul.mubr.msk.bf16.gmra.mrb[8].mxu0 %vm1476_vm6, %v6255_v30  ;;  %v3141_v30 = vrot.slane %v3139_v56, 4  ;;  %v3160_v56 = vrot.slane %v3158_v50, 5 }
 0x1a7   : > { %6790 = vmatprep.mubr.msk.bf16.mxu0 %vm1476_vm6, %v6256_v5  ;;  %v3122_v5 = vrot.slane %v3121_v53, 4  ;;  %v7237_v53 = vld [vmem:[#allocation2 + $0xb8] sm:$0xf]  ;;  %v3156_v18 = vrot.slane %v3155_v27, 4 }
 0x1a8   : > { %v3145_v21 = vor.u32 %v3144_v4, %v3141_v30  ;;  %v3224_v19 = vshrl.u32 %v7237_v53, 16  ;;  %v3180_v30 = vrot.slane %v3179_v37, 4 }
 0x1a9   : > { %6623 = vmatmul.mubr.msk.bf16.gmra.mrb[24].mxu1 %vm1476_vm6, %v7175_v51  ;;  %v3165_v51 = vrot.slane %v3163_v49, 4  ;;  %v3127_v58 = vsel %vm7523_vm8, %v3122_v5, %v9140_v28  ;;  %v3211_v49 = vshrl.u32 %v2868_v6, 16  ;;  %v3202_v28 = vrot.slane %v3200_v43, 4 }
 0x1aa   : > { %6626 = vmatprep.mubr.msk.bf16.mxu1 %vm1476_vm6, %v7176_v13  ;;  %v3132_v13 = vrot.slane %v3131_v10, 4  ;;  %v3220_v10 = vshll.u32 %v7237_v53, 16  ;;  %v3146_v29 = vrot.slane %v3145_v21, 4  ;;  %v3161_v44 = vsel %vm7523_vm8, %v3156_v18, %v3160_v56 }
 0x1ab   : > { %v3169_v32 = vor.u32 %v3168_v11, %v3165_v51  ;;  %v3226_v51 = vrot.slane %v3224_v19, 4  ;;  %v9500_v21 = vcombine.low %v8957_v3, %v8976_v47  ;;  %v3235_v6 = vshrl.u32 %v2871_v7, 16 }
 0x1ac   : > { %v3137_v59 = vsel %vm7523_vm8, %v3132_v13, %v3136_v52  ;;  %v3213_v52 = vrot.slane %v3211_v49, 4  ;;  %v3222_v50 = vrot.slane %v3220_v10, 5  ;;  %v3151_v11 = vsel %vm7523_vm8, %v3146_v29, %v9157_v12  ;;  %v7238_v13 = vld [vmem:[#allocation2 + $0xb0] sm:$0x1] }
 0x1ad   : > { %v3170_v23 = vrot.slane %v3169_v32, 4  ;;  %v3206_v2 = vshll.u32 %v7238_v13, 16  ;;  %v3238_v47 = vshll.u32 %v2871_v7, 16  ;;  %v5319_v43 = vrot.slane %v8916_v17, 5 }
 0x1ae   : > { %6791 = vmatmul.mubr.msk.bf16.gmra.mrb[12].mxu0 %vm1476_vm6, %v6257_v36  ;;  %v7236_v36 = vld [vmem:[#allocation2 + $0xa4] sm:$0x1]  ;;  %v3227_v15 = vor.u32 %v3226_v51, %v3222_v50  ;;  %v3237_v45 = vrot.slane %v3235_v6, 4  ;;  %v5322_v18 = vrot.slane %v8959_v42, 5 }
 0x1af   : > { %6794 = vmatprep.mubr.msk.bf16.mxu0 %vm1476_vm6, %v6258_v57  ;;  %v3182_v46 = vshll.u32 %v7236_v36, 16  ;;  %v3192_v57 = vrot.slane %v3190_v25, 5  ;;  %v3175_v27 = vsel %vm7523_vm8, %v3170_v23, %v9159_v0  ;;  %v3230_v25 = vshll.u32 %v7239_v39, 16 }
 0x1b0   : > { %v3217_v0 = vor.u32 %v3216_v41, %v3213_v52  ;;  %v3208_v37 = vrot.slane %v3206_v2, 5  ;;  %v3228_v19 = vrot.slane %v3227_v15, 4  ;;  %v5321_v29 = vrot.slane %v5319_v43, 4 }
 0x1b1   : > { %6627 = vmatmul.mubr.msk.bf16.gmra.mrb[28].mxu1 %vm1476_vm6, %v7177_v9  ;;  %v6076_v9 = vcombine.low %v3127_v58, %v3137_v59  ;;  %v3184_v4 = vrot.slane %v3182_v46, 5  ;;  %v3193_v5 = vor.u32 %v3192_v57, %v3189_v24  ;;  %v6077_v58 = vcombine.low %v3151_v11, %v3161_v44  ;;  %v7241_v24 = vld [vmem:[#allocation2 + $0xc8] sm:$0x1] }
 0x1b2   : > { %6650 = vmatprep.mubr.msk.bf16.mxu1 %vm1476_vm6, %v6074_v34  ;;  %v9178_v34 = vrot.slane %v3196_v31, 5  ;;  %v5169_v31 = vld [vmem:[#allocation2 + $0xc0] sm:$0xe]  ;;  %v3232_v8 = vrot.slane %v3230_v25, 5  ;;  %v3218_v10 = vrot.slane %v3217_v0, 4  ;;  %v3254_v57 = vshll.u32 %v7241_v24, 16 }
 0x1b3   : > { %v3185_v3 = vsel %vm7523_vm8, %v3180_v30, %v3184_v4  ;;  %v3194_v59 = vrot.slane %v3193_v5, 4  ;;  %v6244_v53 = vrot.slane %v5169_v31, 9 }
 0x1b4   : > { %v3203_v12 = vor.u32 %v3202_v28, %v9178_v34  ;;  %v6078_v36 = vcombine.low %v3175_v27, %v3185_v3  ;;  %v3223_v16 = vsel %vm7523_vm8, %v3218_v10, %v3222_v50  ;;  %v5323_v28 = vsel %vm7833_vm14, %v5321_v29, %v5322_v18 }
 0x1b5   : > { %v3199_v17 = vsel %vm7523_vm8, %v3194_v59, %v9178_v34  ;;  %v5320_v34 = vsel %vm7833_vm14, %v6244_v53, %v5319_v43  ;;  %v3256_v30 = vrot.slane %v3254_v57, 5 }
 0x1b6   : > { %6795 = vmatmul.mubr.msk.bf16.gmra.mrb[16].mxu0 %vm1476_vm6, %v9500_v21  ;;  %v3204_v46 = vrot.slane %v3203_v12, 4  ;;  %v9255_v12 = vld [vmem:[%s9422_s4] ss:$0 sm:$0xff] }
 0x1b7   : > { %6798 = vmatprep.mubr.msk.bf16.mxu0 %vm1476_vm6, %v6260_v38  ;;  %v3240_v38 = vrot.slane %v3238_v47, 5 }
 0x1b8   : > { %v3209_v23 = vsel %vm7523_vm8, %v3204_v46, %v3208_v37 }
 0x1b9   : > { %6651 = vmatmul.mubr.msk.bf16.vlgmr.msra.gmra.mrb[16].mxu1 %vm1476_vm6, %v8980_v62  ;;  %v7240_v62 = vld [vmem:[#allocation2 + $0xc4] sm:$0xf]  ;;  %v3241_v42 = vor.u32 %v3240_v38, %v3237_v45 }
 0x1ba   : > { %6654 = vmatprep.mubr.msk.bf16.mxu1 %vm1476_vm6, %v6076_v9  ;;  %v3244_v56 = vshll.u32 %v7240_v62, 16  ;;  %v3248_v32 = vshrl.u32 %v7240_v62, 16  ;;  %v6079_v9 = vcombine.low %v3199_v17, %v3209_v23 }
 0x1bb   : > { %v3242_v26 = vrot.slane %v3241_v42, 4 }
 0x1bc   : > { %v3246_v49 = vrot.slane %v3244_v56, 5  ;;  %v3250_v61 = vrot.slane %v3248_v32, 4 }
 0x1be   : > { %6799 = vmatmul.mubr.msk.bf16.gmra.mrb[20].mxu0 %vm1476_vm6, %v6261_v54  ;;  %v3251_v1 = vor.u32 %v3250_v61, %v3246_v49  ;;  %v3233_v54 = vsel %vm7523_vm8, %v3228_v19, %v3232_v8  ;;  %v3247_v7 = vsel %vm7523_vm8, %v3242_v26, %v3246_v49 }
 0x1bf   : > { %6802 = vmatprep.mubr.msk.bf16.mxu0 %vm1476_vm6, %v6262_v14  ;;  %v6080_v4 = vcombine.low %v3223_v16, %v3233_v54  ;;  %v6264_v14 = vcombine.low %v5320_v34, %v5323_v28 }
 0x1c0   : > { %v3252_v55 = vrot.slane %v3251_v1, 4 }
 0x1c1   : > { %6655 = vmatmul.mubr.msk.bf16.gmra.mrb[20].mxu1 %vm1476_vm6, %v6077_v58 }
 0x1c2   : > { %6658 = vmatprep.mubr.msk.bf16.mxu1 %vm1476_vm6, %v6078_v36  ;;  %v3257_v22 = vsel %vm7523_vm8, %v3252_v55, %v3256_v30 }
 0x1c3   : > { %v6081_v52 = vcombine.low %v3247_v7, %v3257_v22 }
 0x1c6   : > { %6803 = vmatmul.mubr.msk.bf16.gmra.mrb[24].mxu0 %vm1476_vm6, %v6263_v63 }
 0x1c7   : > { %6806 = vmatprep.mubr.msk.bf16.mxu0 %vm1476_vm6, %v6264_v14 }
 0x1c9   : > { %6659 = vmatmul.mubr.msk.bf16.gmra.mrb[24].mxu1 %vm1476_vm6, %v6079_v9 }
 0x1ca   : > { %6662 = vmatprep.mubr.msk.bf16.mxu1 %vm1476_vm6, %v6080_v4 }
 0x1ce   : > { %6807 = vmatmul.mubr.msk.bf16.gmra.mrb[28].mxu0 %vm1476_vm6, %v6265_v60 }
 0x1d1   : > { %6663 = vmatmul.mubr.msk.bf16.gmra.mrb[28].mxu1 %vm1476_vm6, %v6081_v52 }
 0x24c   : > { %v6600_v33 = vpop.f32.mrb[0].mxu1 }
 0x24d   : > { %v2667_v40 = vpop.f32.mrb[1].mxu1 }
 0x24e   : > { %v6601_v63 = vpop.f32.mrb[2].mxu1 }
 0x24f   : > { %v2670_v41 = vpop.f32.mrb[3].mxu1 }
 0x254   : > { %v6604_v50 = vpop.f32.mrb[4].mxu1 }
 0x255   : > { %v2683_v51 = vpop.f32.mrb[5].mxu1 }
 0x256   : > { %v6605_v35 = vpop.f32.mrb[6].mxu1 }
 0x257   : > { %v2686_v11 = vpop.f32.mrb[7].mxu1 }
 0x25c   : > { %v6608_v44 = vpop.f32.mrb[8].mxu1 }
 0x25d   : > { %v2699_v5 = vpop.f32.mrb[9].mxu1 }
 0x25e   : > { %v6609_v13 = vpop.f32.mrb[10].mxu1 }
 0x25f   : > { %v2702_v2 = vpop.f32.mrb[11].mxu1 }
 0x264   : > { %v9243_v21 = vpop.f32.mrb[12].mxu1 }
 0x265   : > { %v9245_v27 = vpop.f32.mrb[13].mxu1 }
 0x266   : > { %v9247_v20 = vpop.f32.mrb[14].mxu1 }
 0x267   : > { %v9249_v48 = vpop.f32.mrb[15].mxu1 }
 0x269   : > { %v6780_v60 = vpop.f32.mrb[0].mxu0 }
 0x26a   : > { %v6814_v39 = vadd.f32 %v6780_v60, %v6600_v33  ;;  %v5478_v25 = vpop.f32.mrb[1].mxu0 }
 0x26b   : > { %v6815_v6 = vadd.f32 %v5478_v25, %v2667_v40  ;;  %v6781_v3 = vpop.f32.mrb[2].mxu0 }
 0x26c   : > { %v5646_v47 = vadd.f32 %v6814_v39, %v9255_v12  ;;  %v6816_v62 = vadd.f32 %v6781_v3, %v6601_v63  ;;  %v5481_v56 = vpop.f32.mrb[3].mxu0 }
 0x26d   : > { %v5644_v32 = vadd.f32 %v6815_v6, %v9255_v12  ;;  %v6817_v0 = vadd.f32 %v5481_v56, %v2670_v41 }
 0x26e   : > { %v5678_v15 = vmax.f32 %v5646_v47, 0.0  ;;  %v5647_v31 = vadd.f32 %v6816_v62, %v9255_v12 }
 0x26f   : > { %v5676_v43 = vmax.f32 %v5644_v32, 0.0  ;;  %v5645_v58 = vadd.f32 %v6817_v0, %v9255_v12 }
 0x270   : > { %5710 = vst.msk [vmem:[%s9263_s13 + $0x10] sm:$0xff] %vm1476_vm6, %v5678_v15  ;;  %v5679_v59 = vmax.f32 %v5647_v31, 0.0 }
 0x271   : > { %5708 = vst.msk [vmem:[%s9263_s13] sm:$0xff] %vm1476_vm6, %v5676_v43  ;;  %v5677_v37 = vmax.f32 %v5645_v58, 0.0  ;;  %v6784_v36 = vpop.f32.mrb[4].mxu0 }
 0x272   : > { %5711 = vst.msk [vmem:[%s9263_s13 + $0x18] sm:$0xff] %vm1476_vm6, %v5679_v59  ;;  %v6818_v46 = vadd.f32 %v6784_v36, %v6604_v50  ;;  %v5494_v8 = vpop.f32.mrb[5].mxu0 }
 0x273   : > { %5709 = vst.msk [vmem:[%s9263_s13 + $0x8] sm:$0xff] %vm1476_vm6, %v5677_v37  ;;  %v6819_v45 = vadd.f32 %v5494_v8, %v2683_v51  ;;  %v6785_v38 = vpop.f32.mrb[6].mxu0 }
 0x274   : > { %v5650_v49 = vadd.f32 %v6818_v46, %v9255_v12  ;;  %v6820_v61 = vadd.f32 %v6785_v38, %v6605_v35  ;;  %v5497_v53 = vpop.f32.mrb[7].mxu0 }
 0x275   : > { %v5648_v10 = vadd.f32 %v6819_v45, %v9255_v12  ;;  %v6821_v19 = vadd.f32 %v5497_v53, %v2686_v11 }
 0x276   : > { %v5682_v29 = vmax.f32 %v5650_v49, 0.0  ;;  %v5651_v18 = vadd.f32 %v6820_v61, %v9255_v12 }
 0x277   : > { %v5680_v17 = vmax.f32 %v5648_v10, 0.0  ;;  %v5649_v24 = vadd.f32 %v6821_v19, %v9255_v12 }
 0x278   : > { %5714 = vst.msk [vmem:[%s9263_s13 + $0x30] sm:$0xff] %vm1476_vm6, %v5682_v29  ;;  %v5683_v57 = vmax.f32 %v5651_v18, 0.0 }
 0x279   : > { %5712 = vst.msk [vmem:[%s9263_s13 + $0x20] sm:$0xff] %vm1476_vm6, %v5680_v17  ;;  %v5681_v23 = vmax.f32 %v5649_v24, 0.0  ;;  %v6788_v42 = vpop.f32.mrb[8].mxu0 }
 0x27a   : > { %5715 = vst.msk [vmem:[%s9263_s13 + $0x38] sm:$0xff] %vm1476_vm6, %v5683_v57  ;;  %v6822_v1 = vadd.f32 %v6788_v42, %v6608_v44  ;;  %v5510_v16 = vpop.f32.mrb[9].mxu0 }
 0x27b   : > { %5713 = vst.msk [vmem:[%s9263_s13 + $0x28] sm:$0xff] %vm1476_vm6, %v5681_v23  ;;  %v6823_v54 = vadd.f32 %v5510_v16, %v2699_v5  ;;  %v6789_v34 = vpop.f32.mrb[10].mxu0 }
 0x27c   : > { %v5654_v28 = vadd.f32 %v6822_v1, %v9255_v12  ;;  %v6824_v9 = vadd.f32 %v6789_v34, %v6609_v13  ;;  %v5513_v30 = vpop.f32.mrb[11].mxu0 }
 0x27d   : > { %v5652_v4 = vadd.f32 %v6823_v54, %v9255_v12  ;;  %v6825_v26 = vadd.f32 %v5513_v30, %v2702_v2 }
 0x27e   : > { %v5686_v55 = vmax.f32 %v5654_v28, 0.0  ;;  %v5655_v14 = vadd.f32 %v6824_v9, %v9255_v12 }
 0x27f   : > { %v5684_v7 = vmax.f32 %v5652_v4, 0.0  ;;  %v5653_v22 = vadd.f32 %v6825_v26, %v9255_v12 }
 0x280   : > { %5718 = vst.msk [vmem:[%s9263_s13 + $0x50] sm:$0xff] %vm1476_vm6, %v5686_v55  ;;  %v5687_v52 = vmax.f32 %v5655_v14, 0.0 }
 0x281   : > { %5716 = vst.msk [vmem:[%s9263_s13 + $0x40] sm:$0xff] %vm1476_vm6, %v5684_v7  ;;  %v5685_v33 = vmax.f32 %v5653_v22, 0.0  ;;  %v6792_v40 = vpop.f32.mrb[12].mxu0 }
 0x282   : > { %5719 = vst.msk [vmem:[%s9263_s13 + $0x58] sm:$0xff] %vm1476_vm6, %v5687_v52  ;;  %v6826_v63 = vadd.f32 %v6792_v40, %v9243_v21  ;;  %v5526_v41 = vpop.f32.mrb[13].mxu0 }
 0x283   : > { %5717 = vst.msk [vmem:[%s9263_s13 + $0x48] sm:$0xff] %vm1476_vm6, %v5685_v33  ;;  %v6827_v50 = vadd.f32 %v5526_v41, %v9245_v27  ;;  %v6793_v51 = vpop.f32.mrb[14].mxu0 }
 0x284   : > { %v5658_v35 = vadd.f32 %v6826_v63, %v9255_v12  ;;  %v6828_v11 = vadd.f32 %v6793_v51, %v9247_v20  ;;  %v5529_v44 = vpop.f32.mrb[15].mxu0 }
 0x285   : > { %v5656_v5 = vadd.f32 %v6827_v50, %v9255_v12  ;;  %v6829_v13 = vadd.f32 %v5529_v44, %v9249_v48 }
 0x286   : > { %v5690_v2 = vmax.f32 %v5658_v35, 0.0  ;;  %v5659_v21 = vadd.f32 %v6828_v11, %v9255_v12 }
 0x287   : > { %v5688_v60 = vmax.f32 %v5656_v5, 0.0  ;;  %v5657_v39 = vadd.f32 %v6829_v13, %v9255_v12 }
 0x288   : > { %5722 = vst.msk [vmem:[%s9263_s13 + $0x70] sm:$0xff] %vm1476_vm6, %v5690_v2  ;;  %v5691_v27 = vmax.f32 %v5659_v21, 0.0 }
 0x289   : > { %5720 = vst.msk [vmem:[%s9263_s13 + $0x60] sm:$0xff] %vm1476_vm6, %v5688_v60  ;;  %v5689_v25 = vmax.f32 %v5657_v39, 0.0  ;;  %v6796_v20 = vpop.f32.mrb[16].mxu0 }
 0x28a   : > { %5723 = vst.msk [vmem:[%s9263_s13 + $0x78] sm:$0xff] %vm1476_vm6, %v5691_v27  ;;  %v5542_v48 = vpop.f32.mrb[17].mxu0 }
 0x28b   : > { %5721 = vst.msk [vmem:[%s9263_s13 + $0x68] sm:$0xff] %vm1476_vm6, %v5689_v25  ;;  %v6797_v32 = vpop.f32.mrb[18].mxu0 }
 0x28c   : > { %v6652_v6 = vpop.f32.mrb[16].mxu1  ;;  %v5545_v43 = vpop.f32.mrb[19].mxu0 }
 0x28d   : > { %v3469_v3 = vpop.f32.mrb[17].mxu1  ;;  %v6830_v47 = vadd.f32 %v6796_v20, %v6652_v6 }
 0x28e   : > { %v6653_v62 = vpop.f32.mrb[18].mxu1  ;;  %v6831_v56 = vadd.f32 %v5542_v48, %v3469_v3 }
 0x28f   : > { %v5662_v0 = vadd.f32 %v6830_v47, %v9255_v12  ;;  %v3472_v15 = vpop.f32.mrb[19].mxu1  ;;  %v6832_v31 = vadd.f32 %v6797_v32, %v6653_v62 }
 0x290   : > { %v5660_v58 = vadd.f32 %v6831_v56, %v9255_v12  ;;  %v6833_v59 = vadd.f32 %v5545_v43, %v3472_v15 }
 0x291   : > { %v5694_v37 = vmax.f32 %v5662_v0, 0.0  ;;  %v5663_v36 = vadd.f32 %v6832_v31, %v9255_v12  ;;  %v6800_v61 = vpop.f32.mrb[20].mxu0 }
 0x292   : > { %v5692_v46 = vmax.f32 %v5660_v58, 0.0  ;;  %v5661_v8 = vadd.f32 %v6833_v59, %v9255_v12  ;;  %v5558_v19 = vpop.f32.mrb[21].mxu0 }
 0x293   : > { %5726 = vst.msk [vmem:[%s9263_s13 + $0x90] sm:$0xff] %vm1476_vm6, %v5694_v37  ;;  %v5695_v45 = vmax.f32 %v5663_v36, 0.0  ;;  %v6801_v17 = vpop.f32.mrb[22].mxu0 }
 0x294   : > { %5724 = vst.msk [vmem:[%s9263_s13 + $0x80] sm:$0xff] %vm1476_vm6, %v5692_v46  ;;  %v5693_v38 = vmax.f32 %v5661_v8, 0.0  ;;  %v6656_v49 = vpop.f32.mrb[20].mxu1  ;;  %v5561_v42 = vpop.f32.mrb[23].mxu0 }
 0x295   : > { %5727 = vst.msk [vmem:[%s9263_s13 + $0x98] sm:$0xff] %vm1476_vm6, %v5695_v45  ;;  %v3485_v53 = vpop.f32.mrb[21].mxu1  ;;  %v6834_v10 = vadd.f32 %v6800_v61, %v6656_v49 }
 0x296   : > { %5725 = vst.msk [vmem:[%s9263_s13 + $0x88] sm:$0xff] %vm1476_vm6, %v5693_v38  ;;  %v6657_v29 = vpop.f32.mrb[22].mxu1  ;;  %v6835_v18 = vadd.f32 %v5558_v19, %v3485_v53 }
 0x297   : > { %v5666_v24 = vadd.f32 %v6834_v10, %v9255_v12  ;;  %v3488_v57 = vpop.f32.mrb[23].mxu1  ;;  %v6836_v23 = vadd.f32 %v6801_v17, %v6657_v29 }
 0x298   : > { %v5664_v1 = vadd.f32 %v6835_v18, %v9255_v12  ;;  %v6837_v16 = vadd.f32 %v5561_v42, %v3488_v57 }
 0x299   : > { %v5698_v54 = vmax.f32 %v5666_v24, 0.0  ;;  %v5667_v34 = vadd.f32 %v6836_v23, %v9255_v12  ;;  %v6804_v55 = vpop.f32.mrb[24].mxu0 }
 0x29a   : > { %v5696_v28 = vmax.f32 %v5664_v1, 0.0  ;;  %v5665_v9 = vadd.f32 %v6837_v16, %v9255_v12  ;;  %v5574_v22 = vpop.f32.mrb[25].mxu0 }
 0x29b   : > { %5730 = vst.msk [vmem:[%s9263_s13 + $0xb0] sm:$0xff] %vm1476_vm6, %v5698_v54  ;;  %v5699_v30 = vmax.f32 %v5667_v34, 0.0  ;;  %v6805_v40 = vpop.f32.mrb[26].mxu0 }
 0x29c   : > { %5728 = vst.msk [vmem:[%s9263_s13 + $0xa0] sm:$0xff] %vm1476_vm6, %v5696_v28  ;;  %v5697_v4 = vmax.f32 %v5665_v9, 0.0  ;;  %v6660_v26 = vpop.f32.mrb[24].mxu1  ;;  %v5577_v51 = vpop.f32.mrb[27].mxu0 }
 0x29d   : > { %5731 = vst.msk [vmem:[%s9263_s13 + $0xb8] sm:$0xff] %vm1476_vm6, %v5699_v30  ;;  %v3501_v14 = vpop.f32.mrb[25].mxu1  ;;  %v6838_v7 = vadd.f32 %v6804_v55, %v6660_v26 }
 0x29e   : > { %5729 = vst.msk [vmem:[%s9263_s13 + $0xa8] sm:$0xff] %vm1476_vm6, %v5697_v4  ;;  %v6661_v52 = vpop.f32.mrb[26].mxu1  ;;  %v6839_v33 = vadd.f32 %v5574_v22, %v3501_v14 }
 0x29f   : > { %v5670_v63 = vadd.f32 %v6838_v7, %v9255_v12  ;;  %v3504_v41 = vpop.f32.mrb[27].mxu1  ;;  %v6840_v50 = vadd.f32 %v6805_v40, %v6661_v52 }
 0x2a0   : > { %v5668_v35 = vadd.f32 %v6839_v33, %v9255_v12  ;;  %v6841_v11 = vadd.f32 %v5577_v51, %v3504_v41 }
 0x2a1   : > { %v5702_v44 = vmax.f32 %v5670_v63, 0.0  ;;  %v5671_v5 = vadd.f32 %v6840_v50, %v9255_v12  ;;  %v6808_v27 = vpop.f32.mrb[28].mxu0 }
 0x2a2   : > { %v5700_v13 = vmax.f32 %v5668_v35, 0.0  ;;  %v5669_v2 = vadd.f32 %v6841_v11, %v9255_v12  ;;  %v5590_v20 = vpop.f32.mrb[29].mxu0 }
 0x2a3   : > { %5734 = vst.msk [vmem:[%s9263_s13 + $0xd0] sm:$0xff] %vm1476_vm6, %v5702_v44  ;;  %v5703_v21 = vmax.f32 %v5671_v5, 0.0  ;;  %v6809_v48 = vpop.f32.mrb[30].mxu0 }
 0x2a4   : > { %5732 = vst.msk [vmem:[%s9263_s13 + $0xc0] sm:$0xff] %vm1476_vm6, %v5700_v13  ;;  %v5701_v60 = vmax.f32 %v5669_v2, 0.0  ;;  %v6664_v39 = vpop.f32.mrb[28].mxu1  ;;  %v5593_v0 = vpop.f32.mrb[31].mxu0 }
 0x2a5   : > { %5735 = vst.msk [vmem:[%s9263_s13 + $0xd8] sm:$0xff] %vm1476_vm6, %v5703_v21  ;;  %v3517_v25 = vpop.f32.mrb[29].mxu1  ;;  %v6842_v6 = vadd.f32 %v6808_v27, %v6664_v39 }
 0x2a6   : > { %5733 = vst.msk [vmem:[%s9263_s13 + $0xc8] sm:$0xff] %vm1476_vm6, %v5701_v60  ;;  %v6665_v3 = vpop.f32.mrb[30].mxu1  ;;  %v6843_v47 = vadd.f32 %v5590_v20, %v3517_v25 }
 0x2a7   : > { %v5674_v62 = vadd.f32 %v6842_v6, %v9255_v12  ;;  %v3520_v56 = vpop.f32.mrb[31].mxu1  ;;  %v6844_v32 = vadd.f32 %v6809_v48, %v6665_v3 }
 0x2a8   : > { %v5672_v15 = vadd.f32 %v6843_v47, %v9255_v12  ;;  %v6845_v31 = vadd.f32 %v5593_v0, %v3520_v56 }
 0x2a9   : > { %v5706_v43 = vmax.f32 %v5674_v62, 0.0  ;;  %v5675_v58 = vadd.f32 %v6844_v32, %v9255_v12 }
 0x2aa   : > { %v5704_v59 = vmax.f32 %v5672_v15, 0.0  ;;  %v5673_v37 = vadd.f32 %v6845_v31, %v9255_v12 }
 0x2ab   : > { %5738 = vst.msk [vmem:[%s9263_s13 + $0xf0] sm:$0xff] %vm1476_vm6, %v5706_v43  ;;  %v5707_v36 = vmax.f32 %v5675_v58, 0.0 }
 0x2ac   : > { %5736 = vst.msk [vmem:[%s9263_s13 + $0xe0] sm:$0xff] %vm1476_vm6, %v5704_v59  ;;  %v5705_v46 = vmax.f32 %v5673_v37, 0.0 }
 0x2ad   : > { %5739 = vst.msk [vmem:[%s9263_s13 + $0xf8] sm:$0xff] %vm1476_vm6, %v5707_v36 }
 0x2ae   : > { %5737 = vst.msk [vmem:[%s9263_s13 + $0xe8] sm:$0xff] %vm1476_vm6, %v5705_v46 }
 0x2af   : > { %7255 = shalt.err (!%p7252_p5)
}
 0x2b0   : > { %s7256_s7 = scalar_lea.hbm %s9360_s17, 4096  ;;  %s7260_s11 = scalar_lea.hbm %s9423_s5, 8192 }
 0x2b1   : > { %p7257_p6 = scmp.ne.s32.totalorder %s9360_s17, %s7256_s7  ;;  %p7261_p10 = scmp.lt.u32.totalorder %s9360_s17, %s9423_s5 }
 0x2b2   : > { %p7262_p11 = scmp.lt.u32.totalorder %s7260_s11, %s7256_s7  ;;  %p7264_p13 = scmp.lt.u32.totalorder %s7256_s7, %s9360_s17 }
 0x2b3   : > { %p7258_p7 = pnand %p7257_p6, %p7396_p4 }
 0x2b4   : > { %p7263_p12 = por %p7262_p11, %p7261_p10 }
 0x2b5   : > { %p7259_p9 = pneg %p7258_p7 }
 0x2b6   : > { %p7265_p0 = por %p7264_p13, %p7263_p12 }
 0x2b8   : > { %p7266_p1 = pnand %p7265_p0, %p7259_p9 }
 0x2ba   : > { %7269 = shalt.err (!%p7266_p1)
}
 0x2bb   : > { %s7324_s14 = smov 128   ;;  %s7325_s15 = smov 8  }
 0x2bc   : > { %7070 = dma.vmem_to_hbm [thread:$0]  (%p7396_p4), %s9362_s8, 4096, %s9360_s17, %s9372_s21, %s7324_s14, %s7324_s14, %s7325_s15  }
 0x2bd PF: > { %p7076_p2 = scmp.ge.s32.totalorder %s7320_s23, 2  ;;  %s5770_s16 = sand.u32 1, %s7300_s18  }
 0x2be   : > { %s5771_s24 = scalar_lea.sflag [#allocation4], %s5770_s16 }
 0x2bf   : > { %p7073_p3 = pnand %p7076_p2, %p7403_p8 }
 0x2c1   : > { %7295 = dma.done.wait (!%p7073_p3), %s5771_s24, 4096  }
 0x2c2   : > { %7297 = vsyncadd (!%p7073_p3), %s5771_s24, 4294963200  ;;  %s18_s23 = sadd.s32 1, %s7320_s23   ;;  %s9501_s18 = smov %s7304_s19 }
 0x2c3   : > { %p15_p5 = scmp.ge.s32.totalorder %s18_s23, 4   ;;  %s9502_s19 = smov %s7308_s20 }
 0x2c4   : > { %s9503_s20 = smov %s7409_s6  ;;  %s9504_s21 = smov %s7316_s22 }
 0x2c5   : > { %s9505_s22 = smov %s9507_s26  ;;  %17 = sbr.rel (!%p15_p5) target bundleno = 4 (0x4), region = 91 }
 0x2cc   :  { %5776 = vsyncpa [#allocation4], 1 }
 0x2cd   :  { %5778 = vsyncpa [#allocation4 + $0x1], 1 }

</bundles_post_ra>
